<compile_context>
chip_gen: v5e
topology: v5e:2x2
jax: 0.10.0
libtpu: 0.0.40
codegen_flags: <defaults>
</compile_context>

<pallas_src>
import functools

import jax
import jax.numpy as jnp
from jax import lax
from jax.experimental import pallas as pl
from jax.experimental.pallas import tpu as pltpu

EPS = 1e-5  # nn.BatchNorm2d default eps


def residual_block_kernel(x_ref, w1_ref, b1_ref, g1_ref, be1_ref,
                          w2_ref, b2_ref, g2_ref, be2_ref,
                          out_ref, pad_ref, *, mxu_dtype):
    N, H, W, Cp = x_ref.shape
    NHW = N * H * W
    inv_n = 1.0 / NHW

    # ---- zero only the 4 border rings of the shared padded scratch ---------
    # (they stay zero across both convs; only the interior is overwritten)
    zrow = jnp.zeros((N, 1, W + 2, Cp), jnp.float32)
    zcol = jnp.zeros((N, H + 2, 1, Cp), jnp.float32)
    pad_ref[:, 0:1, :, :] = zrow
    pad_ref[:, H + 1:H + 2, :, :] = zrow
    pad_ref[:, :, 0:1, :] = zcol
    pad_ref[:, :, W + 1:W + 2, :] = zcol

    def conv3x3_bn(w_ref, b, g, be, relu):
        # im2col: concatenate the 9 shifted views of the padded activation once
        # (each 128-lane aligned) -> single (NHW, 9*Cp) slab -> ONE MXU dot.
        cols = [pad_ref[:, dy:dy + H, dx:dx + W, :].reshape(NHW, Cp)
                for dy in range(3) for dx in range(3)]
        patches = jnp.concatenate(cols, axis=-1).astype(mxu_dtype)  # (NHW, 9*Cp)
        h = jnp.dot(patches, w_ref[...],
                    preferred_element_type=jnp.float32)             # (NHW, Cp) f32
        h = h + b                                                   # conv bias

        # one-pass batch statistics: per-channel sum and sum-of-squares
        s = jnp.sum(h, axis=0, keepdims=True)
        sq = jnp.sum(h * h, axis=0, keepdims=True)
        mean = s * inv_n
        var = jnp.maximum(sq * inv_n - mean * mean, 0.0)            # biased var
        scale = lax.rsqrt(var + EPS) * g
        h = (h - mean) * scale + be
        if relu:
            h = jnp.maximum(h, 0.0)
        return h

    # ---- conv1 -> bn1 -> relu -----------------------------------------------
    pad_ref[:, 1:H + 1, 1:W + 1, :] = x_ref[...]
    h1 = conv3x3_bn(w1_ref, b1_ref[...], g1_ref[...], be1_ref[...], relu=True)

    # ---- conv2 -> bn2 (reuse scratch: borders already zero) -----------------
    pad_ref[:, 1:H + 1, 1:W + 1, :] = h1.reshape(N, H, W, Cp)
    h2 = conv3x3_bn(w2_ref, b2_ref[...], g2_ref[...], be2_ref[...], relu=False)

    # ---- residual add: unpadded input, lane-dense (Cp=128) store ------------
    out_ref[...] = (x_ref[...] + h2.reshape(N, H, W, Cp)).astype(out_ref.dtype)


def _prep_weight(w_oihw, cp, dtype):
    """OIHW conv weight -> lane-padded im2col weight slab (9*Cp, Cp)."""
    cout, cin, kh, kw = w_oihw.shape
    w = jnp.transpose(w_oihw, (2, 3, 1, 0))                        # OIHW -> HWIO
    w = jnp.pad(w, ((0, 0), (0, 0), (0, cp - cin), (0, cp - cout)))
    return w.reshape(kh * kw * cp, cp).astype(dtype)


def _prep_vec(v, cp):
    """(C,) per-channel param -> lane-padded (1, Cp) f32."""
    return jnp.pad(v, (0, cp - v.shape[0])).reshape(1, cp).astype(jnp.float32)


def residual_block(x_nchw, params, mxu_dtype=jnp.bfloat16):
    """x_nchw: (N, C, H, W) float32. Returns (N, C, H, W)."""
    N, C, H, W = x_nchw.shape
    cp = max(128, ((C + 127) // 128) * 128)          # lane-dense channel axis

    x = jnp.transpose(x_nchw, (0, 2, 3, 1))          # NCHW -> NHWC
    x = jnp.pad(x, ((0, 0), (0, 0), (0, 0), (0, cp - C)))

    w1 = _prep_weight(params["w1"], cp, mxu_dtype)
    w2 = _prep_weight(params["w2"], cp, mxu_dtype)
    b1, g1, be1 = (_prep_vec(params[k], cp) for k in ("b1", "g1", "be1"))
    b2, g2, be2 = (_prep_vec(params[k], cp) for k in ("b2", "g2", "be2"))

    vmem = pl.BlockSpec(memory_space=pltpu.MemorySpace.VMEM)
    out_nhwc = pl.pallas_call(
        functools.partial(residual_block_kernel, mxu_dtype=mxu_dtype),
        out_shape=jax.ShapeDtypeStruct((N, H, W, cp), x.dtype),
        in_specs=[vmem] * 9,
        out_specs=vmem,
        scratch_shapes=[pltpu.VMEM((N, H + 2, W + 2, cp), jnp.float32)],
        compiler_params=pltpu.CompilerParams(
            vmem_limit_bytes=32 * 1024 * 1024),       # headroom, safe on v5e/v6e/v7x
    )(x, w1, b1, g1, be1, w2, b2, g2, be2)

    return jnp.transpose(out_nhwc[..., :C], (0, 3, 1, 2))          # NHWC -> NCHW


def reference_nchw(x, params):
    """Pure-JAX f32 reference matching the PyTorch forward (training-mode BN)."""
    def conv(h, w, b):
        out = lax.conv_general_dilated(
            h, w, window_strides=(1, 1), padding=((1, 1), (1, 1)),
            dimension_numbers=("NCHW", "OIHW", "NCHW"))
        return out + b.reshape(1, -1, 1, 1)

    def bn(h, g, be):
        mean = jnp.mean(h, axis=(0, 2, 3), keepdims=True)
        var = jnp.mean((h - mean) ** 2, axis=(0, 2, 3), keepdims=True)
        return (h - mean) / jnp.sqrt(var + EPS) * g.reshape(1, -1, 1, 1) \
            + be.reshape(1, -1, 1, 1)

    h = jnp.maximum(bn(conv(x, params["w1"], params["b1"]),
                       params["g1"], params["be1"]), 0.0)
    h = bn(conv(h, params["w2"], params["b2"]), params["g2"], params["be2"])
    return x + h


if __name__ == "__main__":
    N, C, H, W = 2, 4, 16, 16
    key = jax.random.PRNGKey(0)
    ks = jax.random.split(key, 9)

    params = {
        "w1": jax.random.normal(ks[0], (C, C, 3, 3), jnp.float32) * 0.1,  # OIHW
        "b1": jax.random.normal(ks[1], (C,), jnp.float32) * 0.1,
        "g1": 1.0 + 0.1 * jax.random.normal(ks[2], (C,), jnp.float32),
        "be1": 0.1 * jax.random.normal(ks[3], (C,), jnp.float32),
        "w2": jax.random.normal(ks[4], (C, C, 3, 3), jnp.float32) * 0.1,
        "b2": jax.random.normal(ks[5], (C,), jnp.float32) * 0.1,
        "g2": 1.0 + 0.1 * jax.random.normal(ks[6], (C,), jnp.float32),
        "be2": 0.1 * jax.random.normal(ks[7], (C,), jnp.float32),
    }
    x = jax.random.normal(ks[8], (N, C, H, W), jnp.float32)

    out = jax.block_until_ready(jax.jit(residual_block)(x, params))
    ref = jax.block_until_ready(reference_nchw(x, params))

    assert out.shape == (N, C, H, W)
    err = float(jnp.max(jnp.abs(out - ref)))
    # bf16 MXU operands (f32 accumulation) through two 3x3 convs + two BNs give
    # ~1e-2 max abs deviation from the pure-f32 reference at these value scales.
    assert jnp.allclose(out, ref, atol=3e-2, rtol=3e-2), f"max err {err}"

    print("KERNEL_OK")
</pallas_src>

<mosaic_0001>
module attributes {stable_mosaic.version = 11 : i64} {
  func.func @residual_block_kernel(%arg0: memref<2x16x16x128xf32, #tpu.memory_space<vmem>>, %arg1: memref<1152x128xbf16, #tpu.memory_space<vmem>>, %arg2: memref<1x128xf32, #tpu.memory_space<vmem>>, %arg3: memref<1x128xf32, #tpu.memory_space<vmem>>, %arg4: memref<1x128xf32, #tpu.memory_space<vmem>>, %arg5: memref<1152x128xbf16, #tpu.memory_space<vmem>>, %arg6: memref<1x128xf32, #tpu.memory_space<vmem>>, %arg7: memref<1x128xf32, #tpu.memory_space<vmem>>, %arg8: memref<1x128xf32, #tpu.memory_space<vmem>>, %arg9: memref<2x16x16x128xf32, #tpu.memory_space<vmem>>, %arg10: memref<2x18x18x128xf32, #tpu.memory_space<vmem>>) attributes {dimension_semantics = [], scalar_prefetch = 0 : i64, scratch_operands = 1 : i64, tpu.core_type = #tpu.core_type<tc>} {
    %cst = arith.constant 0.000000e+00 : f32
    %0 = vector.broadcast %cst : f32 to vector<2x1x18x128xf32>
    %cst_0 = arith.constant 0.000000e+00 : f32
    %1 = vector.broadcast %cst_0 : f32 to vector<2x18x1x128xf32>
    %c0 = arith.constant 0 : index
    %c0_1 = arith.constant 0 : index
    %c0_2 = arith.constant 0 : index
    %c0_3 = arith.constant 0 : index
    %2 = vector.load %arg10[%c0, %c0_1, %c0_2, %c0_3] : memref<2x18x18x128xf32, #tpu.memory_space<vmem>>, vector<2x1x18x128xf32>
    tpu.vector_store %arg10[%c0, %c0_1, %c0_2, %c0_3], %0 {strides = array<i32>} : memref<2x18x18x128xf32, #tpu.memory_space<vmem>>, vector<2x1x18x128xf32>,
    %c0_4 = arith.constant 0 : index
    %c17 = arith.constant 17 : index
    %c0_5 = arith.constant 0 : index
    %c0_6 = arith.constant 0 : index
    %3 = vector.load %arg10[%c0_4, %c17, %c0_5, %c0_6] : memref<2x18x18x128xf32, #tpu.memory_space<vmem>>, vector<2x1x18x128xf32>
    tpu.vector_store %arg10[%c0_4, %c17, %c0_5, %c0_6], %0 {strides = array<i32>} : memref<2x18x18x128xf32, #tpu.memory_space<vmem>>, vector<2x1x18x128xf32>,
    %c0_7 = arith.constant 0 : index
    %c0_8 = arith.constant 0 : index
    %c0_9 = arith.constant 0 : index
    %c0_10 = arith.constant 0 : index
    %4 = vector.load %arg10[%c0_7, %c0_8, %c0_9, %c0_10] : memref<2x18x18x128xf32, #tpu.memory_space<vmem>>, vector<2x18x1x128xf32>
    tpu.vector_store %arg10[%c0_7, %c0_8, %c0_9, %c0_10], %1 {strides = array<i32>} : memref<2x18x18x128xf32, #tpu.memory_space<vmem>>, vector<2x18x1x128xf32>,
    %c0_11 = arith.constant 0 : index
    %c0_12 = arith.constant 0 : index
    %c17_13 = arith.constant 17 : index
    %c0_14 = arith.constant 0 : index
    %5 = vector.load %arg10[%c0_11, %c0_12, %c17_13, %c0_14] : memref<2x18x18x128xf32, #tpu.memory_space<vmem>>, vector<2x18x1x128xf32>
    tpu.vector_store %arg10[%c0_11, %c0_12, %c17_13, %c0_14], %1 {strides = array<i32>} : memref<2x18x18x128xf32, #tpu.memory_space<vmem>>, vector<2x18x1x128xf32>,
    %c0_15 = arith.constant 0 : index
    %c0_16 = arith.constant 0 : index
    %c0_17 = arith.constant 0 : index
    %c0_18 = arith.constant 0 : index
    %6 = vector.load %arg0[%c0_15, %c0_16, %c0_17, %c0_18] : memref<2x16x16x128xf32, #tpu.memory_space<vmem>>, vector<2x16x16x128xf32>
    %c0_19 = arith.constant 0 : index
    %c1 = arith.constant 1 : index
    %c1_20 = arith.constant 1 : index
    %c0_21 = arith.constant 0 : index
    %7 = vector.load %arg10[%c0_19, %c1, %c1_20, %c0_21] : memref<2x18x18x128xf32, #tpu.memory_space<vmem>>, vector<2x16x16x128xf32>
    tpu.vector_store %arg10[%c0_19, %c1, %c1_20, %c0_21], %6 {strides = array<i32>} : memref<2x18x18x128xf32, #tpu.memory_space<vmem>>, vector<2x16x16x128xf32>,
    %c0_22 = arith.constant 0 : index
    %c0_23 = arith.constant 0 : index
    %8 = vector.load %arg2[%c0_22, %c0_23] : memref<1x128xf32, #tpu.memory_space<vmem>>, vector<1x128xf32>
    %c0_24 = arith.constant 0 : index
    %c0_25 = arith.constant 0 : index
    %9 = vector.load %arg3[%c0_24, %c0_25] : memref<1x128xf32, #tpu.memory_space<vmem>>, vector<1x128xf32>
    %c0_26 = arith.constant 0 : index
    %c0_27 = arith.constant 0 : index
    %10 = vector.load %arg4[%c0_26, %c0_27] : memref<1x128xf32, #tpu.memory_space<vmem>>, vector<1x128xf32>
    %c0_28 = arith.constant 0 : index
    %c0_29 = arith.constant 0 : index
    %c0_30 = arith.constant 0 : index
    %c0_31 = arith.constant 0 : index
    %11 = vector.load %arg10[%c0_28, %c0_29, %c0_30, %c0_31] : memref<2x18x18x128xf32, #tpu.memory_space<vmem>>, vector<2x16x16x128xf32>
    %12 = vector.shape_cast %11 : vector<2x16x16x128xf32> to vector<512x128xf32>
    %c0_32 = arith.constant 0 : index
    %c0_33 = arith.constant 0 : index
    %c1_34 = arith.constant 1 : index
    %c0_35 = arith.constant 0 : index
    %13 = vector.load %arg10[%c0_32, %c0_33, %c1_34, %c0_35] : memref<2x18x18x128xf32, #tpu.memory_space<vmem>>, vector<2x16x16x128xf32>
    %14 = vector.shape_cast %13 : vector<2x16x16x128xf32> to vector<512x128xf32>
    %c0_36 = arith.constant 0 : index
    %c0_37 = arith.constant 0 : index
    %c2 = arith.constant 2 : index
    %c0_38 = arith.constant 0 : index
    %15 = vector.load %arg10[%c0_36, %c0_37, %c2, %c0_38] : memref<2x18x18x128xf32, #tpu.memory_space<vmem>>, vector<2x16x16x128xf32>
    %16 = vector.shape_cast %15 : vector<2x16x16x128xf32> to vector<512x128xf32>
    %c0_39 = arith.constant 0 : index
    %c1_40 = arith.constant 1 : index
    %c0_41 = arith.constant 0 : index
    %c0_42 = arith.constant 0 : index
    %17 = vector.load %arg10[%c0_39, %c1_40, %c0_41, %c0_42] : memref<2x18x18x128xf32, #tpu.memory_space<vmem>>, vector<2x16x16x128xf32>
    %18 = vector.shape_cast %17 : vector<2x16x16x128xf32> to vector<512x128xf32>
    %c0_43 = arith.constant 0 : index
    %c1_44 = arith.constant 1 : index
    %c1_45 = arith.constant 1 : index
    %c0_46 = arith.constant 0 : index
    %19 = vector.load %arg10[%c0_43, %c1_44, %c1_45, %c0_46] : memref<2x18x18x128xf32, #tpu.memory_space<vmem>>, vector<2x16x16x128xf32>
    %20 = vector.shape_cast %19 : vector<2x16x16x128xf32> to vector<512x128xf32>
    %c0_47 = arith.constant 0 : index
    %c1_48 = arith.constant 1 : index
    %c2_49 = arith.constant 2 : index
    %c0_50 = arith.constant 0 : index
    %21 = vector.load %arg10[%c0_47, %c1_48, %c2_49, %c0_50] : memref<2x18x18x128xf32, #tpu.memory_space<vmem>>, vector<2x16x16x128xf32>
    %22 = vector.shape_cast %21 : vector<2x16x16x128xf32> to vector<512x128xf32>
    %c0_51 = arith.constant 0 : index
    %c2_52 = arith.constant 2 : index
    %c0_53 = arith.constant 0 : index
    %c0_54 = arith.constant 0 : index
    %23 = vector.load %arg10[%c0_51, %c2_52, %c0_53, %c0_54] : memref<2x18x18x128xf32, #tpu.memory_space<vmem>>, vector<2x16x16x128xf32>
    %24 = vector.shape_cast %23 : vector<2x16x16x128xf32> to vector<512x128xf32>
    %c0_55 = arith.constant 0 : index
    %c2_56 = arith.constant 2 : index
    %c1_57 = arith.constant 1 : index
    %c0_58 = arith.constant 0 : index
    %25 = vector.load %arg10[%c0_55, %c2_56, %c1_57, %c0_58] : memref<2x18x18x128xf32, #tpu.memory_space<vmem>>, vector<2x16x16x128xf32>
    %26 = vector.shape_cast %25 : vector<2x16x16x128xf32> to vector<512x128xf32>
    %c0_59 = arith.constant 0 : index
    %c2_60 = arith.constant 2 : index
    %c2_61 = arith.constant 2 : index
    %c0_62 = arith.constant 0 : index
    %27 = vector.load %arg10[%c0_59, %c2_60, %c2_61, %c0_62] : memref<2x18x18x128xf32, #tpu.memory_space<vmem>>, vector<2x16x16x128xf32>
    %28 = vector.shape_cast %27 : vector<2x16x16x128xf32> to vector<512x128xf32>
    %29 = tpu.concatenate %12, %14, %16, %18, %20, %22, %24, %26, %28 in 1 : vector<512x128xf32>, vector<512x128xf32>, vector<512x128xf32>, vector<512x128xf32>, vector<512x128xf32>, vector<512x128xf32>, vector<512x128xf32>, vector<512x128xf32>, vector<512x128xf32> -> vector<512x1152xf32>
    %30 = arith.truncf %29 : vector<512x1152xf32> to vector<512x1152xbf16>
    %c0_63 = arith.constant 0 : index
    %c0_64 = arith.constant 0 : index
    %31 = vector.load %arg1[%c0_63, %c0_64] : memref<1152x128xbf16, #tpu.memory_space<vmem>>, vector<1152x128xbf16>
    %cst_65 = arith.constant dense<0.000000e+00> : vector<512x128xf32>
    %32 = tpu.matmul %30, %31, %cst_65 {dimension_numbers = #tpu.dot_dimension_numbers<[1], [0], [0], [1], [0, 0, 1, 1], [], []>} : vector<512x1152xbf16>, vector<1152x128xbf16>, vector<512x128xf32> -> vector<512x128xf32>
    %33 = vector.broadcast %8 : vector<1x128xf32> to vector<512x128xf32>
    %34 = arith.addf %32, %33 : vector<512x128xf32>
    %cst_66 = arith.constant dense<0.000000e+00> : vector<128xf32>
    %35 = vector.multi_reduction <add>, %34, %cst_66 [0] : vector<512x128xf32> to vector<128xf32>
    %36 = vector.shape_cast %35 : vector<128xf32> to vector<1x128xf32>
    %37 = arith.mulf %34, %34 : vector<512x128xf32>
    %cst_67 = arith.constant dense<0.000000e+00> : vector<128xf32>
    %38 = vector.multi_reduction <add>, %37, %cst_67 [0] : vector<512x128xf32> to vector<128xf32>
    %39 = vector.shape_cast %38 : vector<128xf32> to vector<1x128xf32>
    %cst_68 = arith.constant 0.001953125 : f32
    %40 = vector.broadcast %cst_68 : f32 to vector<1x128xf32>
    %41 = arith.mulf %36, %40 : vector<1x128xf32>
    %cst_69 = arith.constant 0.001953125 : f32
    %42 = vector.broadcast %cst_69 : f32 to vector<1x128xf32>
    %43 = arith.mulf %39, %42 : vector<1x128xf32>
    %44 = arith.mulf %41, %41 : vector<1x128xf32>
    %45 = arith.subf %43, %44 : vector<1x128xf32>
    %cst_70 = arith.constant 0.000000e+00 : f32
    %46 = vector.broadcast %cst_70 : f32 to vector<1x128xf32>
    %47 = arith.maximumf %45, %46 : vector<1x128xf32>
    %cst_71 = arith.constant 9.99999974E-6 : f32
    %48 = vector.broadcast %cst_71 : f32 to vector<1x128xf32>
    %49 = arith.addf %47, %48 : vector<1x128xf32>
    %50 = math.rsqrt %49 : vector<1x128xf32>
    %51 = arith.mulf %50, %9 : vector<1x128xf32>
    %52 = vector.broadcast %41 : vector<1x128xf32> to vector<512x128xf32>
    %53 = arith.subf %34, %52 : vector<512x128xf32>
    %54 = vector.broadcast %51 : vector<1x128xf32> to vector<512x128xf32>
    %55 = arith.mulf %53, %54 : vector<512x128xf32>
    %56 = vector.broadcast %10 : vector<1x128xf32> to vector<512x128xf32>
    %57 = arith.addf %55, %56 : vector<512x128xf32>
    %cst_72 = arith.constant 0.000000e+00 : f32
    %58 = vector.broadcast %cst_72 : f32 to vector<512x128xf32>
    %59 = arith.maximumf %57, %58 : vector<512x128xf32>
    %60 = vector.shape_cast %59 : vector<512x128xf32> to vector<2x16x16x128xf32>
    %c0_73 = arith.constant 0 : index
    %c1_74 = arith.constant 1 : index
    %c1_75 = arith.constant 1 : index
    %c0_76 = arith.constant 0 : index
    %61 = vector.load %arg10[%c0_73, %c1_74, %c1_75, %c0_76] : memref<2x18x18x128xf32, #tpu.memory_space<vmem>>, vector<2x16x16x128xf32>
    tpu.vector_store %arg10[%c0_73, %c1_74, %c1_75, %c0_76], %60 {strides = array<i32>} : memref<2x18x18x128xf32, #tpu.memory_space<vmem>>, vector<2x16x16x128xf32>,
    %c0_77 = arith.constant 0 : index
    %c0_78 = arith.constant 0 : index
    %62 = vector.load %arg6[%c0_77, %c0_78] : memref<1x128xf32, #tpu.memory_space<vmem>>, vector<1x128xf32>
    %c0_79 = arith.constant 0 : index
    %c0_80 = arith.constant 0 : index
    %63 = vector.load %arg7[%c0_79, %c0_80] : memref<1x128xf32, #tpu.memory_space<vmem>>, vector<1x128xf32>
    %c0_81 = arith.constant 0 : index
    %c0_82 = arith.constant 0 : index
    %64 = vector.load %arg8[%c0_81, %c0_82] : memref<1x128xf32, #tpu.memory_space<vmem>>, vector<1x128xf32>
    %c0_83 = arith.constant 0 : index
    %c0_84 = arith.constant 0 : index
    %c0_85 = arith.constant 0 : index
    %c0_86 = arith.constant 0 : index
    %65 = vector.load %arg10[%c0_83, %c0_84, %c0_85, %c0_86] : memref<2x18x18x128xf32, #tpu.memory_space<vmem>>, vector<2x16x16x128xf32>
    %66 = vector.shape_cast %65 : vector<2x16x16x128xf32> to vector<512x128xf32>
    %c0_87 = arith.constant 0 : index
    %c0_88 = arith.constant 0 : index
    %c1_89 = arith.constant 1 : index
    %c0_90 = arith.constant 0 : index
    %67 = vector.load %arg10[%c0_87, %c0_88, %c1_89, %c0_90] : memref<2x18x18x128xf32, #tpu.memory_space<vmem>>, vector<2x16x16x128xf32>
    %68 = vector.shape_cast %67 : vector<2x16x16x128xf32> to vector<512x128xf32>
    %c0_91 = arith.constant 0 : index
    %c0_92 = arith.constant 0 : index
    %c2_93 = arith.constant 2 : index
    %c0_94 = arith.constant 0 : index
    %69 = vector.load %arg10[%c0_91, %c0_92, %c2_93, %c0_94] : memref<2x18x18x128xf32, #tpu.memory_space<vmem>>, vector<2x16x16x128xf32>
    %70 = vector.shape_cast %69 : vector<2x16x16x128xf32> to vector<512x128xf32>
    %c0_95 = arith.constant 0 : index
    %c1_96 = arith.constant 1 : index
    %c0_97 = arith.constant 0 : index
    %c0_98 = arith.constant 0 : index
    %71 = vector.load %arg10[%c0_95, %c1_96, %c0_97, %c0_98] : memref<2x18x18x128xf32, #tpu.memory_space<vmem>>, vector<2x16x16x128xf32>
    %72 = vector.shape_cast %71 : vector<2x16x16x128xf32> to vector<512x128xf32>
    %c0_99 = arith.constant 0 : index
    %c1_100 = arith.constant 1 : index
    %c1_101 = arith.constant 1 : index
    %c0_102 = arith.constant 0 : index
    %73 = vector.load %arg10[%c0_99, %c1_100, %c1_101, %c0_102] : memref<2x18x18x128xf32, #tpu.memory_space<vmem>>, vector<2x16x16x128xf32>
    %74 = vector.shape_cast %73 : vector<2x16x16x128xf32> to vector<512x128xf32>
    %c0_103 = arith.constant 0 : index
    %c1_104 = arith.constant 1 : index
    %c2_105 = arith.constant 2 : index
    %c0_106 = arith.constant 0 : index
    %75 = vector.load %arg10[%c0_103, %c1_104, %c2_105, %c0_106] : memref<2x18x18x128xf32, #tpu.memory_space<vmem>>, vector<2x16x16x128xf32>
    %76 = vector.shape_cast %75 : vector<2x16x16x128xf32> to vector<512x128xf32>
    %c0_107 = arith.constant 0 : index
    %c2_108 = arith.constant 2 : index
    %c0_109 = arith.constant 0 : index
    %c0_110 = arith.constant 0 : index
    %77 = vector.load %arg10[%c0_107, %c2_108, %c0_109, %c0_110] : memref<2x18x18x128xf32, #tpu.memory_space<vmem>>, vector<2x16x16x128xf32>
    %78 = vector.shape_cast %77 : vector<2x16x16x128xf32> to vector<512x128xf32>
    %c0_111 = arith.constant 0 : index
    %c2_112 = arith.constant 2 : index
    %c1_113 = arith.constant 1 : index
    %c0_114 = arith.constant 0 : index
    %79 = vector.load %arg10[%c0_111, %c2_112, %c1_113, %c0_114] : memref<2x18x18x128xf32, #tpu.memory_space<vmem>>, vector<2x16x16x128xf32>
    %80 = vector.shape_cast %79 : vector<2x16x16x128xf32> to vector<512x128xf32>
    %c0_115 = arith.constant 0 : index
    %c2_116 = arith.constant 2 : index
    %c2_117 = arith.constant 2 : index
    %c0_118 = arith.constant 0 : index
    %81 = vector.load %arg10[%c0_115, %c2_116, %c2_117, %c0_118] : memref<2x18x18x128xf32, #tpu.memory_space<vmem>>, vector<2x16x16x128xf32>
    %82 = vector.shape_cast %81 : vector<2x16x16x128xf32> to vector<512x128xf32>
    %83 = tpu.concatenate %66, %68, %70, %72, %74, %76, %78, %80, %82 in 1 : vector<512x128xf32>, vector<512x128xf32>, vector<512x128xf32>, vector<512x128xf32>, vector<512x128xf32>, vector<512x128xf32>, vector<512x128xf32>, vector<512x128xf32>, vector<512x128xf32> -> vector<512x1152xf32>
    %84 = arith.truncf %83 : vector<512x1152xf32> to vector<512x1152xbf16>
    %c0_119 = arith.constant 0 : index
    %c0_120 = arith.constant 0 : index
    %85 = vector.load %arg5[%c0_119, %c0_120] : memref<1152x128xbf16, #tpu.memory_space<vmem>>, vector<1152x128xbf16>
    %cst_121 = arith.constant dense<0.000000e+00> : vector<512x128xf32>
    %86 = tpu.matmul %84, %85, %cst_121 {dimension_numbers = #tpu.dot_dimension_numbers<[1], [0], [0], [1], [0, 0, 1, 1], [], []>} : vector<512x1152xbf16>, vector<1152x128xbf16>, vector<512x128xf32> -> vector<512x128xf32>
    %87 = vector.broadcast %62 : vector<1x128xf32> to vector<512x128xf32>
    %88 = arith.addf %86, %87 : vector<512x128xf32>
    %cst_122 = arith.constant dense<0.000000e+00> : vector<128xf32>
    %89 = vector.multi_reduction <add>, %88, %cst_122 [0] : vector<512x128xf32> to vector<128xf32>
    %90 = vector.shape_cast %89 : vector<128xf32> to vector<1x128xf32>
    %91 = arith.mulf %88, %88 : vector<512x128xf32>
    %cst_123 = arith.constant dense<0.000000e+00> : vector<128xf32>
    %92 = vector.multi_reduction <add>, %91, %cst_123 [0] : vector<512x128xf32> to vector<128xf32>
    %93 = vector.shape_cast %92 : vector<128xf32> to vector<1x128xf32>
    %cst_124 = arith.constant 0.001953125 : f32
    %94 = vector.broadcast %cst_124 : f32 to vector<1x128xf32>
    %95 = arith.mulf %90, %94 : vector<1x128xf32>
    %cst_125 = arith.constant 0.001953125 : f32
    %96 = vector.broadcast %cst_125 : f32 to vector<1x128xf32>
    %97 = arith.mulf %93, %96 : vector<1x128xf32>
    %98 = arith.mulf %95, %95 : vector<1x128xf32>
    %99 = arith.subf %97, %98 : vector<1x128xf32>
    %cst_126 = arith.constant 0.000000e+00 : f32
    %100 = vector.broadcast %cst_126 : f32 to vector<1x128xf32>
    %101 = arith.maximumf %99, %100 : vector<1x128xf32>
    %cst_127 = arith.constant 9.99999974E-6 : f32
    %102 = vector.broadcast %cst_127 : f32 to vector<1x128xf32>
    %103 = arith.addf %101, %102 : vector<1x128xf32>
    %104 = math.rsqrt %103 : vector<1x128xf32>
    %105 = arith.mulf %104, %63 : vector<1x128xf32>
    %106 = vector.broadcast %95 : vector<1x128xf32> to vector<512x128xf32>
    %107 = arith.subf %88, %106 : vector<512x128xf32>
    %108 = vector.broadcast %105 : vector<1x128xf32> to vector<512x128xf32>
    %109 = arith.mulf %107, %108 : vector<512x128xf32>
    %110 = vector.broadcast %64 : vector<1x128xf32> to vector<512x128xf32>
    %111 = arith.addf %109, %110 : vector<512x128xf32>
    %c0_128 = arith.constant 0 : index
    %c0_129 = arith.constant 0 : index
    %c0_130 = arith.constant 0 : index
    %c0_131 = arith.constant 0 : index
    %112 = vector.load %arg0[%c0_128, %c0_129, %c0_130, %c0_131] : memref<2x16x16x128xf32, #tpu.memory_space<vmem>>, vector<2x16x16x128xf32>
    %113 = vector.shape_cast %111 : vector<512x128xf32> to vector<2x16x16x128xf32>
    %114 = arith.addf %112, %113 : vector<2x16x16x128xf32>
    %c0_132 = arith.constant 0 : index
    %c0_133 = arith.constant 0 : index
    %c0_134 = arith.constant 0 : index
    %c0_135 = arith.constant 0 : index
    %115 = vector.load %arg9[%c0_132, %c0_133, %c0_134, %c0_135] : memref<2x16x16x128xf32, #tpu.memory_space<vmem>>, vector<2x16x16x128xf32>
    tpu.vector_store %arg9[%c0_132, %c0_133, %c0_134, %c0_135], %114 {strides = array<i32>} : memref<2x16x16x128xf32, #tpu.memory_space<vmem>>, vector<2x16x16x128xf32>,
    return
  }
}

</mosaic_0001>

<bundles_post_ra>
// kernel: residual_block.1
= control target key start
LH: loop header
LB: loop body
LE: loop exit
PB: predicated region body
PF: predicated region fallthrough
CT: control target
= control target key end

     0   :  { %v8086_v2 = vmov 0.0   ;;  %s12680_s1 = inlined_call_operand.vmem [shape: bf16[1152,128], index: 1, kind: input, shape index: {}]   ;;  %s12681_s0 = inlined_call_operand.vmem [shape: f32[2,16,16,128], index: 0, kind: input, shape index: {}]   ;;  %s12682_s2 = inlined_call_operand.vmem [shape: f32[1,128], index: 2, kind: input, shape index: {}]   ;;  %s12683_s4 = inlined_call_operand.vmem [shape: f32[1,128], index: 4, kind: input, shape index: {}]   ;;  %s12684_s5 = inlined_call_operand.vmem [shape: bf16[1152,128], index: 5, kind: input, shape index: {}]   ;;  %s12685_s3 = inlined_call_operand.vmem [shape: f32[1,128], index: 3, kind: input, shape index: {}]   ;;  %s12686_s6 = inlined_call_operand.vmem [shape: f32[1,128], index: 6, kind: input, shape index: {}]   ;;  %s12687_s8 = inlined_call_operand.vmem [shape: f32[1,128], index: 8, kind: input, shape index: {}]   ;;  %s12688_s7 = inlined_call_operand.vmem [shape: f32[1,128], index: 7, kind: input, shape index: {}]   ;;  %s12689_s9 = inlined_call_operand.vmem [shape: f32[2,16,16,128], index: 9, kind: output, shape index: {}]  }
   0x1   :  { %v7918_v0 = vld [vmem:[%s12680_s1 + $0x38] sm:$0xff]  ;;  %35 = vst [vmem:[#allocation2 + $0x1b0] sm:$0xff] %v8086_v2  ;;  %v7917_v3 = vld [vmem:[%s12680_s1 + $0x30] sm:$0xff]  ;;  %v7916_v5 = vld [vmem:[%s12680_s1 + $0x28] sm:$0xff] }
   0x2   :  { %v7926_v1 = vld [vmem:[%s12680_s1 + $0x78] sm:$0xff]  ;;  %36 = vst [vmem:[#allocation2 + $0x1b8] sm:$0xff] %v8086_v2  ;;  %8055 = vmatpush.bf16.msra.mxu2 %v7918_v0  ;;  %v7925_v4 = vld [vmem:[%s12680_s1 + $0x70] sm:$0xff]  ;;  %1693 = vmatpush.bf16.msra.mxu0 %v7918_v0  ;;  %v7924_v6 = vld [vmem:[%s12680_s1 + $0x68] sm:$0xff] }
   0x3   :  { %8063 = vmatpush.bf16.msra.mxu3 %v7926_v1  ;;  %63 = vst [vmem:[#allocation2 + $0x1b0] sm:$0x1] %v8086_v2  ;;  %1862 = vmatpush.bf16.msra.mxu1 %v7926_v1  ;;  %v7915_v7 = vld [vmem:[%s12680_s1 + $0x20] sm:$0xff]  ;;  %v7914_v9 = vld [vmem:[%s12680_s1 + $0x18] sm:$0xff]  ;;  %v7913_v11 = vld [vmem:[%s12680_s1 + $0x10] sm:$0xff] }
   0x4   :  { %32 = vst [vmem:[#allocation2] sm:$0xff] %v8086_v2  ;;  %v7923_v8 = vld [vmem:[%s12680_s1 + $0x60] sm:$0xff]  ;;  %v7922_v10 = vld [vmem:[%s12680_s1 + $0x58] sm:$0xff]  ;;  %v7921_v12 = vld [vmem:[%s12680_s1 + $0x50] sm:$0xff] }
   0x5   :  { %33 = vst [vmem:[#allocation2 + $0x8] sm:$0xff] %v8086_v2  ;;  %v7912_v13 = vld [vmem:[%s12680_s1 + $0x8] sm:$0xff]  ;;  %v7911_v15 = vld [vmem:[%s12680_s1] sm:$0xff]  ;;  %v7934_v22 = vld [vmem:[%s12680_s1 + $0xb8] sm:$0xff] }
   0x6   :  { %34 = vst [vmem:[#allocation2 + $0x10] sm:$0x3] %v8086_v2  ;;  %8056 = vmatpush.bf16.msra.mxu2 %v7917_v3  ;;  %1694 = vmatpush.bf16.msra.mxu0 %v7917_v3  ;;  %v7920_v14 = vld [vmem:[%s12680_s1 + $0x48] sm:$0xff]  ;;  %v7919_v16 = vld [vmem:[%s12680_s1 + $0x40] sm:$0xff]  ;;  %v7942_v25 = vld [vmem:[%s12680_s1 + $0xf8] sm:$0xff] }
   0x7   :  { %8064 = vmatpush.bf16.msra.mxu3 %v7925_v4  ;;  %37 = vst [vmem:[#allocation2 + $0x1c0] sm:$0x3] %v8086_v2  ;;  %1863 = vmatpush.bf16.msra.mxu1 %v7925_v4  ;;  %v7950_v27 = vld [vmem:[%s12680_s1 + $0x138] sm:$0xff]  ;;  %v149_v28 = vld [vmem:[%s12681_s0 + $0x100] sm:$0xff]  ;;  %v150_v29 = vld [vmem:[%s12681_s0 + $0x108] sm:$0xff] }
   0x8   :  { %39 = vst [vmem:[#allocation2 + $0x198] sm:$0xff] %v8086_v2  ;;  %v980_v30 = vpack.c.bf16 %v150_v29, %v149_v28  ;;  %v117_v31 = vld [vmem:[%s12681_s0] sm:$0xff]  ;;  %v118_v32 = vld [vmem:[%s12681_s0 + $0x8] sm:$0xff]  ;;  %v151_v34 = vld [vmem:[%s12681_s0 + $0x110] sm:$0xff] }
   0x9   :  { %40 = vst [vmem:[#allocation2 + $0x1a0] sm:$0xff] %v8086_v2  ;;  %v345_v18 = vld [vmem:[#allocation2 + $0x1b1] sm:$0xff]  ;;  %v836_v33 = vpack.c.bf16 %v118_v32, %v117_v31  ;;  %v153_v45 = vld [vmem:[%s12681_s0 + $0x120] sm:$0xff]  ;;  %v154_v46 = vld [vmem:[%s12681_s0 + $0x128] sm:$0xff] }
   0xa   :  { %41 = vst [vmem:[#allocation2 + $0x1a8] sm:$0x3] %v8086_v2  ;;  %8057 = vmatpush.bf16.msra.mxu2 %v7916_v5  ;;  %1695 = vmatpush.bf16.msra.mxu0 %v7916_v5  ;;  %v281_v17 = vld [vmem:[#allocation2 + $0x1b0] sm:$0xff]  ;;  %v152_v35 = vld [vmem:[%s12681_s0 + $0x118] sm:$0xff]  ;;  %v121_v49 = vld [vmem:[%s12681_s0 + $0x20] sm:$0xff]  ;;  %v998_v52 = vpack.c.bf16 %v154_v46, %v153_v45 }
   0xb   :  { %8065 = vmatpush.bf16.msra.mxu3 %v7924_v6  ;;  %42 = vst [vmem:[#allocation2 + $0x348] sm:$0xff] %v8086_v2  ;;  %1864 = vmatpush.bf16.msra.mxu1 %v7924_v6  ;;  %v970_v20 = vpack.c.bf16 0.0, %v281_v17  ;;  %v989_v36 = vpack.c.bf16 %v152_v35, %v151_v34  ;;  %v7933_v37 = vld [vmem:[%s12680_s1 + $0xb0] sm:$0xff]  ;;  %v120_v41 = vld [vmem:[%s12681_s0 + $0x18] sm:$0xff]  ;;  %v122_v50 = vld [vmem:[%s12681_s0 + $0x28] sm:$0xff] }
   0xc   :  { %43 = vst [vmem:[#allocation2 + $0x350] sm:$0xff] %v8086_v2  ;;  %v313_v23 = vld [vmem:[#allocation2 + $0x1] sm:$0xff]  ;;  %v119_v40 = vld [vmem:[%s12681_s0 + $0x10] sm:$0xff]  ;;  %v854_v56 = vpack.c.bf16 %v122_v50, %v121_v49  ;;  %v156_v58 = vld [vmem:[%s12681_s0 + $0x138] sm:$0xff] }
   0xd   :  { %44 = vst [vmem:[#allocation2 + $0x358] sm:$0x3] %v8086_v2  ;;  %v314_v24 = vld [vmem:[#allocation2 + $0x9] sm:$0xff]  ;;  %v845_v43 = vpack.c.bf16 %v120_v41, %v119_v40  ;;  %v124_v63 = vld [vmem:[%s12681_s0 + $0x38] sm:$0xff] }
   0xe   :  { %46 = vst [vmem:[#allocation2 + $0x18] sm:$0x1] %v8086_v2  ;;  %8058 = vmatpush.bf16.msra.mxu2 %v7915_v7  ;;  %1696 = vmatpush.bf16.msra.mxu0 %v7915_v7  ;;  %v346_v19 = vld [vmem:[#allocation2 + $0x1b9] sm:$0xff]  ;;  %v827_v26 = vpack.c.bf16 %v314_v24, %v313_v23  ;;  %v7941_v42 = vld [vmem:[%s12680_s1 + $0xf0] sm:$0xff]  ;;  %v7932_v1 = vld [vmem:[%s12680_s1 + $0xa8] sm:$0xff] }
   0xf   :  { %8066 = vmatpush.bf16.msra.mxu3 %v7923_v8  ;;  %47 = vst [vmem:[#allocation2 + $0x30] sm:$0x1] %v8086_v2  ;;  %1865 = vmatpush.bf16.msra.mxu1 %v7923_v8  ;;  %v971_v21 = vpack.c.bf16 %v346_v19, %v345_v18  ;;  %v7949_v44 = vld [vmem:[%s12680_s1 + $0x130] sm:$0xff]  ;;  %v7940_v5 = vld [vmem:[%s12680_s1 + $0xe8] sm:$0xff]  ;;  %v157_v8 = vld [vmem:[%s12681_s0 + $0x140] sm:$0xff] }
  0x10   :  { %48 = vst [vmem:[#allocation2 + $0x48] sm:$0x1] %v8086_v2  ;;  %v155_v57 = vld [vmem:[%s12681_s0 + $0x130] sm:$0xff]  ;;  %v7948_v7 = vld [vmem:[%s12680_s1 + $0x128] sm:$0xff] }
  0x11   :  { %49 = vst [vmem:[#allocation2 + $0x60] sm:$0x1] %v8086_v2  ;;  %v123_v62 = vld [vmem:[%s12681_s0 + $0x30] sm:$0xff]  ;;  %v1007_v0 = vpack.c.bf16 %v156_v58, %v155_v57 }
  0x12   :  { %50 = vst [vmem:[#allocation2 + $0x78] sm:$0x1] %v8086_v2  ;;  %8059 = vmatpush.bf16.msra.mxu2 %v7914_v9  ;;  %1697 = vmatpush.bf16.msra.mxu0 %v7914_v9  ;;  %v863_v6 = vpack.c.bf16 %v124_v63, %v123_v62 }
  0x13   :  { %8067 = vmatpush.bf16.msra.mxu3 %v7922_v10  ;;  %51 = vst [vmem:[#allocation2 + $0x90] sm:$0x1] %v8086_v2  ;;  %1866 = vmatpush.bf16.msra.mxu1 %v7922_v10 }
  0x14   :  { %52 = vst [vmem:[#allocation2 + $0xa8] sm:$0x1] %v8086_v2 }
  0x15   :  { %53 = vst [vmem:[#allocation2 + $0xc0] sm:$0x1] %v8086_v2 }
  0x16   :  { %54 = vst [vmem:[#allocation2 + $0xd8] sm:$0x1] %v8086_v2  ;;  %8060 = vmatpush.bf16.msra.mxu2 %v7913_v11  ;;  %1698 = vmatpush.bf16.msra.mxu0 %v7913_v11  ;;  %v158_v11 = vld [vmem:[%s12681_s0 + $0x148] sm:$0xff] }
  0x17   :  { %8068 = vmatpush.bf16.msra.mxu3 %v7921_v12  ;;  %55 = vst [vmem:[#allocation2 + $0xf0] sm:$0x1] %v8086_v2  ;;  %1867 = vmatpush.bf16.msra.mxu1 %v7921_v12 }
  0x18   :  { %56 = vst [vmem:[#allocation2 + $0x108] sm:$0x1] %v8086_v2 }
  0x19   :  { %57 = vst [vmem:[#allocation2 + $0x120] sm:$0x1] %v8086_v2 }
  0x1a   :  { %58 = vst [vmem:[#allocation2 + $0x138] sm:$0x1] %v8086_v2  ;;  %8061 = vmatpush.bf16.msra.mxu2 %v7912_v13  ;;  %1699 = vmatpush.bf16.msra.mxu0 %v7912_v13  ;;  %v125_v13 = vld [vmem:[%s12681_s0 + $0x40] sm:$0xff] }
  0x1b   :  { %8069 = vmatpush.bf16.msra.mxu3 %v7920_v14  ;;  %59 = vst [vmem:[#allocation2 + $0x150] sm:$0x1] %v8086_v2  ;;  %1868 = vmatpush.bf16.msra.mxu1 %v7920_v14  ;;  %v126_v14 = vld [vmem:[%s12681_s0 + $0x48] sm:$0xff] }
  0x1c   :  { %60 = vst [vmem:[#allocation2 + $0x168] sm:$0x1] %v8086_v2  ;;  %v872_v19 = vpack.c.bf16 %v126_v14, %v125_v13 }
  0x1d   :  { %61 = vst [vmem:[#allocation2 + $0x180] sm:$0x1] %v8086_v2 }
  0x1e   :  { %64 = vst [vmem:[#allocation2 + $0x1c8] sm:$0x1] %v8086_v2  ;;  %8062 = vmatpush.bf16.msra.mxu2 %v7911_v15  ;;  %1700 = vmatpush.bf16.msra.mxu0 %v7911_v15  ;;  %v1016_v15 = vpack.c.bf16 %v158_v11, %v157_v8 }
  0x1f   :  { %8070 = vmatpush.bf16.msra.mxu3 %v7919_v16  ;;  %65 = vst [vmem:[#allocation2 + $0x1e0] sm:$0x1] %v8086_v2  ;;  %1869 = vmatpush.bf16.msra.mxu1 %v7919_v16 }
  0x20   :  { %66 = vst [vmem:[#allocation2 + $0x1f8] sm:$0x1] %v8086_v2 }
  0x21   :  { %67 = vst [vmem:[#allocation2 + $0x210] sm:$0x1] %v8086_v2  ;;  %1781 = vmatmul.bf16.vlgmr.msra.gmra.mxu2 %v970_v20  ;;  %v159_v20 = vld [vmem:[%s12681_s0 + $0x150] sm:$0xff] }
  0x22   :  { %68 = vst [vmem:[#allocation2 + $0x228] sm:$0x1] %v8086_v2  ;;  %1950 = vmatmul.bf16.vlgmr.msra.gmra.mxu3 %v971_v21  ;;  %2031 = vmatpush.bf16.msrb.mxu2 %v7934_v22  ;;  %v160_v21 = vld [vmem:[%s12681_s0 + $0x158] sm:$0xff] }
  0x23   :  { %69 = vst [vmem:[#allocation2 + $0x240] sm:$0x1] %v8086_v2  ;;  %2200 = vmatpush.bf16.msrb.mxu3 %v7942_v25  ;;  %1870 = vmatmul.bf16.vlgmr.msra.gmra.mxu1 %v827_v26  ;;  %v127_v25 = vld [vmem:[%s12681_s0 + $0x50] sm:$0xff]  ;;  %v128_v26 = vld [vmem:[%s12681_s0 + $0x58] sm:$0xff] }
  0x24   :  { %70 = vst [vmem:[#allocation2 + $0x258] sm:$0x1] %v8086_v2  ;;  %2369 = vmatpush.bf16.msrb.mxu0 %v7950_v27  ;;  %v1025_v27 = vpack.c.bf16 %v160_v21, %v159_v20 }
  0x25   :  { %71 = vst [vmem:[#allocation2 + $0x270] sm:$0x1] %v8086_v2 }
  0x26   :  { %72 = vst [vmem:[#allocation2 + $0x288] sm:$0x1] %v8086_v2  ;;  %2032 = vmatpush.bf16.msrb.mxu2 %v7933_v37 }
  0x27   :  { %73 = vst [vmem:[#allocation2 + $0x2a0] sm:$0x1] %v8086_v2  ;;  %2201 = vmatpush.bf16.msrb.mxu3 %v7941_v42 }
  0x28   :  { %74 = vst [vmem:[#allocation2 + $0x2b8] sm:$0x1] %v8086_v2  ;;  %2370 = vmatpush.bf16.msrb.mxu0 %v7949_v44 }
  0x29   :  { %75 = vst [vmem:[#allocation2 + $0x2d0] sm:$0x1] %v8086_v2 }
  0x2a   :  { %76 = vst [vmem:[#allocation2 + $0x2e8] sm:$0x1] %v8086_v2  ;;  %2033 = vmatpush.bf16.msrb.mxu2 %v7932_v1 }
  0x2b   :  { %77 = vst [vmem:[#allocation2 + $0x300] sm:$0x1] %v8086_v2  ;;  %2202 = vmatpush.bf16.msrb.mxu3 %v7940_v5  ;;  %v165_v5 = vld [vmem:[%s12681_s0 + $0x180] sm:$0xff] }
  0x2c   :  { %78 = vst [vmem:[#allocation2 + $0x318] sm:$0x1] %v8086_v2  ;;  %2371 = vmatpush.bf16.msrb.mxu0 %v7948_v7 }
  0x2d   :  { %79 = vst [vmem:[#allocation2 + $0x330] sm:$0x1] %v8086_v2 }
  0x2e   :  { %82 = vst [vmem:[#allocation2 + $0x29] sm:$0x1] %v8086_v2 }
  0x2f   :  { %83 = vst [vmem:[#allocation2 + $0x41] sm:$0x1] %v8086_v2 }
  0x30   :  { %84 = vst [vmem:[#allocation2 + $0x59] sm:$0x1] %v8086_v2 }
  0x31   :  { %85 = vst [vmem:[#allocation2 + $0x71] sm:$0x1] %v8086_v2 }
  0x32   :  { %86 = vst [vmem:[#allocation2 + $0x89] sm:$0x1] %v8086_v2  ;;  %1955 = vmatmul.bf16.gmra.mxu3 %v980_v30 }
  0x33   :  { %87 = vst [vmem:[#allocation2 + $0xa1] sm:$0x1] %v8086_v2  ;;  %1875 = vmatmul.bf16.gmra.mxu1 %v836_v33  ;;  %v881_v33 = vpack.c.bf16 %v128_v26, %v127_v25 }
  0x34   :  { %88 = vst [vmem:[#allocation2 + $0xb9] sm:$0x1] %v8086_v2 }
  0x35   :  { %89 = vst [vmem:[#allocation2 + $0xd1] sm:$0x1] %v8086_v2 }
  0x36   :  { %90 = vst [vmem:[#allocation2 + $0xe9] sm:$0x1] %v8086_v2 }
  0x37   :  { %91 = vst [vmem:[#allocation2 + $0x101] sm:$0x1] %v8086_v2 }
  0x38   :  { %92 = vst [vmem:[#allocation2 + $0x119] sm:$0x1] %v8086_v2 }
  0x39   :  { %93 = vst [vmem:[#allocation2 + $0x131] sm:$0x1] %v8086_v2 }
  0x3a   :  { %94 = vst [vmem:[#allocation2 + $0x149] sm:$0x1] %v8086_v2 }
  0x3b   :  { %95 = vst [vmem:[#allocation2 + $0x161] sm:$0x1] %v8086_v2 }
  0x3c   :  { %96 = vst [vmem:[#allocation2 + $0x179] sm:$0x1] %v8086_v2 }
  0x3d   :  { %97 = vst [vmem:[#allocation2 + $0x191] sm:$0x1] %v8086_v2 }
  0x3e   :  { %100 = vst [vmem:[#allocation2 + $0x1d9] sm:$0x1] %v8086_v2 }
  0x3f   :  { %101 = vst [vmem:[#allocation2 + $0x1f1] sm:$0x1] %v8086_v2 }
  0x40   :  { %102 = vst [vmem:[#allocation2 + $0x209] sm:$0x1] %v8086_v2 }
  0x41   :  { %103 = vst [vmem:[#allocation2 + $0x221] sm:$0x1] %v8086_v2 }
  0x42   :  { %104 = vst [vmem:[#allocation2 + $0x239] sm:$0x1] %v8086_v2  ;;  %1960 = vmatmul.bf16.gmra.mxu3 %v989_v36 }
  0x43   :  { %105 = vst [vmem:[#allocation2 + $0x251] sm:$0x1] %v8086_v2  ;;  %1880 = vmatmul.bf16.gmra.mxu1 %v845_v43 }
  0x44   :  { %106 = vst [vmem:[#allocation2 + $0x269] sm:$0x1] %v8086_v2 }
  0x45   :  { %107 = vst [vmem:[#allocation2 + $0x281] sm:$0x1] %v8086_v2 }
  0x46   :  { %108 = vst [vmem:[#allocation2 + $0x299] sm:$0x1] %v8086_v2 }
  0x47   :  { %109 = vst [vmem:[#allocation2 + $0x2b1] sm:$0x1] %v8086_v2 }
  0x48   :  { %110 = vst [vmem:[#allocation2 + $0x2c9] sm:$0x1] %v8086_v2 }
  0x49   :  { %111 = vst [vmem:[#allocation2 + $0x2e1] sm:$0x1] %v8086_v2 }
  0x4a   :  { %112 = vst [vmem:[#allocation2 + $0x2f9] sm:$0x1] %v8086_v2 }
  0x4b   :  { %113 = vst [vmem:[#allocation2 + $0x311] sm:$0x1] %v8086_v2 }
  0x4c   :  { %114 = vst [vmem:[#allocation2 + $0x329] sm:$0x1] %v8086_v2 }
  0x4d   :  { %115 = vst [vmem:[#allocation2 + $0x341] sm:$0x1] %v8086_v2 }
  0x4e   :  { %45 = vst [vmem:[#allocation2] sm:$0x1] %v8086_v2 }
  0x4f   :  { %62 = vst [vmem:[#allocation2 + $0x198] sm:$0x1] %v8086_v2 }
  0x50   :  { %80 = vst [vmem:[#allocation2 + $0x348] sm:$0x1] %v8086_v2 }
  0x51   :  { %81 = vst [vmem:[#allocation2 + $0x11] sm:$0x1] %v8086_v2 }
  0x52   :  { %98 = vst [vmem:[#allocation2 + $0x1a9] sm:$0x1] %v8086_v2  ;;  %1965 = vmatmul.bf16.gmra.mxu3 %v998_v52  ;;  %v131_v52 = vld [vmem:[%s12681_s0 + $0x70] sm:$0xff] }
  0x53   :  { %99 = vst [vmem:[#allocation2 + $0x1c1] sm:$0x1] %v8086_v2  ;;  %1885 = vmatmul.bf16.gmra.mxu1 %v854_v56 }
  0x54   :  { %116 = vst [vmem:[#allocation2 + $0x359] sm:$0x1] %v8086_v2 }
  0x55   :  { %v249_v38 = vld [vmem:[#allocation2] sm:$0xff]  ;;  %214 = vst [vmem:[#allocation2 + $0x1c9] sm:$0xff] %v149_v28 }
  0x56   :  { %v826_v39 = vpack.c.bf16 0.0, %v249_v38  ;;  %215 = vst [vmem:[#allocation2 + $0x1d1] sm:$0xff] %v150_v29  ;;  %v7931_v28 = vld [vmem:[%s12680_s1 + $0xa0] sm:$0xff]  ;;  %v162_v38 = vld [vmem:[%s12681_s0 + $0x168] sm:$0xff] }
  0x57   :  { %182 = vst [vmem:[#allocation2 + $0x19] sm:$0xff] %v117_v31  ;;  %2034 = vmatpush.bf16.msrb.mxu2 %v7931_v28 }
  0x58   :  { %1701 = vmatmul.bf16.vlgmr.msra.gmra.mxu0 %v826_v39  ;;  %183 = vst [vmem:[#allocation2 + $0x21] sm:$0xff] %v118_v32  ;;  %v7939_v32 = vld [vmem:[%s12680_s1 + $0xe0] sm:$0xff] }
  0x59   :  { %216 = vst [vmem:[#allocation2 + $0x1e1] sm:$0xff] %v151_v34  ;;  %v7947_v34 = vld [vmem:[%s12680_s1 + $0x120] sm:$0xff]  ;;  %2203 = vmatpush.bf16.msrb.mxu3 %v7939_v32 }
  0x5a   :  { %217 = vst [vmem:[#allocation2 + $0x1e9] sm:$0xff] %v152_v35  ;;  %v161_v35 = vld [vmem:[%s12681_s0 + $0x160] sm:$0xff]  ;;  %2372 = vmatpush.bf16.msrb.mxu0 %v7947_v34 }
  0x5b   :  { %184 = vst [vmem:[#allocation2 + $0x31] sm:$0xff] %v119_v40  ;;  %v129_v40 = vld [vmem:[%s12681_s0 + $0x60] sm:$0xff]  ;;  %v1034_v42 = vpack.c.bf16 %v162_v38, %v161_v35 }
  0x5c   :  { %v283_v47 = vld [vmem:[#allocation2 + $0x1c8] sm:$0xff]  ;;  %185 = vst [vmem:[#allocation2 + $0x39] sm:$0xff] %v120_v41 }
  0x5d   :  { %v284_v48 = vld [vmem:[#allocation2 + $0x1d0] sm:$0xff]  ;;  %218 = vst [vmem:[#allocation2 + $0x1f9] sm:$0xff] %v153_v45  ;;  %v130_v41 = vld [vmem:[%s12681_s0 + $0x68] sm:$0xff] }
  0x5e   :  { %v979_v51 = vpack.c.bf16 %v284_v48, %v283_v47  ;;  %219 = vst [vmem:[#allocation2 + $0x201] sm:$0xff] %v154_v46  ;;  %v251_v53 = vld [vmem:[#allocation2 + $0x18] sm:$0xff]  ;;  %v890_v46 = vpack.c.bf16 %v130_v41, %v129_v40 }
  0x5f   :  { %186 = vst [vmem:[#allocation2 + $0x49] sm:$0xff] %v121_v49  ;;  %v252_v54 = vld [vmem:[#allocation2 + $0x20] sm:$0xff]  ;;  %v163_v49 = vld [vmem:[%s12681_s0 + $0x170] sm:$0xff] }
  0x60   :  { %1786 = vmatmul.bf16.gmra.mxu2 %v979_v51  ;;  %187 = vst [vmem:[#allocation2 + $0x51] sm:$0xff] %v122_v50  ;;  %v835_v55 = vpack.c.bf16 %v252_v54, %v251_v53  ;;  %v285_v59 = vld [vmem:[#allocation2 + $0x1e0] sm:$0xff]  ;;  %v164_v50 = vld [vmem:[%s12681_s0 + $0x178] sm:$0xff] }
  0x61   :  { %v286_v60 = vld [vmem:[#allocation2 + $0x1e8] sm:$0xff]  ;;  %220 = vst [vmem:[#allocation2 + $0x211] sm:$0xff] %v155_v57  ;;  %v132_v53 = vld [vmem:[%s12681_s0 + $0x78] sm:$0xff]  ;;  %v1043_v57 = vpack.c.bf16 %v164_v50, %v163_v49 }
  0x62   :  { %221 = vst [vmem:[#allocation2 + $0x219] sm:$0xff] %v156_v58  ;;  %v988_v61 = vpack.c.bf16 %v286_v60, %v285_v59  ;;  %v253_v2 = vld [vmem:[#allocation2 + $0x30] sm:$0xff]  ;;  %1970 = vmatmul.bf16.gmra.mxu3 %v1007_v0  ;;  %v8404_v58 = vld [vmem:[%s12682_s2] ss:$0 sm:$0xff]  ;;  %v7930_v59 = vld [vmem:[%s12680_s1 + $0x98] sm:$0xff]  ;;  %v899_v0 = vpack.c.bf16 %v132_v53, %v131_v52 }
  0x63   :  { %188 = vst [vmem:[#allocation2 + $0x61] sm:$0xff] %v123_v62  ;;  %v254_v3 = vld [vmem:[#allocation2 + $0x38] sm:$0xff]  ;;  %1890 = vmatmul.bf16.gmra.mxu1 %v863_v6  ;;  %2035 = vmatpush.bf16.msrb.mxu2 %v7930_v59  ;;  %v166_v6 = vld [vmem:[%s12681_s0 + $0x188] sm:$0xff] }
  0x64   :  { %189 = vst [vmem:[#allocation2 + $0x69] sm:$0xff] %v124_v63  ;;  %v844_v4 = vpack.c.bf16 %v254_v3, %v253_v2  ;;  %v287_v9 = vld [vmem:[#allocation2 + $0x1f8] sm:$0xff] }
  0x65   :  { %v288_v10 = vld [vmem:[#allocation2 + $0x200] sm:$0xff]  ;;  %222 = vst [vmem:[#allocation2 + $0x229] sm:$0xff] %v157_v8 }
  0x66   :  { %223 = vst [vmem:[#allocation2 + $0x231] sm:$0xff] %v158_v11  ;;  %v997_v12 = vpack.c.bf16 %v288_v10, %v287_v9  ;;  %v255_v16 = vld [vmem:[#allocation2 + $0x48] sm:$0xff]  ;;  %v133_v8 = vld [vmem:[%s12681_s0 + $0x80] sm:$0xff]  ;;  %v7946_v11 = vld [vmem:[%s12680_s1 + $0x118] sm:$0xff] }
  0x67   :  { %190 = vst [vmem:[#allocation2 + $0x79] sm:$0xff] %v125_v13  ;;  %v256_v17 = vld [vmem:[#allocation2 + $0x50] sm:$0xff]  ;;  %v134_v9 = vld [vmem:[%s12681_s0 + $0x88] sm:$0xff]  ;;  %2373 = vmatpush.bf16.msrb.mxu0 %v7946_v11 }
  0x68   :  { %1706 = vmatmul.bf16.gmra.mxu0 %v835_v55  ;;  %191 = vst [vmem:[#allocation2 + $0x81] sm:$0xff] %v126_v14  ;;  %v853_v18 = vpack.c.bf16 %v256_v17, %v255_v16  ;;  %v289_v22 = vld [vmem:[#allocation2 + $0x210] sm:$0xff]  ;;  %v1052_v16 = vpack.c.bf16 %v166_v6, %v165_v5 }
  0x69   :  { %v290_v23 = vld [vmem:[#allocation2 + $0x218] sm:$0xff]  ;;  %224 = vst [vmem:[#allocation2 + $0x241] sm:$0xff] %v159_v20 }
  0x6a   :  { %225 = vst [vmem:[#allocation2 + $0x249] sm:$0xff] %v160_v21  ;;  %v1006_v24 = vpack.c.bf16 %v290_v23, %v289_v22  ;;  %v257_v29 = vld [vmem:[#allocation2 + $0x60] sm:$0xff]  ;;  %v167_v22 = vld [vmem:[%s12681_s0 + $0x190] sm:$0xff]  ;;  %v168_v23 = vld [vmem:[%s12681_s0 + $0x198] sm:$0xff] }
  0x6b   :  { %192 = vst [vmem:[#allocation2 + $0x91] sm:$0xff] %v127_v25  ;;  %v258_v30 = vld [vmem:[#allocation2 + $0x68] sm:$0xff]  ;;  %v135_v25 = vld [vmem:[%s12681_s0 + $0x90] sm:$0xff]  ;;  %v1061_v32 = vpack.c.bf16 %v168_v23, %v167_v22 }
  0x6c   :  { %193 = vst [vmem:[#allocation2 + $0x99] sm:$0xff] %v128_v26  ;;  %v862_v31 = vpack.c.bf16 %v258_v30, %v257_v29  ;;  %v291_v36 = vld [vmem:[#allocation2 + $0x228] sm:$0xff]  ;;  %v136_v26 = vld [vmem:[%s12681_s0 + $0x98] sm:$0xff] }
  0x6d   :  { %v292_v37 = vld [vmem:[#allocation2 + $0x230] sm:$0xff]  ;;  %226 = vst [vmem:[#allocation2 + $0x259] sm:$0xff] %v161_v35 }
  0x6e   :  { %227 = vst [vmem:[#allocation2 + $0x261] sm:$0xff] %v162_v38  ;;  %v1015_v39 = vpack.c.bf16 %v292_v37, %v291_v36  ;;  %v259_v43 = vld [vmem:[#allocation2 + $0x78] sm:$0xff]  ;;  %v7929_v35 = vld [vmem:[%s12680_s1 + $0x90] sm:$0xff] }
  0x6f   :  { %194 = vst [vmem:[#allocation2 + $0xa9] sm:$0xff] %v129_v40  ;;  %v260_v44 = vld [vmem:[#allocation2 + $0x80] sm:$0xff]  ;;  %2036 = vmatpush.bf16.msrb.mxu2 %v7929_v35  ;;  %v7937_v38 = vld [vmem:[%s12680_s1 + $0xd0] sm:$0xff]  ;;  %v917_v40 = vpack.c.bf16 %v136_v26, %v135_v25 }
  0x70   :  { %1791 = vmatmul.bf16.gmra.mxu2 %v988_v61  ;;  %195 = vst [vmem:[#allocation2 + $0xb1] sm:$0xff] %v130_v41  ;;  %v871_v45 = vpack.c.bf16 %v260_v44, %v259_v43  ;;  %v293_v47 = vld [vmem:[#allocation2 + $0x240] sm:$0xff]  ;;  %v7938_v61 = vld [vmem:[%s12680_s1 + $0xd8] sm:$0xff] }
  0x71   :  { %v294_v48 = vld [vmem:[#allocation2 + $0x248] sm:$0xff]  ;;  %228 = vst [vmem:[#allocation2 + $0x271] sm:$0xff] %v163_v49  ;;  %2204 = vmatpush.bf16.msrb.mxu3 %v7938_v61  ;;  %v169_v44 = vld [vmem:[%s12681_s0 + $0x1a0] sm:$0xff] }
  0x72   :  { %1975 = vmatmul.bf16.gmra.mxu3 %v1016_v15  ;;  %v1024_v51 = vpack.c.bf16 %v294_v48, %v293_v47  ;;  %229 = vst [vmem:[#allocation2 + $0x279] sm:$0xff] %v164_v50  ;;  %v261_v54 = vld [vmem:[#allocation2 + $0x90] sm:$0xff]  ;;  %v137_v48 = vld [vmem:[%s12681_s0 + $0xa0] sm:$0xff]  ;;  %v138_v49 = vld [vmem:[%s12681_s0 + $0xa8] sm:$0xff] }
  0x73   :  { %1895 = vmatmul.bf16.gmra.mxu1 %v872_v19  ;;  %196 = vst [vmem:[#allocation2 + $0xc1] sm:$0xff] %v131_v52  ;;  %v262_v55 = vld [vmem:[#allocation2 + $0x98] sm:$0xff]  ;;  %v908_v19 = vpack.c.bf16 %v134_v9, %v133_v8 }
  0x74   :  { %197 = vst [vmem:[#allocation2 + $0xc9] sm:$0xff] %v132_v53  ;;  %v880_v56 = vpack.c.bf16 %v262_v55, %v261_v54  ;;  %v295_v1 = vld [vmem:[#allocation2 + $0x258] sm:$0xff]  ;;  %v7945_v53 = vld [vmem:[%s12680_s1 + $0x110] sm:$0xff] }
  0x75   :  { %v296_v2 = vld [vmem:[#allocation2 + $0x260] sm:$0xff]  ;;  %230 = vst [vmem:[#allocation2 + $0x289] sm:$0xff] %v165_v5  ;;  %2205 = vmatpush.bf16.msrb.mxu3 %v7937_v38  ;;  %2374 = vmatpush.bf16.msrb.mxu0 %v7945_v53  ;;  %v926_v5 = vpack.c.bf16 %v138_v49, %v137_v48 }
  0x76   :  { %v1033_v7 = vpack.c.bf16 %v296_v2, %v295_v1  ;;  %231 = vst [vmem:[#allocation2 + $0x291] sm:$0xff] %v166_v6  ;;  %v263_v13 = vld [vmem:[#allocation2 + $0xa8] sm:$0xff] }
  0x77   :  { %198 = vst [vmem:[#allocation2 + $0xd9] sm:$0xff] %v133_v8  ;;  %v264_v14 = vld [vmem:[#allocation2 + $0xb0] sm:$0xff] }
  0x78   :  { %1711 = vmatmul.bf16.gmra.mxu0 %v844_v4  ;;  %199 = vst [vmem:[#allocation2 + $0xe1] sm:$0xff] %v134_v9  ;;  %v889_v15 = vpack.c.bf16 %v264_v14, %v263_v13  ;;  %v297_v20 = vld [vmem:[#allocation2 + $0x270] sm:$0xff] }
  0x79   :  { %v298_v21 = vld [vmem:[#allocation2 + $0x278] sm:$0xff]  ;;  %232 = vst [vmem:[#allocation2 + $0x2a1] sm:$0xff] %v167_v22  ;;  %v171_v9 = vld [vmem:[%s12681_s0 + $0x1b0] sm:$0xff] }
  0x7a   :  { %233 = vst [vmem:[#allocation2 + $0x2a9] sm:$0xff] %v168_v23  ;;  %v265_v29 = vld [vmem:[#allocation2 + $0xc0] sm:$0xff] }
  0x7b   :  { %200 = vst [vmem:[#allocation2 + $0xf1] sm:$0xff] %v135_v25  ;;  %v266_v30 = vld [vmem:[#allocation2 + $0xc8] sm:$0xff] }
  0x7c   :  { %201 = vst [vmem:[#allocation2 + $0xf9] sm:$0xff] %v136_v26 }
  0x7d   :  { %v300_v43 = vld [vmem:[#allocation2 + $0x290] sm:$0xff]  ;;  %234 = vst [vmem:[#allocation2 + $0x2b9] sm:$0xff] %v169_v44 }
  0x7e   :  { %202 = vst [vmem:[#allocation2 + $0x109] sm:$0xff] %v137_v48  ;;  %v267_v55 = vld [vmem:[#allocation2 + $0xd8] sm:$0xff]  ;;  %v142_v48 = vld [vmem:[%s12681_s0 + $0xc8] sm:$0xff] }
  0x7f   :  { %203 = vst [vmem:[#allocation2 + $0x111] sm:$0xff] %v138_v49 }
  0x80   :  { %1796 = vmatmul.bf16.gmra.mxu2 %v997_v12  ;;  %v301_v6 = vld [vmem:[#allocation2 + $0x2a0] sm:$0xff]  ;;  %236 = vst [vmem:[#allocation2 + $0x2d1] sm:$0xff] %v171_v9 }
  0x81   :  { %207 = vst [vmem:[#allocation2 + $0x141] sm:$0xff] %v142_v48 }
  0x82   :  { %1980 = vmatmul.bf16.gmra.mxu3 %v1025_v27  ;;  %v269_v22 = vld [vmem:[#allocation2 + $0xf0] sm:$0xff] }
  0x83   :  { %1900 = vmatmul.bf16.gmra.mxu1 %v881_v33  ;;  %v270_v23 = vld [vmem:[#allocation2 + $0xf8] sm:$0xff] }
  0x84   :  { %v916_v25 = vpack.c.bf16 %v270_v23, %v269_v22  ;;  %v143_v22 = vld [vmem:[%s12681_s0 + $0xd0] sm:$0xff]  ;;  %v144_v23 = vld [vmem:[%s12681_s0 + $0xd8] sm:$0xff] }
  0x85   :  { %208 = vst [vmem:[#allocation2 + $0x151] sm:$0xff] %v143_v22 }
  0x86   :  { %209 = vst [vmem:[#allocation2 + $0x159] sm:$0xff] %v144_v23 }
  0x88   :  { %1716 = vmatmul.bf16.gmra.mxu0 %v853_v18 }
  0x90   :  { %1801 = vmatmul.bf16.gmra.mxu2 %v1006_v24  ;;  %v1042_v24 = vpack.c.bf16 %v298_v21, %v297_v20 }
  0x92   :  { %1985 = vmatmul.bf16.gmra.mxu3 %v1034_v42  ;;  %v299_v42 = vld [vmem:[#allocation2 + $0x288] sm:$0xff] }
  0x93   :  { %1905 = vmatmul.bf16.gmra.mxu1 %v890_v46  ;;  %v1051_v46 = vpack.c.bf16 %v300_v43, %v299_v42  ;;  %v173_v43 = vld [vmem:[%s12681_s0 + $0x1c0] sm:$0xff] }
  0x94   :  { %238 = vst [vmem:[#allocation2 + $0x2e9] sm:$0xff] %v173_v43 }
  0x98   :  { %1721 = vmatmul.bf16.gmra.mxu0 %v862_v31  ;;  %v898_v31 = vpack.c.bf16 %v266_v30, %v265_v29 }
  0xa0   :  { %1806 = vmatmul.bf16.gmra.mxu2 %v1015_v39  ;;  %v1871_v60 = vpop.f32.mrf.mxu1 }
  0xa2   :  { %1990 = vmatmul.bf16.gmra.mxu3 %v1043_v57 }
  0xa3   :  { %1910 = vmatmul.bf16.gmra.mxu1 %v899_v0 }
  0xa4   :  { %v1782_v62 = vpop.f32.mrf.mxu2 }
  0xa5   :  { %v1951_v63 = vpop.f32.mrf.mxu3  ;;  %v1783_v3 = vadd.f32 %v8404_v58, %v1782_v62 }
  0xa7   :  { %v8413_v4 = vadd.f32 %v1951_v63, %v1783_v3 }
  0xa8   :  { %1726 = vmatmul.bf16.gmra.mxu0 %v871_v45  ;;  %v1873_v10 = vpop.f32.mrf.mxu1  ;;  %v170_v45 = vld [vmem:[%s12681_s0 + $0x1a8] sm:$0xff] }
  0xa9   :  { %235 = vst [vmem:[#allocation2 + $0x2c1] sm:$0xff] %v170_v45  ;;  %v1070_v61 = vpack.c.bf16 %v170_v45, %v169_v44 }
  0xac   :  { %v8463_v41 = vpop.f32.mrf.mxu2 }
  0xad   :  { %v8430_v12 = vpop.f32.mrf.mxu3 }
  0xb0   :  { %1811 = vmatmul.bf16.gmra.mxu2 %v1024_v51  ;;  %v8432_v17 = vpop.f32.mrf.mxu1 }
  0xb2   :  { %1995 = vmatmul.bf16.gmra.mxu3 %v1052_v16  ;;  %v140_v16 = vld [vmem:[%s12681_s0 + $0xb8] sm:$0xff] }
  0xb3   :  { %1915 = vmatmul.bf16.gmra.mxu1 %v908_v19  ;;  %205 = vst [vmem:[#allocation2 + $0x129] sm:$0xff] %v140_v16 }
  0xb5   :  { %v1956_v18 = vpop.f32.mrf.mxu3 }
  0xb8   :  { %1731 = vmatmul.bf16.gmra.mxu0 %v880_v56  ;;  %v8446_v27 = vpop.f32.mrf.mxu1  ;;  %v268_v56 = vld [vmem:[#allocation2 + $0xe0] sm:$0xff] }
  0xb9   :  { %v907_v59 = vpack.c.bf16 %v268_v56, %v267_v55  ;;  %v7944_v56 = vld [vmem:[%s12680_s1 + $0x108] sm:$0xff] }
  0xba   :  { %2375 = vmatpush.bf16.msrb.mxu0 %v7944_v56  ;;  %v177_v56 = vld [vmem:[%s12681_s0 + $0x1e0] sm:$0xff] }
  0xbb   :  { %242 = vst [vmem:[#allocation2 + $0x319] sm:$0xff] %v177_v56 }
  0xbd   :  { %v8448_v28 = vpop.f32.mrf.mxu3 }
  0xc0   :  { %1816 = vmatmul.bf16.gmra.mxu2 %v1033_v7  ;;  %v8454_v36 = vpop.f32.mrf.mxu1  ;;  %v302_v7 = vld [vmem:[#allocation2 + $0x2a8] sm:$0xff] }
  0xc1   :  { %v1060_v13 = vpack.c.bf16 %v302_v7, %v301_v6 }
  0xc2   :  { %2000 = vmatmul.bf16.gmra.mxu3 %v1061_v32 }
  0xc3   :  { %1920 = vmatmul.bf16.gmra.mxu1 %v917_v40  ;;  %v304_v40 = vld [vmem:[#allocation2 + $0x2c0] sm:$0xff] }
  0xc5   :  { %v8461_v39 = vpop.f32.mrf.mxu3 }
  0xc8   :  { %1736 = vmatmul.bf16.gmra.mxu0 %v889_v15  ;;  %v8478_v51 = vpop.f32.mrf.mxu1  ;;  %v139_v15 = vld [vmem:[%s12681_s0 + $0xb0] sm:$0xff] }
  0xc9   :  { %204 = vst [vmem:[#allocation2 + $0x121] sm:$0xff] %v139_v15  ;;  %v935_v38 = vpack.c.bf16 %v140_v16, %v139_v15  ;;  %v175_v15 = vld [vmem:[%s12681_s0 + $0x1d0] sm:$0xff] }
  0xca   :  { %240 = vst [vmem:[#allocation2 + $0x301] sm:$0xff] %v175_v15 }
  0xcd   :  { %v8485_v54 = vpop.f32.mrf.mxu3 }
  0xd0   :  { %1821 = vmatmul.bf16.gmra.mxu2 %v1042_v24  ;;  %v8491_v1 = vpop.f32.mrf.mxu1 }
  0xd2   :  { %2005 = vmatmul.bf16.gmra.mxu3 %v1070_v61 }
  0xd3   :  { %1925 = vmatmul.bf16.gmra.mxu1 %v926_v5 }
  0xd5   :  { %v1702_v33 = vpop.f32.mrf.mxu0  ;;  %v8496_v3 = vpop.f32.mrf.mxu3 }
  0xd6   :  { %v1703_v34 = vadd.f32 %v8404_v58, %v1702_v33 }
  0xd8   :  { %v8456_v37 = vadd.f32 %v1871_v60, %v1703_v34  ;;  %1741 = vmatmul.bf16.gmra.mxu0 %v898_v31  ;;  %v8515_v19 = vpop.f32.mrf.mxu1  ;;  %v7936_v34 = vld [vmem:[%s12680_s1 + $0xc8] sm:$0xff] }
  0xd9   :  { %2206 = vmatpush.bf16.msrb.mxu3 %v7936_v34 }
  0xdd   :  { %v1704_v47 = vpop.f32.mrf.mxu0  ;;  %v8520_v21 = vpop.f32.mrf.mxu3 }
  0xde   :  { %v1705_v50 = vadd.f32 %v8404_v58, %v1704_v47  ;;  %v141_v47 = vld [vmem:[%s12681_s0 + $0xc0] sm:$0xff] }
  0xdf   :  { %206 = vst [vmem:[#allocation2 + $0x139] sm:$0xff] %v141_v47 }
  0xe0   :  { %v8480_v52 = vadd.f32 %v1873_v10, %v1705_v50  ;;  %1826 = vmatmul.bf16.gmra.mxu2 %v1051_v46  ;;  %v172_v10 = vld [vmem:[%s12681_s0 + $0x1b8] sm:$0xff]  ;;  %v8530_v32 = vpop.f32.mrf.mxu1 }
  0xe1   :  { %237 = vst [vmem:[#allocation2 + $0x2d9] sm:$0xff] %v172_v10  ;;  %v1079_v29 = vpack.c.bf16 %v172_v10, %v171_v9  ;;  %v944_v10 = vpack.c.bf16 %v142_v48, %v141_v47  ;;  %v307_v47 = vld [vmem:[#allocation2 + $0x2e8] sm:$0xff] }
  0xe3   :  { %v1787_v57 = vpop.f32.mrf.mxu2  ;;  %2010 = vmatmul.bf16.gmra.mxu3 %v1079_v29  ;;  %1930 = vmatmul.bf16.gmra.mxu1 %v935_v38 }
  0xe4   :  { %v1788_v60 = vadd.f32 %v8404_v58, %v1787_v57 }
  0xe5   :  { %v1707_v62 = vpop.f32.mrf.mxu0  ;;  %v8538_v35 = vpop.f32.mrf.mxu3 }
  0xe6   :  { %v1708_v63 = vadd.f32 %v8404_v58, %v1707_v62  ;;  %v8489_v0 = vadd.f32 %v1956_v18, %v1788_v60  ;;  %v272_v60 = vld [vmem:[#allocation2 + $0x110] sm:$0xff] }
  0xe8   :  { %12841 = vst [vmem:[#allocation3_spill] sm:$0xff] %v8489_v0  ;;  %v8494_v2 = vadd.f32 %v8432_v17, %v1708_v63  ;;  %1746 = vmatmul.bf16.gmra.mxu0 %v907_v59  ;;  %v8557_v53 = vpop.f32.mrf.mxu1  ;;  %v271_v59 = vld [vmem:[#allocation2 + $0x108] sm:$0xff]  ;;  %v590_v0 = vld [vmem:[#allocation2 + $0x112] sm:$0xff] }
  0xeb   :  { %v1789_v8 = vpop.f32.mrf.mxu2 }
  0xec   :  { %v1790_v11 = vadd.f32 %v8404_v58, %v1789_v8 }
  0xed   :  { %v1709_v14 = vpop.f32.mrf.mxu0  ;;  %v8565_v57 = vpop.f32.mrf.mxu3 }
  0xee   :  { %v1710_v17 = vadd.f32 %v8404_v58, %v1709_v14  ;;  %v8513_v18 = vadd.f32 %v8448_v28, %v1790_v11  ;;  %v305_v11 = vld [vmem:[#allocation2 + $0x2d0] sm:$0xff] }
  0xf0   :  { %12842 = vst [vmem:[#allocation4_spill] sm:$0xff] %v8513_v18  ;;  %v8518_v20 = vadd.f32 %v8446_v27, %v1710_v17  ;;  %1831 = vmatmul.bf16.gmra.mxu2 %v1060_v13  ;;  %v7928_v27 = vld [vmem:[%s12680_s1 + $0x88] sm:$0xff]  ;;  %v8572_v7 = vpop.f32.mrf.mxu1  ;;  %v306_v13 = vld [vmem:[#allocation2 + $0x2d8] sm:$0xff] }
  0xf1   :  { %2037 = vmatpush.bf16.msrb.mxu2 %v7928_v27  ;;  %v274_v27 = vld [vmem:[#allocation2 + $0x128] sm:$0xff] }
  0xf2   :  { %v589_v18 = vld [vmem:[#allocation2 + $0x10a] sm:$0xff] }
  0xf3   :  { %v1792_v24 = vpop.f32.mrf.mxu2  ;;  %1935 = vmatmul.bf16.gmra.mxu1 %v944_v10 }
  0xf4   :  { %v1793_v26 = vadd.f32 %v8404_v58, %v1792_v24 }
  0xf5   :  { %v1712_v30 = vpop.f32.mrf.mxu0  ;;  %v8577_v9 = vpop.f32.mrf.mxu3 }
  0xf6   :  { %v1713_v28 = vadd.f32 %v8404_v58, %v1712_v30  ;;  %v8525_v31 = vadd.f32 %v8461_v39, %v1793_v26  ;;  %v303_v39 = vld [vmem:[#allocation2 + $0x2b8] sm:$0xff] }
  0xf7   :  { %v1069_v45 = vpack.c.bf16 %v304_v40, %v303_v39 }
  0xf8   :  { %12843 = vst [vmem:[#allocation5_spill] sm:$0xff] %v8525_v31  ;;  %v8533_v33 = vadd.f32 %v8454_v36, %v1713_v28  ;;  %1751 = vmatmul.bf16.gmra.mxu0 %v916_v25  ;;  %v174_v36 = vld [vmem:[%s12681_s0 + $0x1c8] sm:$0xff]  ;;  %v8596_v26 = vpop.f32.mrf.mxu1  ;;  %v273_v28 = vld [vmem:[#allocation2 + $0x120] sm:$0xff] }
  0xf9   :  { %239 = vst [vmem:[#allocation2 + $0x2f1] sm:$0xff] %v174_v36  ;;  %v1088_v63 = vpack.c.bf16 %v174_v36, %v173_v43  ;;  %v934_v38 = vpack.c.bf16 %v274_v27, %v273_v28 }
  0xfb   :  { %v1794_v42 = vpop.f32.mrf.mxu2  ;;  %2015 = vmatmul.bf16.gmra.mxu3 %v1088_v63 }
  0xfc   :  { %v1795_v44 = vadd.f32 %v8404_v58, %v1794_v42 }
  0xfd   :  { %v1714_v46 = vpop.f32.mrf.mxu0  ;;  %v8601_v30 = vpop.f32.mrf.mxu3 }
  0xfe   :  { %v1715_v49 = vadd.f32 %v8404_v58, %v1714_v46  ;;  %v8555_v50 = vadd.f32 %v8485_v54, %v1795_v44  ;;  %v925_v54 = vpack.c.bf16 %v272_v60, %v271_v59 }
 0x100   :  { %12844 = vst [vmem:[#allocation6_spill] sm:$0xff] %v8555_v50  ;;  %v8560_v55 = vadd.f32 %v8478_v51, %v1715_v49  ;;  %1836 = vmatmul.bf16.gmra.mxu2 %v1069_v45  ;;  %v8611_v36 = vpop.f32.mrf.mxu1  ;;  %v7935_v45 = vld [vmem:[%s12680_s1 + $0xc0] sm:$0xff]  ;;  %v308_v48 = vld [vmem:[#allocation2 + $0x2f0] sm:$0xff] }
 0x101   :  { %2207 = vmatpush.bf16.msrb.mxu3 %v7935_v45  ;;  %v1087_v60 = vpack.c.bf16 %v308_v48, %v307_v47 }
 0x103   :  { %v1797_v61 = vpop.f32.mrf.mxu2 }
 0x104   :  { %v1798_v62 = vadd.f32 %v8404_v58, %v1797_v61 }
 0x105   :  { %v1717_v5 = vpop.f32.mrf.mxu0  ;;  %v8619_v46 = vpop.f32.mrf.mxu3 }
 0x106   :  { %v1718_v6 = vadd.f32 %v8404_v58, %v1717_v5  ;;  %v8570_v51 = vadd.f32 %v8496_v3, %v1798_v62  ;;  %v176_v3 = vld [vmem:[%s12681_s0 + $0x1d8] sm:$0xff]  ;;  %v146_v62 = vld [vmem:[%s12681_s0 + $0xe8] sm:$0xff] }
 0x107   :  { %241 = vst [vmem:[#allocation2 + $0x309] sm:$0xff] %v176_v3  ;;  %v1097_v40 = vpack.c.bf16 %v176_v3, %v175_v15  ;;  %v276_v15 = vld [vmem:[#allocation2 + $0x140] sm:$0xff] }
 0x108   :  { %12845 = vst [vmem:[#allocation7_spill] sm:$0xff] %v8570_v51  ;;  %v8575_v8 = vadd.f32 %v8491_v1, %v1718_v6  ;;  %1756 = vmatmul.bf16.gmra.mxu0 %v925_v54  ;;  %v1078_v1 = vpack.c.bf16 %v306_v13, %v305_v11  ;;  %v145_v54 = vld [vmem:[%s12681_s0 + $0xe0] sm:$0xff]  ;;  %v8638_v6 = vpop.f32.mrf.mxu1 }
 0x109   :  { %210 = vst [vmem:[#allocation2 + $0x169] sm:$0xff] %v145_v54  ;;  %v7943_v11 = vld [vmem:[%s12680_s1 + $0x100] sm:$0xff] }
 0x10a   :  { %211 = vst [vmem:[#allocation2 + $0x171] sm:$0xff] %v146_v62  ;;  %2376 = vmatpush.bf16.msrb.mxu0 %v7943_v11 }
 0x10b   :  { %v1799_v14 = vpop.f32.mrf.mxu2  ;;  %2020 = vmatmul.bf16.gmra.mxu3 %v1097_v40  ;;  %v309_v40 = vld [vmem:[#allocation2 + $0x300] sm:$0xff] }
 0x10c   :  { %v1800_v16 = vadd.f32 %v8404_v58, %v1799_v14  ;;  %v7958_v14 = vld [vmem:[%s12680_s1 + $0x178] sm:$0xff] }
 0x10d   :  { %v1719_v17 = vpop.f32.mrf.mxu0  ;;  %v8646_v13 = vpop.f32.mrf.mxu3  ;;  %2538 = vmatpush.bf16.msrb.mxu1 %v7958_v14 }
 0x10e   :  { %v1720_v24 = vadd.f32 %v8404_v58, %v1719_v17  ;;  %v8594_v25 = vadd.f32 %v8520_v21, %v1800_v16 }
 0x110   :  { %12846 = vst [vmem:[#allocation8_spill] sm:$0xff] %v8594_v25  ;;  %v8599_v29 = vadd.f32 %v8515_v19, %v1720_v24  ;;  %1841 = vmatmul.bf16.gmra.mxu2 %v1078_v1  ;;  %v7927_v19 = vld [vmem:[%s12680_s1 + $0x80] sm:$0xff]  ;;  %v8659_v28 = vpop.f32.mrf.mxu1 }
 0x111   :  { %2038 = vmatpush.bf16.msrb.mxu2 %v7927_v19 }
 0x113   :  { %v1802_v34 = vpop.f32.mrf.mxu2 }
 0x114   :  { %v1803_v39 = vadd.f32 %v8404_v58, %v1802_v34 }
 0x115   :  { %v1722_v42 = vpop.f32.mrf.mxu0  ;;  %v8664_v34 = vpop.f32.mrf.mxu3 }
 0x116   :  { %v1723_v21 = vadd.f32 %v8404_v58, %v1722_v42  ;;  %v8606_v43 = vadd.f32 %v8538_v35, %v1803_v39  ;;  %v953_v35 = vpack.c.bf16 %v144_v23, %v143_v22  ;;  %v7957_v22 = vld [vmem:[%s12680_s1 + $0x170] sm:$0xff]  ;;  %v7956_v39 = vld [vmem:[%s12680_s1 + $0x168] sm:$0xff] }
 0x117   :  { %2539 = vmatpush.bf16.msrb.mxu1 %v7957_v22  ;;  %v310_v42 = vld [vmem:[#allocation2 + $0x308] sm:$0xff] }
 0x118   :  { %12847 = vst [vmem:[#allocation9_spill] sm:$0xff] %v8606_v43  ;;  %v8614_v44 = vadd.f32 %v8530_v32, %v1723_v21  ;;  %1761 = vmatmul.bf16.gmra.mxu0 %v934_v38  ;;  %1940 = vmatmul.bf16.gmra.mxu1 %v953_v35  ;;  %v178_v32 = vld [vmem:[%s12681_s0 + $0x1e8] sm:$0xff]  ;;  %v962_v38 = vpack.c.bf16 %v146_v62, %v145_v54  ;;  %v8677_v48 = vpop.f32.mrf.mxu1  ;;  %v441_v54 = vld [vmem:[#allocation2 + $0x18] sm:$0xff] }
 0x119   :  { %243 = vst [vmem:[#allocation2 + $0x321] sm:$0xff] %v178_v32  ;;  %v1106_v1 = vpack.c.bf16 %v178_v32, %v177_v56  ;;  %v1096_v19 = vpack.c.bf16 %v310_v42, %v309_v40  ;;  %v7954_v32 = vld [vmem:[%s12680_s1 + $0x158] sm:$0xff]  ;;  %v7951_v42 = vld [vmem:[%s12680_s1 + $0x140] sm:$0xff] }
 0x11a   :  { %v460_v43 = vld [vmem:[#allocation2 + $0xf8] sm:$0xff] }
 0x11b   :  { %v1804_v49 = vpop.f32.mrf.mxu2  ;;  %2025 = vmatmul.bf16.gmra.mxu3 %v1106_v1  ;;  %2540 = vmatpush.bf16.msrb.mxu1 %v7956_v39  ;;  %v7974_v1 = vld [vmem:[%s12680_s1 + $0x1f8] sm:$0xff] }
 0x11c   :  { %v1805_v59 = vadd.f32 %v8404_v58, %v1804_v49  ;;  %2876 = vmatpush.bf16.msra.mxu3 %v7974_v1 }
 0x11d   :  { %v1724_v61 = vpop.f32.mrf.mxu0  ;;  %v8682_v56 = vpop.f32.mrf.mxu3 }
 0x11e   :  { %v1725_v63 = vadd.f32 %v8404_v58, %v1724_v61  ;;  %v8636_v5 = vadd.f32 %v8565_v57, %v1805_v59  ;;  %v275_v57 = vld [vmem:[#allocation2 + $0x138] sm:$0xff]  ;;  %v277_v59 = vld [vmem:[#allocation2 + $0x150] sm:$0xff] }
 0x11f   :  { %v943_v16 = vpack.c.bf16 %v276_v15, %v275_v57 }
 0x120   :  { %12848 = vst [vmem:[#allocation10_spill] sm:$0xff] %v8636_v5  ;;  %v8641_v10 = vadd.f32 %v8557_v53, %v1725_v63  ;;  %1846 = vmatmul.bf16.gmra.mxu2 %v1087_v60  ;;  %v278_v60 = vld [vmem:[#allocation2 + $0x158] sm:$0xff]  ;;  %v442_v63 = vld [vmem:[#allocation2 + $0x20] sm:$0xff] }
 0x121   :  { %v829_v14 = vpack.c.bf16 %v442_v63, %v441_v54  ;;  %v312_v22 = vld [vmem:[#allocation2 + $0x320] sm:$0xff] }
 0x123   :  { %v1807_v3 = vpop.f32.mrf.mxu2 }
 0x124   :  { %v1808_v53 = vadd.f32 %v8404_v58, %v1807_v3  ;;  %v7966_v3 = vld [vmem:[%s12680_s1 + $0x1b8] sm:$0xff] }
 0x125   :  { %v1727_v17 = vpop.f32.mrf.mxu0  ;;  %2707 = vmatpush.bf16.msra.mxu2 %v7966_v3 }
 0x126   :  { %v1728_v23 = vadd.f32 %v8404_v58, %v1727_v17  ;;  %v8657_v24 = vadd.f32 %v8577_v9, %v1808_v53  ;;  %v311_v17 = vld [vmem:[#allocation2 + $0x318] sm:$0xff] }
 0x127   :  { %v1105_v39 = vpack.c.bf16 %v312_v22, %v311_v17  ;;  %v378_v17 = vld [vmem:[#allocation2 + $0xa] sm:$0xff] }
 0x128   :  { %12849 = vst [vmem:[#allocation11_spill] sm:$0xff] %v8657_v24  ;;  %v8662_v27 = vadd.f32 %v8572_v7, %v1728_v23  ;;  %1766 = vmatmul.bf16.gmra.mxu0 %v943_v16  ;;  %1945 = vmatmul.bf16.gmra.mxu1 %v962_v38  ;;  %v7955_v7 = vld [vmem:[%s12680_s1 + $0x160] sm:$0xff]  ;;  %v8698_v16 = vpop.f32.mrf.mxu1  ;;  %v8709_v23 = vpop.f32.mrf.mxu3 }
 0x129   :  { %2541 = vmatpush.bf16.msrb.mxu1 %v7955_v7  ;;  %v570_v7 = vld [vmem:[#allocation2 + $0x22] sm:$0xff] }
 0x12b   :  { %v1809_v9 = vpop.f32.mrf.mxu2  ;;  %2208 = vmatmul.bf16.vlgmr.msrb.gmra.mxu3 %v829_v14 }
 0x12c   :  { %v1810_v21 = vadd.f32 %v8404_v58, %v1809_v9 }
 0x12d   :  { %v1729_v45 = vpop.f32.mrf.mxu0  ;;  %2542 = vmatpush.bf16.msrb.mxu1 %v7954_v32  ;;  %v7982_v32 = vld [vmem:[%s12680_s1 + $0x238] sm:$0xff] }
 0x12e   :  { %v1730_v35 = vadd.f32 %v8404_v58, %v1729_v45  ;;  %v8675_v47 = vadd.f32 %v8601_v30, %v1810_v21  ;;  %v952_v30 = vpack.c.bf16 %v278_v60, %v277_v59  ;;  %v569_v45 = vld [vmem:[#allocation2 + $0x1a] sm:$0xff]  ;;  %v279_v60 = vld [vmem:[#allocation2 + $0x168] sm:$0xff]  ;;  %3045 = vmatpush.bf16.msra.mxu0 %v7982_v32 }
 0x12f   :  { %v831_v59 = vpack.c.bf16 %v570_v7, %v569_v45  ;;  %v571_v45 = vld [vmem:[#allocation2 + $0x32] sm:$0xff]  ;;  %v572_v7 = vld [vmem:[#allocation2 + $0x3a] sm:$0xff] }
 0x130   :  { %12850 = vst [vmem:[#allocation12_spill] sm:$0xff] %v8675_v47  ;;  %v8680_v49 = vadd.f32 %v8596_v26, %v1730_v35  ;;  %1851 = vmatmul.bf16.gmra.mxu2 %v1096_v19  ;;  %v7953_v26 = vld [vmem:[%s12680_s1 + $0x150] sm:$0xff]  ;;  %v8719_v19 = vpop.f32.mrf.mxu1  ;;  %v1993_v54 = vpop.f32.mrf.mxu3  ;;  %v840_v32 = vpack.c.bf16 %v572_v7, %v571_v45 }
 0x131   :  { %2543 = vmatpush.bf16.msrb.mxu1 %v7953_v26 }
 0x133   :  { %v1812_v61 = vpop.f32.mrf.mxu2 }
 0x134   :  { %v1813_v62 = vadd.f32 %v8404_v58, %v1812_v61  ;;  %v280_v61 = vld [vmem:[#allocation2 + $0x170] sm:$0xff] }
 0x135   :  { %v1732_v11 = vpop.f32.mrf.mxu0  ;;  %v961_v63 = vpack.c.bf16 %v280_v61, %v279_v60  ;;  %v505_v60 = vld [vmem:[#allocation2 + $0x19] sm:$0xff]  ;;  %v506_v61 = vld [vmem:[#allocation2 + $0x21] sm:$0xff] }
 0x136   :  { %v1733_v57 = vadd.f32 %v8404_v58, %v1732_v11  ;;  %v8693_v15 = vadd.f32 %v8619_v46, %v1813_v62  ;;  %v7952_v46 = vld [vmem:[%s12680_s1 + $0x148] sm:$0xff]  ;;  %v444_v62 = vld [vmem:[#allocation2 + $0x38] sm:$0xff] }
 0x137   :  { %2544 = vmatpush.bf16.msrb.mxu1 %v7952_v46  ;;  %v377_v46 = vld [vmem:[#allocation2 + $0x2] sm:$0xff] }
 0x138   :  { %12851 = vst [vmem:[#allocation13_spill] sm:$0xff] %v8693_v15  ;;  %v8701_v53 = vadd.f32 %v8611_v36, %v1733_v57  ;;  %1771 = vmatmul.bf16.gmra.mxu0 %v952_v30  ;;  %v443_v30 = vld [vmem:[#allocation2 + $0x30] sm:$0xff]  ;;  %v1916_v3 = vpop.f32.mrf.mxu1  ;;  %v1996_v22 = vpop.f32.mrf.mxu3 }
 0x139   :  { %v838_v14 = vpack.c.bf16 %v444_v62, %v443_v30  ;;  %v445_v62 = vld [vmem:[#allocation2 + $0x48] sm:$0xff] }
 0x13b   :  { %v1814_v38 = vpop.f32.mrf.mxu2  ;;  %2545 = vmatpush.bf16.msrb.mxu1 %v7951_v42  ;;  %2213 = vmatmul.bf16.gmra.mxu3 %v838_v14 }
 0x13c   :  { %v1815_v36 = vadd.f32 %v8404_v58, %v1814_v38 }
 0x13d   :  { %v1734_v40 = vpop.f32.mrf.mxu0 }
 0x13e   :  { %v1735_v9 = vadd.f32 %v8404_v58, %v1734_v40  ;;  %v8717_v21 = vadd.f32 %v8646_v13, %v1815_v36  ;;  %2546 = vmatmul.bf16.vlgmr.msrb.gmra.mxu1 %v831_v59 }
 0x140   :  { %12852 = vst [vmem:[#allocation14_spill] sm:$0xff] %v8717_v21  ;;  %v8722_v35 = vadd.f32 %v8638_v6, %v1735_v9  ;;  %1856 = vmatmul.bf16.gmra.mxu2 %v1105_v39  ;;  %v828_v39 = vpack.c.bf16 %v378_v17, %v377_v46 }
 0x143   :  { %v1817_v13 = vpop.f32.mrf.mxu2 }
 0x144   :  { %v1818_v11 = vadd.f32 %v8404_v58, %v1817_v13  ;;  %v1998_v13 = vpop.f32.mrf.mxu3 }
 0x145   :  { %v1737_v6 = vpop.f32.mrf.mxu0 }
 0x146   :  { %v1738_v26 = vadd.f32 %v8404_v58, %v1737_v6  ;;  %v8730_v57 = vadd.f32 %v8664_v34, %v1818_v11  ;;  %v1918_v34 = vpop.f32.mrf.mxu1  ;;  %v830_v11 = vpack.c.bf16 %v506_v61, %v505_v60  ;;  %v573_v60 = vld [vmem:[#allocation2 + $0x4a] sm:$0xff] }
 0x148   :  { %12853 = vst [vmem:[#allocation15_spill] sm:$0xff] %v8730_v57  ;;  %v8733_v1 = vadd.f32 %v8659_v28, %v1738_v26  ;;  %1776 = vmatmul.bf16.gmra.mxu0 %v961_v63  ;;  %v446_v63 = vld [vmem:[#allocation2 + $0x50] sm:$0xff] }
 0x14b   :  { %v1819_v38 = vpop.f32.mrf.mxu2 }
 0x14c   :  { %v1820_v36 = vadd.f32 %v8404_v58, %v1819_v38  ;;  %v2001_v38 = vpop.f32.mrf.mxu3 }
 0x14d   :  { %v1739_v40 = vpop.f32.mrf.mxu0 }
 0x14e   :  { %v1740_v42 = vadd.f32 %v8404_v58, %v1739_v40  ;;  %v8738_v9 = vadd.f32 %v8682_v56, %v1820_v36  ;;  %2551 = vmatmul.bf16.gmra.mxu1 %v840_v32  ;;  %v847_v56 = vpack.c.bf16 %v446_v63, %v445_v62  ;;  %v508_v62 = vld [vmem:[#allocation2 + $0x39] sm:$0xff] }
 0x150   :  { %12854 = vst [vmem:[#allocation16_spill] sm:$0xff] %v8738_v9  ;;  %v8741_v28 = vadd.f32 %v8677_v48, %v1740_v42  ;;  %2039 = vmatmul.bf16.vlgmr.msrb.gmra.mxu2 %v828_v39  ;;  %2218 = vmatmul.bf16.gmra.mxu3 %v847_v56  ;;  %v1921_v48 = vpop.f32.mrf.mxu1  ;;  %v448_v56 = vld [vmem:[#allocation2 + $0x68] sm:$0xff] }
 0x153   :  { %v1822_v30 = vpop.f32.mrf.mxu2 }
 0x154   :  { %v1823_v14 = vadd.f32 %v8404_v58, %v1822_v30  ;;  %v507_v30 = vld [vmem:[#allocation2 + $0x31] sm:$0xff]  ;;  %v2003_v63 = vpop.f32.mrf.mxu3 }
 0x155   :  { %v1742_v6 = vpop.f32.mrf.mxu0 }
 0x156   :  { %v1743_v26 = vadd.f32 %v8404_v58, %v1742_v6  ;;  %v8746_v46 = vadd.f32 %v8709_v23, %v1823_v14  ;;  %v574_v23 = vld [vmem:[#allocation2 + $0x52] sm:$0xff]  ;;  %v447_v14 = vld [vmem:[#allocation2 + $0x60] sm:$0xff]  ;;  %v839_v6 = vpack.c.bf16 %v508_v62, %v507_v30 }
 0x158   :  { %12855 = vst [vmem:[#allocation17_spill] sm:$0xff] %v8746_v46  ;;  %v8749_v17 = vadd.f32 %v8698_v16, %v1743_v26  ;;  %2377 = vmatmul.bf16.vlgmr.msrb.gmra.mxu0 %v830_v11  ;;  %v8755_v7 = vpop.f32.mrf.mxu1  ;;  %v849_v16 = vpack.c.bf16 %v574_v23, %v573_v60  ;;  %v856_v26 = vpack.c.bf16 %v448_v56, %v447_v14  ;;  %v575_v14 = vld [vmem:[#allocation2 + $0x62] sm:$0xff] }
 0x15b   :  { %v1824_v36 = vpop.f32.mrf.mxu2 }
 0x15c   :  { %v1825_v39 = vadd.f32 %v8404_v58, %v1824_v36 }
 0x15d   :  { %v1744_v40 = vpop.f32.mrf.mxu0 }
 0x15e   :  { %v1745_v42 = vadd.f32 %v8404_v58, %v1744_v40  ;;  %v8753_v45 = vadd.f32 %v1993_v54, %v1825_v39  ;;  %2556 = vmatmul.bf16.gmra.mxu1 %v849_v16 }
 0x160   :  { %12856 = vst [vmem:[#allocation18_spill] sm:$0xff] %v8753_v45  ;;  %v8758_v61 = vadd.f32 %v8719_v19, %v1745_v42  ;;  %2044 = vmatmul.bf16.gmra.mxu2 %v831_v59  ;;  %2223 = vmatmul.bf16.gmra.mxu3 %v856_v26  ;;  %v8764_v19 = vpop.f32.mrf.mxu1  ;;  %v2006_v42 = vpop.f32.mrf.mxu3 }
 0x163   :  { %v1827_v11 = vpop.f32.mrf.mxu2 }
 0x164   :  { %v1828_v54 = vadd.f32 %v8404_v58, %v1827_v11 }
 0x165   :  { %v1747_v36 = vpop.f32.mrf.mxu0 }
 0x166   :  { %v1748_v39 = vadd.f32 %v8404_v58, %v1747_v36  ;;  %v8762_v40 = vadd.f32 %v1996_v22, %v1828_v54  ;;  %v576_v22 = vld [vmem:[#allocation2 + $0x6a] sm:$0xff] }
 0x167   :  { %v8776_v54 = vpack.c.bf16 %v576_v22, %v575_v14  ;;  %v7973_v22 = vld [vmem:[%s12680_s1 + $0x1f0] sm:$0xff] }
 0x168   :  { %12857 = vst [vmem:[#allocation19_spill] sm:$0xff] %v8762_v40  ;;  %v8766_v59 = vadd.f32 %v1916_v3, %v1748_v39  ;;  %2382 = vmatmul.bf16.gmra.mxu0 %v839_v6  ;;  %v8772_v11 = vpop.f32.mrf.mxu1  ;;  %v509_v3 = vld [vmem:[#allocation2 + $0x49] sm:$0xff]  ;;  %v510_v6 = vld [vmem:[#allocation2 + $0x51] sm:$0xff]  ;;  %v2008_v26 = vpop.f32.mrf.mxu3  ;;  %2877 = vmatpush.bf16.msra.mxu3 %v7973_v22 }
 0x169   :  { %v449_v39 = vld [vmem:[#allocation2 + $0x78] sm:$0xff]  ;;  %v512_v22 = vld [vmem:[#allocation2 + $0x69] sm:$0xff] }
 0x16b   :  { %v1829_v60 = vpop.f32.mrf.mxu2 }
 0x16c   :  { %v1830_v23 = vadd.f32 %v8404_v58, %v1829_v60  ;;  %v450_v60 = vld [vmem:[#allocation2 + $0x80] sm:$0xff] }
 0x16d   :  { %v1749_v45 = vpop.f32.mrf.mxu0 }
 0x16e   :  { %v1750_v30 = vadd.f32 %v8404_v58, %v1749_v45  ;;  %v8770_v62 = vadd.f32 %v1998_v13, %v1830_v23  ;;  %2561 = vmatmul.bf16.gmra.mxu1 %v8776_v54  ;;  %v848_v45 = vpack.c.bf16 %v510_v6, %v509_v3  ;;  %v865_v23 = vpack.c.bf16 %v450_v60, %v449_v39 }
 0x170   :  { %12858 = vst [vmem:[#allocation20_spill] sm:$0xff] %v8770_v62  ;;  %v8774_v56 = vadd.f32 %v1918_v34, %v1750_v30  ;;  %2049 = vmatmul.bf16.gmra.mxu2 %v840_v32  ;;  %v7965_v32 = vld [vmem:[%s12680_s1 + $0x1b0] sm:$0xff]  ;;  %2228 = vmatmul.bf16.gmra.mxu3 %v865_v23  ;;  %v8786_v30 = vpop.f32.mrf.mxu1  ;;  %v2011_v3 = vpop.f32.mrf.mxu3 }
 0x171   :  { %2708 = vmatpush.bf16.msra.mxu2 %v7965_v32  ;;  %v511_v32 = vld [vmem:[#allocation2 + $0x61] sm:$0xff] }
 0x173   :  { %v1832_v36 = vpop.f32.mrf.mxu2 }
 0x174   :  { %v1833_v13 = vadd.f32 %v8404_v58, %v1832_v36 }
 0x175   :  { %v1752_v62 = vpop.f32.mrf.mxu0 }
 0x176   :  { %v1753_v40 = vadd.f32 %v8404_v58, %v1752_v62  ;;  %v8781_v34 = vadd.f32 %v2001_v38, %v1833_v13  ;;  %v577_v13 = vld [vmem:[#allocation2 + $0x7a] sm:$0xff] }
 0x178   :  { %12859 = vst [vmem:[#allocation21_spill] sm:$0xff] %v8781_v34  ;;  %v8788_v14 = vadd.f32 %v1921_v48, %v1753_v40  ;;  %2387 = vmatmul.bf16.gmra.mxu0 %v848_v45  ;;  %v1933_v60 = vpop.f32.mrf.mxu1  ;;  %v578_v48 = vld [vmem:[#allocation2 + $0x82] sm:$0xff]  ;;  %v7981_v45 = vld [vmem:[%s12680_s1 + $0x230] sm:$0xff] }
 0x179   :  { %v867_v23 = vpack.c.bf16 %v578_v48, %v577_v13  ;;  %3046 = vmatpush.bf16.msra.mxu0 %v7981_v45 }
 0x17b   :  { %v1834_v62 = vpop.f32.mrf.mxu2 }
 0x17c   :  { %v1835_v38 = vadd.f32 %v8404_v58, %v1834_v62  ;;  %v2013_v62 = vpop.f32.mrf.mxu3 }
 0x17d   :  { %v1754_v6 = vpop.f32.mrf.mxu0 }
 0x17e   :  { %v1755_v36 = vadd.f32 %v8404_v58, %v1754_v6  ;;  %v8795_v39 = vadd.f32 %v2003_v63, %v1835_v38  ;;  %2566 = vmatmul.bf16.gmra.mxu1 %v867_v23  ;;  %v451_v63 = vld [vmem:[#allocation2 + $0x90] sm:$0xff]  ;;  %v452_v38 = vld [vmem:[#allocation2 + $0x98] sm:$0xff] }
 0x17f   :  { %v874_v46 = vpack.c.bf16 %v452_v38, %v451_v63  ;;  %v579_v63 = vld [vmem:[#allocation2 + $0x92] sm:$0xff]  ;;  %v580_v38 = vld [vmem:[#allocation2 + $0x9a] sm:$0xff] }
 0x180   :  { %12860 = vst [vmem:[#allocation22_spill] sm:$0xff] %v8795_v39  ;;  %v8798_v40 = vadd.f32 %v8755_v7, %v1755_v36  ;;  %2054 = vmatmul.bf16.gmra.mxu2 %v849_v16  ;;  %v857_v39 = vpack.c.bf16 %v512_v22, %v511_v32  ;;  %v1936_v9 = vpop.f32.mrf.mxu1 }
 0x181   :  { %2233 = vmatmul.bf16.gmra.mxu3 %v874_v46  ;;  %v876_v46 = vpack.c.bf16 %v580_v38, %v579_v63 }
 0x183   :  { %v1837_v6 = vpop.f32.mrf.mxu2 }
 0x184   :  { %v1838_v34 = vadd.f32 %v8404_v58, %v1837_v6  ;;  %v2016_v48 = vpop.f32.mrf.mxu3 }
 0x185   :  { %v1757_v7 = vpop.f32.mrf.mxu0 }
 0x186   :  { %v1758_v16 = vadd.f32 %v8404_v58, %v1757_v7  ;;  %v8805_v36 = vadd.f32 %v2006_v42, %v1838_v34  ;;  %v514_v34 = vld [vmem:[#allocation2 + $0x81] sm:$0xff] }
 0x188   :  { %12861 = vst [vmem:[#allocation23_spill] sm:$0xff] %v8805_v36  ;;  %v8808_v13 = vadd.f32 %v8764_v19, %v1758_v16  ;;  %2392 = vmatmul.bf16.gmra.mxu0 %v857_v39  ;;  %v1938_v6 = vpop.f32.mrf.mxu1  ;;  %v513_v19 = vld [vmem:[#allocation2 + $0x79] sm:$0xff]  ;;  %v453_v16 = vld [vmem:[#allocation2 + $0xa8] sm:$0xff] }
 0x189   :  { %v866_v36 = vpack.c.bf16 %v514_v34, %v513_v19 }
 0x18b   :  { %v1839_v45 = vpop.f32.mrf.mxu2 }
 0x18c   :  { %v1840_v57 = vadd.f32 %v8404_v58, %v1839_v45  ;;  %v2018_v39 = vpop.f32.mrf.mxu3  ;;  %v454_v45 = vld [vmem:[#allocation2 + $0xb0] sm:$0xff] }
 0x18d   :  { %v1759_v21 = vpop.f32.mrf.mxu0 }
 0x18e   :  { %v1760_v32 = vadd.f32 %v8404_v58, %v1759_v21  ;;  %v8812_v22 = vadd.f32 %v2008_v26, %v1840_v57  ;;  %2571 = vmatmul.bf16.gmra.mxu1 %v876_v46  ;;  %v883_v57 = vpack.c.bf16 %v454_v45, %v453_v16  ;;  %v582_v16 = vld [vmem:[#allocation2 + $0xb2] sm:$0xff] }
 0x190   :  { %12862 = vst [vmem:[#allocation24_spill] sm:$0xff] %v8812_v22  ;;  %v8815_v42 = vadd.f32 %v8772_v11, %v1760_v32  ;;  %2059 = vmatmul.bf16.gmra.mxu2 %v8776_v54 }
 0x191   :  { %2238 = vmatmul.bf16.gmra.mxu3 %v883_v57 }
 0x193   :  { %v1842_v7 = vpop.f32.mrf.mxu2 }
 0x194   :  { %v1843_v21 = vadd.f32 %v8404_v58, %v1842_v7  ;;  %v2021_v32 = vpop.f32.mrf.mxu3  ;;  %v581_v7 = vld [vmem:[#allocation2 + $0xaa] sm:$0xff] }
 0x195   :  { %v1762_v26 = vpop.f32.mrf.mxu0  ;;  %v1941_v54 = vpop.f32.mrf.mxu1 }
 0x196   :  { %v1763_v22 = vadd.f32 %v8404_v58, %v1762_v26  ;;  %v8820_v15 = vadd.f32 %v2011_v3, %v1843_v21  ;;  %v8831_v3 = vpack.c.bf16 %v582_v16, %v581_v7  ;;  %v455_v26 = vld [vmem:[#allocation2 + $0xc0] sm:$0xff] }
 0x198   :  { %12863 = vst [vmem:[#allocation25_spill] sm:$0xff] %v8820_v15  ;;  %v8823_v11 = vadd.f32 %v8786_v30, %v1763_v22  ;;  %2397 = vmatmul.bf16.gmra.mxu0 %v866_v36  ;;  %v515_v30 = vld [vmem:[#allocation2 + $0x91] sm:$0xff]  ;;  %v516_v22 = vld [vmem:[#allocation2 + $0x99] sm:$0xff] }
 0x199   :  { %v875_v15 = vpack.c.bf16 %v516_v22, %v515_v30 }
 0x19b   :  { %v1844_v63 = vpop.f32.mrf.mxu2 }
 0x19c   :  { %v1845_v38 = vadd.f32 %v8404_v58, %v1844_v63  ;;  %v2023_v36 = vpop.f32.mrf.mxu3  ;;  %v456_v63 = vld [vmem:[#allocation2 + $0xc8] sm:$0xff] }
 0x19d   :  { %v1764_v47 = vpop.f32.mrf.mxu0  ;;  %v1943_v57 = vpop.f32.mrf.mxu1 }
 0x19e   :  { %v1765_v19 = vadd.f32 %v8404_v58, %v1764_v47  ;;  %v8827_v34 = vadd.f32 %v2013_v62, %v1845_v38  ;;  %2576 = vmatmul.bf16.gmra.mxu1 %v8831_v3  ;;  %v8837_v58 = vld [vmem:[%s12682_s2] ss:$0 sm:$0xff] }
 0x1a0   :  { %12864 = vst [vmem:[#allocation26_spill] sm:$0xff] %v8827_v34  ;;  %v8829_v45 = vadd.f32 %v1933_v60, %v1765_v19  ;;  %2064 = vmatmul.bf16.gmra.mxu2 %v867_v23  ;;  %v892_v60 = vpack.c.bf16 %v456_v63, %v455_v26  ;;  %v584_v26 = vld [vmem:[#allocation2 + $0xca] sm:$0xff] }
 0x1a2   :  { %2243 = vmatmul.bf16.gmra.mxu3 %v892_v60 }
 0x1a3   :  { %v1847_v21 = vpop.f32.mrf.mxu2 }
 0x1a4   :  { %v1848_v47 = vadd.f32 %v8837_v58, %v1847_v21  ;;  %v2026_v7 = vpop.f32.mrf.mxu3  ;;  %v583_v21 = vld [vmem:[#allocation2 + $0xc2] sm:$0xff] }
 0x1a5   :  { %v1767_v23 = vpop.f32.mrf.mxu0  ;;  %v1946_v34 = vpop.f32.mrf.mxu1 }
 0x1a6   :  { %v1768_v62 = vadd.f32 %v8837_v58, %v1767_v23  ;;  %v8841_v38 = vadd.f32 %v2016_v48, %v1848_v47  ;;  %v8851_v48 = vpack.c.bf16 %v584_v26, %v583_v21  ;;  %v518_v47 = vld [vmem:[#allocation2 + $0xb1] sm:$0xff] }
 0x1a7   :  { %v457_v23 = vld [vmem:[#allocation2 + $0xd8] sm:$0xff] }
 0x1a8   :  { %12865 = vst [vmem:[#allocation27_spill] sm:$0xff] %v8841_v38  ;;  %v8843_v19 = vadd.f32 %v1936_v9, %v1768_v62  ;;  %2402 = vmatmul.bf16.gmra.mxu0 %v875_v15  ;;  %v517_v9 = vld [vmem:[#allocation2 + $0xa9] sm:$0xff]  ;;  %v458_v62 = vld [vmem:[#allocation2 + $0xe0] sm:$0xff] }
 0x1a9   :  { %v459_v38 = vld [vmem:[#allocation2 + $0xf0] sm:$0xff] }
 0x1ab   :  { %v1849_v16 = vpop.f32.mrf.mxu2 }
 0x1ac   :  { %v1850_v30 = vadd.f32 %v8837_v58, %v1849_v16  ;;  %v2028_v15 = vpop.f32.mrf.mxu3  ;;  %v884_v16 = vpack.c.bf16 %v518_v47, %v517_v9  ;;  %v7972_v9 = vld [vmem:[%s12680_s1 + $0x1e8] sm:$0xff] }
 0x1ad   :  { %v1769_v22 = vpop.f32.mrf.mxu0  ;;  %v1948_v21 = vpop.f32.mrf.mxu1  ;;  %2878 = vmatpush.bf16.msra.mxu3 %v7972_v9  ;;  %v519_v9 = vld [vmem:[#allocation2 + $0xc1] sm:$0xff] }
 0x1ae   :  { %v1770_v24 = vadd.f32 %v8837_v58, %v1769_v22  ;;  %v8847_v5 = vadd.f32 %v2018_v39, %v1850_v30  ;;  %2581 = vmatmul.bf16.gmra.mxu1 %v8851_v48  ;;  %v901_v39 = vpack.c.bf16 %v458_v62, %v457_v23 }
 0x1b0   :  { %12866 = vst [vmem:[#allocation28_spill] sm:$0xff] %v8847_v5  ;;  %v8849_v63 = vadd.f32 %v1938_v6, %v1770_v24  ;;  %2069 = vmatmul.bf16.gmra.mxu2 %v876_v46  ;;  %v7964_v24 = vld [vmem:[%s12680_s1 + $0x1a8] sm:$0xff] }
 0x1b1   :  { %2709 = vmatpush.bf16.msra.mxu2 %v7964_v24 }
 0x1b2   :  { %2248 = vmatmul.bf16.gmra.mxu3 %v901_v39 }
 0x1b3   :  { %v1852_v60 = vpop.f32.mrf.mxu2 }
 0x1b4   :  { %v1853_v22 = vadd.f32 %v8837_v58, %v1852_v60  ;;  %v2209_v47 = vpop.f32.mrf.mxu3 }
 0x1b5   :  { %v1772_v30 = vpop.f32.mrf.mxu0 }
 0x1b6   :  { %v1773_v6 = vadd.f32 %v8837_v58, %v1772_v30  ;;  %v8859_v46 = vadd.f32 %v2021_v32, %v1853_v22  ;;  %v7980_v32 = vld [vmem:[%s12680_s1 + $0x228] sm:$0xff] }
 0x1b7   :  { %3047 = vmatpush.bf16.msra.mxu0 %v7980_v32 }
 0x1b8   :  { %12867 = vst [vmem:[#allocation29_spill] sm:$0xff] %v8859_v46  ;;  %v8861_v26 = vadd.f32 %v1941_v54, %v1773_v6  ;;  %2407 = vmatmul.bf16.gmra.mxu0 %v884_v16  ;;  %v585_v54 = vld [vmem:[#allocation2 + $0xda] sm:$0xff]  ;;  %v586_v16 = vld [vmem:[#allocation2 + $0xe2] sm:$0xff] }
 0x1b9   :  { %v903_v24 = vpack.c.bf16 %v586_v16, %v585_v54 }
 0x1bb   :  { %v1854_v60 = vpop.f32.mrf.mxu2  ;;  %v2547_v30 = vpop.f32.mrf.mxu1 }
 0x1bc   :  { %v1855_v23 = vadd.f32 %v8837_v58, %v1854_v60  ;;  %v520_v60 = vld [vmem:[#allocation2 + $0xc9] sm:$0xff]  ;;  %v2211_v46 = vpop.f32.mrf.mxu3 }
 0x1bd   :  { %v1774_v62 = vpop.f32.mrf.mxu0  ;;  %v893_v25 = vpack.c.bf16 %v520_v60, %v519_v9 }
 0x1be   :  { %v1775_v22 = vadd.f32 %v8837_v58, %v1774_v62  ;;  %v8871_v39 = vadd.f32 %v2023_v36, %v1855_v23  ;;  %2586 = vmatmul.bf16.gmra.mxu1 %v903_v24  ;;  %v910_v23 = vpack.c.bf16 %v460_v43, %v459_v38  ;;  %v587_v43 = vld [vmem:[#allocation2 + $0xf2] sm:$0xff] }
 0x1c0   :  { %12868 = vst [vmem:[#allocation30_spill] sm:$0xff] %v8871_v39  ;;  %v8873_v6 = vadd.f32 %v1943_v57, %v1775_v22  ;;  %2074 = vmatmul.bf16.gmra.mxu2 %v8831_v3 }
 0x1c2   :  { %2253 = vmatmul.bf16.gmra.mxu3 %v910_v23  ;;  %v461_v23 = vld [vmem:[#allocation2 + $0x108] sm:$0xff] }
 0x1c3   :  { %v1857_v5 = vpop.f32.mrf.mxu2  ;;  %v2549_v57 = vpop.f32.mrf.mxu1 }
 0x1c4   :  { %v1858_v36 = vadd.f32 %v8837_v58, %v1857_v5  ;;  %v2214_v3 = vpop.f32.mrf.mxu3  ;;  %v588_v5 = vld [vmem:[#allocation2 + $0xfa] sm:$0xff] }
 0x1c5   :  { %v1777_v62 = vpop.f32.mrf.mxu0 }
 0x1c6   :  { %v1778_v39 = vadd.f32 %v8837_v58, %v1777_v62  ;;  %v8878_v32 = vadd.f32 %v2026_v7, %v1858_v36  ;;  %v912_v62 = vpack.c.bf16 %v588_v5, %v587_v43 }
 0x1c8   :  { %12869 = vst [vmem:[#allocation31_spill] sm:$0xff] %v8878_v32  ;;  %v8880_v22 = vadd.f32 %v1946_v34, %v1778_v39  ;;  %2412 = vmatmul.bf16.gmra.mxu0 %v893_v25  ;;  %v521_v34 = vld [vmem:[#allocation2 + $0xd9] sm:$0xff]  ;;  %v522_v39 = vld [vmem:[#allocation2 + $0xe1] sm:$0xff] }
 0x1c9   :  { %v902_v32 = vpack.c.bf16 %v522_v39, %v521_v34  ;;  %v8893_v39 = vpack.c.bf16 %v590_v0, %v589_v18 }
 0x1cb   :  { %v1859_v54 = vpop.f32.mrf.mxu2  ;;  %v2552_v38 = vpop.f32.mrf.mxu1 }
 0x1cc   :  { %v1860_v16 = vadd.f32 %v8837_v58, %v1859_v54  ;;  %v2216_v25 = vpop.f32.mrf.mxu3  ;;  %v462_v54 = vld [vmem:[#allocation2 + $0x110] sm:$0xff] }
 0x1cd   :  { %v1779_v51 = vpop.f32.mrf.mxu0 }
 0x1ce   :  { %v1780_v9 = vadd.f32 %v8837_v58, %v1779_v51  ;;  %v8884_v60 = vadd.f32 %v2028_v15, %v1860_v16  ;;  %2591 = vmatmul.bf16.gmra.mxu1 %v912_v62  ;;  %v919_v58 = vpack.c.bf16 %v462_v54, %v461_v23  ;;  %v463_v54 = vld [vmem:[#allocation2 + $0x120] sm:$0xff] }
 0x1d0   :  { %12870 = vst [vmem:[#allocation32_spill] sm:$0xff] %v8884_v60  ;;  %v8886_v7 = vadd.f32 %v1948_v21, %v1780_v9  ;;  %2079 = vmatmul.bf16.gmra.mxu2 %v8851_v48 }
 0x1d2   :  { %2258 = vmatmul.bf16.gmra.mxu3 %v919_v58 }
 0x1d3   :  { %v2040_v36 = vpop.f32.mrf.mxu2  ;;  %v2554_v60 = vpop.f32.mrf.mxu1 }
 0x1d4   :  { %v2041_v51 = vadd.f32 %v2040_v36, %v8456_v37  ;;  %v2219_v48 = vpop.f32.mrf.mxu3  ;;  %v524_v36 = vld [vmem:[#allocation2 + $0xf9] sm:$0xff] }
 0x1d5   :  { %v2378_v15 = vpop.f32.mrf.mxu0 }
 0x1d6   :  { %v2210_v16 = vadd.f32 %v2209_v47, %v2041_v51  ;;  %v523_v47 = vld [vmem:[#allocation2 + $0xf1] sm:$0xff]  ;;  %v464_v51 = vld [vmem:[#allocation2 + $0x128] sm:$0xff] }
 0x1d7   :  { %v928_v58 = vpack.c.bf16 %v464_v51, %v463_v54 }
 0x1d8   :  { %2417 = vmatmul.bf16.gmra.mxu0 %v902_v32  ;;  %v2379_v21 = vadd.f32 %v2378_v15, %v2210_v16 }
 0x1da   :  { %v8890_v9 = vadd.f32 %v2547_v30, %v2379_v21 }
 0x1db   :  { %v2042_v43 = vpop.f32.mrf.mxu2  ;;  %v2557_v34 = vpop.f32.mrf.mxu1 }
 0x1dc   :  { %v2043_v5 = vadd.f32 %v2042_v43, %v8480_v52  ;;  %v2221_v32 = vpop.f32.mrf.mxu3  ;;  %v911_v52 = vpack.c.bf16 %v524_v36, %v523_v47 }
 0x1dd   :  { %v2380_v50 = vpop.f32.mrf.mxu0 }
 0x1de   :  { %v2212_v31 = vadd.f32 %v2211_v46, %v2043_v5  ;;  %2596 = vmatmul.bf16.gmra.mxu1 %v8893_v39  ;;  %v591_v5 = vld [vmem:[#allocation2 + $0x122] sm:$0xff] }
 0x1e0   :  { %2084 = vmatmul.bf16.gmra.mxu2 %v903_v24  ;;  %v2381_v37 = vadd.f32 %v2380_v50, %v2212_v31 }
 0x1e2   :  { %v8895_v23 = vadd.f32 %v2549_v57, %v2381_v37  ;;  %2263 = vmatmul.bf16.gmra.mxu3 %v928_v58  ;;  %v592_v37 = vld [vmem:[#allocation2 + $0x12a] sm:$0xff] }
 0x1e3   :  { %v2045_v30 = vpop.f32.mrf.mxu2  ;;  %v2559_v0 = vpop.f32.mrf.mxu1  ;;  %v8902_v36 = vpack.c.bf16 %v592_v37, %v591_v5 }
 0x1e4   :  { %v2046_v46 = vadd.f32 %v2045_v30, %v8494_v2  ;;  %v2224_v50 = vpop.f32.mrf.mxu3  ;;  %v526_v30 = vld [vmem:[#allocation2 + $0x111] sm:$0xff] }
 0x1e5   :  { %v2383_v15 = vpop.f32.mrf.mxu0 }
 0x1e6   :  { %v2215_v16 = vadd.f32 %v2214_v3, %v2046_v46  ;;  %v525_v3 = vld [vmem:[#allocation2 + $0x109] sm:$0xff]  ;;  %v466_v46 = vld [vmem:[#allocation2 + $0x140] sm:$0xff] }
 0x1e8   :  { %2422 = vmatmul.bf16.gmra.mxu0 %v911_v52  ;;  %v2384_v18 = vadd.f32 %v2383_v15, %v2215_v16  ;;  %v465_v52 = vld [vmem:[#allocation2 + $0x138] sm:$0xff] }
 0x1e9   :  { %v937_v58 = vpack.c.bf16 %v466_v46, %v465_v52  ;;  %v527_v52 = vld [vmem:[#allocation2 + $0x121] sm:$0xff]  ;;  %v528_v46 = vld [vmem:[#allocation2 + $0x129] sm:$0xff] }
 0x1ea   :  { %v8899_v31 = vadd.f32 %v2552_v38, %v2384_v18 }
 0x1eb   :  { %v2047_v24 = vpop.f32.mrf.mxu2  ;;  %v2562_v47 = vpop.f32.mrf.mxu1 }
 0x1ec   :  { %v2048_v57 = vadd.f32 %v2047_v24, %v8518_v20  ;;  %v2226_v51 = vpop.f32.mrf.mxu3  ;;  %v920_v20 = vpack.c.bf16 %v526_v30, %v525_v3  ;;  %v7971_v24 = vld [vmem:[%s12680_s1 + $0x1e0] sm:$0xff] }
 0x1ed   :  { %v2385_v21 = vpop.f32.mrf.mxu0  ;;  %2879 = vmatpush.bf16.msra.mxu3 %v7971_v24  ;;  %v594_v3 = vld [vmem:[#allocation2 + $0x142] sm:$0xff] }
 0x1ee   :  { %v2217_v43 = vadd.f32 %v2216_v25, %v2048_v57  ;;  %2601 = vmatmul.bf16.gmra.mxu1 %v8902_v36 }
 0x1f0   :  { %2089 = vmatmul.bf16.gmra.mxu2 %v912_v62  ;;  %v2386_v2 = vadd.f32 %v2385_v21, %v2217_v43  ;;  %v7963_v62 = vld [vmem:[%s12680_s1 + $0x1a0] sm:$0xff] }
 0x1f1   :  { %2710 = vmatpush.bf16.msra.mxu2 %v7963_v62 }
 0x1f2   :  { %v8904_v54 = vadd.f32 %v2554_v60, %v2386_v2  ;;  %2268 = vmatmul.bf16.gmra.mxu3 %v937_v58  ;;  %v593_v2 = vld [vmem:[#allocation2 + $0x13a] sm:$0xff]  ;;  %v467_v58 = vld [vmem:[#allocation2 + $0x150] sm:$0xff] }
 0x1f3   :  { %v2050_v38 = vpop.f32.mrf.mxu2  ;;  %v2564_v60 = vpop.f32.mrf.mxu1 }
 0x1f4   :  { %v2051_v25 = vadd.f32 %v2050_v38, %v8533_v33  ;;  %v2229_v33 = vpop.f32.mrf.mxu3  ;;  %v8920_v38 = vpack.c.bf16 %v594_v3, %v593_v2  ;;  %v595_v3 = vld [vmem:[#allocation2 + $0x152] sm:$0xff] }
 0x1f5   :  { %v2388_v15 = vpop.f32.mrf.mxu0 }
 0x1f6   :  { %v2220_v16 = vadd.f32 %v2219_v48, %v2051_v25  ;;  %v7979_v48 = vld [vmem:[%s12680_s1 + $0x220] sm:$0xff] }
 0x1f7   :  { %3048 = vmatpush.bf16.msra.mxu0 %v7979_v48 }
 0x1f8   :  { %2427 = vmatmul.bf16.gmra.mxu0 %v920_v20  ;;  %v2389_v18 = vadd.f32 %v2388_v15, %v2220_v16  ;;  %v468_v15 = vld [vmem:[#allocation2 + $0x158] sm:$0xff] }
 0x1f9   :  { %v946_v16 = vpack.c.bf16 %v468_v15, %v467_v58 }
 0x1fa   :  { %v8914_v57 = vadd.f32 %v2557_v34, %v2389_v18 }
 0x1fb   :  { %v2052_v21 = vpop.f32.mrf.mxu2  ;;  %v2567_v30 = vpop.f32.mrf.mxu1 }
 0x1fc   :  { %v2053_v43 = vadd.f32 %v2052_v21, %v8560_v55  ;;  %v2231_v55 = vpop.f32.mrf.mxu3 }
 0x1fd   :  { %v2390_v5 = vpop.f32.mrf.mxu0 }
 0x1fe   :  { %v2222_v37 = vadd.f32 %v2221_v32, %v2053_v43  ;;  %2606 = vmatmul.bf16.gmra.mxu1 %v8920_v38  ;;  %v929_v32 = vpack.c.bf16 %v528_v46, %v527_v52 }
 0x200   :  { %2094 = vmatmul.bf16.gmra.mxu2 %v8893_v39  ;;  %v2391_v34 = vadd.f32 %v2390_v5, %v2222_v37 }
 0x202   :  { %v8923_v20 = vadd.f32 %v2559_v0, %v2391_v34  ;;  %2273 = vmatmul.bf16.gmra.mxu3 %v946_v16  ;;  %v596_v34 = vld [vmem:[#allocation2 + $0x15a] sm:$0xff] }
 0x203   :  { %v2055_v25 = vpop.f32.mrf.mxu2  ;;  %v2569_v21 = vpop.f32.mrf.mxu1  ;;  %v8930_v46 = vpack.c.bf16 %v596_v34, %v595_v3  ;;  %v597_v3 = vld [vmem:[#allocation2 + $0x16a] sm:$0xff]  ;;  %v598_v34 = vld [vmem:[#allocation2 + $0x172] sm:$0xff] }
 0x204   :  { %v2056_v62 = vadd.f32 %v2055_v25, %v8575_v8  ;;  %v2234_v0 = vpop.f32.mrf.mxu3  ;;  %v530_v25 = vld [vmem:[#allocation2 + $0x141] sm:$0xff] }
 0x205   :  { %v2393_v18 = vpop.f32.mrf.mxu0 }
 0x206   :  { %v2225_v24 = vadd.f32 %v2224_v50, %v2056_v62  ;;  %v529_v50 = vld [vmem:[#allocation2 + $0x139] sm:$0xff] }
 0x207   :  { %v938_v62 = vpack.c.bf16 %v530_v25, %v529_v50  ;;  %v8952_v50 = vpack.c.bf16 %v598_v34, %v597_v3 }
 0x208   :  { %2432 = vmatmul.bf16.gmra.mxu0 %v929_v32  ;;  %v2394_v39 = vadd.f32 %v2393_v18, %v2225_v24  ;;  %v469_v32 = vld [vmem:[#allocation2 + $0x168] sm:$0xff] }
 0x20a   :  { %v8927_v43 = vadd.f32 %v2562_v47, %v2394_v39 }
 0x20b   :  { %v2057_v5 = vpop.f32.mrf.mxu2  ;;  %v2572_v52 = vpop.f32.mrf.mxu1 }
 0x20c   :  { %v2058_v48 = vadd.f32 %v2057_v5, %v8599_v29  ;;  %v2236_v47 = vpop.f32.mrf.mxu3  ;;  %v470_v29 = vld [vmem:[#allocation2 + $0x170] sm:$0xff] }
 0x20d   :  { %v2395_v37 = vpop.f32.mrf.mxu0  ;;  %v955_v16 = vpack.c.bf16 %v470_v29, %v469_v32  ;;  %v532_v32 = vld [vmem:[#allocation2 + $0x159] sm:$0xff] }
 0x20e   :  { %v2227_v2 = vadd.f32 %v2226_v51, %v2058_v48  ;;  %2611 = vmatmul.bf16.gmra.mxu1 %v8930_v46 }
 0x210   :  { %2099 = vmatmul.bf16.gmra.mxu2 %v8902_v36  ;;  %v2396_v8 = vadd.f32 %v2395_v37, %v2227_v2  ;;  %v8942_v37 = vld [vmem:[%s12681_s0 + $0xf0] sm:$0xff] }
 0x211   :  { %212 = vst [vmem:[#allocation2 + $0x181] sm:$0xff] %v8942_v37 }
 0x212   :  { %v8933_v58 = vadd.f32 %v2564_v60, %v2396_v8  ;;  %2278 = vmatmul.bf16.gmra.mxu3 %v955_v16 }
 0x213   :  { %v2060_v15 = vpop.f32.mrf.mxu2  ;;  %v2574_v39 = vpop.f32.mrf.mxu1 }
 0x214   :  { %v2061_v51 = vadd.f32 %v2060_v15, %v8614_v44  ;;  %v2239_v60 = vpop.f32.mrf.mxu3  ;;  %v8947_v44 = vld [vmem:[%s12681_s0 + $0xf8] sm:$0xff] }
 0x215   :  { %v2398_v18 = vpop.f32.mrf.mxu0  ;;  %213 = vst [vmem:[#allocation2 + $0x189] sm:$0xff] %v8947_v44  ;;  %v531_v15 = vld [vmem:[#allocation2 + $0x151] sm:$0xff] }
 0x216   :  { %v2230_v24 = vadd.f32 %v2229_v33, %v2061_v51  ;;  %v947_v16 = vpack.c.bf16 %v532_v32, %v531_v15 }
 0x218   :  { %2437 = vmatmul.bf16.gmra.mxu0 %v938_v62  ;;  %v2399_v36 = vadd.f32 %v2398_v18, %v2230_v24  ;;  %v471_v51 = vld [vmem:[#allocation2 + $0x180] sm:$0xff] }
 0x21a   :  { %v8937_v5 = vadd.f32 %v2567_v30, %v2399_v36 }
 0x21b   :  { %v2062_v48 = vpop.f32.mrf.mxu2  ;;  %v2577_v8 = vpop.f32.mrf.mxu1 }
 0x21c   :  { %v2063_v33 = vadd.f32 %v2062_v48, %v8641_v10  ;;  %v2241_v62 = vpop.f32.mrf.mxu3  ;;  %v472_v18 = vld [vmem:[#allocation2 + $0x188] sm:$0xff] }
 0x21d   :  { %v2400_v2 = vpop.f32.mrf.mxu0  ;;  %v964_v36 = vpack.c.bf16 %v472_v18, %v471_v51  ;;  %v600_v15 = vld [vmem:[#allocation2 + $0x18a] sm:$0xff] }
 0x21e   :  { %v2232_v30 = vadd.f32 %v2231_v55, %v2063_v33  ;;  %2616 = vmatmul.bf16.gmra.mxu1 %v8952_v50  ;;  %v534_v51 = vld [vmem:[#allocation2 + $0x171] sm:$0xff]  ;;  %v473_v18 = vld [vmem:[#allocation2 + $0x1c8] sm:$0xff] }
 0x220   :  { %2104 = vmatmul.bf16.gmra.mxu2 %v8920_v38  ;;  %v2401_v25 = vadd.f32 %v2400_v2, %v2232_v30 }
 0x222   :  { %v8955_v29 = vadd.f32 %v2569_v21, %v2401_v25  ;;  %2283 = vmatmul.bf16.gmra.mxu3 %v964_v36  ;;  %v474_v36 = vld [vmem:[#allocation2 + $0x1d0] sm:$0xff] }
 0x223   :  { %v2065_v10 = vpop.f32.mrf.mxu2  ;;  %v2579_v33 = vpop.f32.mrf.mxu1 }
 0x224   :  { %12871 = vst [vmem:[#allocation33_spill] sm:$0xff] %v8955_v29  ;;  %v2066_v55 = vadd.f32 %v2065_v10, %v8662_v27  ;;  %v599_v29 = vld [vmem:[#allocation2 + $0x182] sm:$0xff] }
 0x225   :  { %v2403_v24 = vpop.f32.mrf.mxu0  ;;  %v2244_v21 = vpop.f32.mrf.mxu3  ;;  %v966_v27 = vpack.c.bf16 %v600_v15, %v599_v29  ;;  %v7962_v29 = vld [vmem:[%s12680_s1 + $0x198] sm:$0xff] }
 0x226   :  { %v2235_v48 = vadd.f32 %v2234_v0, %v2066_v55  ;;  %v533_v0 = vld [vmem:[#allocation2 + $0x169] sm:$0xff]  ;;  %2711 = vmatpush.bf16.msra.mxu2 %v7962_v29 }
 0x228   :  { %2442 = vmatmul.bf16.gmra.mxu0 %v947_v16  ;;  %v2404_v38 = vadd.f32 %v2403_v24, %v2235_v48  ;;  %v956_v24 = vpack.c.bf16 %v534_v51, %v533_v0  ;;  %v973_v48 = vpack.c.bf16 %v474_v36, %v473_v18  ;;  %v602_v0 = vld [vmem:[#allocation2 + $0x1d2] sm:$0xff]  ;;  %v476_v36 = vld [vmem:[#allocation2 + $0x1e8] sm:$0xff] }
 0x22a   :  { %v8959_v2 = vadd.f32 %v2572_v52, %v2404_v38 }
 0x22b   :  { %v2067_v30 = vpop.f32.mrf.mxu2  ;;  %v2582_v32 = vpop.f32.mrf.mxu1 }
 0x22c   :  { %v2068_v3 = vadd.f32 %v2067_v30, %v8680_v49  ;;  %v7970_v30 = vld [vmem:[%s12680_s1 + $0x1d8] sm:$0xff] }
 0x22d   :  { %v2405_v34 = vpop.f32.mrf.mxu0  ;;  %v2246_v16 = vpop.f32.mrf.mxu3  ;;  %2880 = vmatpush.bf16.msra.mxu3 %v7970_v30  ;;  %v409_v30 = vld [vmem:[#allocation2 + $0x1b2] sm:$0xff] }
 0x22e   :  { %v2237_v25 = vadd.f32 %v2236_v47, %v2068_v3  ;;  %2621 = vmatmul.bf16.gmra.mxu1 %v966_v27 }
 0x230   :  { %2109 = vmatmul.bf16.gmra.mxu2 %v8930_v46  ;;  %v2406_v10 = vadd.f32 %v2405_v34, %v2237_v25 }
 0x232   :  { %v8963_v55 = vadd.f32 %v2574_v39, %v2406_v10  ;;  %2288 = vmatmul.bf16.gmra.mxu3 %v973_v48  ;;  %v601_v10 = vld [vmem:[#allocation2 + $0x1ca] sm:$0xff] }
 0x233   :  { %v2070_v52 = vpop.f32.mrf.mxu2  ;;  %v2584_v38 = vpop.f32.mrf.mxu1 }
 0x234   :  { %v2071_v49 = vadd.f32 %v2070_v52, %v8701_v53  ;;  %v975_v52 = vpack.c.bf16 %v602_v0, %v601_v10 }
 0x235   :  { %v2408_v47 = vpop.f32.mrf.mxu0  ;;  %v2249_v53 = vpop.f32.mrf.mxu3 }
 0x236   :  { %v2240_v46 = vadd.f32 %v2239_v60, %v2071_v49  ;;  %v7978_v60 = vld [vmem:[%s12680_s1 + $0x218] sm:$0xff] }
 0x237   :  { %3049 = vmatpush.bf16.msra.mxu0 %v7978_v60 }
 0x238   :  { %2447 = vmatmul.bf16.gmra.mxu0 %v956_v24  ;;  %v2409_v39 = vadd.f32 %v2408_v47, %v2240_v46  ;;  %v965_v47 = vpack.c.bf16 %v8947_v44, %v8942_v37  ;;  %v603_v44 = vld [vmem:[#allocation2 + $0x1e2] sm:$0xff] }
 0x23a   :  { %v8972_v3 = vadd.f32 %v2577_v8, %v2409_v39 }
 0x23b   :  { %v2072_v34 = vpop.f32.mrf.mxu2  ;;  %v2587_v51 = vpop.f32.mrf.mxu1 }
 0x23c   :  { %v2073_v25 = vadd.f32 %v2072_v34, %v8722_v35  ;;  %v475_v35 = vld [vmem:[#allocation2 + $0x1e0] sm:$0xff] }
 0x23d   :  { %v2410_v15 = vpop.f32.mrf.mxu0  ;;  %v2251_v24 = vpop.f32.mrf.mxu3  ;;  %v982_v48 = vpack.c.bf16 %v476_v36, %v475_v35  ;;  %v538_v35 = vld [vmem:[#allocation2 + $0x1d1] sm:$0xff] }
 0x23e   :  { %v2242_v27 = vadd.f32 %v2241_v62, %v2073_v25  ;;  %2626 = vmatmul.bf16.gmra.mxu1 %v975_v52 }
 0x240   :  { %2114 = vmatmul.bf16.gmra.mxu2 %v8952_v50  ;;  %v2411_v8 = vadd.f32 %v2410_v15, %v2242_v27 }
 0x242   :  { %v8979_v18 = vadd.f32 %v2579_v33, %v2411_v8  ;;  %2293 = vmatmul.bf16.gmra.mxu3 %v982_v48  ;;  %v410_v33 = vld [vmem:[#allocation2 + $0x1ba] sm:$0xff] }
 0x243   :  { %v2075_v49 = vpop.f32.mrf.mxu2  ;;  %v2589_v39 = vpop.f32.mrf.mxu1  ;;  %v972_v27 = vpack.c.bf16 %v410_v33, %v409_v30  ;;  %v478_v48 = vld [vmem:[#allocation2 + $0x200] sm:$0xff] }
 0x244   :  { %v2076_v62 = vadd.f32 %v2075_v49, %v8733_v1  ;;  %v604_v1 = vld [vmem:[#allocation2 + $0x1ea] sm:$0xff] }
 0x245   :  { %v2413_v29 = vpop.f32.mrf.mxu0  ;;  %v2254_v25 = vpop.f32.mrf.mxu3  ;;  %v984_v8 = vpack.c.bf16 %v604_v1, %v603_v44  ;;  %v537_v49 = vld [vmem:[#allocation2 + $0x1c9] sm:$0xff]  ;;  %v605_v44 = vld [vmem:[#allocation2 + $0x1fa] sm:$0xff] }
 0x246   :  { %v2245_v46 = vadd.f32 %v2244_v21, %v2076_v62  ;;  %v477_v62 = vld [vmem:[#allocation2 + $0x1f8] sm:$0xff]  ;;  %v606_v1 = vld [vmem:[#allocation2 + $0x202] sm:$0xff] }
 0x248   :  { %2452 = vmatmul.bf16.gmra.mxu0 %v965_v47  ;;  %v2414_v50 = vadd.f32 %v2413_v29, %v2245_v46  ;;  %v974_v29 = vpack.c.bf16 %v538_v35, %v537_v49  ;;  %v991_v46 = vpack.c.bf16 %v478_v48, %v477_v62  ;;  %v8993_v49 = vpack.c.bf16 %v606_v1, %v605_v44  ;;  %v540_v35 = vld [vmem:[#allocation2 + $0x1e9] sm:$0xff]  ;;  %v607_v44 = vld [vmem:[#allocation2 + $0x212] sm:$0xff]  ;;  %v608_v1 = vld [vmem:[#allocation2 + $0x21a] sm:$0xff] }
 0x249   :  { %v479_v48 = vld [vmem:[#allocation2 + $0x210] sm:$0xff] }
 0x24a   :  { %v8984_v34 = vadd.f32 %v2582_v32, %v2414_v50 }
 0x24b   :  { %v2077_v15 = vpop.f32.mrf.mxu2  ;;  %v2592_v0 = vpop.f32.mrf.mxu1 }
 0x24c   :  { %v2078_v60 = vadd.f32 %v2077_v15, %v8741_v28 }
 0x24d   :  { %v2415_v10 = vpop.f32.mrf.mxu0  ;;  %v2256_v47 = vpop.f32.mrf.mxu3 }
 0x24e   :  { %v2247_v37 = vadd.f32 %v2246_v16, %v2078_v60  ;;  %2631 = vmatmul.bf16.gmra.mxu1 %v984_v8 }
 0x250   :  { %2119 = vmatmul.bf16.gmra.mxu2 %v972_v27  ;;  %v2416_v21 = vadd.f32 %v2415_v10, %v2247_v37 }
 0x252   :  { %v8987_v36 = vadd.f32 %v2584_v38, %v2416_v21  ;;  %2298 = vmatmul.bf16.gmra.mxu3 %v991_v46 }
 0x253   :  { %v2080_v32 = vpop.f32.mrf.mxu2  ;;  %v2594_v30 = vpop.f32.mrf.mxu1 }
 0x254   :  { %v2081_v28 = vadd.f32 %v2080_v32, %v8749_v17 }
 0x255   :  { %v2418_v16 = vpop.f32.mrf.mxu0  ;;  %v2259_v60 = vpop.f32.mrf.mxu3 }
 0x256   :  { %v2250_v50 = vadd.f32 %v2249_v53, %v2081_v28  ;;  %v539_v53 = vld [vmem:[#allocation2 + $0x1e1] sm:$0xff] }
 0x258   :  { %2457 = vmatmul.bf16.gmra.mxu0 %v974_v29  ;;  %v2419_v33 = vadd.f32 %v2418_v16, %v2250_v50  ;;  %v480_v29 = vld [vmem:[#allocation2 + $0x218] sm:$0xff] }
 0x259   :  { %v1000_v28 = vpack.c.bf16 %v480_v29, %v479_v48  ;;  %v481_v29 = vld [vmem:[#allocation2 + $0x228] sm:$0xff] }
 0x25a   :  { %v8990_v15 = vadd.f32 %v2587_v51, %v2419_v33 }
 0x25b   :  { %v2082_v38 = vpop.f32.mrf.mxu2  ;;  %v2597_v21 = vpop.f32.mrf.mxu1 }
 0x25c   :  { %v2083_v27 = vadd.f32 %v2082_v38, %v8758_v61  ;;  %v983_v61 = vpack.c.bf16 %v540_v35, %v539_v53  ;;  %v9002_v53 = vpack.c.bf16 %v608_v1, %v607_v44  ;;  %v542_v35 = vld [vmem:[#allocation2 + $0x201] sm:$0xff]  ;;  %v609_v1 = vld [vmem:[#allocation2 + $0x22a] sm:$0xff] }
 0x25d   :  { %v2420_v10 = vpop.f32.mrf.mxu0  ;;  %v2261_v62 = vpop.f32.mrf.mxu3 }
 0x25e   :  { %v2252_v37 = vadd.f32 %v2251_v24, %v2083_v27  ;;  %2636 = vmatmul.bf16.gmra.mxu1 %v8993_v49 }
 0x260   :  { %2124 = vmatmul.bf16.gmra.mxu2 %v975_v52  ;;  %v2421_v17 = vadd.f32 %v2420_v10, %v2252_v37 }
 0x262   :  { %v8995_v32 = vadd.f32 %v2589_v39, %v2421_v17  ;;  %2303 = vmatmul.bf16.gmra.mxu3 %v1000_v28 }
 0x263   :  { %v2085_v51 = vpop.f32.mrf.mxu2  ;;  %v2599_v50 = vpop.f32.mrf.mxu1 }
 0x264   :  { %v2086_v24 = vadd.f32 %v2085_v51, %v8766_v59 }
 0x265   :  { %v2423_v46 = vpop.f32.mrf.mxu0  ;;  %v2264_v39 = vpop.f32.mrf.mxu3 }
 0x266   :  { %v2255_v16 = vadd.f32 %v2254_v25, %v2086_v24  ;;  %v541_v25 = vld [vmem:[#allocation2 + $0x1f9] sm:$0xff] }
 0x268   :  { %2462 = vmatmul.bf16.gmra.mxu0 %v983_v61  ;;  %v2424_v52 = vadd.f32 %v2423_v46, %v2255_v16  ;;  %v482_v61 = vld [vmem:[#allocation2 + $0x230] sm:$0xff] }
 0x269   :  { %v1009_v24 = vpack.c.bf16 %v482_v61, %v481_v29  ;;  %v544_v29 = vld [vmem:[#allocation2 + $0x219] sm:$0xff] }
 0x26a   :  { %v8999_v33 = vadd.f32 %v2592_v0, %v2424_v52  ;;  %v7969_v52 = vld [vmem:[%s12680_s1 + $0x1d0] sm:$0xff] }
 0x26b   :  { %v2087_v38 = vpop.f32.mrf.mxu2  ;;  %v2602_v17 = vpop.f32.mrf.mxu1  ;;  %2881 = vmatpush.bf16.msra.mxu3 %v7969_v52 }
 0x26c   :  { %v2088_v27 = vadd.f32 %v2087_v38, %v8774_v56  ;;  %v992_v56 = vpack.c.bf16 %v542_v35, %v541_v25 }
 0x26d   :  { %v2425_v10 = vpop.f32.mrf.mxu0  ;;  %v2266_v48 = vpop.f32.mrf.mxu3 }
 0x26e   :  { %v2257_v37 = vadd.f32 %v2256_v47, %v2088_v27  ;;  %2641 = vmatmul.bf16.gmra.mxu1 %v9002_v53 }
 0x270   :  { %2129 = vmatmul.bf16.gmra.mxu2 %v984_v8  ;;  %v2426_v59 = vadd.f32 %v2425_v10, %v2257_v37  ;;  %v7961_v8 = vld [vmem:[%s12680_s1 + $0x190] sm:$0xff] }
 0x271   :  { %2712 = vmatpush.bf16.msra.mxu2 %v7961_v8 }
 0x272   :  { %v9004_v51 = vadd.f32 %v2594_v30, %v2426_v59  ;;  %2308 = vmatmul.bf16.gmra.mxu3 %v1009_v24  ;;  %v610_v59 = vld [vmem:[#allocation2 + $0x232] sm:$0xff]  ;;  %v484_v24 = vld [vmem:[#allocation2 + $0x248] sm:$0xff] }
 0x273   :  { %v2090_v0 = vpop.f32.mrf.mxu2  ;;  %v2604_v30 = vpop.f32.mrf.mxu1  ;;  %v1011_v35 = vpack.c.bf16 %v610_v59, %v609_v1  ;;  %v611_v1 = vld [vmem:[#allocation2 + $0x242] sm:$0xff]  ;;  %v612_v59 = vld [vmem:[#allocation2 + $0x24a] sm:$0xff] }
 0x274   :  { %v2091_v47 = vadd.f32 %v2090_v0, %v8788_v14  ;;  %v543_v0 = vld [vmem:[#allocation2 + $0x211] sm:$0xff] }
 0x275   :  { %v2428_v28 = vpop.f32.mrf.mxu0  ;;  %v2269_v14 = vpop.f32.mrf.mxu3 }
 0x276   :  { %v2260_v46 = vadd.f32 %v2259_v60, %v2091_v47  ;;  %v7977_v60 = vld [vmem:[%s12680_s1 + $0x210] sm:$0xff]  ;;  %v483_v47 = vld [vmem:[#allocation2 + $0x240] sm:$0xff] }
 0x277   :  { %3050 = vmatpush.bf16.msra.mxu0 %v7977_v60  ;;  %v1018_v8 = vpack.c.bf16 %v484_v24, %v483_v47  ;;  %v485_v24 = vld [vmem:[#allocation2 + $0x258] sm:$0xff] }
 0x278   :  { %2467 = vmatmul.bf16.gmra.mxu0 %v992_v56  ;;  %v2429_v16 = vadd.f32 %v2428_v28, %v2260_v46  ;;  %v1001_v28 = vpack.c.bf16 %v544_v29, %v543_v0  ;;  %v1020_v0 = vpack.c.bf16 %v612_v59, %v611_v1  ;;  %v546_v29 = vld [vmem:[#allocation2 + $0x231] sm:$0xff]  ;;  %v613_v1 = vld [vmem:[#allocation2 + $0x25a] sm:$0xff]  ;;  %v614_v59 = vld [vmem:[#allocation2 + $0x262] sm:$0xff] }
 0x27a   :  { %v9014_v38 = vadd.f32 %v2597_v21, %v2429_v16 }
 0x27b   :  { %v2092_v27 = vpop.f32.mrf.mxu2  ;;  %v2607_v25 = vpop.f32.mrf.mxu1 }
 0x27c   :  { %v2093_v10 = vadd.f32 %v2092_v27, %v8798_v40 }
 0x27d   :  { %v2430_v37 = vpop.f32.mrf.mxu0  ;;  %v2271_v56 = vpop.f32.mrf.mxu3 }
 0x27e   :  { %v2262_v44 = vadd.f32 %v2261_v62, %v2093_v10  ;;  %2646 = vmatmul.bf16.gmra.mxu1 %v1011_v35 }
 0x280   :  { %2134 = vmatmul.bf16.gmra.mxu2 %v8993_v49  ;;  %v2431_v21 = vadd.f32 %v2430_v37, %v2262_v44 }
 0x282   :  { %v9021_v61 = vadd.f32 %v2599_v50, %v2431_v21  ;;  %2313 = vmatmul.bf16.gmra.mxu3 %v1018_v8 }
 0x283   :  { %v2095_v40 = vpop.f32.mrf.mxu2  ;;  %v2609_v52 = vpop.f32.mrf.mxu1 }
 0x284   :  { %v2096_v62 = vadd.f32 %v2095_v40, %v8808_v13 }
 0x285   :  { %v2433_v46 = vpop.f32.mrf.mxu0  ;;  %v2274_v10 = vpop.f32.mrf.mxu3 }
 0x286   :  { %v2265_v16 = vadd.f32 %v2264_v39, %v2096_v62  ;;  %v545_v39 = vld [vmem:[#allocation2 + $0x229] sm:$0xff] }
 0x287   :  { %v1010_v62 = vpack.c.bf16 %v546_v29, %v545_v39  ;;  %v9034_v39 = vpack.c.bf16 %v614_v59, %v613_v1  ;;  %v548_v29 = vld [vmem:[#allocation2 + $0x249] sm:$0xff]  ;;  %v615_v1 = vld [vmem:[#allocation2 + $0x272] sm:$0xff]  ;;  %v616_v59 = vld [vmem:[#allocation2 + $0x27a] sm:$0xff] }
 0x288   :  { %2472 = vmatmul.bf16.gmra.mxu0 %v1001_v28  ;;  %v2434_v49 = vadd.f32 %v2433_v46, %v2265_v16  ;;  %v486_v28 = vld [vmem:[#allocation2 + $0x260] sm:$0xff] }
 0x28a   :  { %v9024_v27 = vadd.f32 %v2602_v17, %v2434_v49 }
 0x28b   :  { %v2097_v50 = vpop.f32.mrf.mxu2  ;;  %v2612_v21 = vpop.f32.mrf.mxu1 }
 0x28c   :  { %v2098_v37 = vadd.f32 %v2097_v50, %v8815_v42 }
 0x28d   :  { %v2435_v60 = vpop.f32.mrf.mxu0  ;;  %v2276_v47 = vpop.f32.mrf.mxu3 }
 0x28e   :  { %v2267_v44 = vadd.f32 %v2266_v48, %v2098_v37  ;;  %2651 = vmatmul.bf16.gmra.mxu1 %v1020_v0  ;;  %v1027_v48 = vpack.c.bf16 %v486_v28, %v485_v24  ;;  %v487_v28 = vld [vmem:[#allocation2 + $0x270] sm:$0xff] }
 0x290   :  { %2139 = vmatmul.bf16.gmra.mxu2 %v9002_v53  ;;  %v2436_v13 = vadd.f32 %v2435_v60, %v2267_v44 }
 0x292   :  { %v9028_v40 = vadd.f32 %v2604_v30, %v2436_v13  ;;  %2318 = vmatmul.bf16.gmra.mxu3 %v1027_v48 }
 0x293   :  { %v2100_v17 = vpop.f32.mrf.mxu2  ;;  %v2614_v16 = vpop.f32.mrf.mxu1 }
 0x294   :  { %v2101_v42 = vadd.f32 %v2100_v17, %v8823_v11 }
 0x295   :  { %v2438_v8 = vpop.f32.mrf.mxu0  ;;  %v2279_v50 = vpop.f32.mrf.mxu3 }
 0x296   :  { %v2270_v46 = vadd.f32 %v2269_v14, %v2101_v42  ;;  %v547_v14 = vld [vmem:[#allocation2 + $0x241] sm:$0xff] }
 0x298   :  { %2477 = vmatmul.bf16.gmra.mxu0 %v1010_v62  ;;  %v2439_v53 = vadd.f32 %v2438_v8, %v2270_v46  ;;  %v488_v62 = vld [vmem:[#allocation2 + $0x278] sm:$0xff] }
 0x299   :  { %v1036_v42 = vpack.c.bf16 %v488_v62, %v487_v28  ;;  %v489_v62 = vld [vmem:[#allocation2 + $0x288] sm:$0xff] }
 0x29a   :  { %v9031_v49 = vadd.f32 %v2607_v25, %v2439_v53 }
 0x29b   :  { %v2102_v30 = vpop.f32.mrf.mxu2  ;;  %v2617_v13 = vpop.f32.mrf.mxu1 }
 0x29c   :  { %v2103_v37 = vadd.f32 %v2102_v30, %v8829_v45  ;;  %v1019_v45 = vpack.c.bf16 %v548_v29, %v547_v14  ;;  %v9043_v14 = vpack.c.bf16 %v616_v59, %v615_v1  ;;  %v550_v29 = vld [vmem:[#allocation2 + $0x261] sm:$0xff]  ;;  %v617_v59 = vld [vmem:[#allocation2 + $0x28a] sm:$0xff] }
 0x29d   :  { %v2440_v60 = vpop.f32.mrf.mxu0  ;;  %v2281_v24 = vpop.f32.mrf.mxu3 }
 0x29e   :  { %v2272_v44 = vadd.f32 %v2271_v56, %v2103_v37  ;;  %2656 = vmatmul.bf16.gmra.mxu1 %v9034_v39 }
 0x2a0   :  { %2144 = vmatmul.bf16.gmra.mxu2 %v1011_v35  ;;  %v2441_v11 = vadd.f32 %v2440_v60, %v2272_v44 }
 0x2a2   :  { %v9036_v17 = vadd.f32 %v2609_v52, %v2441_v11  ;;  %2323 = vmatmul.bf16.gmra.mxu3 %v1036_v42 }
 0x2a3   :  { %v2105_v25 = vpop.f32.mrf.mxu2  ;;  %v2619_v46 = vpop.f32.mrf.mxu1 }
 0x2a4   :  { %v2106_v56 = vadd.f32 %v2105_v25, %v8843_v19 }
 0x2a5   :  { %v2443_v48 = vpop.f32.mrf.mxu0  ;;  %v2284_v52 = vpop.f32.mrf.mxu3 }
 0x2a6   :  { %v2275_v8 = vadd.f32 %v2274_v10, %v2106_v56  ;;  %v549_v10 = vld [vmem:[#allocation2 + $0x259] sm:$0xff] }
 0x2a8   :  { %2482 = vmatmul.bf16.gmra.mxu0 %v1019_v45  ;;  %v2444_v35 = vadd.f32 %v2443_v48, %v2275_v8  ;;  %v490_v45 = vld [vmem:[#allocation2 + $0x290] sm:$0xff] }
 0x2a9   :  { %v1045_v56 = vpack.c.bf16 %v490_v45, %v489_v62  ;;  %v552_v62 = vld [vmem:[#allocation2 + $0x279] sm:$0xff] }
 0x2aa   :  { %v9040_v53 = vadd.f32 %v2612_v21, %v2444_v35  ;;  %v7968_v35 = vld [vmem:[%s12680_s1 + $0x1c8] sm:$0xff] }
 0x2ab   :  { %v2107_v30 = vpop.f32.mrf.mxu2  ;;  %v2622_v11 = vpop.f32.mrf.mxu1  ;;  %2882 = vmatpush.bf16.msra.mxu3 %v7968_v35 }
 0x2ac   :  { %v2108_v37 = vadd.f32 %v2107_v30, %v8849_v63  ;;  %v1028_v63 = vpack.c.bf16 %v550_v29, %v549_v10 }
 0x2ad   :  { %v2445_v60 = vpop.f32.mrf.mxu0  ;;  %v2286_v28 = vpop.f32.mrf.mxu3 }
 0x2ae   :  { %v2277_v44 = vadd.f32 %v2276_v47, %v2108_v37  ;;  %2661 = vmatmul.bf16.gmra.mxu1 %v9043_v14 }
 0x2b0   :  { %2149 = vmatmul.bf16.gmra.mxu2 %v1020_v0  ;;  %v2446_v19 = vadd.f32 %v2445_v60, %v2277_v44  ;;  %v7960_v0 = vld [vmem:[%s12680_s1 + $0x188] sm:$0xff] }
 0x2b1   :  { %2713 = vmatpush.bf16.msra.mxu2 %v7960_v0 }
 0x2b2   :  { %v9045_v25 = vadd.f32 %v2614_v16, %v2446_v19  ;;  %2328 = vmatmul.bf16.gmra.mxu3 %v1045_v56  ;;  %v618_v19 = vld [vmem:[#allocation2 + $0x292] sm:$0xff]  ;;  %v492_v56 = vld [vmem:[#allocation2 + $0x2a8] sm:$0xff] }
 0x2b3   :  { %v2110_v21 = vpop.f32.mrf.mxu2  ;;  %v2624_v16 = vpop.f32.mrf.mxu1  ;;  %v1047_v29 = vpack.c.bf16 %v618_v19, %v617_v59  ;;  %v619_v59 = vld [vmem:[#allocation2 + $0x2a2] sm:$0xff]  ;;  %v620_v19 = vld [vmem:[#allocation2 + $0x2aa] sm:$0xff] }
 0x2b4   :  { %v2111_v47 = vadd.f32 %v2110_v21, %v8861_v26  ;;  %v551_v21 = vld [vmem:[#allocation2 + $0x271] sm:$0xff] }
 0x2b5   :  { %v2448_v42 = vpop.f32.mrf.mxu0  ;;  %v2289_v26 = vpop.f32.mrf.mxu3 }
 0x2b6   :  { %v2280_v48 = vadd.f32 %v2279_v50, %v2111_v47  ;;  %v7976_v50 = vld [vmem:[%s12680_s1 + $0x208] sm:$0xff]  ;;  %v491_v47 = vld [vmem:[#allocation2 + $0x2a0] sm:$0xff] }
 0x2b7   :  { %3051 = vmatpush.bf16.msra.mxu0 %v7976_v50  ;;  %v1054_v0 = vpack.c.bf16 %v492_v56, %v491_v47  ;;  %v493_v56 = vld [vmem:[#allocation2 + $0x2b8] sm:$0xff] }
 0x2b8   :  { %2487 = vmatmul.bf16.gmra.mxu0 %v1028_v63  ;;  %v2449_v8 = vadd.f32 %v2448_v42, %v2280_v48  ;;  %v1037_v42 = vpack.c.bf16 %v552_v62, %v551_v21  ;;  %v1056_v21 = vpack.c.bf16 %v620_v19, %v619_v59  ;;  %v554_v62 = vld [vmem:[#allocation2 + $0x291] sm:$0xff] }
 0x2ba   :  { %v9055_v30 = vadd.f32 %v2617_v13, %v2449_v8 }
 0x2bb   :  { %v2112_v37 = vpop.f32.mrf.mxu2  ;;  %v2627_v10 = vpop.f32.mrf.mxu1 }
 0x2bc   :  { %v2113_v60 = vadd.f32 %v2112_v37, %v8873_v6 }
 0x2bd   :  { %v2450_v44 = vpop.f32.mrf.mxu0  ;;  %v2291_v63 = vpop.f32.mrf.mxu3 }
 0x2be   :  { %v2282_v1 = vadd.f32 %v2281_v24, %v2113_v60  ;;  %2666 = vmatmul.bf16.gmra.mxu1 %v1047_v29 }
 0x2c0   :  { %2154 = vmatmul.bf16.gmra.mxu2 %v9034_v39  ;;  %v2451_v13 = vadd.f32 %v2450_v44, %v2282_v1 }
 0x2c2   :  { %v9062_v45 = vadd.f32 %v2619_v46, %v2451_v13  ;;  %2333 = vmatmul.bf16.gmra.mxu3 %v1054_v0 }
 0x2c3   :  { %v2115_v6 = vpop.f32.mrf.mxu2  ;;  %v2629_v35 = vpop.f32.mrf.mxu1 }
 0x2c4   :  { %v2116_v24 = vadd.f32 %v2115_v6, %v8880_v22 }
 0x2c5   :  { %v2453_v48 = vpop.f32.mrf.mxu0  ;;  %v2294_v60 = vpop.f32.mrf.mxu3 }
 0x2c6   :  { %v2285_v8 = vadd.f32 %v2284_v52, %v2116_v24  ;;  %v553_v52 = vld [vmem:[#allocation2 + $0x289] sm:$0xff] }
 0x2c7   :  { %v1046_v24 = vpack.c.bf16 %v554_v62, %v553_v52  ;;  %v622_v52 = vld [vmem:[#allocation2 + $0x2c2] sm:$0xff] }
 0x2c8   :  { %2492 = vmatmul.bf16.gmra.mxu0 %v1037_v42  ;;  %v2454_v39 = vadd.f32 %v2453_v48, %v2285_v8  ;;  %v494_v42 = vld [vmem:[#allocation2 + $0x2c0] sm:$0xff] }
 0x2c9   :  { %v8081_v48 = vld [vmem:[%s12682_s2] ss:$0 sm:$0xff] }
 0x2ca   :  { %v9065_v37 = vadd.f32 %v2622_v11, %v2454_v39 }
 0x2cb   :  { %v2117_v46 = vpop.f32.mrf.mxu2  ;;  %v2632_v13 = vpop.f32.mrf.mxu1 }
 0x2cc   :  { %v2118_v44 = vadd.f32 %v2117_v46, %v8886_v7 }
 0x2cd   :  { %v2455_v50 = vpop.f32.mrf.mxu0  ;;  %v2296_v47 = vpop.f32.mrf.mxu3 }
 0x2ce   :  { %v2287_v1 = vadd.f32 %v2286_v28, %v2118_v44  ;;  %2671 = vmatmul.bf16.gmra.mxu1 %v1056_v21  ;;  %v1063_v28 = vpack.c.bf16 %v494_v42, %v493_v56  ;;  %v556_v56 = vld [vmem:[#allocation2 + $0x2a9] sm:$0xff] }
 0x2d0   :  { %2159 = vmatmul.bf16.gmra.mxu2 %v9043_v14  ;;  %v2456_v22 = vadd.f32 %v2455_v50, %v2287_v1  ;;  %v1785_v14 = vadd.f32 %v8081_v48, %v8463_v41 }
 0x2d2   :  { %v9069_v6 = vadd.f32 %v2624_v16, %v2456_v22  ;;  %2338 = vmatmul.bf16.gmra.mxu3 %v1063_v28  ;;  %v1954_v46 = vadd.f32 %v8430_v12, %v1785_v14  ;;  %v621_v22 = vld [vmem:[#allocation2 + $0x2ba] sm:$0xff] }
 0x2d3   :  { %v2120_v11 = vpop.f32.mrf.mxu2  ;;  %v2634_v16 = vpop.f32.mrf.mxu1 }
 0x2d4   :  { %v2121_v7 = vadd.f32 %v2120_v11, %v8413_v4  ;;  %v9079_v11 = vpack.c.bf16 %v622_v52, %v621_v22  ;;  %v623_v52 = vld [vmem:[#allocation2 + $0x2d2] sm:$0xff] }
 0x2d5   :  { %v2458_v0 = vpop.f32.mrf.mxu0  ;;  %v2299_v50 = vpop.f32.mrf.mxu3 }
 0x2d6   :  { %v2290_v8 = vadd.f32 %v2289_v26, %v2121_v7  ;;  %v555_v26 = vld [vmem:[#allocation2 + $0x2a1] sm:$0xff]  ;;  %v496_v7 = vld [vmem:[#allocation2 + $0x2d8] sm:$0xff] }
 0x2d7   :  { %v1055_v28 = vpack.c.bf16 %v556_v56, %v555_v26 }
 0x2d8   :  { %2497 = vmatmul.bf16.gmra.mxu0 %v1046_v24  ;;  %v2459_v39 = vadd.f32 %v2458_v0, %v2290_v8  ;;  %v12872_v0 = vld [vmem:[#allocation3_spill] sm:$0xff] }
 0x2da   :  { %v9077_v44 = vadd.f32 %v2627_v10, %v2459_v39  ;;  %v495_v10 = vld [vmem:[#allocation2 + $0x2d0] sm:$0xff] }
 0x2db   :  { %v2122_v1 = vpop.f32.mrf.mxu2  ;;  %v2637_v62 = vpop.f32.mrf.mxu1  ;;  %v1072_v48 = vpack.c.bf16 %v496_v7, %v495_v10  ;;  %v558_v10 = vld [vmem:[#allocation2 + $0x2c1] sm:$0xff] }
 0x2dc   :  { %v2123_v4 = vadd.f32 %v2122_v1, %v1954_v46 }
 0x2dd   :  { %v2460_v59 = vpop.f32.mrf.mxu0  ;;  %v2301_v24 = vpop.f32.mrf.mxu3 }
 0x2de   :  { %v2292_v19 = vadd.f32 %v2291_v63, %v2123_v4  ;;  %2676 = vmatmul.bf16.gmra.mxu1 %v9079_v11  ;;  %v12873_v4 = vld [vmem:[#allocation4_spill] sm:$0xff] }
 0x2e0   :  { %2164 = vmatmul.bf16.gmra.mxu2 %v1047_v29  ;;  %v2461_v41 = vadd.f32 %v2460_v59, %v2292_v19 }
 0x2e2   :  { %v9081_v42 = vadd.f32 %v2629_v35, %v2461_v41  ;;  %2343 = vmatmul.bf16.gmra.mxu3 %v1072_v48  ;;  %v624_v41 = vld [vmem:[#allocation2 + $0x2da] sm:$0xff] }
 0x2e3   :  { %v2125_v12 = vpop.f32.mrf.mxu2  ;;  %v2639_v39 = vpop.f32.mrf.mxu1  ;;  %v9088_v56 = vpack.c.bf16 %v624_v41, %v623_v52  ;;  %v12877_v41 = vld [vmem:[#allocation6_spill] sm:$0xff] }
 0x2e4   :  { %v2126_v63 = vadd.f32 %v2125_v12, %v12872_v0  ;;  %v497_v0 = vld [vmem:[#allocation2 + $0x2e8] sm:$0xff] }
 0x2e5   :  { %v2463_v14 = vpop.f32.mrf.mxu0  ;;  %v2304_v35 = vpop.f32.mrf.mxu3 }
 0x2e6   :  { %v2295_v8 = vadd.f32 %v2294_v60, %v2126_v63  ;;  %v557_v60 = vld [vmem:[#allocation2 + $0x2b9] sm:$0xff]  ;;  %v498_v63 = vld [vmem:[#allocation2 + $0x2f0] sm:$0xff] }
 0x2e7   :  { %v1064_v48 = vpack.c.bf16 %v558_v10, %v557_v60 }
 0x2e8   :  { %2502 = vmatmul.bf16.gmra.mxu0 %v1055_v28  ;;  %v2464_v29 = vadd.f32 %v2463_v14, %v2295_v8  ;;  %v12875_v14 = vld [vmem:[#allocation5_spill] sm:$0xff]  ;;  %v1081_v8 = vpack.c.bf16 %v498_v63, %v497_v0 }
 0x2e9   :  { %v626_v0 = vld [vmem:[#allocation2 + $0x2f2] sm:$0xff] }
 0x2ea   :  { %v9085_v46 = vadd.f32 %v2632_v13, %v2464_v29 }
 0x2eb   :  { %v2127_v1 = vpop.f32.mrf.mxu2  ;;  %v2642_v26 = vpop.f32.mrf.mxu1 }
 0x2ec   :  { %v2128_v59 = vadd.f32 %v2127_v1, %v12873_v4 }
 0x2ed   :  { %v2465_v19 = vpop.f32.mrf.mxu0  ;;  %v2306_v28 = vpop.f32.mrf.mxu3 }
 0x2ee   :  { %v2297_v22 = vadd.f32 %v2296_v47, %v2128_v59  ;;  %2681 = vmatmul.bf16.gmra.mxu1 %v9088_v56  ;;  %v7967_v59 = vld [vmem:[%s12680_s1 + $0x1c0] sm:$0xff] }
 0x2ef   :  { %2883 = vmatpush.bf16.msra.mxu3 %v7967_v59 }
 0x2f0   :  { %2169 = vmatmul.bf16.gmra.mxu2 %v1056_v21  ;;  %v2466_v12 = vadd.f32 %v2465_v19, %v2297_v22  ;;  %v7959_v21 = vld [vmem:[%s12680_s1 + $0x180] sm:$0xff] }
 0x2f1   :  { %2714 = vmatpush.bf16.msra.mxu2 %v7959_v21 }
 0x2f2   :  { %v9090_v7 = vadd.f32 %v2634_v16, %v2466_v12  ;;  %2348 = vmatmul.bf16.gmra.mxu3 %v1081_v8 }
 0x2f3   :  { %v2130_v13 = vpop.f32.mrf.mxu2  ;;  %v2644_v16 = vpop.f32.mrf.mxu1 }
 0x2f4   :  { %12874 = vst [vmem:[#allocation3_spill] sm:$0xff] %v9090_v7  ;;  %v2131_v47 = vadd.f32 %v2130_v13, %v12875_v14  ;;  %v625_v13 = vld [vmem:[#allocation2 + $0x2ea] sm:$0xff]  ;;  %v627_v7 = vld [vmem:[#allocation2 + $0x302] sm:$0xff] }
 0x2f5   :  { %v2468_v29 = vpop.f32.mrf.mxu0  ;;  %v2309_v22 = vpop.f32.mrf.mxu3  ;;  %v559_v14 = vld [vmem:[#allocation2 + $0x2d1] sm:$0xff] }
 0x2f6   :  { %v2300_v1 = vadd.f32 %v2299_v50, %v2131_v47  ;;  %v7975_v50 = vld [vmem:[%s12680_s1 + $0x200] sm:$0xff] }
 0x2f7   :  { %3052 = vmatpush.bf16.msra.mxu0 %v7975_v50  ;;  %v560_v47 = vld [vmem:[#allocation2 + $0x2d9] sm:$0xff] }
 0x2f8   :  { %2507 = vmatmul.bf16.gmra.mxu0 %v1064_v48  ;;  %v2469_v4 = vadd.f32 %v2468_v29, %v2300_v1  ;;  %v1083_v48 = vpack.c.bf16 %v626_v0, %v625_v13  ;;  %v499_v1 = vld [vmem:[#allocation2 + $0x300] sm:$0xff]  ;;  %v1073_v59 = vpack.c.bf16 %v560_v47, %v559_v14  ;;  %v12882_v13 = vld [vmem:[#allocation8_spill] sm:$0xff] }
 0x2f9   :  { %v628_v14 = vld [vmem:[#allocation2 + $0x30a] sm:$0xff] }
 0x2fa   :  { %v9100_v19 = vadd.f32 %v2637_v62, %v2469_v4  ;;  %v500_v4 = vld [vmem:[#allocation2 + $0x308] sm:$0xff]  ;;  %v1092_v47 = vpack.c.bf16 %v628_v14, %v627_v7  ;;  %v12886_v14 = vld [vmem:[#allocation10_spill] sm:$0xff] }
 0x2fb   :  { %v2132_v52 = vpop.f32.mrf.mxu2  ;;  %v2647_v63 = vpop.f32.mrf.mxu1 }
 0x2fc   :  { %12876 = vst [vmem:[#allocation4_spill] sm:$0xff] %v9100_v19  ;;  %v2133_v12 = vadd.f32 %v2132_v52, %v12877_v41  ;;  %v12879_v52 = vld [vmem:[#allocation7_spill] sm:$0xff]  ;;  %v1090_v41 = vpack.c.bf16 %v500_v4, %v499_v1  ;;  %v562_v1 = vld [vmem:[#allocation2 + $0x2f1] sm:$0xff] }
 0x2fd   :  { %v2470_v60 = vpop.f32.mrf.mxu0  ;;  %v2311_v29 = vpop.f32.mrf.mxu3 }
 0x2fe   :  { %v2302_v10 = vadd.f32 %v2301_v24, %v2133_v12  ;;  %2686 = vmatmul.bf16.gmra.mxu1 %v1083_v48 }
 0x300   :  { %2174 = vmatmul.bf16.gmra.mxu2 %v9079_v11  ;;  %v2471_v62 = vadd.f32 %v2470_v60, %v2302_v10 }
 0x302   :  { %v9107_v8 = vadd.f32 %v2639_v39, %v2471_v62  ;;  %2353 = vmatmul.bf16.gmra.mxu3 %v1090_v41 }
 0x303   :  { %v2135_v21 = vpop.f32.mrf.mxu2  ;;  %v9110_v11 = vpop.f32.mrf.mxu1 }
 0x304   :  { %12878 = vst [vmem:[#allocation5_spill] sm:$0xff] %v9107_v8  ;;  %v2136_v24 = vadd.f32 %v2135_v21, %v12879_v52  ;;  %v501_v52 = vld [vmem:[#allocation2 + $0x318] sm:$0xff] }
 0x305   :  { %v2473_v12 = vpop.f32.mrf.mxu0  ;;  %12880 = vst [vmem:[#allocation6_spill] sm:$0xff] %v9110_v11  ;;  %v2314_v39 = vpop.f32.mrf.mxu3 }
 0x306   :  { %v2305_v19 = vadd.f32 %v2304_v35, %v2136_v24  ;;  %v561_v35 = vld [vmem:[#allocation2 + $0x2e9] sm:$0xff]  ;;  %v502_v24 = vld [vmem:[#allocation2 + $0x320] sm:$0xff] }
 0x307   :  { %v1082_v41 = vpack.c.bf16 %v562_v1, %v561_v35  ;;  %v629_v1 = vld [vmem:[#allocation2 + $0x31a] sm:$0xff] }
 0x308   :  { %2512 = vmatmul.bf16.gmra.mxu0 %v1073_v59  ;;  %v2474_v50 = vadd.f32 %v2473_v12, %v2305_v19  ;;  %v12884_v12 = vld [vmem:[#allocation9_spill] sm:$0xff] }
 0x30a   :  { %v9112_v60 = vadd.f32 %v2642_v26, %v2474_v50 }
 0x30b   :  { %v2137_v10 = vpop.f32.mrf.mxu2  ;;  %v2652_v59 = vpop.f32.mrf.mxu1 }
 0x30c   :  { %12881 = vst [vmem:[#allocation7_spill] sm:$0xff] %v9112_v60  ;;  %v2138_v0 = vadd.f32 %v2137_v10, %v12882_v13 }
 0x30d   :  { %v2475_v62 = vpop.f32.mrf.mxu0  ;;  %v2316_v19 = vpop.f32.mrf.mxu3 }
 0x30e   :  { %v2307_v8 = vadd.f32 %v2306_v28, %v2138_v0  ;;  %2691 = vmatmul.bf16.gmra.mxu1 %v1092_v47  ;;  %v1099_v28 = vpack.c.bf16 %v502_v24, %v501_v52  ;;  %v9124_v0 = vld [vmem:[%s12681_s0 + $0x1f0] sm:$0xff] }
 0x30f   :  { %244 = vst [vmem:[#allocation2 + $0x331] sm:$0xff] %v9124_v0 }
 0x310   :  { %2179 = vmatmul.bf16.gmra.mxu2 %v9088_v56  ;;  %v2476_v21 = vadd.f32 %v2475_v62, %v2307_v8  ;;  %v9129_v62 = vld [vmem:[%s12681_s0 + $0x1f8] sm:$0xff] }
 0x311   :  { %245 = vst [vmem:[#allocation2 + $0x339] sm:$0xff] %v9129_v62 }
 0x312   :  { %v9116_v4 = vadd.f32 %v2644_v16, %v2476_v21  ;;  %2358 = vmatmul.bf16.gmra.mxu3 %v1099_v28 }
 0x313   :  { %v2140_v26 = vpop.f32.mrf.mxu2  ;;  %v9133_v35 = vpop.f32.mrf.mxu1 }
 0x314   :  { %12883 = vst [vmem:[#allocation8_spill] sm:$0xff] %v9116_v4  ;;  %v2141_v50 = vadd.f32 %v2140_v26, %v12884_v12  ;;  %v630_v26 = vld [vmem:[#allocation2 + $0x322] sm:$0xff] }
 0x315   :  { %v2478_v10 = vpop.f32.mrf.mxu0  ;;  %v2319_v8 = vpop.f32.mrf.mxu3  ;;  %12887 = vst [vmem:[#allocation10_spill] sm:$0xff] %v9133_v35  ;;  %v1101_v52 = vpack.c.bf16 %v630_v26, %v629_v1  ;;  %v564_v12 = vld [vmem:[#allocation2 + $0x309] sm:$0xff] }
 0x316   :  { %v2310_v13 = vadd.f32 %v2309_v22, %v2141_v50  ;;  %v12890_v1 = vld [vmem:[#allocation12_spill] sm:$0xff] }
 0x318   :  { %2517 = vmatmul.bf16.gmra.mxu0 %v1082_v41  ;;  %v2479_v56 = vadd.f32 %v2478_v10, %v2310_v13  ;;  %v563_v41 = vld [vmem:[#allocation2 + $0x301] sm:$0xff]  ;;  %v503_v10 = vld [vmem:[#allocation2 + $0x330] sm:$0xff] }
 0x319   :  { %v1091_v13 = vpack.c.bf16 %v564_v12, %v563_v41  ;;  %v631_v60 = vld [vmem:[#allocation2 + $0x332] sm:$0xff]  ;;  %v632_v41 = vld [vmem:[#allocation2 + $0x33a] sm:$0xff] }
 0x31a   :  { %v9119_v7 = vadd.f32 %v2647_v63, %v2479_v56  ;;  %v12889_v56 = vld [vmem:[#allocation11_spill] sm:$0xff]  ;;  %v1110_v12 = vpack.c.bf16 %v632_v41, %v631_v60 }
 0x31b   :  { %v2142_v16 = vpop.f32.mrf.mxu2 }
 0x31c   :  { %12885 = vst [vmem:[#allocation9_spill] sm:$0xff] %v9119_v7  ;;  %v2143_v21 = vadd.f32 %v2142_v16, %v12886_v14  ;;  %v504_v14 = vld [vmem:[#allocation2 + $0x338] sm:$0xff] }
 0x31d   :  { %v2480_v22 = vpop.f32.mrf.mxu0  ;;  %v2321_v50 = vpop.f32.mrf.mxu3  ;;  %v1108_v11 = vpack.c.bf16 %v504_v14, %v503_v10  ;;  %v565_v10 = vld [vmem:[#allocation2 + $0x319] sm:$0xff] }
 0x31e   :  { %v2312_v63 = vadd.f32 %v2311_v29, %v2143_v21  ;;  %2696 = vmatmul.bf16.gmra.mxu1 %v1101_v52  ;;  %v2657_v29 = vpop.f32.mrf.mxu1  ;;  %v699_v14 = vld [vmem:[#allocation2 + $0x39] sm:$0xff] }
 0x320   :  { %2184 = vmatmul.bf16.gmra.mxu2 %v1083_v48  ;;  %v9136_v24 = vadd.f32 %v2480_v22, %v2312_v63 }
 0x322   :  { %12888 = vst [vmem:[#allocation34_spill] sm:$0xff] %v9136_v24  ;;  %2363 = vmatmul.bf16.gmra.mxu3 %v1108_v11 }
 0x323   :  { %v2145_v28 = vpop.f32.mrf.mxu2 }
 0x324   :  { %v2146_v16 = vadd.f32 %v2145_v28, %v12889_v56 }
 0x325   :  { %v2483_v35 = vpop.f32.mrf.mxu0  ;;  %v2324_v22 = vpop.f32.mrf.mxu3 }
 0x326   :  { %v2315_v7 = vadd.f32 %v2314_v39, %v2146_v16  ;;  %v566_v39 = vld [vmem:[#allocation2 + $0x321] sm:$0xff]  ;;  %v9144_v56 = vpop.f32.mrf.mxu1 }
 0x327   :  { %12892 = vst [vmem:[#allocation12_spill] sm:$0xff] %v9144_v56 }
 0x328   :  { %2522 = vmatmul.bf16.gmra.mxu0 %v1091_v13  ;;  %v2484_v21 = vadd.f32 %v2483_v35, %v2315_v7  ;;  %v698_v7 = vld [vmem:[#allocation2 + $0x31] sm:$0xff]  ;;  %v1100_v35 = vpack.c.bf16 %v566_v39, %v565_v10 }
 0x329   :  { %v12893_v13 = vld [vmem:[#allocation13_spill] sm:$0xff] }
 0x32a   :  { %v9139_v48 = vadd.f32 %v2652_v59, %v2484_v21 }
 0x32b   :  { %v2147_v63 = vpop.f32.mrf.mxu2 }
 0x32c   :  { %v2148_v26 = vadd.f32 %v2147_v63, %v12890_v1 }
 0x32d   :  { %v2485_v24 = vpop.f32.mrf.mxu0  ;;  %v2326_v11 = vpop.f32.mrf.mxu3 }
 0x32e   :  { %v2317_v4 = vadd.f32 %v2316_v19, %v2148_v26  ;;  %2701 = vmatmul.bf16.gmra.mxu1 %v1110_v12  ;;  %v833_v19 = vpack.c.bf16 %v699_v14, %v698_v7  ;;  %v2662_v1 = vpop.f32.mrf.mxu1  ;;  %v12894_v26 = vld [vmem:[#allocation14_spill] sm:$0xff]  ;;  %v12896_v7 = vld [vmem:[#allocation15_spill] sm:$0xff] }
 0x330   :  { %2189 = vmatmul.bf16.gmra.mxu2 %v1092_v47  ;;  %v9142_v28 = vadd.f32 %v2485_v24, %v2317_v4 }
 0x332   :  { %12891 = vst [vmem:[#allocation11_spill] sm:$0xff] %v9142_v28  ;;  %2884 = vmatmul.bf16.vlgmr.msra.gmra.mxu3 %v833_v19 }
 0x333   :  { %v2150_v59 = vpop.f32.mrf.mxu2 }
 0x334   :  { %v2151_v16 = vadd.f32 %v2150_v59, %v12893_v13  ;;  %v700_v13 = vld [vmem:[#allocation2 + $0x49] sm:$0xff] }
 0x335   :  { %v2488_v21 = vpop.f32.mrf.mxu0  ;;  %v2329_v4 = vpop.f32.mrf.mxu3 }
 0x336   :  { %v2320_v63 = vadd.f32 %v2319_v8, %v2151_v16  ;;  %v1109_v8 = vpack.c.bf16 %v9129_v62, %v9124_v0  ;;  %v9155_v14 = vpop.f32.mrf.mxu1 }
 0x337   :  { %12897 = vst [vmem:[#allocation14_spill] sm:$0xff] %v9155_v14 }
 0x338   :  { %2527 = vmatmul.bf16.gmra.mxu0 %v1100_v35  ;;  %v2489_v60 = vadd.f32 %v2488_v21, %v2320_v63 }
 0x33a   :  { %v9147_v47 = vadd.f32 %v2657_v29, %v2489_v60  ;;  %v701_v29 = vld [vmem:[#allocation2 + $0x51] sm:$0xff] }
 0x33b   :  { %v2152_v24 = vpop.f32.mrf.mxu2  ;;  %v842_v21 = vpack.c.bf16 %v701_v29, %v700_v13  ;;  %v762_v13 = vld [vmem:[#allocation2 + $0x32] sm:$0xff]  ;;  %v702_v29 = vld [vmem:[#allocation2 + $0x61] sm:$0xff] }
 0x33c   :  { %v2153_v41 = vadd.f32 %v2152_v24, %v12894_v26  ;;  %v12898_v26 = vld [vmem:[#allocation16_spill] sm:$0xff] }
 0x33d   :  { %v2490_v12 = vpop.f32.mrf.mxu0  ;;  %v2331_v39 = vpop.f32.mrf.mxu3 }
 0x33e   :  { %v2322_v56 = vadd.f32 %v2321_v50, %v2153_v41 }
 0x340   :  { %2194 = vmatmul.bf16.gmra.mxu2 %v1101_v52  ;;  %v9150_v10 = vadd.f32 %v2490_v12, %v2322_v56  ;;  %v634_v52 = vld [vmem:[#allocation2 + $0x30] sm:$0xff]  ;;  %v635_v56 = vld [vmem:[#allocation2 + $0x38] sm:$0xff] }
 0x341   :  { %v832_v0 = vpack.c.bf16 %v635_v56, %v634_v52  ;;  %v637_v56 = vld [vmem:[#allocation2 + $0x50] sm:$0xff] }
 0x342   :  { %12895 = vst [vmem:[#allocation13_spill] sm:$0xff] %v9150_v10  ;;  %2889 = vmatmul.bf16.gmra.mxu3 %v842_v21  ;;  %v12900_v21 = vld [vmem:[#allocation17_spill] sm:$0xff] }
 0x343   :  { %v2155_v59 = vpop.f32.mrf.mxu2 }
 0x344   :  { %v2156_v35 = vadd.f32 %v2155_v59, %v12896_v7  ;;  %v2667_v59 = vpop.f32.mrf.mxu1 }
 0x345   :  { %v2493_v16 = vpop.f32.mrf.mxu0  ;;  %v2334_v60 = vpop.f32.mrf.mxu3 }
 0x346   :  { %v2325_v19 = vadd.f32 %v2324_v22, %v2156_v35  ;;  %v763_v22 = vld [vmem:[#allocation2 + $0x3a] sm:$0xff] }
 0x348   :  { %2532 = vmatmul.bf16.gmra.mxu0 %v1109_v8  ;;  %v2494_v50 = vadd.f32 %v2493_v16, %v2325_v19  ;;  %v834_v16 = vpack.c.bf16 %v763_v22, %v762_v13  ;;  %v703_v19 = vld [vmem:[#allocation2 + $0x69] sm:$0xff] }
 0x349   :  { %v851_v14 = vpack.c.bf16 %v703_v19, %v702_v29 }
 0x34a   :  { %v9157_v63 = vadd.f32 %v2662_v1, %v2494_v50 }
 0x34b   :  { %v2157_v24 = vpop.f32.mrf.mxu2 }
 0x34c   :  { %v2158_v41 = vadd.f32 %v2157_v24, %v12898_v26  ;;  %v9163_v24 = vpop.f32.mrf.mxu1 }
 0x34d   :  { %v2495_v62 = vpop.f32.mrf.mxu0  ;;  %v2336_v35 = vpop.f32.mrf.mxu3  ;;  %12901 = vst [vmem:[#allocation16_spill] sm:$0xff] %v9163_v24 }
 0x34e   :  { %v2327_v12 = vadd.f32 %v2326_v11, %v2158_v41  ;;  %v636_v11 = vld [vmem:[#allocation2 + $0x48] sm:$0xff] }
 0x34f   :  { %v841_v13 = vpack.c.bf16 %v637_v56, %v636_v11  ;;  %v639_v56 = vld [vmem:[#allocation2 + $0x68] sm:$0xff] }
 0x350   :  { %2715 = vmatmul.bf16.vlgmr.msra.gmra.mxu2 %v832_v0  ;;  %v9160_v7 = vadd.f32 %v2495_v62, %v2327_v12  ;;  %v12902_v62 = vld [vmem:[#allocation18_spill] sm:$0xff] }
 0x352   :  { %12899 = vst [vmem:[#allocation15_spill] sm:$0xff] %v9160_v7  ;;  %2894 = vmatmul.bf16.gmra.mxu3 %v851_v14  ;;  %v765_v14 = vld [vmem:[#allocation2 + $0x52] sm:$0xff] }
 0x353   :  { %v2160_v8 = vpop.f32.mrf.mxu2 }
 0x354   :  { %v2161_v1 = vadd.f32 %v2160_v8, %v12900_v21 }
 0x355   :  { %v2498_v50 = vpop.f32.mrf.mxu0  ;;  %v2339_v41 = vpop.f32.mrf.mxu3 }
 0x356   :  { %v2330_v10 = vadd.f32 %v2329_v4, %v2161_v1  ;;  %v764_v4 = vld [vmem:[#allocation2 + $0x4a] sm:$0xff]  ;;  %v704_v1 = vld [vmem:[#allocation2 + $0x79] sm:$0xff] }
 0x357   :  { %v843_v19 = vpack.c.bf16 %v765_v14, %v764_v4 }
 0x358   :  { %3053 = vmatmul.bf16.vlgmr.msra.gmra.mxu0 %v834_v16  ;;  %v2499_v52 = vadd.f32 %v2498_v50, %v2330_v10  ;;  %v2672_v16 = vpop.f32.mrf.mxu1  ;;  %v12904_v50 = vld [vmem:[#allocation19_spill] sm:$0xff] }
 0x35a   :  { %v9165_v26 = vadd.f32 %v2667_v59, %v2499_v52  ;;  %v705_v52 = vld [vmem:[#allocation2 + $0x81] sm:$0xff] }
 0x35b   :  { %v2162_v0 = vpop.f32.mrf.mxu2  ;;  %v860_v7 = vpack.c.bf16 %v705_v52, %v704_v1 }
 0x35c   :  { %v2163_v12 = vadd.f32 %v2162_v0, %v12902_v62 }
 0x35d   :  { %v2500_v22 = vpop.f32.mrf.mxu0  ;;  %v2341_v29 = vpop.f32.mrf.mxu3 }
 0x35e   :  { %v2332_v8 = vadd.f32 %v2331_v39, %v2163_v12  ;;  %v638_v39 = vld [vmem:[#allocation2 + $0x60] sm:$0xff] }
 0x360   :  { %2720 = vmatmul.bf16.gmra.mxu2 %v841_v13  ;;  %v9168_v21 = vadd.f32 %v2500_v22, %v2332_v8  ;;  %v12905_v13 = vld [vmem:[#allocation20_spill] sm:$0xff]  ;;  %v850_v8 = vpack.c.bf16 %v639_v56, %v638_v39  ;;  %v9174_v4 = vpop.f32.mrf.mxu1 }
 0x361   :  { %12906 = vst [vmem:[#allocation18_spill] sm:$0xff] %v9174_v4 }
 0x362   :  { %12903 = vst [vmem:[#allocation17_spill] sm:$0xff] %v9168_v21  ;;  %2899 = vmatmul.bf16.gmra.mxu3 %v860_v7  ;;  %v767_v7 = vld [vmem:[#allocation2 + $0x6a] sm:$0xff] }
 0x363   :  { %v2165_v10 = vpop.f32.mrf.mxu2 }
 0x364   :  { %v2166_v59 = vadd.f32 %v2165_v10, %v12904_v50 }
 0x365   :  { %v2503_v24 = vpop.f32.mrf.mxu0  ;;  %v2344_v62 = vpop.f32.mrf.mxu3 }
 0x366   :  { %v2335_v28 = vadd.f32 %v2334_v60, %v2166_v59  ;;  %v766_v60 = vld [vmem:[#allocation2 + $0x62] sm:$0xff]  ;;  %v707_v59 = vld [vmem:[#allocation2 + $0x99] sm:$0xff] }
 0x368   :  { %3058 = vmatmul.bf16.gmra.mxu0 %v843_v19  ;;  %v2504_v11 = vadd.f32 %v2503_v24, %v2335_v28  ;;  %v706_v24 = vld [vmem:[#allocation2 + $0x91] sm:$0xff]  ;;  %v852_v19 = vpack.c.bf16 %v767_v7, %v766_v60  ;;  %v2677_v39 = vpop.f32.mrf.mxu1 }
 0x36a   :  { %v9171_v0 = vadd.f32 %v2672_v16, %v2504_v11  ;;  %v12908_v16 = vld [vmem:[#allocation21_spill] sm:$0xff]  ;;  %v869_v11 = vpack.c.bf16 %v707_v59, %v706_v24  ;;  %v768_v24 = vld [vmem:[#allocation2 + $0x7a] sm:$0xff] }
 0x36b   :  { %v2167_v12 = vpop.f32.mrf.mxu2 }
 0x36c   :  { %v2168_v22 = vadd.f32 %v2167_v12, %v12905_v13  ;;  %v641_v13 = vld [vmem:[#allocation2 + $0x80] sm:$0xff] }
 0x36d   :  { %v2505_v21 = vpop.f32.mrf.mxu0  ;;  %v2346_v1 = vpop.f32.mrf.mxu3 }
 0x36e   :  { %v2337_v14 = vadd.f32 %v2336_v35, %v2168_v22  ;;  %v640_v35 = vld [vmem:[#allocation2 + $0x78] sm:$0xff] }
 0x370   :  { %2725 = vmatmul.bf16.gmra.mxu2 %v850_v8  ;;  %v9176_v10 = vadd.f32 %v2505_v21, %v2337_v14  ;;  %v12910_v14 = vld [vmem:[#allocation22_spill] sm:$0xff] }
 0x372   :  { %12907 = vst [vmem:[#allocation19_spill] sm:$0xff] %v9176_v10  ;;  %2904 = vmatmul.bf16.gmra.mxu3 %v869_v11  ;;  %v859_v10 = vpack.c.bf16 %v641_v13, %v640_v35 }
 0x373   :  { %v2170_v28 = vpop.f32.mrf.mxu2 }
 0x374   :  { %v2171_v50 = vadd.f32 %v2170_v28, %v12908_v16 }
 0x375   :  { %v2508_v52 = vpop.f32.mrf.mxu0  ;;  %v2349_v22 = vpop.f32.mrf.mxu3 }
 0x376   :  { %v2340_v12 = vadd.f32 %v2339_v41, %v2171_v50  ;;  %v769_v41 = vld [vmem:[#allocation2 + $0x82] sm:$0xff] }
 0x377   :  { %v861_v59 = vpack.c.bf16 %v769_v41, %v768_v24  ;;  %v770_v41 = vld [vmem:[#allocation2 + $0x92] sm:$0xff] }
 0x378   :  { %3063 = vmatmul.bf16.gmra.mxu0 %v852_v19  ;;  %v2509_v56 = vadd.f32 %v2508_v52, %v2340_v12  ;;  %v708_v19 = vld [vmem:[#allocation2 + $0xa9] sm:$0xff]  ;;  %v12912_v52 = vld [vmem:[#allocation23_spill] sm:$0xff]  ;;  %v709_v12 = vld [vmem:[#allocation2 + $0xb1] sm:$0xff] }
 0x37a   :  { %v9179_v21 = vadd.f32 %v2677_v39, %v2509_v56  ;;  %v878_v56 = vpack.c.bf16 %v709_v12, %v708_v19  ;;  %v711_v12 = vld [vmem:[#allocation2 + $0xc9] sm:$0xff] }
 0x37b   :  { %v2172_v8 = vpop.f32.mrf.mxu2 }
 0x37c   :  { %12909 = vst [vmem:[#allocation20_spill] sm:$0xff] %v9179_v21  ;;  %v2173_v4 = vadd.f32 %v2172_v8, %v12910_v14  ;;  %v12914_v8 = vld [vmem:[#allocation24_spill] sm:$0xff] }
 0x37d   :  { %v2510_v60 = vpop.f32.mrf.mxu0  ;;  %v2351_v16 = vpop.f32.mrf.mxu3 }
 0x37e   :  { %v2342_v7 = vadd.f32 %v2341_v29, %v2173_v4  ;;  %v642_v29 = vld [vmem:[#allocation2 + $0x90] sm:$0xff]  ;;  %v643_v4 = vld [vmem:[#allocation2 + $0x98] sm:$0xff] }
 0x380   :  { %2730 = vmatmul.bf16.gmra.mxu2 %v859_v10  ;;  %v9182_v28 = vadd.f32 %v2510_v60, %v2342_v7  ;;  %v868_v60 = vpack.c.bf16 %v643_v4, %v642_v29  ;;  %v645_v4 = vld [vmem:[#allocation2 + $0xb0] sm:$0xff] }
 0x382   :  { %12911 = vst [vmem:[#allocation21_spill] sm:$0xff] %v9182_v28  ;;  %2909 = vmatmul.bf16.gmra.mxu3 %v878_v56 }
 0x383   :  { %v2175_v50 = vpop.f32.mrf.mxu2 }
 0x384   :  { %v2176_v11 = vadd.f32 %v2175_v50, %v12912_v52  ;;  %v771_v50 = vld [vmem:[#allocation2 + $0x9a] sm:$0xff] }
 0x385   :  { %v2513_v39 = vpop.f32.mrf.mxu0  ;;  %v2354_v10 = vpop.f32.mrf.mxu3  ;;  %v710_v52 = vld [vmem:[#allocation2 + $0xc1] sm:$0xff] }
 0x386   :  { %v2345_v21 = vadd.f32 %v2344_v62, %v2176_v11  ;;  %v887_v56 = vpack.c.bf16 %v711_v12, %v710_v52  ;;  %v713_v12 = vld [vmem:[#allocation2 + $0xe1] sm:$0xff] }
 0x388   :  { %3068 = vmatmul.bf16.gmra.mxu0 %v861_v59  ;;  %v9185_v35 = vadd.f32 %v2513_v39, %v2345_v21  ;;  %v870_v59 = vpack.c.bf16 %v771_v50, %v770_v41  ;;  %v12916_v21 = vld [vmem:[#allocation25_spill] sm:$0xff] }
 0x389   :  { %v772_v50 = vld [vmem:[#allocation2 + $0xaa] sm:$0xff] }
 0x38a   :  { %12913 = vst [vmem:[#allocation22_spill] sm:$0xff] %v9185_v35 }
 0x38b   :  { %v2177_v13 = vpop.f32.mrf.mxu2 }
 0x38c   :  { %v2178_v14 = vadd.f32 %v2177_v13, %v12914_v8  ;;  %v12918_v8 = vld [vmem:[#allocation26_spill] sm:$0xff] }
 0x38d   :  { %v2515_v7 = vpop.f32.mrf.mxu0  ;;  %v2356_v19 = vpop.f32.mrf.mxu3 }
 0x38e   :  { %v2347_v28 = vadd.f32 %v2346_v1, %v2178_v14  ;;  %v644_v1 = vld [vmem:[#allocation2 + $0xa8] sm:$0xff] }
 0x390   :  { %2735 = vmatmul.bf16.gmra.mxu2 %v868_v60  ;;  %v9188_v24 = vadd.f32 %v2515_v7, %v2347_v28  ;;  %v877_v60 = vpack.c.bf16 %v645_v4, %v644_v1  ;;  %v647_v4 = vld [vmem:[#allocation2 + $0xc8] sm:$0xff] }
 0x392   :  { %12915 = vst [vmem:[#allocation23_spill] sm:$0xff] %v9188_v24  ;;  %2914 = vmatmul.bf16.gmra.mxu3 %v887_v56 }
 0x393   :  { %v2180_v62 = vpop.f32.mrf.mxu2 }
 0x394   :  { %v2181_v11 = vadd.f32 %v2180_v62, %v12916_v21  ;;  %v773_v62 = vld [vmem:[#allocation2 + $0xb2] sm:$0xff] }
 0x395   :  { %v2518_v39 = vpop.f32.mrf.mxu0  ;;  %v2359_v28 = vpop.f32.mrf.mxu3  ;;  %v712_v21 = vld [vmem:[#allocation2 + $0xd9] sm:$0xff] }
 0x396   :  { %v2350_v35 = vadd.f32 %v2349_v22, %v2181_v11  ;;  %v896_v56 = vpack.c.bf16 %v713_v12, %v712_v21  ;;  %v715_v12 = vld [vmem:[#allocation2 + $0xf9] sm:$0xff] }
 0x398   :  { %3073 = vmatmul.bf16.gmra.mxu0 %v870_v59  ;;  %v9191_v29 = vadd.f32 %v2518_v39, %v2350_v35  ;;  %v879_v59 = vpack.c.bf16 %v773_v62, %v772_v50  ;;  %v12920_v35 = vld [vmem:[#allocation27_spill] sm:$0xff] }
 0x399   :  { %v774_v62 = vld [vmem:[#allocation2 + $0xc2] sm:$0xff] }
 0x39a   :  { %12917 = vst [vmem:[#allocation24_spill] sm:$0xff] %v9191_v29 }
 0x39b   :  { %v2182_v13 = vpop.f32.mrf.mxu2 }
 0x39c   :  { %v2183_v14 = vadd.f32 %v2182_v13, %v12918_v8  ;;  %v12922_v8 = vld [vmem:[#allocation28_spill] sm:$0xff] }
 0x39d   :  { %v2520_v7 = vpop.f32.mrf.mxu0  ;;  %v2361_v52 = vpop.f32.mrf.mxu3 }
 0x39e   :  { %v2352_v24 = vadd.f32 %v2351_v16, %v2183_v14  ;;  %v646_v16 = vld [vmem:[#allocation2 + $0xc0] sm:$0xff] }
 0x3a0   :  { %2740 = vmatmul.bf16.gmra.mxu2 %v877_v60  ;;  %v9194_v41 = vadd.f32 %v2520_v7, %v2352_v24  ;;  %v886_v60 = vpack.c.bf16 %v647_v4, %v646_v16  ;;  %v649_v4 = vld [vmem:[#allocation2 + $0xe0] sm:$0xff] }
 0x3a2   :  { %12919 = vst [vmem:[#allocation25_spill] sm:$0xff] %v9194_v41  ;;  %2919 = vmatmul.bf16.gmra.mxu3 %v896_v56 }
 0x3a3   :  { %v2185_v22 = vpop.f32.mrf.mxu2 }
 0x3a4   :  { %v2186_v11 = vadd.f32 %v2185_v22, %v12920_v35  ;;  %v775_v22 = vld [vmem:[#allocation2 + $0xca] sm:$0xff] }
 0x3a5   :  { %v2523_v39 = vpop.f32.mrf.mxu0  ;;  %v2364_v24 = vpop.f32.mrf.mxu3  ;;  %v714_v35 = vld [vmem:[#allocation2 + $0xf1] sm:$0xff] }
 0x3a6   :  { %v2355_v29 = vadd.f32 %v2354_v10, %v2186_v11  ;;  %v905_v56 = vpack.c.bf16 %v715_v12, %v714_v35  ;;  %v717_v12 = vld [vmem:[#allocation2 + $0x111] sm:$0xff] }
 0x3a8   :  { %3078 = vmatmul.bf16.gmra.mxu0 %v879_v59  ;;  %v9197_v1 = vadd.f32 %v2523_v39, %v2355_v29  ;;  %v888_v59 = vpack.c.bf16 %v775_v22, %v774_v62  ;;  %v12924_v29 = vld [vmem:[#allocation29_spill] sm:$0xff]  ;;  %v776_v22 = vld [vmem:[#allocation2 + $0xda] sm:$0xff] }
 0x3aa   :  { %12921 = vst [vmem:[#allocation26_spill] sm:$0xff] %v9197_v1 }
 0x3ab   :  { %v2187_v13 = vpop.f32.mrf.mxu2 }
 0x3ac   :  { %v2188_v14 = vadd.f32 %v2187_v13, %v12922_v8  ;;  %v12926_v8 = vld [vmem:[#allocation30_spill] sm:$0xff] }
 0x3ad   :  { %v2525_v7 = vpop.f32.mrf.mxu0  ;;  %v2366_v21 = vpop.f32.mrf.mxu3 }
 0x3ae   :  { %v2357_v41 = vadd.f32 %v2356_v19, %v2188_v14  ;;  %v648_v19 = vld [vmem:[#allocation2 + $0xd8] sm:$0xff] }
 0x3b0   :  { %2745 = vmatmul.bf16.gmra.mxu2 %v886_v60  ;;  %v9200_v50 = vadd.f32 %v2525_v7, %v2357_v41  ;;  %v895_v60 = vpack.c.bf16 %v649_v4, %v648_v19  ;;  %v651_v4 = vld [vmem:[#allocation2 + $0xf8] sm:$0xff] }
 0x3b2   :  { %12923 = vst [vmem:[#allocation27_spill] sm:$0xff] %v9200_v50  ;;  %2924 = vmatmul.bf16.gmra.mxu3 %v905_v56 }
 0x3b3   :  { %v2190_v10 = vpop.f32.mrf.mxu2 }
 0x3b4   :  { %v2191_v11 = vadd.f32 %v2190_v10, %v12924_v29  ;;  %v777_v10 = vld [vmem:[#allocation2 + $0xe2] sm:$0xff] }
 0x3b5   :  { %v2528_v39 = vpop.f32.mrf.mxu0  ;;  %v2885_v41 = vpop.f32.mrf.mxu3  ;;  %v716_v29 = vld [vmem:[#allocation2 + $0x109] sm:$0xff] }
 0x3b6   :  { %v2360_v1 = vadd.f32 %v2359_v28, %v2191_v11  ;;  %v914_v56 = vpack.c.bf16 %v717_v12, %v716_v29 }
 0x3b8   :  { %3083 = vmatmul.bf16.gmra.mxu0 %v888_v59  ;;  %v9203_v16 = vadd.f32 %v2528_v39, %v2360_v1  ;;  %v897_v59 = vpack.c.bf16 %v777_v10, %v776_v22  ;;  %v12928_v1 = vld [vmem:[#allocation31_spill] sm:$0xff]  ;;  %v778_v10 = vld [vmem:[#allocation2 + $0xf2] sm:$0xff] }
 0x3ba   :  { %12925 = vst [vmem:[#allocation28_spill] sm:$0xff] %v9203_v16 }
 0x3bb   :  { %v2192_v13 = vpop.f32.mrf.mxu2 }
 0x3bc   :  { %v2193_v14 = vadd.f32 %v2192_v13, %v12926_v8  ;;  %v12930_v8 = vld [vmem:[#allocation32_spill] sm:$0xff] }
 0x3bd   :  { %v2530_v7 = vpop.f32.mrf.mxu0  ;;  %v2887_v35 = vpop.f32.mrf.mxu3 }
 0x3be   :  { %v2362_v50 = vadd.f32 %v2361_v52, %v2193_v14  ;;  %v650_v52 = vld [vmem:[#allocation2 + $0xf0] sm:$0xff] }
 0x3c0   :  { %2750 = vmatmul.bf16.gmra.mxu2 %v895_v60  ;;  %v9206_v62 = vadd.f32 %v2530_v7, %v2362_v50  ;;  %v904_v60 = vpack.c.bf16 %v651_v4, %v650_v52  ;;  %v653_v4 = vld [vmem:[#allocation2 + $0x110] sm:$0xff] }
 0x3c2   :  { %12927 = vst [vmem:[#allocation29_spill] sm:$0xff] %v9206_v62  ;;  %2929 = vmatmul.bf16.gmra.mxu3 %v914_v56 }
 0x3c3   :  { %v2195_v28 = vpop.f32.mrf.mxu2 }
 0x3c4   :  { %v2196_v11 = vadd.f32 %v2195_v28, %v12928_v1  ;;  %v779_v28 = vld [vmem:[#allocation2 + $0xfa] sm:$0xff] }
 0x3c5   :  { %v2533_v39 = vpop.f32.mrf.mxu0  ;;  %v2890_v50 = vpop.f32.mrf.mxu3  ;;  %v718_v1 = vld [vmem:[#allocation2 + $0x121] sm:$0xff] }
 0x3c6   :  { %v2365_v16 = vadd.f32 %v2364_v24, %v2196_v11  ;;  %v719_v11 = vld [vmem:[#allocation2 + $0x129] sm:$0xff] }
 0x3c8   :  { %3088 = vmatmul.bf16.gmra.mxu0 %v897_v59  ;;  %v9209_v19 = vadd.f32 %v2533_v39, %v2365_v16  ;;  %v906_v59 = vpack.c.bf16 %v779_v28, %v778_v10  ;;  %v923_v39 = vpack.c.bf16 %v719_v11, %v718_v1  ;;  %v781_v28 = vld [vmem:[#allocation2 + $0x112] sm:$0xff]  ;;  %v721_v11 = vld [vmem:[#allocation2 + $0x141] sm:$0xff] }
 0x3c9   :  { %v720_v1 = vld [vmem:[#allocation2 + $0x139] sm:$0xff] }
 0x3ca   :  { %12929 = vst [vmem:[#allocation30_spill] sm:$0xff] %v9209_v19 }
 0x3cb   :  { %v2197_v13 = vpop.f32.mrf.mxu2 }
 0x3cc   :  { %v2198_v14 = vadd.f32 %v2197_v13, %v12930_v8 }
 0x3cd   :  { %v2535_v7 = vpop.f32.mrf.mxu0  ;;  %v2892_v29 = vpop.f32.mrf.mxu3 }
 0x3ce   :  { %v2367_v62 = vadd.f32 %v2366_v21, %v2198_v14  ;;  %v652_v21 = vld [vmem:[#allocation2 + $0x108] sm:$0xff] }
 0x3cf   :  { %v913_v14 = vpack.c.bf16 %v653_v4, %v652_v21  ;;  %v654_v21 = vld [vmem:[#allocation2 + $0x120] sm:$0xff]  ;;  %v655_v4 = vld [vmem:[#allocation2 + $0x128] sm:$0xff] }
 0x3d0   :  { %2755 = vmatmul.bf16.gmra.mxu2 %v904_v60  ;;  %v9212_v22 = vadd.f32 %v2535_v7, %v2367_v62 }
 0x3d2   :  { %12931 = vst [vmem:[#allocation31_spill] sm:$0xff] %v9212_v22  ;;  %2934 = vmatmul.bf16.gmra.mxu3 %v923_v39  ;;  %v932_v39 = vpack.c.bf16 %v721_v11, %v720_v1 }
 0x3d3   :  { %v2716_v24 = vpop.f32.mrf.mxu2 }
 0x3d4   :  { %v2717_v16 = vadd.f32 %v2716_v24, %v8890_v9  ;;  %v780_v9 = vld [vmem:[#allocation2 + $0x10a] sm:$0xff] }
 0x3d5   :  { %v3054_v12 = vpop.f32.mrf.mxu0  ;;  %v2895_v62 = vpop.f32.mrf.mxu3 }
 0x3d6   :  { %v2886_v56 = vadd.f32 %v2885_v41, %v2717_v16 }
 0x3d8   :  { %3093 = vmatmul.bf16.gmra.mxu0 %v906_v59  ;;  %v9215_v52 = vadd.f32 %v3054_v12, %v2886_v56  ;;  %v915_v59 = vpack.c.bf16 %v781_v28, %v780_v9  ;;  %v782_v28 = vld [vmem:[#allocation2 + $0x122] sm:$0xff] }
 0x3db   :  { %v2718_v13 = vpop.f32.mrf.mxu2 }
 0x3dc   :  { %v2719_v8 = vadd.f32 %v2718_v13, %v8895_v23  ;;  %v7990_v23 = vld [vmem:[%s12684_s5 + $0x38] sm:$0xff] }
 0x3dd   :  { %v3056_v60 = vpop.f32.mrf.mxu0  ;;  %v2897_v24 = vpop.f32.mrf.mxu3  ;;  %5203 = vmatpush.bf16.msra.mxu1 %v7990_v23 }
 0x3de   :  { %v2888_v7 = vadd.f32 %v2887_v35, %v2719_v8 }
 0x3e0   :  { %v9218_v10 = vadd.f32 %v3056_v60, %v2888_v7  ;;  %2760 = vmatmul.bf16.gmra.mxu2 %v913_v14 }
 0x3e2   :  { %12932 = vst [vmem:[#allocation32_spill] sm:$0xff] %v9218_v10  ;;  %2939 = vmatmul.bf16.gmra.mxu3 %v932_v39 }
 0x3e3   :  { %v2721_v41 = vpop.f32.mrf.mxu2 }
 0x3e4   :  { %v2722_v16 = vadd.f32 %v2721_v41, %v8899_v31  ;;  %v922_v31 = vpack.c.bf16 %v655_v4, %v654_v21  ;;  %v783_v41 = vld [vmem:[#allocation2 + $0x12a] sm:$0xff]  ;;  %v657_v21 = vld [vmem:[#allocation2 + $0x140] sm:$0xff] }
 0x3e5   :  { %v3059_v12 = vpop.f32.mrf.mxu0  ;;  %v2900_v13 = vpop.f32.mrf.mxu3 }
 0x3e6   :  { %v2891_v56 = vadd.f32 %v2890_v50, %v2722_v16  ;;  %v722_v16 = vld [vmem:[#allocation2 + $0x151] sm:$0xff] }
 0x3e8   :  { %3098 = vmatmul.bf16.gmra.mxu0 %v915_v59  ;;  %v9224_v35 = vadd.f32 %v3059_v12, %v2891_v56  ;;  %v924_v59 = vpack.c.bf16 %v783_v41, %v782_v28  ;;  %v723_v12 = vld [vmem:[#allocation2 + $0x159] sm:$0xff]  ;;  %v785_v41 = vld [vmem:[#allocation2 + $0x142] sm:$0xff] }
 0x3e9   :  { %v941_v23 = vpack.c.bf16 %v723_v12, %v722_v16  ;;  %v724_v16 = vld [vmem:[#allocation2 + $0x169] sm:$0xff]  ;;  %v725_v12 = vld [vmem:[#allocation2 + $0x171] sm:$0xff] }
 0x3ea   :  { %12933 = vst [vmem:[#allocation35_spill] sm:$0xff] %v9224_v35 }
 0x3eb   :  { %v2723_v8 = vpop.f32.mrf.mxu2 }
 0x3ec   :  { %v2724_v14 = vadd.f32 %v2723_v8, %v8904_v54 }
 0x3ed   :  { %v3061_v60 = vpop.f32.mrf.mxu0  ;;  %v2902_v50 = vpop.f32.mrf.mxu3 }
 0x3ee   :  { %v2893_v7 = vadd.f32 %v2892_v29, %v2724_v14  ;;  %v656_v29 = vld [vmem:[#allocation2 + $0x138] sm:$0xff] }
 0x3f0   :  { %v9227_v9 = vadd.f32 %v3061_v60, %v2893_v7  ;;  %2765 = vmatmul.bf16.gmra.mxu2 %v922_v31  ;;  %v931_v31 = vpack.c.bf16 %v657_v21, %v656_v29  ;;  %v659_v29 = vld [vmem:[#allocation2 + $0x158] sm:$0xff] }
 0x3f2   :  { %12934 = vst [vmem:[#allocation36_spill] sm:$0xff] %v9227_v9  ;;  %2944 = vmatmul.bf16.gmra.mxu3 %v941_v23  ;;  %v950_v23 = vpack.c.bf16 %v725_v12, %v724_v16  ;;  %v726_v16 = vld [vmem:[#allocation2 + $0x181] sm:$0xff]  ;;  %v727_v12 = vld [vmem:[#allocation2 + $0x189] sm:$0xff] }
 0x3f3   :  { %v2726_v1 = vpop.f32.mrf.mxu2 }
 0x3f4   :  { %v2727_v11 = vadd.f32 %v2726_v1, %v8914_v57  ;;  %v784_v57 = vld [vmem:[#allocation2 + $0x13a] sm:$0xff] }
 0x3f5   :  { %v3064_v39 = vpop.f32.mrf.mxu0  ;;  %v2905_v4 = vpop.f32.mrf.mxu3 }
 0x3f6   :  { %v2896_v56 = vadd.f32 %v2895_v62, %v2727_v11 }
 0x3f8   :  { %3103 = vmatmul.bf16.gmra.mxu0 %v924_v59  ;;  %v9230_v54 = vadd.f32 %v3064_v39, %v2896_v56  ;;  %v933_v59 = vpack.c.bf16 %v785_v41, %v784_v57  ;;  %v787_v41 = vld [vmem:[#allocation2 + $0x15a] sm:$0xff] }
 0x3fb   :  { %v2728_v8 = vpop.f32.mrf.mxu2 }
 0x3fc   :  { %v2729_v14 = vadd.f32 %v2728_v8, %v8923_v20 }
 0x3fd   :  { %v3066_v60 = vpop.f32.mrf.mxu0  ;;  %v2907_v1 = vpop.f32.mrf.mxu3 }
 0x3fe   :  { %v2898_v7 = vadd.f32 %v2897_v24, %v2729_v14  ;;  %v658_v24 = vld [vmem:[#allocation2 + $0x150] sm:$0xff] }
 0x400   :  { %v9233_v28 = vadd.f32 %v3066_v60, %v2898_v7  ;;  %2770 = vmatmul.bf16.gmra.mxu2 %v931_v31  ;;  %v940_v31 = vpack.c.bf16 %v659_v29, %v658_v24  ;;  %v661_v24 = vld [vmem:[#allocation2 + $0x170] sm:$0xff] }
 0x402   :  { %12935 = vst [vmem:[#allocation37_spill] sm:$0xff] %v9233_v28  ;;  %2949 = vmatmul.bf16.gmra.mxu3 %v950_v23  ;;  %v959_v23 = vpack.c.bf16 %v727_v12, %v726_v16  ;;  %v728_v16 = vld [vmem:[#allocation2 + $0x199] sm:$0xff] }
 0x403   :  { %v2731_v62 = vpop.f32.mrf.mxu2 }
 0x404   :  { %v2732_v11 = vadd.f32 %v2731_v62, %v8927_v43  ;;  %v786_v43 = vld [vmem:[#allocation2 + $0x152] sm:$0xff] }
 0x405   :  { %v3069_v39 = vpop.f32.mrf.mxu0  ;;  %v2910_v21 = vpop.f32.mrf.mxu3 }
 0x406   :  { %v2901_v56 = vadd.f32 %v2900_v13, %v2732_v11 }
 0x408   :  { %3108 = vmatmul.bf16.gmra.mxu0 %v933_v59  ;;  %v9236_v20 = vadd.f32 %v3069_v39, %v2901_v56  ;;  %v942_v59 = vpack.c.bf16 %v787_v41, %v786_v43  ;;  %v789_v41 = vld [vmem:[#allocation2 + $0x172] sm:$0xff] }
 0x40b   :  { %v2733_v8 = vpop.f32.mrf.mxu2 }
 0x40c   :  { %v2734_v14 = vadd.f32 %v2733_v8, %v8933_v58 }
 0x40d   :  { %v3071_v60 = vpop.f32.mrf.mxu0  ;;  %v2912_v62 = vpop.f32.mrf.mxu3 }
 0x40e   :  { %v2903_v7 = vadd.f32 %v2902_v50, %v2734_v14  ;;  %v660_v50 = vld [vmem:[#allocation2 + $0x168] sm:$0xff]  ;;  %v12936_v14 = vld [vmem:[#allocation33_spill] sm:$0xff] }
 0x410   :  { %v9239_v57 = vadd.f32 %v3071_v60, %v2903_v7  ;;  %2775 = vmatmul.bf16.gmra.mxu2 %v940_v31  ;;  %v949_v60 = vpack.c.bf16 %v661_v24, %v660_v50  ;;  %v663_v24 = vld [vmem:[#allocation2 + $0x188] sm:$0xff] }
 0x412   :  { %2954 = vmatmul.bf16.gmra.mxu3 %v959_v23 }
 0x413   :  { %v2736_v13 = vpop.f32.mrf.mxu2 }
 0x414   :  { %v2737_v11 = vadd.f32 %v2736_v13, %v8937_v5  ;;  %v788_v5 = vld [vmem:[#allocation2 + $0x16a] sm:$0xff] }
 0x415   :  { %v3074_v39 = vpop.f32.mrf.mxu0  ;;  %v2915_v29 = vpop.f32.mrf.mxu3 }
 0x416   :  { %v2906_v56 = vadd.f32 %v2905_v4, %v2737_v11  ;;  %v951_v11 = vpack.c.bf16 %v789_v41, %v788_v5  ;;  %v790_v41 = vld [vmem:[#allocation2 + $0x182] sm:$0xff] }
 0x418   :  { %3113 = vmatmul.bf16.gmra.mxu0 %v942_v59  ;;  %v9242_v58 = vadd.f32 %v3074_v39, %v2906_v56  ;;  %v729_v59 = vld [vmem:[#allocation2 + $0x1a1] sm:$0xff]  ;;  %v7989_v56 = vld [vmem:[%s12684_s5 + $0x30] sm:$0xff] }
 0x419   :  { %v968_v39 = vpack.c.bf16 %v729_v59, %v728_v16  ;;  %5204 = vmatpush.bf16.msra.mxu1 %v7989_v56  ;;  %v730_v59 = vld [vmem:[#allocation2 + $0x1e1] sm:$0xff] }
 0x41b   :  { %v2738_v8 = vpop.f32.mrf.mxu2 }
 0x41c   :  { %v2739_v31 = vadd.f32 %v2738_v8, %v12936_v14 }
 0x41d   :  { %v3076_v7 = vpop.f32.mrf.mxu0  ;;  %v2917_v13 = vpop.f32.mrf.mxu3 }
 0x41e   :  { %v2908_v22 = vadd.f32 %v2907_v1, %v2739_v31  ;;  %v662_v1 = vld [vmem:[#allocation2 + $0x180] sm:$0xff] }
 0x420   :  { %v9245_v43 = vadd.f32 %v3076_v7, %v2908_v22  ;;  %2780 = vmatmul.bf16.gmra.mxu2 %v949_v60  ;;  %v958_v60 = vpack.c.bf16 %v663_v24, %v662_v1 }
 0x422   :  { %2959 = vmatmul.bf16.gmra.mxu3 %v968_v39  ;;  %v731_v39 = vld [vmem:[#allocation2 + $0x1e9] sm:$0xff] }
 0x423   :  { %v2741_v4 = vpop.f32.mrf.mxu2  ;;  %v977_v56 = vpack.c.bf16 %v731_v39, %v730_v59  ;;  %v732_v59 = vld [vmem:[#allocation2 + $0x1f9] sm:$0xff]  ;;  %v733_v39 = vld [vmem:[#allocation2 + $0x201] sm:$0xff] }
 0x424   :  { %v2742_v12 = vadd.f32 %v2741_v4, %v8959_v2  ;;  %v791_v4 = vld [vmem:[#allocation2 + $0x18a] sm:$0xff] }
 0x425   :  { %v3079_v23 = vpop.f32.mrf.mxu0  ;;  %v2920_v8 = vpop.f32.mrf.mxu3 }
 0x426   :  { %v2911_v50 = vadd.f32 %v2910_v21, %v2742_v12 }
 0x428   :  { %3118 = vmatmul.bf16.gmra.mxu0 %v951_v11  ;;  %v9251_v22 = vadd.f32 %v3079_v23, %v2911_v50  ;;  %v960_v11 = vpack.c.bf16 %v791_v4, %v790_v41  ;;  %v792_v41 = vld [vmem:[#allocation2 + $0x19a] sm:$0xff] }
 0x42a   :  { %12937 = vst [vmem:[#allocation33_spill] sm:$0xff] %v9251_v22 }
 0x42b   :  { %v2743_v14 = vpop.f32.mrf.mxu2 }
 0x42c   :  { %v2744_v31 = vadd.f32 %v2743_v14, %v8963_v55 }
 0x42d   :  { %v3081_v2 = vpop.f32.mrf.mxu0  ;;  %v2922_v21 = vpop.f32.mrf.mxu3 }
 0x42e   :  { %v2913_v7 = vadd.f32 %v2912_v62, %v2744_v31  ;;  %v664_v62 = vld [vmem:[#allocation2 + $0x198] sm:$0xff] }
 0x42f   :  { %v9260_v31 = vld [vmem:[#allocation2 + $0x1b8] sm:$0xff] }
 0x430   :  { %v9254_v5 = vadd.f32 %v3081_v2, %v2913_v7  ;;  %2785 = vmatmul.bf16.gmra.mxu2 %v958_v60  ;;  %v967_v60 = vpack.c.bf16 %v9260_v31, %v664_v62  ;;  %v667_v62 = vld [vmem:[#allocation2 + $0x1e8] sm:$0xff] }
 0x432   :  { %12938 = vst [vmem:[#allocation38_spill] sm:$0xff] %v9254_v5  ;;  %2964 = vmatmul.bf16.gmra.mxu3 %v977_v56 }
 0x433   :  { %v2746_v16 = vpop.f32.mrf.mxu2 }
 0x434   :  { %v2747_v12 = vadd.f32 %v2746_v16, %v8972_v3 }
 0x435   :  { %v3084_v23 = vpop.f32.mrf.mxu0  ;;  %v2925_v1 = vpop.f32.mrf.mxu3 }
 0x436   :  { %v2916_v50 = vadd.f32 %v2915_v29, %v2747_v12  ;;  %v793_v29 = vld [vmem:[#allocation2 + $0x1a2] sm:$0xff] }
 0x438   :  { %3123 = vmatmul.bf16.gmra.mxu0 %v960_v11  ;;  %v9257_v55 = vadd.f32 %v3084_v23, %v2916_v50  ;;  %v969_v11 = vpack.c.bf16 %v793_v29, %v792_v41  ;;  %v795_v29 = vld [vmem:[#allocation2 + $0x1ea] sm:$0xff] }
 0x43a   :  { %12939 = vst [vmem:[#allocation39_spill] sm:$0xff] %v9257_v55 }
 0x43b   :  { %v2748_v24 = vpop.f32.mrf.mxu2 }
 0x43c   :  { %v2749_v14 = vadd.f32 %v2748_v24, %v8979_v18  ;;  %v986_v18 = vpack.c.bf16 %v733_v39, %v732_v59  ;;  %v734_v59 = vld [vmem:[#allocation2 + $0x211] sm:$0xff]  ;;  %v735_v39 = vld [vmem:[#allocation2 + $0x219] sm:$0xff] }
 0x43d   :  { %v3086_v2 = vpop.f32.mrf.mxu0  ;;  %v2927_v4 = vpop.f32.mrf.mxu3 }
 0x43e   :  { %v2918_v7 = vadd.f32 %v2917_v13, %v2749_v14  ;;  %v666_v13 = vld [vmem:[#allocation2 + $0x1e0] sm:$0xff] }
 0x440   :  { %v9263_v3 = vadd.f32 %v3086_v2, %v2918_v7  ;;  %2790 = vmatmul.bf16.gmra.mxu2 %v967_v60  ;;  %v976_v2 = vpack.c.bf16 %v667_v62, %v666_v13 }
 0x442   :  { %12940 = vst [vmem:[#allocation40_spill] sm:$0xff] %v9263_v3  ;;  %2969 = vmatmul.bf16.gmra.mxu3 %v986_v18  ;;  %v995_v18 = vpack.c.bf16 %v735_v39, %v734_v59  ;;  %v736_v59 = vld [vmem:[#allocation2 + $0x229] sm:$0xff]  ;;  %v737_v39 = vld [vmem:[#allocation2 + $0x231] sm:$0xff] }
 0x443   :  { %v2751_v16 = vpop.f32.mrf.mxu2 }
 0x444   :  { %v2752_v12 = vadd.f32 %v2751_v16, %v8984_v34  ;;  %v794_v34 = vld [vmem:[#allocation2 + $0x1e2] sm:$0xff] }
 0x445   :  { %v3089_v23 = vpop.f32.mrf.mxu0  ;;  %v2930_v24 = vpop.f32.mrf.mxu3 }
 0x446   :  { %v2921_v56 = vadd.f32 %v2920_v8, %v2752_v12 }
 0x448   :  { %3128 = vmatmul.bf16.gmra.mxu0 %v969_v11  ;;  %v9266_v50 = vadd.f32 %v3089_v23, %v2921_v56  ;;  %v978_v11 = vpack.c.bf16 %v795_v29, %v794_v34  ;;  %v797_v29 = vld [vmem:[#allocation2 + $0x202] sm:$0xff] }
 0x44a   :  { %12941 = vst [vmem:[#allocation41_spill] sm:$0xff] %v9266_v50 }
 0x44b   :  { %v2753_v14 = vpop.f32.mrf.mxu2 }
 0x44c   :  { %v2754_v60 = vadd.f32 %v2753_v14, %v8987_v36 }
 0x44d   :  { %v3091_v7 = vpop.f32.mrf.mxu0  ;;  %v2932_v16 = vpop.f32.mrf.mxu3 }
 0x44e   :  { %v2923_v19 = vadd.f32 %v2922_v21, %v2754_v60  ;;  %v668_v21 = vld [vmem:[#allocation2 + $0x1f8] sm:$0xff] }
 0x450   :  { %v9269_v41 = vadd.f32 %v3091_v7, %v2923_v19  ;;  %2795 = vmatmul.bf16.gmra.mxu2 %v976_v2  ;;  %v669_v19 = vld [vmem:[#allocation2 + $0x200] sm:$0xff] }
 0x451   :  { %v985_v60 = vpack.c.bf16 %v669_v19, %v668_v21  ;;  %v670_v21 = vld [vmem:[#allocation2 + $0x210] sm:$0xff]  ;;  %v671_v19 = vld [vmem:[#allocation2 + $0x218] sm:$0xff] }
 0x452   :  { %12942 = vst [vmem:[#allocation42_spill] sm:$0xff] %v9269_v41  ;;  %2974 = vmatmul.bf16.gmra.mxu3 %v995_v18  ;;  %v1004_v18 = vpack.c.bf16 %v737_v39, %v736_v59 }
 0x453   :  { %v2756_v8 = vpop.f32.mrf.mxu2 }
 0x454   :  { %v2757_v12 = vadd.f32 %v2756_v8, %v8990_v15  ;;  %v796_v15 = vld [vmem:[#allocation2 + $0x1fa] sm:$0xff] }
 0x455   :  { %v3094_v23 = vpop.f32.mrf.mxu0  ;;  %v2935_v13 = vpop.f32.mrf.mxu3 }
 0x456   :  { %v2926_v56 = vadd.f32 %v2925_v1, %v2757_v12 }
 0x458   :  { %3133 = vmatmul.bf16.gmra.mxu0 %v978_v11  ;;  %v9272_v36 = vadd.f32 %v3094_v23, %v2926_v56  ;;  %v987_v11 = vpack.c.bf16 %v797_v29, %v796_v15  ;;  %v798_v29 = vld [vmem:[#allocation2 + $0x212] sm:$0xff] }
 0x45a   :  { %12943 = vst [vmem:[#allocation43_spill] sm:$0xff] %v9272_v36 }
 0x45b   :  { %v2758_v62 = vpop.f32.mrf.mxu2 }
 0x45c   :  { %v2759_v14 = vadd.f32 %v2758_v62, %v8995_v32  ;;  %v7988_v32 = vld [vmem:[%s12684_s5 + $0x28] sm:$0xff] }
 0x45d   :  { %v3096_v2 = vpop.f32.mrf.mxu0  ;;  %v2937_v8 = vpop.f32.mrf.mxu3  ;;  %5205 = vmatpush.bf16.msra.mxu1 %v7988_v32 }
 0x45e   :  { %v2928_v7 = vadd.f32 %v2927_v4, %v2759_v14 }
 0x460   :  { %v9275_v34 = vadd.f32 %v3096_v2, %v2928_v7  ;;  %2800 = vmatmul.bf16.gmra.mxu2 %v985_v60 }
 0x462   :  { %12944 = vst [vmem:[#allocation44_spill] sm:$0xff] %v9275_v34  ;;  %2979 = vmatmul.bf16.gmra.mxu3 %v1004_v18 }
 0x463   :  { %v2761_v1 = vpop.f32.mrf.mxu2 }
 0x464   :  { %v2762_v12 = vadd.f32 %v2761_v1, %v8999_v33  ;;  %v994_v33 = vpack.c.bf16 %v671_v19, %v670_v21  ;;  %v799_v1 = vld [vmem:[#allocation2 + $0x21a] sm:$0xff]  ;;  %v673_v21 = vld [vmem:[#allocation2 + $0x230] sm:$0xff] }
 0x465   :  { %v3099_v23 = vpop.f32.mrf.mxu0  ;;  %v2940_v62 = vpop.f32.mrf.mxu3 }
 0x466   :  { %v2931_v56 = vadd.f32 %v2930_v24, %v2762_v12  ;;  %v738_v12 = vld [vmem:[#allocation2 + $0x241] sm:$0xff] }
 0x468   :  { %3138 = vmatmul.bf16.gmra.mxu0 %v987_v11  ;;  %v9281_v4 = vadd.f32 %v3099_v23, %v2931_v56  ;;  %v996_v11 = vpack.c.bf16 %v799_v1, %v798_v29  ;;  %v739_v23 = vld [vmem:[#allocation2 + $0x249] sm:$0xff]  ;;  %v801_v1 = vld [vmem:[#allocation2 + $0x232] sm:$0xff] }
 0x469   :  { %v1013_v32 = vpack.c.bf16 %v739_v23, %v738_v12  ;;  %v740_v12 = vld [vmem:[#allocation2 + $0x259] sm:$0xff]  ;;  %v741_v23 = vld [vmem:[#allocation2 + $0x261] sm:$0xff] }
 0x46a   :  { %12945 = vst [vmem:[#allocation45_spill] sm:$0xff] %v9281_v4 }
 0x46b   :  { %v2763_v14 = vpop.f32.mrf.mxu2 }
 0x46c   :  { %v2764_v60 = vadd.f32 %v2763_v14, %v9004_v51 }
 0x46d   :  { %v3101_v2 = vpop.f32.mrf.mxu0  ;;  %v2942_v24 = vpop.f32.mrf.mxu3 }
 0x46e   :  { %v2933_v7 = vadd.f32 %v2932_v16, %v2764_v60  ;;  %v672_v16 = vld [vmem:[#allocation2 + $0x228] sm:$0xff] }
 0x470   :  { %v9284_v15 = vadd.f32 %v3101_v2, %v2933_v7  ;;  %2805 = vmatmul.bf16.gmra.mxu2 %v994_v33  ;;  %v1003_v33 = vpack.c.bf16 %v673_v21, %v672_v16  ;;  %v675_v16 = vld [vmem:[#allocation2 + $0x248] sm:$0xff] }
 0x472   :  { %12946 = vst [vmem:[#allocation46_spill] sm:$0xff] %v9284_v15  ;;  %2984 = vmatmul.bf16.gmra.mxu3 %v1013_v32  ;;  %v1022_v32 = vpack.c.bf16 %v741_v23, %v740_v12  ;;  %v742_v12 = vld [vmem:[#allocation2 + $0x271] sm:$0xff]  ;;  %v743_v23 = vld [vmem:[#allocation2 + $0x279] sm:$0xff] }
 0x473   :  { %v2766_v59 = vpop.f32.mrf.mxu2 }
 0x474   :  { %v2767_v39 = vadd.f32 %v2766_v59, %v9014_v38  ;;  %v800_v38 = vld [vmem:[#allocation2 + $0x22a] sm:$0xff] }
 0x475   :  { %v3104_v18 = vpop.f32.mrf.mxu0  ;;  %v2945_v19 = vpop.f32.mrf.mxu3 }
 0x476   :  { %v2936_v56 = vadd.f32 %v2935_v13, %v2767_v39 }
 0x478   :  { %3143 = vmatmul.bf16.gmra.mxu0 %v996_v11  ;;  %v9287_v51 = vadd.f32 %v3104_v18, %v2936_v56  ;;  %v1005_v11 = vpack.c.bf16 %v801_v1, %v800_v38  ;;  %v803_v1 = vld [vmem:[#allocation2 + $0x24a] sm:$0xff] }
 0x47a   :  { %12947 = vst [vmem:[#allocation47_spill] sm:$0xff] %v9287_v51 }
 0x47b   :  { %v2768_v14 = vpop.f32.mrf.mxu2 }
 0x47c   :  { %v2769_v60 = vadd.f32 %v2768_v14, %v9021_v61 }
 0x47d   :  { %v3106_v2 = vpop.f32.mrf.mxu0  ;;  %v2947_v59 = vpop.f32.mrf.mxu3 }
 0x47e   :  { %v2938_v7 = vadd.f32 %v2937_v8, %v2769_v60  ;;  %v674_v8 = vld [vmem:[#allocation2 + $0x240] sm:$0xff] }
 0x480   :  { %v9290_v29 = vadd.f32 %v3106_v2, %v2938_v7  ;;  %2810 = vmatmul.bf16.gmra.mxu2 %v1003_v33  ;;  %v1012_v33 = vpack.c.bf16 %v675_v16, %v674_v8  ;;  %v677_v8 = vld [vmem:[#allocation2 + $0x260] sm:$0xff] }
 0x482   :  { %12948 = vst [vmem:[#allocation48_spill] sm:$0xff] %v9290_v29  ;;  %2989 = vmatmul.bf16.gmra.mxu3 %v1022_v32  ;;  %v1031_v32 = vpack.c.bf16 %v743_v23, %v742_v12  ;;  %v744_v12 = vld [vmem:[#allocation2 + $0x289] sm:$0xff]  ;;  %v745_v23 = vld [vmem:[#allocation2 + $0x291] sm:$0xff] }
 0x483   :  { %v2771_v13 = vpop.f32.mrf.mxu2 }
 0x484   :  { %v2772_v39 = vadd.f32 %v2771_v13, %v9024_v27  ;;  %v802_v27 = vld [vmem:[#allocation2 + $0x242] sm:$0xff] }
 0x485   :  { %v3109_v18 = vpop.f32.mrf.mxu0  ;;  %v2950_v21 = vpop.f32.mrf.mxu3 }
 0x486   :  { %v2941_v56 = vadd.f32 %v2940_v62, %v2772_v39 }
 0x488   :  { %3148 = vmatmul.bf16.gmra.mxu0 %v1005_v11  ;;  %v9293_v61 = vadd.f32 %v3109_v18, %v2941_v56  ;;  %v1014_v11 = vpack.c.bf16 %v803_v1, %v802_v27  ;;  %v805_v1 = vld [vmem:[#allocation2 + $0x262] sm:$0xff] }
 0x48a   :  { %12949 = vst [vmem:[#allocation49_spill] sm:$0xff] %v9293_v61 }
 0x48b   :  { %v2773_v14 = vpop.f32.mrf.mxu2 }
 0x48c   :  { %v2774_v60 = vadd.f32 %v2773_v14, %v9028_v40 }
 0x48d   :  { %v3111_v2 = vpop.f32.mrf.mxu0  ;;  %v2952_v13 = vpop.f32.mrf.mxu3 }
 0x48e   :  { %v2943_v7 = vadd.f32 %v2942_v24, %v2774_v60  ;;  %v676_v24 = vld [vmem:[#allocation2 + $0x258] sm:$0xff] }
 0x490   :  { %v9296_v38 = vadd.f32 %v3111_v2, %v2943_v7  ;;  %2815 = vmatmul.bf16.gmra.mxu2 %v1012_v33  ;;  %v1021_v33 = vpack.c.bf16 %v677_v8, %v676_v24  ;;  %v678_v24 = vld [vmem:[#allocation2 + $0x270] sm:$0xff]  ;;  %v679_v8 = vld [vmem:[#allocation2 + $0x278] sm:$0xff] }
 0x492   :  { %12950 = vst [vmem:[#allocation50_spill] sm:$0xff] %v9296_v38  ;;  %2994 = vmatmul.bf16.gmra.mxu3 %v1031_v32  ;;  %v1040_v32 = vpack.c.bf16 %v745_v23, %v744_v12 }
 0x493   :  { %v2776_v62 = vpop.f32.mrf.mxu2 }
 0x494   :  { %v2777_v39 = vadd.f32 %v2776_v62, %v9031_v49  ;;  %v804_v49 = vld [vmem:[#allocation2 + $0x25a] sm:$0xff] }
 0x495   :  { %v3114_v18 = vpop.f32.mrf.mxu0  ;;  %v2955_v16 = vpop.f32.mrf.mxu3 }
 0x496   :  { %v2946_v56 = vadd.f32 %v2945_v19, %v2777_v39 }
 0x498   :  { %3153 = vmatmul.bf16.gmra.mxu0 %v1014_v11  ;;  %v9299_v40 = vadd.f32 %v3114_v18, %v2946_v56  ;;  %v1023_v11 = vpack.c.bf16 %v805_v1, %v804_v49  ;;  %v806_v1 = vld [vmem:[#allocation2 + $0x272] sm:$0xff] }
 0x49a   :  { %12951 = vst [vmem:[#allocation51_spill] sm:$0xff] %v9299_v40 }
 0x49b   :  { %v2778_v14 = vpop.f32.mrf.mxu2 }
 0x49c   :  { %v2779_v60 = vadd.f32 %v2778_v14, %v9036_v17  ;;  %v7987_v17 = vld [vmem:[%s12684_s5 + $0x20] sm:$0xff] }
 0x49d   :  { %v3116_v2 = vpop.f32.mrf.mxu0  ;;  %v2957_v62 = vpop.f32.mrf.mxu3  ;;  %5206 = vmatpush.bf16.msra.mxu1 %v7987_v17 }
 0x49e   :  { %v2948_v7 = vadd.f32 %v2947_v59, %v2779_v60 }
 0x4a0   :  { %v9302_v27 = vadd.f32 %v3116_v2, %v2948_v7  ;;  %2820 = vmatmul.bf16.gmra.mxu2 %v1021_v33 }
 0x4a2   :  { %12952 = vst [vmem:[#allocation52_spill] sm:$0xff] %v9302_v27  ;;  %2999 = vmatmul.bf16.gmra.mxu3 %v1040_v32 }
 0x4a3   :  { %v2781_v19 = vpop.f32.mrf.mxu2 }
 0x4a4   :  { %v2782_v39 = vadd.f32 %v2781_v19, %v9040_v53  ;;  %v1030_v53 = vpack.c.bf16 %v679_v8, %v678_v24  ;;  %v807_v19 = vld [vmem:[#allocation2 + $0x27a] sm:$0xff]  ;;  %v681_v24 = vld [vmem:[#allocation2 + $0x290] sm:$0xff] }
 0x4a5   :  { %v3119_v18 = vpop.f32.mrf.mxu0  ;;  %v2960_v14 = vpop.f32.mrf.mxu3 }
 0x4a6   :  { %v2951_v56 = vadd.f32 %v2950_v21, %v2782_v39  ;;  %v746_v39 = vld [vmem:[#allocation2 + $0x2a1] sm:$0xff] }
 0x4a8   :  { %3158 = vmatmul.bf16.gmra.mxu0 %v1023_v11  ;;  %v9308_v59 = vadd.f32 %v3119_v18, %v2951_v56  ;;  %v1032_v11 = vpack.c.bf16 %v807_v19, %v806_v1  ;;  %v747_v18 = vld [vmem:[#allocation2 + $0x2a9] sm:$0xff]  ;;  %v809_v19 = vld [vmem:[#allocation2 + $0x292] sm:$0xff] }
 0x4a9   :  { %v1049_v17 = vpack.c.bf16 %v747_v18, %v746_v39  ;;  %v748_v39 = vld [vmem:[#allocation2 + $0x2b9] sm:$0xff]  ;;  %v749_v18 = vld [vmem:[#allocation2 + $0x2c1] sm:$0xff] }
 0x4aa   :  { %12953 = vst [vmem:[#allocation53_spill] sm:$0xff] %v9308_v59 }
 0x4ab   :  { %v2783_v60 = vpop.f32.mrf.mxu2 }
 0x4ac   :  { %v2784_v33 = vadd.f32 %v2783_v60, %v9045_v25 }
 0x4ad   :  { %v3121_v2 = vpop.f32.mrf.mxu0  ;;  %v2962_v21 = vpop.f32.mrf.mxu3 }
 0x4ae   :  { %v2953_v7 = vadd.f32 %v2952_v13, %v2784_v33  ;;  %v680_v13 = vld [vmem:[#allocation2 + $0x288] sm:$0xff] }
 0x4b0   :  { %v9311_v49 = vadd.f32 %v3121_v2, %v2953_v7  ;;  %2825 = vmatmul.bf16.gmra.mxu2 %v1030_v53  ;;  %v1039_v53 = vpack.c.bf16 %v681_v24, %v680_v13  ;;  %v683_v13 = vld [vmem:[#allocation2 + $0x2a8] sm:$0xff] }
 0x4b2   :  { %12954 = vst [vmem:[#allocation54_spill] sm:$0xff] %v9311_v49  ;;  %3004 = vmatmul.bf16.gmra.mxu3 %v1049_v17  ;;  %v1058_v17 = vpack.c.bf16 %v749_v18, %v748_v39  ;;  %v750_v39 = vld [vmem:[#allocation2 + $0x2d1] sm:$0xff]  ;;  %v751_v18 = vld [vmem:[#allocation2 + $0x2d9] sm:$0xff] }
 0x4b3   :  { %v2786_v12 = vpop.f32.mrf.mxu2 }
 0x4b4   :  { %v2787_v23 = vadd.f32 %v2786_v12, %v9055_v30  ;;  %v808_v30 = vld [vmem:[#allocation2 + $0x28a] sm:$0xff] }
 0x4b5   :  { %v3124_v32 = vpop.f32.mrf.mxu0  ;;  %v2965_v8 = vpop.f32.mrf.mxu3 }
 0x4b6   :  { %v2956_v56 = vadd.f32 %v2955_v16, %v2787_v23 }
 0x4b8   :  { %3163 = vmatmul.bf16.gmra.mxu0 %v1032_v11  ;;  %v9314_v25 = vadd.f32 %v3124_v32, %v2956_v56  ;;  %v1041_v11 = vpack.c.bf16 %v809_v19, %v808_v30  ;;  %v811_v19 = vld [vmem:[#allocation2 + $0x2aa] sm:$0xff] }
 0x4ba   :  { %12955 = vst [vmem:[#allocation55_spill] sm:$0xff] %v9314_v25 }
 0x4bb   :  { %v2788_v60 = vpop.f32.mrf.mxu2 }
 0x4bc   :  { %v2789_v33 = vadd.f32 %v2788_v60, %v9062_v45 }
 0x4bd   :  { %v3126_v2 = vpop.f32.mrf.mxu0  ;;  %v2967_v12 = vpop.f32.mrf.mxu3 }
 0x4be   :  { %v2958_v7 = vadd.f32 %v2957_v62, %v2789_v33  ;;  %v682_v62 = vld [vmem:[#allocation2 + $0x2a0] sm:$0xff] }
 0x4c0   :  { %v9317_v1 = vadd.f32 %v3126_v2, %v2958_v7  ;;  %2830 = vmatmul.bf16.gmra.mxu2 %v1039_v53  ;;  %v1048_v53 = vpack.c.bf16 %v683_v13, %v682_v62  ;;  %v685_v62 = vld [vmem:[#allocation2 + $0x2c0] sm:$0xff] }
 0x4c2   :  { %12956 = vst [vmem:[#allocation56_spill] sm:$0xff] %v9317_v1  ;;  %3009 = vmatmul.bf16.gmra.mxu3 %v1058_v17  ;;  %v1067_v17 = vpack.c.bf16 %v751_v18, %v750_v39  ;;  %v752_v39 = vld [vmem:[#allocation2 + $0x2e9] sm:$0xff]  ;;  %v753_v18 = vld [vmem:[#allocation2 + $0x2f1] sm:$0xff] }
 0x4c3   :  { %v2791_v16 = vpop.f32.mrf.mxu2 }
 0x4c4   :  { %v2792_v23 = vadd.f32 %v2791_v16, %v9065_v37  ;;  %v810_v37 = vld [vmem:[#allocation2 + $0x2a2] sm:$0xff] }
 0x4c5   :  { %v3129_v32 = vpop.f32.mrf.mxu0  ;;  %v2970_v24 = vpop.f32.mrf.mxu3 }
 0x4c6   :  { %v2961_v56 = vadd.f32 %v2960_v14, %v2792_v23 }
 0x4c8   :  { %3168 = vmatmul.bf16.gmra.mxu0 %v1041_v11  ;;  %v9320_v45 = vadd.f32 %v3129_v32, %v2961_v56  ;;  %v1050_v11 = vpack.c.bf16 %v811_v19, %v810_v37  ;;  %v813_v19 = vld [vmem:[#allocation2 + $0x2c2] sm:$0xff] }
 0x4ca   :  { %12957 = vst [vmem:[#allocation57_spill] sm:$0xff] %v9320_v45 }
 0x4cb   :  { %v2793_v60 = vpop.f32.mrf.mxu2 }
 0x4cc   :  { %v2794_v33 = vadd.f32 %v2793_v60, %v9069_v6 }
 0x4cd   :  { %v3131_v2 = vpop.f32.mrf.mxu0  ;;  %v2972_v16 = vpop.f32.mrf.mxu3 }
 0x4ce   :  { %v2963_v7 = vadd.f32 %v2962_v21, %v2794_v33  ;;  %v684_v21 = vld [vmem:[#allocation2 + $0x2b8] sm:$0xff] }
 0x4d0   :  { %v9323_v30 = vadd.f32 %v3131_v2, %v2963_v7  ;;  %2835 = vmatmul.bf16.gmra.mxu2 %v1048_v53  ;;  %v1057_v53 = vpack.c.bf16 %v685_v62, %v684_v21  ;;  %v686_v21 = vld [vmem:[#allocation2 + $0x2d0] sm:$0xff]  ;;  %v687_v62 = vld [vmem:[#allocation2 + $0x2d8] sm:$0xff] }
 0x4d2   :  { %12958 = vst [vmem:[#allocation58_spill] sm:$0xff] %v9323_v30  ;;  %3014 = vmatmul.bf16.gmra.mxu3 %v1067_v17  ;;  %v1076_v17 = vpack.c.bf16 %v753_v18, %v752_v39  ;;  %v815_v39 = vld [vmem:[#allocation2 + $0x2da] sm:$0xff] }
 0x4d3   :  { %v2796_v14 = vpop.f32.mrf.mxu2  ;;  %v754_v18 = vld [vmem:[#allocation2 + $0x301] sm:$0xff] }
 0x4d4   :  { %v2797_v23 = vadd.f32 %v2796_v14, %v9077_v44  ;;  %v812_v44 = vld [vmem:[#allocation2 + $0x2ba] sm:$0xff] }
 0x4d5   :  { %v3134_v32 = vpop.f32.mrf.mxu0  ;;  %v2975_v13 = vpop.f32.mrf.mxu3 }
 0x4d6   :  { %v2966_v56 = vadd.f32 %v2965_v8, %v2797_v23 }
 0x4d8   :  { %3173 = vmatmul.bf16.gmra.mxu0 %v1050_v11  ;;  %v9326_v6 = vadd.f32 %v3134_v32, %v2966_v56  ;;  %v1059_v11 = vpack.c.bf16 %v813_v19, %v812_v44 }
 0x4da   :  { %12959 = vst [vmem:[#allocation59_spill] sm:$0xff] %v9326_v6 }
 0x4db   :  { %v2798_v60 = vpop.f32.mrf.mxu2 }
 0x4dc   :  { %v2799_v33 = vadd.f32 %v2798_v60, %v9081_v42  ;;  %v7986_v42 = vld [vmem:[%s12684_s5 + $0x18] sm:$0xff] }
 0x4dd   :  { %v3136_v2 = vpop.f32.mrf.mxu0  ;;  %v2977_v14 = vpop.f32.mrf.mxu3  ;;  %5207 = vmatpush.bf16.msra.mxu1 %v7986_v42  ;;  %v755_v42 = vld [vmem:[#allocation2 + $0x309] sm:$0xff] }
 0x4de   :  { %v2968_v7 = vadd.f32 %v2967_v12, %v2799_v33 }
 0x4e0   :  { %v9329_v37 = vadd.f32 %v3136_v2, %v2968_v7  ;;  %2840 = vmatmul.bf16.gmra.mxu2 %v1057_v53  ;;  %v12962_v53 = vld [vmem:[#allocation3_spill] sm:$0xff] }
 0x4e2   :  { %12960 = vst [vmem:[#allocation60_spill] sm:$0xff] %v9329_v37  ;;  %3019 = vmatmul.bf16.gmra.mxu3 %v1076_v17 }
 0x4e3   :  { %v2801_v8 = vpop.f32.mrf.mxu2 }
 0x4e4   :  { %v2802_v23 = vadd.f32 %v2801_v8, %v9085_v46  ;;  %v1066_v46 = vpack.c.bf16 %v687_v62, %v686_v21  ;;  %v814_v8 = vld [vmem:[#allocation2 + $0x2d2] sm:$0xff] }
 0x4e5   :  { %v3139_v32 = vpop.f32.mrf.mxu0  ;;  %v2980_v60 = vpop.f32.mrf.mxu3  ;;  %v689_v62 = vld [vmem:[#allocation2 + $0x2f0] sm:$0xff] }
 0x4e6   :  { %v2971_v56 = vadd.f32 %v2970_v24, %v2802_v23 }
 0x4e8   :  { %3178 = vmatmul.bf16.gmra.mxu0 %v1059_v11  ;;  %v9335_v12 = vadd.f32 %v3139_v32, %v2971_v56  ;;  %v1068_v11 = vpack.c.bf16 %v815_v39, %v814_v8  ;;  %v12964_v32 = vld [vmem:[#allocation4_spill] sm:$0xff] }
 0x4e9   :  { %v816_v39 = vld [vmem:[#allocation2 + $0x2ea] sm:$0xff] }
 0x4ea   :  { %12961 = vst [vmem:[#allocation61_spill] sm:$0xff] %v9335_v12  ;;  %v1085_v12 = vpack.c.bf16 %v755_v42, %v754_v18 }
 0x4eb   :  { %v2803_v33 = vpop.f32.mrf.mxu2 }
 0x4ec   :  { %v2804_v2 = vadd.f32 %v2803_v33, %v12962_v53 }
 0x4ed   :  { %v3141_v7 = vpop.f32.mrf.mxu0  ;;  %v2982_v24 = vpop.f32.mrf.mxu3 }
 0x4ee   :  { %v2973_v44 = vadd.f32 %v2972_v16, %v2804_v2  ;;  %v688_v16 = vld [vmem:[#allocation2 + $0x2e8] sm:$0xff]  ;;  %v12966_v2 = vld [vmem:[#allocation5_spill] sm:$0xff] }
 0x4f0   :  { %v9338_v19 = vadd.f32 %v3141_v7, %v2973_v44  ;;  %2845 = vmatmul.bf16.gmra.mxu2 %v1066_v46  ;;  %v1075_v7 = vpack.c.bf16 %v689_v62, %v688_v16 }
 0x4f2   :  { %12963 = vst [vmem:[#allocation3_spill] sm:$0xff] %v9338_v19  ;;  %3024 = vmatmul.bf16.gmra.mxu3 %v1085_v12  ;;  %v756_v12 = vld [vmem:[#allocation2 + $0x319] sm:$0xff] }
 0x4f3   :  { %v2806_v23 = vpop.f32.mrf.mxu2 }
 0x4f4   :  { %v2807_v17 = vadd.f32 %v2806_v23, %v12964_v32  ;;  %v817_v23 = vld [vmem:[#allocation2 + $0x2f2] sm:$0xff] }
 0x4f5   :  { %v3144_v56 = vpop.f32.mrf.mxu0  ;;  %v2985_v33 = vpop.f32.mrf.mxu3 }
 0x4f6   :  { %v2976_v37 = vadd.f32 %v2975_v13, %v2807_v17  ;;  %v757_v17 = vld [vmem:[#allocation2 + $0x321] sm:$0xff] }
 0x4f8   :  { %3183 = vmatmul.bf16.gmra.mxu0 %v1068_v11  ;;  %v9341_v21 = vadd.f32 %v3144_v56, %v2976_v37  ;;  %v1077_v37 = vpack.c.bf16 %v817_v23, %v816_v39  ;;  %v12968_v11 = vld [vmem:[#allocation7_spill] sm:$0xff]  ;;  %v1094_v56 = vpack.c.bf16 %v757_v17, %v756_v12 }
 0x4f9   :  { %v818_v23 = vld [vmem:[#allocation2 + $0x302] sm:$0xff]  ;;  %v759_v17 = vld [vmem:[#allocation2 + $0x339] sm:$0xff] }
 0x4fa   :  { %12965 = vst [vmem:[#allocation4_spill] sm:$0xff] %v9341_v21 }
 0x4fb   :  { %v2808_v53 = vpop.f32.mrf.mxu2 }
 0x4fc   :  { %v2809_v46 = vadd.f32 %v2808_v53, %v12966_v2  ;;  %v12970_v2 = vld [vmem:[#allocation8_spill] sm:$0xff] }
 0x4fd   :  { %v3146_v44 = vpop.f32.mrf.mxu0  ;;  %v9346_v18 = vpop.f32.mrf.mxu3 }
 0x4fe   :  { %v2978_v19 = vadd.f32 %v2977_v14, %v2809_v46  ;;  %12967 = vst [vmem:[#allocation5_spill] sm:$0xff] %v9346_v18  ;;  %v690_v14 = vld [vmem:[#allocation2 + $0x300] sm:$0xff] }
 0x500   :  { %v9344_v8 = vadd.f32 %v3146_v44, %v2978_v19  ;;  %2850 = vmatmul.bf16.gmra.mxu2 %v1075_v7  ;;  %v691_v19 = vld [vmem:[#allocation2 + $0x308] sm:$0xff] }
 0x501   :  { %v1084_v7 = vpack.c.bf16 %v691_v19, %v690_v14 }
 0x502   :  { %3029 = vmatmul.bf16.gmra.mxu3 %v1094_v56 }
 0x503   :  { %v2811_v13 = vpop.f32.mrf.mxu2 }
 0x504   :  { %v2812_v32 = vadd.f32 %v2811_v13, %v12968_v11  ;;  %v819_v13 = vld [vmem:[#allocation2 + $0x30a] sm:$0xff] }
 0x505   :  { %v3149_v42 = vpop.f32.mrf.mxu0  ;;  %v2990_v62 = vpop.f32.mrf.mxu3  ;;  %v12972_v11 = vld [vmem:[#allocation9_spill] sm:$0xff] }
 0x506   :  { %v2981_v21 = vadd.f32 %v2980_v60, %v2812_v32 }
 0x508   :  { %3188 = vmatmul.bf16.gmra.mxu0 %v1077_v37  ;;  %v9349_v16 = vadd.f32 %v3149_v42, %v2981_v21  ;;  %v758_v37 = vld [vmem:[#allocation2 + $0x331] sm:$0xff]  ;;  %v1086_v21 = vpack.c.bf16 %v819_v13, %v818_v23 }
 0x509   :  { %v1103_v56 = vpack.c.bf16 %v759_v17, %v758_v37 }
 0x50a   :  { %12969 = vst [vmem:[#allocation7_spill] sm:$0xff] %v9349_v16 }
 0x50b   :  { %v2813_v53 = vpop.f32.mrf.mxu2 }
 0x50c   :  { %v2814_v46 = vadd.f32 %v2813_v53, %v12970_v2 }
 0x50d   :  { %v3151_v44 = vpop.f32.mrf.mxu0  ;;  %v9354_v12 = vpop.f32.mrf.mxu3 }
 0x50e   :  { %v2983_v18 = vadd.f32 %v2982_v24, %v2814_v46  ;;  %v692_v24 = vld [vmem:[#allocation2 + $0x318] sm:$0xff] }
 0x510   :  { %v9352_v39 = vadd.f32 %v3151_v44, %v2983_v18  ;;  %2855 = vmatmul.bf16.gmra.mxu2 %v1084_v7  ;;  %v693_v18 = vld [vmem:[#allocation2 + $0x320] sm:$0xff] }
 0x511   :  { %v1093_v2 = vpack.c.bf16 %v693_v18, %v692_v24  ;;  %v820_v7 = vld [vmem:[#allocation2 + $0x31a] sm:$0xff]  ;;  %v821_v44 = vld [vmem:[#allocation2 + $0x322] sm:$0xff] }
 0x512   :  { %12971 = vst [vmem:[#allocation8_spill] sm:$0xff] %v9352_v39  ;;  %3034 = vmatmul.bf16.gmra.mxu3 %v1103_v56  ;;  %v1095_v37 = vpack.c.bf16 %v821_v44, %v820_v7  ;;  %v694_v56 = vld [vmem:[#allocation2 + $0x330] sm:$0xff]  ;;  %v695_v24 = vld [vmem:[#allocation2 + $0x338] sm:$0xff] }
 0x513   :  { %v2816_v60 = vpop.f32.mrf.mxu2  ;;  %v1102_v7 = vpack.c.bf16 %v695_v24, %v694_v56 }
 0x514   :  { %v2817_v32 = vadd.f32 %v2816_v60, %v12972_v11  ;;  %v760_v60 = vld [vmem:[#allocation2 + $0x349] sm:$0xff] }
 0x515   :  { %v3154_v42 = vpop.f32.mrf.mxu0  ;;  %v2995_v19 = vpop.f32.mrf.mxu3 }
 0x516   :  { %v2986_v16 = vadd.f32 %v2985_v33, %v2817_v32  ;;  %v761_v33 = vld [vmem:[#allocation2 + $0x351] sm:$0xff] }
 0x517   :  { %v7985_v32 = vld [vmem:[%s12684_s5 + $0x10] sm:$0xff] }
 0x518   :  { %3193 = vmatmul.bf16.gmra.mxu0 %v1086_v21  ;;  %v9357_v14 = vadd.f32 %v3154_v42, %v2986_v16  ;;  %v1112_v21 = vpack.c.bf16 %v761_v33, %v760_v60  ;;  %5208 = vmatpush.bf16.msra.mxu1 %v7985_v32  ;;  %v696_v32 = vld [vmem:[#allocation2 + $0x348] sm:$0xff] }
 0x519   :  { %v1111_v56 = vpack.c.bf16 %v9260_v31, %v696_v32  ;;  %v3285_v31 = vmul.f32 %v9224_v35, %v9224_v35 }
 0x51b   :  { %v9359_v53 = vpop.f32.mrf.mxu2 }
 0x51d   :  { %v9361_v46 = vpop.f32.mrf.mxu0  ;;  %v9363_v23 = vpop.f32.mrf.mxu3 }
 0x51e   :  { %12973 = vst [vmem:[#allocation9_spill] sm:$0xff] %v9363_v23 }
 0x520   :  { %2860 = vmatmul.bf16.gmra.mxu2 %v1093_v2 }
 0x522   :  { %3039 = vmatmul.bf16.gmra.mxu3 %v1112_v21 }
 0x523   :  { %v2821_v13 = vpop.f32.mrf.mxu2 }
 0x524   :  { %v2822_v16 = vadd.f32 %v2821_v13, %v9139_v48  ;;  %v822_v48 = vld [vmem:[#allocation2 + $0x332] sm:$0xff]  ;;  %v823_v13 = vld [vmem:[#allocation2 + $0x33a] sm:$0xff] }
 0x525   :  { %v3159_v11 = vpop.f32.mrf.mxu0  ;;  %v3000_v18 = vpop.f32.mrf.mxu3 }
 0x526   :  { %v2991_v17 = vadd.f32 %v2990_v62, %v2822_v16  ;;  %v1104_v62 = vpack.c.bf16 %v823_v13, %v822_v48  ;;  %v3284_v13 = vmul.f32 %v9218_v10, %v9218_v10 }
 0x528   :  { %3198 = vmatmul.bf16.gmra.mxu0 %v1095_v37  ;;  %v9369_v42 = vadd.f32 %v3159_v11, %v2991_v17 }
 0x52a   :  { %12974 = vst [vmem:[#allocation62_spill] sm:$0xff] %v9369_v42 }
 0x52b   :  { %v9371_v2 = vpop.f32.mrf.mxu2 }
 0x52d   :  { %v9373_v44 = vpop.f32.mrf.mxu0  ;;  %v9375_v60 = vpop.f32.mrf.mxu3 }
 0x52e   :  { %12975 = vst [vmem:[#allocation63_spill] sm:$0xff] %v9375_v60  ;;  %v825_v60 = vld [vmem:[#allocation2 + $0x352] sm:$0xff] }
 0x530   :  { %2865 = vmatmul.bf16.gmra.mxu2 %v1102_v7  ;;  %v824_v7 = vld [vmem:[#allocation2 + $0x34a] sm:$0xff] }
 0x533   :  { %v2826_v33 = vpop.f32.mrf.mxu2 }
 0x534   :  { %v2827_v16 = vadd.f32 %v2826_v33, %v9147_v47  ;;  %v1113_v47 = vpack.c.bf16 %v825_v60, %v824_v7 }
 0x535   :  { %v3164_v37 = vpop.f32.mrf.mxu0  ;;  %v3005_v17 = vpop.f32.mrf.mxu3 }
 0x536   :  { %v2996_v21 = vadd.f32 %v2995_v19, %v2827_v16  ;;  %v3283_v16 = vmul.f32 %v9215_v52, %v9215_v52 }
 0x538   :  { %3203 = vmatmul.bf16.gmra.mxu0 %v1104_v62  ;;  %v9378_v11 = vadd.f32 %v3164_v37, %v2996_v21  ;;  %v3214_v21 = vadd.f32 %v9218_v10, %v9215_v52  ;;  %v3347_v60 = vadd.f32 %v3284_v13, %v3283_v16 }
 0x53a   :  { %v3215_v32 = vadd.f32 %v3214_v21, %v9224_v35  ;;  %v3290_v35 = vmul.f32 %v9239_v57, %v9239_v57 }
 0x53b   :  { %v9380_v42 = vpop.f32.mrf.mxu2 }
 0x53d   :  { %v9383_v24 = vpop.f32.mrf.mxu0  ;;  %v9385_v23 = vpop.f32.mrf.mxu3 }
 0x540   :  { %2870 = vmatmul.bf16.gmra.mxu2 %v1111_v56  ;;  %v3348_v56 = vadd.f32 %v3347_v60, %v3285_v31  ;;  %v3289_v31 = vmul.f32 %v9236_v20, %v9236_v20 }
 0x543   :  { %v2831_v48 = vpop.f32.mrf.mxu2 }
 0x544   :  { %v2832_v19 = vadd.f32 %v2831_v48, %v9157_v63  ;;  %v3286_v63 = vmul.f32 %v9227_v9, %v9227_v9 }
 0x545   :  { %v3169_v33 = vpop.f32.mrf.mxu0  ;;  %v3010_v48 = vpop.f32.mrf.mxu3 }
 0x546   :  { %v3001_v62 = vadd.f32 %v3000_v18, %v2832_v19  ;;  %v3287_v18 = vmul.f32 %v9230_v54, %v9230_v54  ;;  %v3349_v19 = vadd.f32 %v3348_v56, %v3286_v63  ;;  %v3291_v56 = vmul.f32 %v9242_v58, %v9242_v58 }
 0x548   :  { %3208 = vmatmul.bf16.gmra.mxu0 %v1113_v47  ;;  %v9394_v37 = vadd.f32 %v3169_v33, %v3001_v62  ;;  %v3216_v47 = vadd.f32 %v3215_v32, %v9227_v9  ;;  %v3288_v33 = vmul.f32 %v9233_v28, %v9233_v28  ;;  %v3350_v16 = vadd.f32 %v3349_v19, %v3287_v18 }
 0x549   :  { %v3292_v19 = vmul.f32 %v9245_v43, %v9245_v43 }
 0x54a   :  { %v3217_v13 = vadd.f32 %v3216_v47, %v9230_v54  ;;  %v3351_v60 = vadd.f32 %v3350_v16, %v3288_v33 }
 0x54b   :  { %v9403_v7 = vpop.f32.mrf.mxu2 }
 0x54c   :  { %v3218_v21 = vadd.f32 %v3217_v13, %v9233_v28  ;;  %v3352_v63 = vadd.f32 %v3351_v60, %v3289_v31  ;;  %v3293_v31 = vmul.f32 %v9251_v22, %v9251_v22 }
 0x54d   :  { %v9408_v62 = vpop.f32.mrf.mxu0  ;;  %v9423_v33 = vpop.f32.mrf.mxu3 }
 0x54e   :  { %v3219_v32 = vadd.f32 %v3218_v21, %v9236_v20  ;;  %v3353_v47 = vadd.f32 %v3352_v63, %v3290_v35  ;;  %v3294_v35 = vmul.f32 %v9254_v5, %v9254_v5 }
 0x550   :  { %v3220_v18 = vadd.f32 %v3219_v32, %v9239_v57  ;;  %v3354_v21 = vadd.f32 %v3353_v47, %v3291_v56  ;;  %v3296_v47 = vmul.f32 %v9263_v3, %v9263_v3 }
 0x552   :  { %v3221_v28 = vadd.f32 %v3220_v18, %v9242_v58 }
 0x553   :  { %v2836_v9 = vpop.f32.mrf.mxu2 }
 0x554   :  { %v2837_v10 = vadd.f32 %v2836_v9, %v9165_v26  ;;  %v3222_v26 = vadd.f32 %v3221_v28, %v9245_v43  ;;  %v3355_v9 = vadd.f32 %v3354_v21, %v3292_v19 }
 0x555   :  { %v3174_v13 = vpop.f32.mrf.mxu0  ;;  %v3015_v21 = vpop.f32.mrf.mxu3 }
 0x556   :  { %v3006_v16 = vadd.f32 %v3005_v17, %v2837_v10  ;;  %v3223_v32 = vadd.f32 %v3222_v26, %v9251_v22  ;;  %v3356_v63 = vadd.f32 %v3355_v9, %v3293_v31  ;;  %v3295_v10 = vmul.f32 %v9257_v55, %v9257_v55  ;;  %v12987_v22 = vld [vmem:[#allocation13_spill] sm:$0xff] }
 0x557   :  { %v3298_v9 = vmul.f32 %v9269_v41, %v9269_v41 }
 0x558   :  { %v9428_v60 = vadd.f32 %v3174_v13, %v3006_v16  ;;  %v3224_v56 = vadd.f32 %v3223_v32, %v9254_v5  ;;  %v3357_v18 = vadd.f32 %v3356_v63, %v3294_v35  ;;  %v3297_v16 = vmul.f32 %v9266_v50, %v9266_v50  ;;  %v9449_v32 = vpop.f32.mrf.mxu1 }
 0x559   :  { %v3299_v5 = vmul.f32 %v9272_v36, %v9272_v36 }
 0x55a   :  { %v3225_v28 = vadd.f32 %v3224_v56, %v9257_v55  ;;  %v3358_v19 = vadd.f32 %v3357_v18, %v3295_v10 }
 0x55b   :  { %v9436_v17 = vpop.f32.mrf.mxu2 }
 0x55c   :  { %v3226_v31 = vadd.f32 %v3225_v28, %v9263_v3  ;;  %v3359_v26 = vadd.f32 %v3358_v19, %v3296_v47  ;;  %v3300_v47 = vmul.f32 %v9275_v34, %v9275_v34  ;;  %v7984_v19 = vld [vmem:[%s12684_s5 + $0x8] sm:$0xff] }
 0x55d   :  { %v9441_v13 = vpop.f32.mrf.mxu0  ;;  %5209 = vmatpush.bf16.msra.mxu1 %v7984_v19 }
 0x55e   :  { %v3227_v35 = vadd.f32 %v3226_v31, %v9266_v50  ;;  %v3360_v63 = vadd.f32 %v3359_v26, %v3297_v16  ;;  %v3301_v26 = vmul.f32 %v9281_v4, %v9281_v4 }
 0x560   :  { %v3228_v18 = vadd.f32 %v3227_v35, %v9269_v41  ;;  %v3361_v55 = vadd.f32 %v3360_v63, %v3298_v9  ;;  %v3302_v63 = vmul.f32 %v9284_v15, %v9284_v15 }
 0x562   :  { %v3229_v16 = vadd.f32 %v3228_v18, %v9272_v36  ;;  %v3362_v31 = vadd.f32 %v3361_v55, %v3299_v5  ;;  %v3303_v5 = vmul.f32 %v9287_v51, %v9287_v51  ;;  %v12983_v36 = vld [vmem:[#allocation11_spill] sm:$0xff] }
 0x563   :  { %v2841_v56 = vpop.f32.mrf.mxu2 }
 0x564   :  { %v2842_v10 = vadd.f32 %v2841_v56, %v9171_v0  ;;  %v3230_v9 = vadd.f32 %v3229_v16, %v9275_v34  ;;  %v3363_v35 = vadd.f32 %v3362_v31, %v3300_v47  ;;  %v9469_v56 = vpop.f32.mrf.mxu3  ;;  %v3304_v47 = vmul.f32 %v9290_v29, %v9290_v29 }
 0x565   :  { %v3179_v28 = vpop.f32.mrf.mxu0  ;;  %v3305_v31 = vmul.f32 %v9293_v61, %v9293_v61 }
 0x566   :  { %v3011_v3 = vadd.f32 %v3010_v48, %v2842_v10  ;;  %v3231_v41 = vadd.f32 %v3230_v9, %v9281_v4  ;;  %v3364_v48 = vadd.f32 %v3363_v35, %v3301_v26  ;;  %v9476_v10 = vpop.f32.mrf.mxu1  ;;  %v3306_v35 = vmul.f32 %v9296_v38, %v9296_v38 }
 0x568   :  { %v9464_v0 = vadd.f32 %v3179_v28, %v3011_v3  ;;  %v3232_v3 = vadd.f32 %v3231_v41, %v9284_v15  ;;  %v3365_v18 = vadd.f32 %v3364_v48, %v3302_v63  ;;  %v3307_v48 = vmul.f32 %v9299_v40, %v9299_v40 }
 0x56a   :  { %v3233_v19 = vadd.f32 %v3232_v3, %v9287_v51  ;;  %v3366_v16 = vadd.f32 %v3365_v18, %v3303_v5  ;;  %v12976_v3 = vld [vmem:[#allocation20_spill] sm:$0xff] }
 0x56b   :  { %v9474_v55 = vpop.f32.mrf.mxu2 }
 0x56c   :  { %v3234_v26 = vadd.f32 %v3233_v19, %v9290_v29  ;;  %v3367_v9 = vadd.f32 %v3366_v16, %v3304_v47  ;;  %v9492_v4 = vpop.f32.mrf.mxu3  ;;  %v3308_v47 = vmul.f32 %v9302_v27, %v9302_v27 }
 0x56d   :  { %v9481_v28 = vpop.f32.mrf.mxu0 }
 0x56e   :  { %v3235_v41 = vadd.f32 %v3234_v26, %v9293_v61  ;;  %v3368_v63 = vadd.f32 %v3367_v9, %v3305_v31  ;;  %v9498_v29 = vpop.f32.mrf.mxu1  ;;  %v3309_v9 = vmul.f32 %v9308_v59, %v9308_v59 }
 0x570   :  { %v3236_v18 = vadd.f32 %v3235_v41, %v9296_v38  ;;  %v3369_v51 = vadd.f32 %v3368_v63, %v3306_v35  ;;  %v3310_v35 = vmul.f32 %v9311_v49, %v9311_v49 }
 0x572   :  { %v3237_v31 = vadd.f32 %v3236_v18, %v9299_v40  ;;  %v3370_v26 = vadd.f32 %v3369_v51, %v3307_v48  ;;  %v3312_v18 = vmul.f32 %v9317_v1, %v9317_v1 }
 0x573   :  { %v2846_v15 = vpop.f32.mrf.mxu2 }
 0x574   :  { %v2847_v5 = vadd.f32 %v2846_v15, %v12976_v3  ;;  %v3238_v15 = vadd.f32 %v3237_v31, %v9302_v27  ;;  %v3371_v3 = vadd.f32 %v3370_v26, %v3308_v47  ;;  %v9518_v47 = vpop.f32.mrf.mxu3  ;;  %v3313_v26 = vmul.f32 %v9320_v45, %v9320_v45 }
 0x575   :  { %v3184_v19 = vpop.f32.mrf.mxu0 }
 0x576   :  { %v3016_v16 = vadd.f32 %v3015_v21, %v2847_v5  ;;  %v3239_v41 = vadd.f32 %v3238_v15, %v9308_v59  ;;  %v3372_v63 = vadd.f32 %v3371_v3, %v3309_v9  ;;  %v3311_v21 = vmul.f32 %v9314_v25, %v9314_v25  ;;  %v9523_v9 = vpop.f32.mrf.mxu1 }
 0x578   :  { %v9503_v61 = vadd.f32 %v3184_v19, %v3016_v16  ;;  %v3240_v51 = vadd.f32 %v3239_v41, %v9311_v49  ;;  %v3373_v48 = vadd.f32 %v3372_v63, %v3310_v35  ;;  %v3314_v35 = vmul.f32 %v9323_v30, %v9323_v30 }
 0x579   :  { %v3315_v49 = vmul.f32 %v9326_v6, %v9326_v6 }
 0x57a   :  { %v3241_v16 = vadd.f32 %v3240_v51, %v9314_v25  ;;  %v3374_v31 = vadd.f32 %v3373_v48, %v3311_v21  ;;  %v12977_v48 = vld [vmem:[#allocation60_spill] sm:$0xff] }
 0x57b   :  { %v9511_v5 = vpop.f32.mrf.mxu2  ;;  %v3316_v25 = vmul.f32 %v12977_v48, %v12977_v48 }
 0x57c   :  { %v3242_v15 = vadd.f32 %v3241_v16, %v9317_v1  ;;  %v3375_v3 = vadd.f32 %v3374_v31, %v3312_v18  ;;  %v12978_v31 = vld [vmem:[#allocation61_spill] sm:$0xff] }
 0x57d   :  { %v9516_v19 = vpop.f32.mrf.mxu0 }
 0x57e   :  { %v3243_v41 = vadd.f32 %v3242_v15, %v9320_v45  ;;  %v3376_v63 = vadd.f32 %v3375_v3, %v3313_v26  ;;  %v3317_v15 = vmul.f32 %v12978_v31, %v12978_v31  ;;  %v9541_v26 = vpop.f32.mrf.mxu3  ;;  %v12979_v3 = vld [vmem:[#allocation34_spill] sm:$0xff]  ;;  %v9549_v38 = vpop.f32.mrf.mxu1 }
 0x57f   :  { %v12980_v45 = vld [vmem:[#allocation6_spill] sm:$0xff] }
 0x580   :  { %v3244_v21 = vadd.f32 %v3243_v41, %v9323_v30  ;;  %v3377_v51 = vadd.f32 %v3376_v63, %v3314_v35  ;;  %v2650_v1 = vadd.f32 %v12980_v45, %v12979_v3  ;;  %v12981_v35 = vld [vmem:[#allocation3_spill] sm:$0xff]  ;;  %v12984_v45 = vld [vmem:[#allocation10_spill] sm:$0xff] }
 0x581   :  { %v3318_v63 = vmul.f32 %v12981_v35, %v12981_v35  ;;  %v2655_v3 = vadd.f32 %v12984_v45, %v12983_v36  ;;  %v12988_v36 = vld [vmem:[#allocation12_spill] sm:$0xff] }
 0x582   :  { %v3245_v18 = vadd.f32 %v3244_v21, %v9326_v6  ;;  %v3378_v16 = vadd.f32 %v3377_v51, %v3315_v49  ;;  %v2819_v30 = vadd.f32 %v9359_v53, %v2650_v1  ;;  %v12982_v51 = vld [vmem:[#allocation4_spill] sm:$0xff]  ;;  %v12985_v53 = vld [vmem:[#allocation5_spill] sm:$0xff]  ;;  %v2660_v45 = vadd.f32 %v12988_v36, %v12987_v22  ;;  %v12989_v22 = vld [vmem:[#allocation15_spill] sm:$0xff] }
 0x583   :  { %v9531_v59 = vpop.f32.mrf.mxu2  ;;  %v3319_v6 = vmul.f32 %v12982_v51, %v12982_v51 }
 0x584   :  { %v3246_v40 = vadd.f32 %v3245_v18, %v12977_v48  ;;  %v3379_v41 = vadd.f32 %v3378_v16, %v3316_v25  ;;  %v3320_v16 = vmul.f32 %v9344_v8, %v9344_v8  ;;  %v2988_v48 = vadd.f32 %v12985_v53, %v2819_v30  ;;  %v12990_v53 = vld [vmem:[#allocation14_spill] sm:$0xff] }
 0x585   :  { %v9536_v27 = vpop.f32.mrf.mxu0 }
 0x586   :  { %v3247_v49 = vadd.f32 %v3246_v40, %v12978_v31  ;;  %v3380_v21 = vadd.f32 %v3379_v41, %v3317_v15  ;;  %v2824_v40 = vadd.f32 %v9371_v2, %v2655_v3  ;;  %v12986_v31 = vld [vmem:[#allocation7_spill] sm:$0xff]  ;;  %v9576_v30 = vadd.f32 %v9361_v46, %v2988_v48 }
 0x587   :  { %v3321_v50 = vmul.f32 %v12986_v31, %v12986_v31 }
 0x588   :  { %v3248_v25 = vadd.f32 %v3247_v49, %v12981_v35  ;;  %v3381_v18 = vadd.f32 %v3380_v21, %v3318_v63  ;;  %v3322_v21 = vmul.f32 %v9352_v39, %v9352_v39  ;;  %v9573_v35 = vpop.f32.mrf.mxu3  ;;  %v2993_v2 = vadd.f32 %v9354_v12, %v2824_v40 }
 0x589   :  { %v3324_v12 = vmul.f32 %v9576_v30, %v9576_v30 }
 0x58a   :  { %v3249_v15 = vadd.f32 %v3248_v25, %v12982_v51  ;;  %v3382_v41 = vadd.f32 %v3381_v18, %v3319_v6  ;;  %v2829_v6 = vadd.f32 %v9380_v42, %v2660_v45  ;;  %v12991_v42 = vld [vmem:[#allocation9_spill] sm:$0xff] }
 0x58b   :  { %v9554_v34 = vpop.f32.mrf.mxu2 }
 0x58c   :  { %v3250_v63 = vadd.f32 %v3249_v15, %v9344_v8  ;;  %v3383_v49 = vadd.f32 %v3382_v41, %v3320_v16  ;;  %v2665_v16 = vadd.f32 %v12990_v53, %v12989_v22  ;;  %v3323_v15 = vmul.f32 %v9357_v14, %v9357_v14  ;;  %v9587_v41 = vpop.f32.mrf.mxu1  ;;  %v12992_v22 = vld [vmem:[#allocation62_spill] sm:$0xff] }
 0x58d   :  { %v9561_v1 = vpop.f32.mrf.mxu0  ;;  %v2998_v40 = vadd.f32 %v12991_v42, %v2829_v6  ;;  %v3325_v53 = vmul.f32 %v12992_v22, %v12992_v22  ;;  %v12995_v6 = vld [vmem:[#allocation63_spill] sm:$0xff] }
 0x58e   :  { %v3251_v3 = vadd.f32 %v3250_v63, %v12986_v31  ;;  %v3384_v25 = vadd.f32 %v3383_v49, %v3321_v50  ;;  %v9595_v50 = vadd.f32 %v9373_v44, %v2993_v2  ;;  %v2834_v45 = vadd.f32 %v9403_v7, %v2665_v16 }
 0x58f   :  { %v9608_v2 = vadd.f32 %v9383_v24, %v2998_v40 }
 0x590   :  { %v3252_v46 = vadd.f32 %v3251_v3, %v9352_v39  ;;  %v3385_v48 = vadd.f32 %v3384_v25, %v3322_v21  ;;  %v12993_v3 = vld [vmem:[#allocation17_spill] sm:$0xff]  ;;  %v12994_v21 = vld [vmem:[#allocation16_spill] sm:$0xff]  ;;  %v3326_v44 = vmul.f32 %v9595_v50, %v9595_v50  ;;  %v3003_v7 = vadd.f32 %v12995_v6, %v2834_v45 }
 0x591   :  { %v2670_v25 = vadd.f32 %v12994_v21, %v12993_v3 }
 0x592   :  { %v3253_v63 = vadd.f32 %v3252_v46, %v9357_v14  ;;  %v3386_v49 = vadd.f32 %v3385_v48, %v3323_v15  ;;  %v9613_v48 = vpop.f32.mrf.mxu3 }
 0x593   :  { %v9581_v18 = vpop.f32.mrf.mxu2  ;;  %v2839_v15 = vadd.f32 %v9436_v17, %v2670_v25  ;;  %v9625_v17 = vadd.f32 %v9408_v62, %v3003_v7 }
 0x594   :  { %v3254_v39 = vadd.f32 %v3253_v63, %v9576_v30  ;;  %v3387_v31 = vadd.f32 %v3386_v49, %v3324_v12  ;;  %v3327_v63 = vmul.f32 %v9378_v11, %v9378_v11  ;;  %v12996_v12 = vld [vmem:[#allocation19_spill] sm:$0xff]  ;;  %v12997_v49 = vld [vmem:[#allocation18_spill] sm:$0xff]  ;;  %v2694_v45 = vpop.f32.mrf.mxu1 }
 0x595   :  { %v9590_v36 = vpop.f32.mrf.mxu0  ;;  %v2675_v3 = vadd.f32 %v12997_v49, %v12996_v12  ;;  %v12998_v12 = vld [vmem:[#allocation21_spill] sm:$0xff]  ;;  %v12999_v49 = vld [vmem:[#allocation22_spill] sm:$0xff] }
 0x596   :  { %v3255_v16 = vadd.f32 %v3254_v39, %v12992_v22  ;;  %v3388_v42 = vadd.f32 %v3387_v31, %v3325_v53  ;;  %v3328_v39 = vmul.f32 %v9608_v2, %v9608_v2  ;;  %v3008_v53 = vadd.f32 %v9385_v23, %v2839_v15 }
 0x597   :  { %v2844_v25 = vadd.f32 %v9474_v55, %v2675_v3  ;;  %v2683_v62 = vadd.f32 %v9476_v10, %v12999_v49  ;;  %v3331_v10 = vmul.f32 %v9428_v60, %v9428_v60 }
 0x598   :  { %v3256_v21 = vadd.f32 %v3255_v16, %v9595_v50  ;;  %v3389_v40 = vadd.f32 %v3388_v42, %v3326_v44  ;;  %v3329_v16 = vmul.f32 %v9394_v37, %v9394_v37  ;;  %v2680_v44 = vadd.f32 %v9449_v32, %v12998_v12 }
 0x599   :  { %v9641_v55 = vadd.f32 %v9441_v13, %v3008_v53  ;;  %v3013_v15 = vadd.f32 %v9423_v33, %v2844_v25  ;;  %v7983_v13 = vld [vmem:[%s12684_s5] sm:$0xff] }
 0x59a   :  { %v3257_v31 = vadd.f32 %v3256_v21, %v9378_v11  ;;  %v3390_v6 = vadd.f32 %v3389_v40, %v3327_v63  ;;  %v3330_v21 = vmul.f32 %v9625_v17, %v9625_v17  ;;  %v2849_v63 = vadd.f32 %v9511_v5, %v2680_v44  ;;  %v13000_v53 = vld [vmem:[#allocation23_spill] sm:$0xff]  ;;  %5210 = vmatpush.bf16.msra.mxu1 %v7983_v13  ;;  %v13001_v44 = vld [vmem:[#allocation24_spill] sm:$0xff] }
 0x59b   :  { %v2858_v46 = vpop.f32.mrf.mxu2  ;;  %v2685_v33 = vadd.f32 %v9498_v29, %v13000_v53  ;;  %v9658_v12 = vadd.f32 %v9481_v28, %v3013_v15 }
 0x59c   :  { %v3258_v42 = vadd.f32 %v3257_v31, %v9608_v2  ;;  %v3391_v7 = vadd.f32 %v3390_v6, %v3328_v39  ;;  %v2852_v39 = vadd.f32 %v9531_v59, %v2683_v62  ;;  %v3032_v6 = vpop.f32.mrf.mxu3  ;;  %v3018_v59 = vadd.f32 %v9469_v56, %v2849_v63  ;;  %v2697_v62 = vpop.f32.mrf.mxu1 }
 0x59d   :  { %v9620_v24 = vpop.f32.mrf.mxu0  ;;  %v2854_v49 = vadd.f32 %v9554_v34, %v2685_v33  ;;  %v3334_v34 = vmul.f32 %v9658_v12, %v9658_v12 }
 0x59e   :  { %v3259_v23 = vadd.f32 %v3258_v42, %v9394_v37  ;;  %v3392_v32 = vadd.f32 %v3391_v7, %v3329_v16  ;;  %v3332_v16 = vmul.f32 %v9641_v55, %v9641_v55  ;;  %v2688_v42 = vadd.f32 %v9523_v9, %v13001_v44 }
 0x59f   :  { %v9675_v9 = vadd.f32 %v9516_v19, %v3018_v59 }
 0x5a0   :  { %v3260_v40 = vadd.f32 %v3259_v23, %v9625_v17  ;;  %v3393_v25 = vadd.f32 %v3392_v32, %v3330_v21  ;;  %v3333_v21 = vmul.f32 %v9464_v0, %v9464_v0  ;;  %v3021_v23 = vadd.f32 %v9492_v4, %v2852_v39  ;;  %v13002_v32 = vld [vmem:[#allocation25_spill] sm:$0xff] }
 0x5a1   :  { %v2690_v28 = vadd.f32 %v9549_v38, %v13002_v32  ;;  %v2857_v56 = vadd.f32 %v9581_v18, %v2688_v42  ;;  %v3023_v4 = vadd.f32 %v9518_v47, %v2854_v49  ;;  %v3335_v18 = vmul.f32 %v9503_v61, %v9503_v61 }
 0x5a2   :  { %v3261_v5 = vadd.f32 %v3260_v40, %v9428_v60  ;;  %v3394_v7 = vadd.f32 %v3393_v25, %v3331_v10  ;;  %v13003_v10 = vld [vmem:[#allocation26_spill] sm:$0xff]  ;;  %v9684_v33 = vadd.f32 %v9536_v27, %v3021_v23  ;;  %v3336_v47 = vmul.f32 %v9675_v9, %v9675_v9 }
 0x5a3   :  { %v2861_v3 = vpop.f32.mrf.mxu2  ;;  %v2693_v13 = vadd.f32 %v9587_v41, %v13003_v10  ;;  %v2859_v39 = vadd.f32 %v2858_v46, %v2690_v28  ;;  %v9692_v42 = vadd.f32 %v9561_v1, %v3023_v4 }
 0x5a4   :  { %v3262_v29 = vadd.f32 %v3261_v5, %v9641_v55  ;;  %v3395_v15 = vadd.f32 %v3394_v7, %v3332_v16  ;;  %v13004_v5 = vld [vmem:[#allocation27_spill] sm:$0xff]  ;;  %v3026_v16 = vadd.f32 %v9541_v26, %v2857_v56  ;;  %v3035_v46 = vpop.f32.mrf.mxu3  ;;  %v3337_v26 = vmul.f32 %v9684_v33, %v9684_v33  ;;  %v2699_v32 = vpop.f32.mrf.mxu1 }
 0x5a5   :  { %v3199_v31 = vpop.f32.mrf.mxu0  ;;  %v2695_v19 = vadd.f32 %v2694_v45, %v13004_v5  ;;  %v2862_v59 = vadd.f32 %v2861_v3, %v2693_v13  ;;  %v3028_v49 = vadd.f32 %v9573_v35, %v2859_v39  ;;  %v13005_v45 = vld [vmem:[#allocation28_spill] sm:$0xff]  ;;  %v3338_v35 = vmul.f32 %v9692_v42, %v9692_v42 }
 0x5a6   :  { %v3263_v63 = vadd.f32 %v3262_v29, %v9464_v0  ;;  %v3396_v53 = vadd.f32 %v3395_v15, %v3333_v21  ;;  %v2698_v3 = vadd.f32 %v2697_v62, %v13005_v45  ;;  %v9700_v21 = vadd.f32 %v9590_v36, %v3026_v16 }
 0x5a7   :  { %v3031_v23 = vadd.f32 %v9613_v48, %v2862_v59  ;;  %v9707_v15 = vadd.f32 %v9620_v24, %v3028_v49 }
 0x5a8   :  { %v3264_v38 = vadd.f32 %v3263_v63, %v9658_v12  ;;  %v3397_v44 = vadd.f32 %v3396_v53, %v3334_v34  ;;  %v3339_v48 = vmul.f32 %v9700_v21, %v9700_v21 }
 0x5a9   :  { %v9712_v10 = vadd.f32 %v3199_v31, %v3031_v23  ;;  %v3340_v53 = vmul.f32 %v9707_v15, %v9707_v15 }
 0x5aa   :  { %v3265_v41 = vadd.f32 %v3264_v38, %v9503_v61  ;;  %v3398_v7 = vadd.f32 %v3397_v44, %v3335_v18 }
 0x5ab   :  { %v2863_v40 = vpop.f32.mrf.mxu2  ;;  %v3341_v16 = vmul.f32 %v9712_v10, %v9712_v10 }
 0x5ac   :  { %v2864_v27 = vadd.f32 %v2863_v40, %v2695_v19  ;;  %v3266_v29 = vadd.f32 %v3265_v41, %v9675_v9  ;;  %v3399_v28 = vadd.f32 %v3398_v7, %v3336_v47  ;;  %v3037_v18 = vpop.f32.mrf.mxu3 }
 0x5ad   :  { %v3201_v25 = vpop.f32.mrf.mxu0 }
 0x5ae   :  { %v3267_v1 = vadd.f32 %v3266_v29, %v9684_v33  ;;  %v3033_v63 = vadd.f32 %v3032_v6, %v2864_v27  ;;  %v3400_v40 = vadd.f32 %v3399_v28, %v3337_v26  ;;  %v13006_v6 = vld [vmem:[#allocation29_spill] sm:$0xff] }
 0x5af   :  { %v2700_v38 = vadd.f32 %v2699_v32, %v13006_v6  ;;  %v13009_v32 = vld [vmem:[#allocation30_spill] sm:$0xff]  ;;  %v13011_v6 = vld [vmem:[#allocation31_spill] sm:$0xff] }
 0x5b0   :  { %v3268_v36 = vadd.f32 %v3267_v1, %v9692_v42  ;;  %v3401_v4 = vadd.f32 %v3400_v40, %v3338_v35  ;;  %v9717_v24 = vadd.f32 %v3201_v25, %v3033_v63 }
 0x5b2   :  { %v3269_v39 = vadd.f32 %v3268_v36, %v9700_v21  ;;  %v3402_v5 = vadd.f32 %v3401_v4, %v3339_v48  ;;  %v3342_v47 = vmul.f32 %v9717_v24, %v9717_v24  ;;  %v7998_v48 = vld [vmem:[%s12684_s5 + $0x78] sm:$0xff] }
 0x5b3   :  { %v2866_v56 = vpop.f32.mrf.mxu2  ;;  %5372 = vmatpush.bf16.msrb.mxu2 %v7998_v48 }
 0x5b4   :  { %v2867_v34 = vadd.f32 %v2866_v56, %v2698_v3  ;;  %v3270_v19 = vadd.f32 %v3269_v39, %v9707_v15  ;;  %v3403_v44 = vadd.f32 %v3402_v5, %v3340_v53  ;;  %v8006_v39 = vld [vmem:[%s12684_s5 + $0xb8] sm:$0xff] }
 0x5b5   :  { %v3204_v62 = vpop.f32.mrf.mxu0  ;;  %5541 = vmatpush.bf16.msrb.mxu3 %v8006_v39  ;;  %v8005_v39 = vld [vmem:[%s12684_s5 + $0xb0] sm:$0xff] }
 0x5b6   :  { %v3036_v13 = vadd.f32 %v3035_v46, %v2867_v34  ;;  %v3271_v41 = vadd.f32 %v3270_v19, %v9712_v10  ;;  %v2702_v46 = vpop.f32.mrf.mxu1  ;;  %v3404_v27 = vadd.f32 %v3403_v44, %v3341_v16  ;;  %v3040_v34 = vpop.f32.mrf.mxu3 }
 0x5b7   :  { %v2703_v28 = vadd.f32 %v2702_v46, %v13009_v32 }
 0x5b8   :  { %v9723_v31 = vadd.f32 %v3204_v62, %v3036_v13  ;;  %v3272_v7 = vadd.f32 %v3271_v41, %v9717_v24  ;;  %v3405_v45 = vadd.f32 %v3404_v27, %v3342_v47 }
 0x5b9   :  { %5542 = vmatpush.bf16.msrb.mxu3 %v8005_v39 }
 0x5ba   :  { %13007 = vst [vmem:[#allocation20_spill] sm:$0xff] %v9723_v31  ;;  %v3343_v29 = vmul.f32 %v9723_v31, %v9723_v31  ;;  %v3273_v3 = vadd.f32 %v3272_v7, %v9723_v31 }
 0x5bb   :  { %v2868_v59 = vpop.f32.mrf.mxu2 }
 0x5bc   :  { %v2869_v25 = vadd.f32 %v2868_v59, %v2700_v38  ;;  %v3406_v1 = vadd.f32 %v3405_v45, %v3343_v29  ;;  %v7997_v29 = vld [vmem:[%s12684_s5 + $0x70] sm:$0xff] }
 0x5bd   :  { %v3206_v49 = vpop.f32.mrf.mxu0  ;;  %5373 = vmatpush.bf16.msrb.mxu2 %v7997_v29  ;;  %v13041_v29 = vld [vmem:[#allocation3_spill] sm:$0xff] }
 0x5be   :  { %v3038_v26 = vadd.f32 %v3037_v18, %v2869_v25  ;;  %v2704_v4 = vpop.f32.mrf.mxu1  ;;  %v3042_v44 = vpop.f32.mrf.mxu3 }
 0x5bf   :  { %v2705_v38 = vadd.f32 %v2704_v4, %v13011_v6 }
 0x5c0   :  { %v9732_v23 = vadd.f32 %v3206_v49, %v3038_v26 }
 0x5c2   :  { %13008 = vst [vmem:[#allocation34_spill] sm:$0xff] %v9732_v23  ;;  %v3274_v56 = vadd.f32 %v3273_v3, %v9732_v23  ;;  %v3344_v35 = vmul.f32 %v9732_v23, %v9732_v23  ;;  %v13035_v23 = vld [vmem:[#allocation56_spill] sm:$0xff] }
 0x5c3   :  { %v2871_v63 = vpop.f32.mrf.mxu2 }
 0x5c4   :  { %v3407_v40 = vadd.f32 %v3406_v1, %v3344_v35  ;;  %v2872_v62 = vadd.f32 %v2871_v63, %v2703_v28 }
 0x5c5   :  { %v3209_v36 = vpop.f32.mrf.mxu0 }
 0x5c6   :  { %v3041_v13 = vadd.f32 %v3040_v34, %v2872_v62 }
 0x5c8   :  { %v9744_v53 = vadd.f32 %v3209_v36, %v3041_v13  ;;  %v13039_v13 = vld [vmem:[#allocation60_spill] sm:$0xff] }
 0x5ca   :  { %13010 = vst [vmem:[#allocation6_spill] sm:$0xff] %v9744_v53  ;;  %v3275_v18 = vadd.f32 %v3274_v56, %v9744_v53  ;;  %v3345_v5 = vmul.f32 %v9744_v53, %v9744_v53  ;;  %v13036_v53 = vld [vmem:[#allocation57_spill] sm:$0xff] }
 0x5cb   :  { %v2873_v19 = vpop.f32.mrf.mxu2 }
 0x5cc   :  { %v3408_v16 = vadd.f32 %v3407_v40, %v3345_v5  ;;  %v2874_v59 = vadd.f32 %v2873_v19, %v2705_v38  ;;  %v13012_v5 = vld [vmem:[#allocation32_spill] sm:$0xff] }
 0x5cd   :  { %v3211_v47 = vpop.f32.mrf.mxu0 }
 0x5ce   :  { %v3043_v41 = vadd.f32 %v3042_v44, %v2874_v59  ;;  %v13014_v44 = vld [vmem:[#allocation36_spill] sm:$0xff] }
 0x5d0   :  { %v9750_v25 = vadd.f32 %v3211_v47, %v3043_v41  ;;  %v13037_v47 = vld [vmem:[#allocation58_spill] sm:$0xff] }
 0x5d2   :  { %v3276_v46 = vadd.f32 %v3275_v18, %v9750_v25  ;;  %v3346_v49 = vmul.f32 %v9750_v25, %v9750_v25  ;;  %v13042_v18 = vld [vmem:[#allocation7_spill] sm:$0xff] }
 0x5d4   :  { %v3277_v27 = vrot.slane %v3276_v46, 4  ;;  %v3409_v7 = vadd.f32 %v3408_v16, %v3346_v49  ;;  %v13013_v16 = vld [vmem:[#allocation35_spill] sm:$0xff] }
 0x5d6   :  { %v3278_v26 = vadd.f32 %v3277_v27, %v3276_v46  ;;  %v3410_v45 = vrot.slane %v3409_v7, 4  ;;  %v13015_v46 = vld [vmem:[#allocation37_spill] sm:$0xff] }
 0x5d8   :  { %v3279_v3 = vrot.slane %v3278_v26, 2  ;;  %v3411_v32 = vadd.f32 %v3410_v45, %v3409_v7  ;;  %v13028_v45 = vld [vmem:[#allocation49_spill] sm:$0xff]  ;;  %v13043_v7 = vld [vmem:[#allocation8_spill] sm:$0xff] }
 0x5da   :  { %v3280_v28 = vadd.f32 %v3279_v3, %v3278_v26  ;;  %v3412_v1 = vrot.slane %v3411_v32, 2  ;;  %v13016_v3 = vld [vmem:[#allocation33_spill] sm:$0xff] }
 0x5dc   :  { %v3281_v56 = vrot.slane %v3280_v28, 1  ;;  %v3413_v35 = vadd.f32 %v3412_v1, %v3411_v32  ;;  %v13023_v32 = vld [vmem:[#allocation44_spill] sm:$0xff]  ;;  %v13024_v1 = vld [vmem:[#allocation45_spill] sm:$0xff] }
 0x5de   :  { %v3282_v63 = vadd.f32 %v3281_v56, %v3280_v28  ;;  %v3414_v34 = vrot.slane %v3413_v35, 1  ;;  %v13017_v28 = vld [vmem:[#allocation38_spill] sm:$0xff]  ;;  %v13018_v56 = vld [vmem:[#allocation39_spill] sm:$0xff] }
 0x5e0   :  { %v3415_v40 = vadd.f32 %v3414_v34, %v3413_v35  ;;  %v9758_v62 = vmul.f32 0.001953125, %v3282_v63  ;;  %v13019_v34 = vld [vmem:[#allocation40_spill] sm:$0xff]  ;;  %v13025_v35 = vld [vmem:[#allocation46_spill] sm:$0xff] }
 0x5e2   :  { %v3417_v36 = vmul.f32 0.001953125, %v3415_v40  ;;  %v3418_v48 = vmul.f32 %v9758_v62, %v9758_v62  ;;  %v13026_v40 = vld [vmem:[#allocation47_spill] sm:$0xff]  ;;  %v13044_v39 = vsub.f32 %v9750_v25, %v9758_v62  ;;  %v13048_v25 = vsub.f32 %v13014_v44, %v9758_v62 }
 0x5e4   :  { %v3419_v4 = vsub.f32 %v3417_v36, %v3418_v48  ;;  %v13020_v36 = vld [vmem:[#allocation41_spill] sm:$0xff]  ;;  %v13027_v48 = vld [vmem:[#allocation48_spill] sm:$0xff] }
 0x5e6   :  { %v3420_v6 = vmax.f32 %v3419_v4, 0.0  ;;  %v13021_v4 = vld [vmem:[#allocation42_spill] sm:$0xff] }
 0x5e8   :  { %v3421_v38 = vadd.f32 1e-05, %v3420_v6  ;;  %v13022_v6 = vld [vmem:[#allocation43_spill] sm:$0xff] }
 0x5ea   :  { %8076 = vrsqrt.f32 %v3421_v38  ;;  %vm3428_vm0 = vweird.f32 %v3421_v38 }
 0x5f0   :  { %v8077_v26 = vpop.eup %8076 }
 0x5f1   :  { %v3423_v63 = vmul.f32 %v8077_v26, %v3421_v38  ;;  %vm3429_vm1 = vweird.f32 %v8077_v26 }
 0x5f2   :  { %vm3430_vm2 = vmor %vm3428_vm0, %vm3429_vm1 }
 0x5f3   :  { %v3424_v49 = vmul.f32 %v8077_v26, %v3423_v63 }
 0x5f5   :  { %v3425_v27 = vmul.f32 0.5, %v3424_v49 }
 0x5f7   :  { %v3426_v49 = vsub.f32 1.5, %v3425_v27  ;;  %v247_v27 = vld [vmem:[%s12685_s3] sm:$0x1] }
 0x5f9   :  { %v3427_v41 = vmul.f32 %v8077_v26, %v3426_v49 }
 0x5fb   :  { %v3431_v51 = vsel %vm3430_vm2, %v8077_v26, %v3427_v41  ;;  %v13045_v26 = vsub.f32 %v9215_v52, %v9758_v62 }
 0x5fc   :  { %v3432_v31 = vmul.f32 %v3431_v51, %v247_v27  ;;  %v9886_v27 = vld [vmem:[%s12683_s4] ss:$0 sm:$0xff]  ;;  %v13046_v51 = vsub.f32 %v13012_v5, %v9758_v62 }
 0x5fe   :  { %v9888_v49 = vperm.slane %v3432_v31, 0  ;;  %v13047_v31 = vsub.f32 %v13013_v16, %v9758_v62 }
 0x600   :  { %v3561_v41 = vmul.f32 %v9888_v49, %v13044_v39  ;;  %v9912_v19 = vmul.f32 %v9888_v49, %v13045_v26  ;;  %v9918_v38 = vmul.f32 %v9888_v49, %v13046_v51  ;;  %v9924_v63 = vmul.f32 %v9888_v49, %v13047_v31 }
 0x601   :  { %v9930_v52 = vmul.f32 %v9888_v49, %v13048_v25  ;;  %v13049_v39 = vsub.f32 %v9230_v54, %v9758_v62  ;;  %v13050_v26 = vsub.f32 %v13015_v46, %v9758_v62  ;;  %v13051_v51 = vsub.f32 %v9236_v20, %v9758_v62 }
 0x602   :  { %v3628_v31 = vadd.f32 %v9886_v27, %v3561_v41  ;;  %v13052_v54 = vsub.f32 %v9239_v57, %v9758_v62  ;;  %v13053_v46 = vsub.f32 %v9242_v58, %v9758_v62  ;;  %v13054_v20 = vsub.f32 %v9245_v43, %v9758_v62 }
 0x603   :  { %v9936_v5 = vmul.f32 %v9888_v49, %v13049_v39  ;;  %v9942_v16 = vmul.f32 %v9888_v49, %v13050_v26  ;;  %v9948_v44 = vmul.f32 %v9888_v49, %v13051_v51  ;;  %v13055_v41 = vsub.f32 %v13016_v3, %v9758_v62 }
 0x604   :  { %v9955_v25 = vmul.f32 %v9888_v49, %v13052_v54  ;;  %v9961_v39 = vmul.f32 %v9888_v49, %v13053_v46  ;;  %v9967_v26 = vmul.f32 %v9888_v49, %v13054_v20  ;;  %v13056_v51 = vsub.f32 %v13017_v28, %v9758_v62 }
 0x605   :  { %v9973_v57 = vmul.f32 %v9888_v49, %v13055_v41  ;;  %v13057_v54 = vsub.f32 %v13018_v56, %v9758_v62  ;;  %v13058_v46 = vsub.f32 %v13019_v34, %v9758_v62  ;;  %v3692_v20 = vmax.f32 %v3628_v31, 0.0 }
 0x606   :  { %v9979_v58 = vmul.f32 %v9888_v49, %v13056_v51  ;;  %v13059_v41 = vsub.f32 %v13020_v36, %v9758_v62  ;;  %v13060_v51 = vsub.f32 %v13021_v4, %v9758_v62  ;;  %v13062_v31 = vsub.f32 %v13023_v32, %v9758_v62 }
 0x607   :  { %v9985_v43 = vmul.f32 %v9888_v49, %v13057_v54  ;;  %v9991_v3 = vmul.f32 %v9888_v49, %v13058_v46  ;;  %v13061_v54 = vsub.f32 %v13022_v6, %v9758_v62  ;;  %v13063_v46 = vsub.f32 %v13024_v1, %v9758_v62  ;;  %3756 = vst [vmem:[#allocation2 + $0x339] sm:$0xff] %v3692_v20 }
 0x608   :  { %v9997_v28 = vmul.f32 %v9888_v49, %v13059_v41  ;;  %v10003_v56 = vmul.f32 %v9888_v49, %v13060_v51  ;;  %v10015_v36 = vmul.f32 %v9888_v49, %v13062_v31  ;;  %v13064_v41 = vsub.f32 %v13025_v35, %v9758_v62 }
 0x609   :  { %v10009_v34 = vmul.f32 %v9888_v49, %v13061_v54  ;;  %v10021_v4 = vmul.f32 %v9888_v49, %v13063_v46  ;;  %v13065_v51 = vsub.f32 %v13026_v40, %v9758_v62  ;;  %v13066_v54 = vsub.f32 %v13027_v48, %v9758_v62  ;;  %v13069_v46 = vld [vmem:[#allocation50_spill] sm:$0xff] }
 0x60a   :  { %v10027_v6 = vmul.f32 %v9888_v49, %v13064_v41  ;;  %v13067_v31 = vsub.f32 %v13028_v45, %v9758_v62  ;;  %v13070_v41 = vsub.f32 %v13069_v46, %v9758_v62 }
 0x60b   :  { %v10033_v32 = vmul.f32 %v9888_v49, %v13065_v51  ;;  %v10039_v1 = vmul.f32 %v9888_v49, %v13066_v54  ;;  %v13072_v51 = vld [vmem:[#allocation51_spill] sm:$0xff]  ;;  %v13075_v54 = vld [vmem:[#allocation52_spill] sm:$0xff] }
 0x60c   :  { %v10045_v35 = vmul.f32 %v9888_v49, %v13067_v31  ;;  %v10051_v40 = vmul.f32 %v9888_v49, %v13070_v41  ;;  %v13073_v20 = vsub.f32 %v13072_v51, %v9758_v62  ;;  %v13076_v59 = vsub.f32 %v13075_v54, %v9758_v62  ;;  %v13077_v31 = vld [vmem:[#allocation53_spill] sm:$0xff]  ;;  %v13079_v41 = vld [vmem:[#allocation54_spill] sm:$0xff] }
 0x60e   :  { %13068 = vst [vmem:[#allocation11_spill] sm:$0xff] %v10045_v35  ;;  %v10057_v48 = vmul.f32 %v9888_v49, %v13073_v20  ;;  %v10063_v45 = vmul.f32 %v9888_v49, %v13076_v59  ;;  %v13078_v35 = vsub.f32 %v13077_v31, %v9758_v62  ;;  %v13081_v20 = vld [vmem:[#allocation55_spill] sm:$0xff]  ;;  %v13084_v59 = vsub.f32 %v13035_v23, %v9758_v62 }
 0x60f   :  { %13071 = vst [vmem:[#allocation10_spill] sm:$0xff] %v10051_v40  ;;  %v13080_v40 = vsub.f32 %v13079_v41, %v9758_v62 }
 0x610   :  { %13074 = vst [vmem:[#allocation5_spill] sm:$0xff] %v10057_v48  ;;  %v10069_v46 = vmul.f32 %v9888_v49, %v13078_v35  ;;  %v13082_v48 = vsub.f32 %v13081_v20, %v9758_v62  ;;  %v10087_v31 = vmul.f32 %v9888_v49, %v13084_v59  ;;  %v13086_v35 = vsub.f32 %v13036_v53, %v9758_v62 }
 0x611   :  { %v10075_v51 = vmul.f32 %v9888_v49, %v13080_v40  ;;  %v13088_v40 = vsub.f32 %v13037_v47, %v9758_v62  ;;  %v13093_v59 = vsub.f32 %v13039_v13, %v9758_v62  ;;  %v13101_v13 = vsub.f32 %v9344_v8, %v9758_v62 }
 0x612   :  { %v10081_v54 = vmul.f32 %v9888_v49, %v13082_v48  ;;  %13085 = vst [vmem:[#allocation12_spill] sm:$0xff] %v10087_v31  ;;  %v10093_v41 = vmul.f32 %v9888_v49, %v13086_v35  ;;  %v13090_v48 = vld [vmem:[#allocation59_spill] sm:$0xff]  ;;  %v13095_v35 = vld [vmem:[#allocation61_spill] sm:$0xff]  ;;  %v13105_v8 = vsub.f32 %v9576_v30, %v9758_v62  ;;  %v13109_v30 = vsub.f32 %v9608_v2, %v9758_v62  ;;  %v13128_v31 = vld [vmem:[#allocation6_spill] sm:$0xff] }
 0x613   :  { %v10099_v20 = vmul.f32 %v9888_v49, %v13088_v40  ;;  %v10111_v53 = vmul.f32 %v9888_v49, %v13093_v59  ;;  %v13098_v40 = vsub.f32 %v13041_v29, %v9758_v62  ;;  %v3535_v59 = vmul.f32 %v9888_v49, %v13101_v13 }
 0x614   :  { %13083 = vst [vmem:[#allocation13_spill] sm:$0xff] %v10081_v54  ;;  %v13091_v54 = vsub.f32 %v13090_v48, %v9758_v62  ;;  %v13103_v29 = vsub.f32 %v13043_v7, %v9758_v62  ;;  %v3539_v13 = vmul.f32 %v9888_v49, %v13105_v8  ;;  %v13107_v7 = vsub.f32 %v9595_v50, %v9758_v62 }
 0x615   :  { %13087 = vst [vmem:[#allocation15_spill] sm:$0xff] %v10093_v41  ;;  %v13096_v41 = vsub.f32 %v13095_v35, %v9758_v62  ;;  %v3533_v48 = vmul.f32 %v9888_v49, %v13098_v40  ;;  %v13102_v35 = vsub.f32 %v13042_v18, %v9758_v62  ;;  %v13106_v18 = vsub.f32 %v12992_v22, %v9758_v62 }
 0x616   :  { %13089 = vst [vmem:[#allocation14_spill] sm:$0xff] %v10099_v20  ;;  %v10105_v23 = vmul.f32 %v9888_v49, %v13091_v54  ;;  %v13099_v20 = vld [vmem:[#allocation4_spill] sm:$0xff]  ;;  %v3537_v40 = vmul.f32 %v9888_v49, %v13103_v29  ;;  %v3541_v29 = vmul.f32 %v9888_v49, %v13107_v7  ;;  %v3543_v8 = vmul.f32 %v9888_v49, %v13109_v30 }
 0x617   :  { %13094 = vst [vmem:[#allocation62_spill] sm:$0xff] %v10111_v53  ;;  %v10117_v47 = vmul.f32 %v9888_v49, %v13096_v41  ;;  %v13100_v54 = vsub.f32 %v13099_v20, %v9758_v62  ;;  %v3536_v41 = vmul.f32 %v9888_v49, %v13102_v35  ;;  %v13104_v20 = vsub.f32 %v9357_v14, %v9758_v62  ;;  %v13126_v53 = vld [vmem:[#allocation34_spill] sm:$0xff] }
 0x618   :  { %13092 = vst [vmem:[#allocation9_spill] sm:$0xff] %v10105_v23  ;;  %v3540_v35 = vmul.f32 %v9888_v49, %v13106_v18  ;;  %v13108_v14 = vsub.f32 %v9378_v11, %v9758_v62  ;;  %v13110_v22 = vsub.f32 %v9394_v37, %v9758_v62  ;;  %v13111_v50 = vsub.f32 %v9625_v17, %v9758_v62 }
 0x619   :  { %13097 = vst [vmem:[#allocation17_spill] sm:$0xff] %v10117_v47  ;;  %v3534_v23 = vmul.f32 %v9888_v49, %v13100_v54  ;;  %v3538_v54 = vmul.f32 %v9888_v49, %v13104_v20  ;;  %v13112_v11 = vsub.f32 %v9428_v60, %v9758_v62  ;;  %v13113_v2 = vsub.f32 %v9641_v55, %v9758_v62  ;;  %v13124_v47 = vld [vmem:[#allocation20_spill] sm:$0xff] }
 0x61a   :  { %v3542_v20 = vmul.f32 %v9888_v49, %v13108_v14  ;;  %v3544_v18 = vmul.f32 %v9888_v49, %v13110_v22  ;;  %v3545_v7 = vmul.f32 %v9888_v49, %v13111_v50  ;;  %v13114_v37 = vsub.f32 %v9464_v0, %v9758_v62 }
 0x61b   :  { %v3546_v14 = vmul.f32 %v9888_v49, %v13112_v11  ;;  %v3547_v30 = vmul.f32 %v9888_v49, %v13113_v2  ;;  %v13115_v17 = vsub.f32 %v9658_v12, %v9758_v62  ;;  %v13116_v60 = vsub.f32 %v9503_v61, %v9758_v62 }
 0x61c   :  { %v3548_v22 = vmul.f32 %v9888_v49, %v13114_v37  ;;  %v13117_v55 = vsub.f32 %v9675_v9, %v9758_v62  ;;  %v13118_v0 = vsub.f32 %v9684_v33, %v9758_v62  ;;  %v13119_v12 = vsub.f32 %v9692_v42, %v9758_v62 }
 0x61d   :  { %v3549_v50 = vmul.f32 %v9888_v49, %v13115_v17  ;;  %v3550_v11 = vmul.f32 %v9888_v49, %v13116_v60  ;;  %v13120_v61 = vsub.f32 %v9700_v21, %v9758_v62  ;;  %v13121_v9 = vsub.f32 %v9707_v15, %v9758_v62 }
 0x61e   :  { %v3551_v2 = vmul.f32 %v9888_v49, %v13117_v55  ;;  %v3552_v37 = vmul.f32 %v9888_v49, %v13118_v0  ;;  %v3553_v17 = vmul.f32 %v9888_v49, %v13119_v12  ;;  %v13122_v33 = vsub.f32 %v9712_v10, %v9758_v62 }
 0x61f   :  { %v3554_v60 = vmul.f32 %v9888_v49, %v13120_v61  ;;  %v3555_v55 = vmul.f32 %v9888_v49, %v13121_v9  ;;  %v13123_v42 = vsub.f32 %v9717_v24, %v9758_v62  ;;  %v13125_v21 = vsub.f32 %v13124_v47, %v9758_v62  ;;  %v7996_v24 = vld [vmem:[%s12684_s5 + $0x68] sm:$0xff] }
 0x620   :  { %v3556_v0 = vmul.f32 %v9888_v49, %v13122_v33  ;;  %v13127_v15 = vsub.f32 %v13126_v53, %v9758_v62  ;;  %v13129_v10 = vsub.f32 %v13128_v31, %v9758_v62  ;;  %v10240_v47 = vadd.f32 %v9886_v27, %v9918_v38  ;;  %5374 = vmatpush.bf16.msrb.mxu2 %v7996_v24  ;;  %v8004_v53 = vld [vmem:[%s12684_s5 + $0xa8] sm:$0xff] }
 0x621   :  { %v3557_v12 = vmul.f32 %v9888_v49, %v13123_v42  ;;  %v3558_v61 = vmul.f32 %v9888_v49, %v13125_v21  ;;  %v10236_v42 = vadd.f32 %v9886_v27, %v9912_v19  ;;  %v10247_v62 = vadd.f32 %v9886_v27, %v9924_v63  ;;  %5543 = vmatpush.bf16.msrb.mxu3 %v8004_v53 }
 0x622   :  { %v3559_v9 = vmul.f32 %v9888_v49, %v13127_v15  ;;  %v3560_v33 = vmul.f32 %v9888_v49, %v13129_v10  ;;  %v10251_v49 = vadd.f32 %v9886_v27, %v9930_v52  ;;  %v10255_v19 = vadd.f32 %v9886_v27, %v9936_v5  ;;  %v7995_v5 = vld [vmem:[%s12684_s5 + $0x60] sm:$0xff] }
 0x623   :  { %v10259_v38 = vadd.f32 %v9886_v27, %v9942_v16  ;;  %v10263_v31 = vadd.f32 %v9886_v27, %v9948_v44  ;;  %v10266_v21 = vadd.f32 %v9886_v27, %v3533_v48  ;;  %v10269_v63 = vadd.f32 %v9886_v27, %v3534_v23 }
 0x624   :  { %v10272_v52 = vadd.f32 %v9886_v27, %v3535_v59  ;;  %v10278_v16 = vadd.f32 %v9886_v27, %v3536_v41  ;;  %v10281_v44 = vadd.f32 %v9886_v27, %v3537_v40  ;;  %v10284_v48 = vadd.f32 %v9886_v27, %v3538_v54  ;;  %5375 = vmatpush.bf16.msrb.mxu2 %v7995_v5  ;;  %v8003_v40 = vld [vmem:[%s12684_s5 + $0xa0] sm:$0xff]  ;;  %v7993_v5 = vld [vmem:[%s12684_s5 + $0x50] sm:$0xff] }
 0x625   :  { %v10287_v23 = vadd.f32 %v9886_v27, %v3539_v13  ;;  %v10290_v59 = vadd.f32 %v9886_v27, %v3540_v35  ;;  %v10293_v15 = vadd.f32 %v9886_v27, %v3541_v29  ;;  %v10296_v10 = vadd.f32 %v9886_v27, %v3542_v20  ;;  %5544 = vmatpush.bf16.msrb.mxu3 %v8003_v40 }
 0x626   :  { %v10299_v41 = vadd.f32 %v9886_v27, %v3543_v8  ;;  %v10305_v54 = vadd.f32 %v9886_v27, %v3544_v18  ;;  %v10308_v13 = vadd.f32 %v9886_v27, %v3545_v7  ;;  %v10311_v35 = vadd.f32 %v9886_v27, %v3546_v14  ;;  %v7994_v7 = vld [vmem:[%s12684_s5 + $0x58] sm:$0xff] }
 0x627   :  { %v10314_v29 = vadd.f32 %v9886_v27, %v3547_v30  ;;  %v10317_v20 = vadd.f32 %v9886_v27, %v3548_v22  ;;  %v10320_v8 = vadd.f32 %v9886_v27, %v3549_v50  ;;  %v10323_v24 = vadd.f32 %v9886_v27, %v3550_v11 }
 0x628   :  { %v10326_v18 = vadd.f32 %v9886_v27, %v3551_v2  ;;  %v10332_v14 = vadd.f32 %v9886_v27, %v3552_v37  ;;  %v10335_v30 = vadd.f32 %v9886_v27, %v3553_v17  ;;  %v10338_v22 = vadd.f32 %v9886_v27, %v3554_v60  ;;  %5376 = vmatpush.bf16.msrb.mxu2 %v7994_v7  ;;  %v8002_v17 = vld [vmem:[%s12684_s5 + $0x98] sm:$0xff] }
 0x629   :  { %13130 = vst [vmem:[#allocation16_spill] sm:$0xff] %v10320_v8  ;;  %v10341_v50 = vadd.f32 %v9886_v27, %v3555_v55  ;;  %v10344_v11 = vadd.f32 %v9886_v27, %v3556_v0  ;;  %v10347_v2 = vadd.f32 %v9886_v27, %v3557_v12  ;;  %v10350_v53 = vadd.f32 %v9886_v27, %v3558_v61 }
 0x62a   :  { %13131 = vst [vmem:[#allocation63_spill] sm:$0xff] %v10323_v24  ;;  %v10353_v37 = vadd.f32 %v9886_v27, %v3559_v9  ;;  %v10359_v60 = vadd.f32 %v9886_v27, %v3560_v33  ;;  %v12760_v55 = vmax.f32 %v10236_v42, 0.0  ;;  %v12761_v0 = vmax.f32 %v10240_v47, 0.0  ;;  %5545 = vmatpush.bf16.msrb.mxu3 %v8002_v17 }
 0x62b   :  { %13132 = vst [vmem:[#allocation19_spill] sm:$0xff] %v10326_v18  ;;  %v12762_v12 = vmax.f32 %v10247_v62, 0.0  ;;  %v10366_v61 = vadd.f32 %v9886_v27, %v9955_v25  ;;  %v12763_v9 = vmax.f32 %v10251_v49, 0.0  ;;  %v10374_v33 = vadd.f32 %v9886_v27, %v9961_v39  ;;  %v8001_v39 = vld [vmem:[%s12684_s5 + $0x90] sm:$0xff] }
 0x62c   :  { %13133 = vst [vmem:[#allocation18_spill] sm:$0xff] %v10332_v14  ;;  %v12764_v40 = vmax.f32 %v10255_v19, 0.0  ;;  %v10381_v25 = vadd.f32 %v9886_v27, %v9967_v26  ;;  %v12765_v7 = vmax.f32 %v10259_v38, 0.0  ;;  %5377 = vmatpush.bf16.msrb.mxu2 %v7993_v5  ;;  %v10391_v17 = vadd.f32 %v9886_v27, %v9973_v57  ;;  %v7992_v57 = vld [vmem:[%s12684_s5 + $0x48] sm:$0xff] }
 0x62d   :  { %13134 = vst [vmem:[#allocation21_spill] sm:$0xff] %v10335_v30  ;;  %v10398_v26 = vadd.f32 %v9886_v27, %v9979_v58  ;;  %v10408_v5 = vadd.f32 %v9886_v27, %v9985_v43  ;;  %v10415_v58 = vadd.f32 %v9886_v27, %v9991_v3  ;;  %v8000_v43 = vld [vmem:[%s12684_s5 + $0x88] sm:$0xff]  ;;  %v10432_v3 = vadd.f32 %v9886_v27, %v10003_v56  ;;  %v8014_v56 = vld [vmem:[%s12684_s5 + $0xf8] sm:$0xff] }
 0x62e   :  { %13135 = vst [vmem:[#allocation22_spill] sm:$0xff] %v10338_v22  ;;  %5546 = vmatpush.bf16.msrb.mxu3 %v8001_v39  ;;  %v10425_v39 = vadd.f32 %v9886_v27, %v9997_v28  ;;  %v7991_v28 = vld [vmem:[%s12684_s5 + $0x40] sm:$0xff]  ;;  %5710 = vmatpush.bf16.msrb.mxu0 %v8014_v56  ;;  %v13161_v22 = vld [vmem:[#allocation17_spill] sm:$0xff] }
 0x62f   :  { %13136 = vst [vmem:[#allocation23_spill] sm:$0xff] %v10341_v50  ;;  %v13142_v56 = vmax.f32 %v10408_v5, 0.0  ;;  %v10505_v50 = vld [vmem:[#allocation2 + $0x1b8] sm:$0xff] }
 0x630   :  { %13137 = vst [vmem:[#allocation24_spill] sm:$0xff] %v10344_v11  ;;  %5378 = vmatpush.bf16.msrb.mxu2 %v7992_v57  ;;  %v10442_v57 = vadd.f32 %v9886_v27, %v10009_v34  ;;  %v7999_v34 = vld [vmem:[%s12684_s5 + $0x80] sm:$0xff]  ;;  %v13147_v11 = vmax.f32 %v10432_v3, 0.0 }
 0x631   :  { %13138 = vst [vmem:[#allocation25_spill] sm:$0xff] %v10347_v2  ;;  %v13146_v2 = vld [vmem:[#allocation10_spill] sm:$0xff] }
 0x632   :  { %13139 = vst [vmem:[#allocation26_spill] sm:$0xff] %v10350_v53  ;;  %5547 = vmatpush.bf16.msrb.mxu3 %v8000_v43  ;;  %v10452_v43 = vadd.f32 %v9886_v27, %v10015_v36  ;;  %v10469_v36 = vadd.f32 %v9886_v27, %v10027_v6  ;;  %v8013_v6 = vld [vmem:[%s12684_s5 + $0xf0] sm:$0xff] }
 0x633   :  { %13140 = vst [vmem:[#allocation27_spill] sm:$0xff] %v10353_v37  ;;  %5711 = vmatpush.bf16.msrb.mxu0 %v8013_v6  ;;  %v3889_v53 = vld [vmem:[#allocation2 + $0xa] sm:$0xff]  ;;  %v13150_v6 = vmax.f32 %v10442_v57, 0.0 }
 0x634   :  { %13141 = vst [vmem:[#allocation28_spill] sm:$0xff] %v10359_v60  ;;  %5379 = vmatpush.bf16.msrb.mxu2 %v7991_v28  ;;  %v13144_v28 = vld [vmem:[#allocation11_spill] sm:$0xff]  ;;  %v13145_v60 = vmax.f32 %v10425_v39, 0.0 }
 0x635   :  { %3693 = vst [vmem:[#allocation2 + $0x19] sm:$0xff] %v12760_v55  ;;  %v12766_v55 = vmax.f32 %v10263_v31, 0.0 }
 0x636   :  { %3694 = vst [vmem:[#allocation2 + $0x21] sm:$0xff] %v12761_v0  ;;  %v12767_v0 = vmax.f32 %v10366_v61, 0.0  ;;  %5548 = vmatpush.bf16.msrb.mxu3 %v7999_v34  ;;  %v10500_v34 = vadd.f32 %v9886_v27, %v13146_v2 }
 0x637   :  { %3695 = vst [vmem:[#allocation2 + $0x31] sm:$0xff] %v12762_v12  ;;  %v12768_v12 = vmax.f32 %v10374_v33, 0.0 }
 0x638   :  { %3696 = vst [vmem:[#allocation2 + $0x39] sm:$0xff] %v12763_v9  ;;  %v12769_v9 = vmax.f32 %v10381_v25, 0.0 }
 0x639   :  { %3697 = vst [vmem:[#allocation2 + $0x49] sm:$0xff] %v12764_v40  ;;  %v12770_v40 = vmax.f32 %v10391_v17, 0.0 }
 0x63a   :  { %3698 = vst [vmem:[#allocation2 + $0x51] sm:$0xff] %v12765_v7  ;;  %v12771_v7 = vmax.f32 %v10398_v26, 0.0 }
 0x63b   :  { %3699 = vst [vmem:[#allocation2 + $0x61] sm:$0xff] %v12766_v55  ;;  %v10493_v55 = vadd.f32 %v9886_v27, %v13144_v28 }
 0x63c   :  { %3700 = vst [vmem:[#allocation2 + $0x69] sm:$0xff] %v12767_v0  ;;  %v3825_v0 = vld [vmem:[#allocation2 + $0x9] sm:$0xff] }
 0x63d   :  { %3701 = vst [vmem:[#allocation2 + $0x79] sm:$0xff] %v12768_v12  ;;  %v10462_v12 = vadd.f32 %v9886_v27, %v10021_v4  ;;  %v10476_v4 = vadd.f32 %v9886_v27, %v10033_v32  ;;  %v3888_v32 = vld [vmem:[#allocation2 + $0x2] sm:$0xff]  ;;  %v3890_v8 = vld [vmem:[#allocation2 + $0x1a] sm:$0xff] }
 0x63e   :  { %3702 = vst [vmem:[#allocation2 + $0x81] sm:$0xff] %v12769_v9  ;;  %v3824_v9 = vld [vmem:[#allocation2 + $0x1] sm:$0xff]  ;;  %v4338_v28 = vpack.c.bf16 %v3889_v53, %v3888_v32  ;;  %v13151_v32 = vmax.f32 %v10452_v43, 0.0 }
 0x63f   :  { %3703 = vst [vmem:[#allocation2 + $0x91] sm:$0xff] %v12770_v40  ;;  %v10486_v40 = vadd.f32 %v9886_v27, %v10039_v1  ;;  %v4337_v37 = vpack.c.bf16 %v3825_v0, %v3824_v9  ;;  %v3760_v1 = vld [vmem:[#allocation2] sm:$0xff]  ;;  %v13149_v0 = vld [vmem:[#allocation5_spill] sm:$0xff]  ;;  %v12773_v2 = vmax.f32 %v10476_v4, 0.0 }
 0x640   :  { %3704 = vst [vmem:[#allocation2 + $0x99] sm:$0xff] %v12771_v7  ;;  %v13143_v7 = vmax.f32 %v10415_v58, 0.0  ;;  %v10513_v9 = vadd.f32 %v9886_v27, %v13149_v0  ;;  %5549 = vmatmul.bf16.vlgmr.msrb.gmra.mxu3 %v4338_v28  ;;  %v12776_v0 = vmax.f32 %v10493_v55, 0.0  ;;  %v3763_v24 = vld [vmem:[#allocation2 + $0x20] sm:$0xff] }
 0x641   :  { %3705 = vst [vmem:[#allocation2 + $0xa9] sm:$0xff] %v13142_v56  ;;  %v4336_v56 = vpack.c.bf16 %v10505_v50, %v3760_v1  ;;  %5380 = vmatmul.bf16.vlgmr.msrb.gmra.mxu2 %v4337_v37  ;;  %v12775_v53 = vmax.f32 %v10486_v40, 0.0  ;;  %v10527_v1 = vadd.f32 %v9886_v27, %v10069_v46  ;;  %v8011_v46 = vld [vmem:[%s12684_s5 + $0xe0] sm:$0xff] }
 0x642   :  { %3706 = vst [vmem:[#allocation2 + $0xb1] sm:$0xff] %v13143_v7  ;;  %v12772_v7 = vmax.f32 %v10469_v36, 0.0 }
 0x643   :  { %3707 = vst [vmem:[#allocation2 + $0xc1] sm:$0xff] %v13145_v60  ;;  %v8012_v60 = vld [vmem:[%s12684_s5 + $0xe8] sm:$0xff]  ;;  %5211 = vmatmul.bf16.vlgmr.msra.gmra.mxu1 %v4336_v56  ;;  %v13153_v56 = vld [vmem:[#allocation13_spill] sm:$0xff]  ;;  %v13163_v18 = vmax.f32 %v10527_v1, 0.0 }
 0x644   :  { %3708 = vst [vmem:[#allocation2 + $0xc9] sm:$0xff] %v13147_v11  ;;  %v10520_v11 = vadd.f32 %v9886_v27, %v10063_v45  ;;  %5712 = vmatpush.bf16.msrb.mxu0 %v8012_v60  ;;  %v10534_v45 = vadd.f32 %v9886_v27, %v10075_v51  ;;  %v10544_v28 = vadd.f32 %v9886_v27, %v13153_v56  ;;  %v13154_v51 = vld [vmem:[#allocation12_spill] sm:$0xff] }
 0x645   :  { %13148 = vst [vmem:[#allocation29_spill] sm:$0xff] %v10505_v50  ;;  %v10551_v60 = vadd.f32 %v9886_v27, %v13154_v51  ;;  %v13157_v50 = vmax.f32 %v10500_v34, 0.0 }
 0x646   :  { %3709 = vst [vmem:[#allocation2 + $0xd9] sm:$0xff] %v13150_v6  ;;  %v13152_v6 = vmax.f32 %v10462_v12, 0.0  ;;  %v3656_v51 = vmax.f32 %v10534_v45, 0.0  ;;  %v3657_v56 = vmax.f32 %v10544_v28, 0.0  ;;  %v3599_v45 = vadd.f32 %v9886_v27, %v13161_v22 }
 0x647   :  { %3710 = vst [vmem:[#allocation2 + $0xe1] sm:$0xff] %v13151_v32  ;;  %v13156_v32 = vld [vmem:[#allocation14_spill] sm:$0xff]  ;;  %v13162_v30 = vmax.f32 %v10520_v11, 0.0  ;;  %v3664_v22 = vmax.f32 %v10266_v21, 0.0  ;;  %v13166_v21 = vmax.f32 %v10247_v62, 0.0  ;;  %v13172_v62 = vmax.f32 %v10374_v33, 0.0 }
 0x648   :  { %3711 = vst [vmem:[#allocation2 + $0xf1] sm:$0xff] %v13152_v6  ;;  %5713 = vmatpush.bf16.msrb.mxu0 %v8011_v46  ;;  %v13158_v6 = vld [vmem:[#allocation9_spill] sm:$0xff]  ;;  %v13160_v46 = vld [vmem:[#allocation62_spill] sm:$0xff]  ;;  %v3891_v33 = vld [vmem:[#allocation2 + $0x22] sm:$0xff] }
 0x649   :  { %3712 = vst [vmem:[#allocation2 + $0xf9] sm:$0xff] %v12772_v7  ;;  %v13155_v7 = vld [vmem:[#allocation15_spill] sm:$0xff] }
 0x64a   :  { %3713 = vst [vmem:[#allocation2 + $0x109] sm:$0xff] %v12773_v2  ;;  %v3595_v37 = vadd.f32 %v9886_v27, %v13155_v7  ;;  %v3596_v2 = vadd.f32 %v9886_v27, %v13156_v32  ;;  %v3597_v7 = vadd.f32 %v9886_v27, %v13158_v6  ;;  %v3598_v32 = vadd.f32 %v9886_v27, %v13160_v46 }
 0x64b   :  { %3714 = vst [vmem:[#allocation2 + $0x111] sm:$0xff] %v12775_v53  ;;  %v8010_v53 = vld [vmem:[%s12684_s5 + $0xd8] sm:$0xff]  ;;  %v3663_v27 = vmax.f32 %v3599_v45, 0.0 }
 0x64c   :  { %3715 = vst [vmem:[#allocation2 + $0x121] sm:$0xff] %v12776_v0  ;;  %v13159_v0 = vmax.f32 %v10513_v9, 0.0  ;;  %v3659_v14 = vmax.f32 %v3595_v37, 0.0  ;;  %5714 = vmatpush.bf16.msrb.mxu0 %v8010_v53  ;;  %v3660_v28 = vmax.f32 %v3596_v2, 0.0  ;;  %v3661_v6 = vmax.f32 %v3597_v7, 0.0  ;;  %v8008_v2 = vld [vmem:[%s12684_s5 + $0xc8] sm:$0xff] }
 0x64d   :  { %3716 = vst [vmem:[#allocation2 + $0x129] sm:$0xff] %v13157_v50  ;;  %v3658_v50 = vmax.f32 %v10551_v60, 0.0  ;;  %v3662_v46 = vmax.f32 %v3598_v32, 0.0  ;;  %v13164_v53 = vmax.f32 %v10236_v42, 0.0  ;;  %v13165_v37 = vmax.f32 %v10240_v47, 0.0 }
 0x64e   :  { %3717 = vst [vmem:[#allocation2 + $0x139] sm:$0xff] %v13159_v0  ;;  %v8009_v0 = vld [vmem:[%s12684_s5 + $0xd0] sm:$0xff]  ;;  %v13167_v7 = vmax.f32 %v10251_v49, 0.0  ;;  %v13169_v32 = vmax.f32 %v10259_v38, 0.0  ;;  %v13170_v42 = vmax.f32 %v10263_v31, 0.0  ;;  %v13171_v47 = vmax.f32 %v10366_v61, 0.0 }
 0x64f   :  { %3718 = vst [vmem:[#allocation2 + $0x141] sm:$0xff] %v13162_v30  ;;  %v3665_v30 = vmax.f32 %v10269_v63, 0.0  ;;  %v4346_v60 = vpack.c.bf16 %v13165_v37, %v13164_v53  ;;  %v13173_v49 = vmax.f32 %v10381_v25, 0.0  ;;  %v13175_v38 = vmax.f32 %v10398_v26, 0.0 }
 0x650   :  { %3719 = vst [vmem:[#allocation2 + $0x151] sm:$0xff] %v13163_v18  ;;  %v8022_v18 = vld [vmem:[%s12684_s5 + $0x138] sm:$0xff]  ;;  %5715 = vmatpush.bf16.msrb.mxu0 %v8009_v0  ;;  %v10602_v63 = vpack.c.bf16 %v13167_v7, %v13166_v21  ;;  %v10614_v53 = vpack.c.bf16 %v13171_v47, %v13170_v42  ;;  %v13176_v21 = vmax.f32 %v10408_v5, 0.0  ;;  %v13177_v31 = vmax.f32 %v10415_v58, 0.0 }
 0x651   :  { %3720 = vst [vmem:[#allocation2 + $0x159] sm:$0xff] %v3656_v51  ;;  %v3762_v0 = vld [vmem:[#allocation2 + $0x18] sm:$0xff]  ;;  %v10620_v37 = vpack.c.bf16 %v13173_v49, %v13172_v62  ;;  %5879 = vmatpush.bf16.msrb.mxu1 %v8022_v18  ;;  %5385 = vmatmul.bf16.gmra.mxu2 %v4346_v60  ;;  %v13178_v25 = vmax.f32 %v10425_v39, 0.0  ;;  %v13180_v26 = vmax.f32 %v10442_v57, 0.0  ;;  %v3666_v58 = vmax.f32 %v10272_v52, 0.0  ;;  %v8007_v52 = vld [vmem:[%s12684_s5 + $0xc0] sm:$0xff] }
 0x652   :  { %3721 = vst [vmem:[#allocation2 + $0x169] sm:$0xff] %v3657_v56  ;;  %v10632_v7 = vpack.c.bf16 %v13177_v31, %v13176_v21  ;;  %v4345_v61 = vpack.c.bf16 %v3763_v24, %v3762_v0  ;;  %v13182_v24 = vmax.f32 %v10462_v12, 0.0  ;;  %v13183_v18 = vmax.f32 %v10469_v36, 0.0  ;;  %v13194_v62 = vld [vmem:[#allocation18_spill] sm:$0xff]  ;;  %v13197_v31 = vld [vmem:[#allocation23_spill] sm:$0xff] }
 0x653   :  { %3722 = vst [vmem:[#allocation2 + $0x171] sm:$0xff] %v3658_v50  ;;  %v13184_v39 = vmax.f32 %v10476_v4, 0.0  ;;  %v3667_v57 = vmax.f32 %v10278_v16, 0.0  ;;  %v13187_v12 = vmax.f32 %v10500_v34, 0.0  ;;  %v13188_v36 = vmax.f32 %v10513_v9, 0.0 }
 0x654   :  { %3723 = vst [vmem:[#allocation2 + $0x181] sm:$0xff] %v3659_v14  ;;  %v13168_v14 = vmax.f32 %v10255_v19, 0.0  ;;  %v13174_v19 = vmax.f32 %v10391_v17, 0.0  ;;  %v10651_v60 = vpack.c.bf16 %v13183_v18, %v13182_v24  ;;  %5716 = vmatpush.bf16.msrb.mxu0 %v8008_v2  ;;  %5216 = vmatmul.bf16.gmra.mxu1 %v4345_v61  ;;  %v3668_v16 = vmax.f32 %v10281_v44, 0.0  ;;  %v8021_v24 = vld [vmem:[%s12684_s5 + $0x130] sm:$0xff]  ;;  %v13202_v18 = vld [vmem:[#allocation28_spill] sm:$0xff] }
 0x655   :  { %3724 = vst [vmem:[#allocation2 + $0x189] sm:$0xff] %v3660_v28  ;;  %v10681_v34 = vpack.c.bf16 %v3658_v50, %v3657_v56  ;;  %v3670_v2 = vmax.f32 %v10287_v23, 0.0  ;;  %v3671_v9 = vmax.f32 %v10290_v59, 0.0  ;;  %v3672_v44 = vmax.f32 %v10293_v15, 0.0  ;;  %v3764_v15 = vld [vmem:[#allocation2 + $0x30] sm:$0xff]  ;;  %v3893_v50 = vld [vmem:[#allocation2 + $0x3a] sm:$0xff]  ;;  %5880 = vmatpush.bf16.msrb.mxu1 %v8021_v24 }
 0x656   :  { %v10608_v45 = vpack.c.bf16 %v13169_v32, %v13168_v14  ;;  %v10626_v28 = vpack.c.bf16 %v13175_v38, %v13174_v19  ;;  %3725 = vst [vmem:[#allocation2 + $0x1c9] sm:$0xff] %v3661_v6  ;;  %v13179_v14 = vmax.f32 %v10432_v3, 0.0  ;;  %v13181_v32 = vmax.f32 %v10452_v43, 0.0  ;;  %v13196_v38 = vld [vmem:[#allocation22_spill] sm:$0xff]  ;;  %v3907_v24 = vld [vmem:[#allocation2 + $0xe2] sm:$0xff] }
 0x657   :  { %3726 = vst [vmem:[#allocation2 + $0x1d1] sm:$0xff] %v3662_v46  ;;  %v4347_v6 = vpack.c.bf16 %v3891_v33, %v3890_v8  ;;  %v13185_v3 = vmax.f32 %v10486_v40, 0.0  ;;  %v13186_v8 = vmax.f32 %v10493_v55, 0.0  ;;  %v13189_v40 = vmax.f32 %v10520_v11, 0.0  ;;  %v13198_v33 = vld [vmem:[#allocation24_spill] sm:$0xff] }
 0x658   :  { %v10638_v17 = vpack.c.bf16 %v13179_v14, %v13178_v25  ;;  %v10644_v5 = vpack.c.bf16 %v13181_v32, %v13180_v26  ;;  %3727 = vst [vmem:[#allocation2 + $0x1e1] sm:$0xff] %v3663_v27  ;;  %v13190_v46 = vmax.f32 %v10527_v1, 0.0  ;;  %v3669_v55 = vmax.f32 %v10284_v48, 0.0  ;;  %5717 = vmatpush.bf16.msrb.mxu0 %v8007_v52  ;;  %v13199_v25 = vld [vmem:[#allocation25_spill] sm:$0xff]  ;;  %v13200_v26 = vld [vmem:[#allocation26_spill] sm:$0xff] }
 0x659   :  { %v10657_v0 = vpack.c.bf16 %v13185_v3, %v13184_v39  ;;  %v10667_v43 = vpack.c.bf16 %v13187_v12, %v13186_v8  ;;  %v10673_v4 = vpack.c.bf16 %v13189_v40, %v13188_v36  ;;  %3728 = vst [vmem:[#allocation2 + $0x1e9] sm:$0xff] %v3664_v22  ;;  %5554 = vmatmul.bf16.gmra.mxu3 %v4347_v6  ;;  %v3673_v11 = vmax.f32 %v10296_v10, 0.0  ;;  %v13191_v22 = vld [vmem:[#allocation16_spill] sm:$0xff]  ;;  %v3895_v8 = vld [vmem:[#allocation2 + $0x52] sm:$0xff]  ;;  %v3768_v40 = vld [vmem:[#allocation2 + $0x60] sm:$0xff] }
 0x65a   :  { %v10678_v27 = vpack.c.bf16 %v3656_v51, %v13190_v46  ;;  %3729 = vst [vmem:[#allocation2 + $0x1f9] sm:$0xff] %v3665_v30  ;;  %v3674_v1 = vmax.f32 %v10299_v41, 0.0  ;;  %v3675_v48 = vmax.f32 %v10305_v54, 0.0  ;;  %v3676_v23 = vmax.f32 %v10308_v13, 0.0  ;;  %v3765_v51 = vld [vmem:[#allocation2 + $0x38] sm:$0xff]  ;;  %v13192_v54 = vld [vmem:[#allocation63_spill] sm:$0xff] }
 0x65b   :  { %3730 = vst [vmem:[#allocation2 + $0x201] sm:$0xff] %v3666_v58  ;;  %5718 = vmatmul.bf16.vlgmr.msrb.gmra.mxu0 %v4345_v61  ;;  %v3677_v59 = vmax.f32 %v10311_v35, 0.0  ;;  %v3678_v56 = vmax.f32 %v10314_v29, 0.0  ;;  %v3679_v10 = vmax.f32 %v10317_v20, 0.0  ;;  %v3892_v41 = vld [vmem:[#allocation2 + $0x32] sm:$0xff]  ;;  %v3680_v30 = vmax.f32 %v13191_v22, 0.0 }
 0x65c   :  { %3731 = vst [vmem:[#allocation2 + $0x211] sm:$0xff] %v3667_v57  ;;  %v3681_v42 = vmax.f32 %v13192_v54, 0.0  ;;  %v4354_v13 = vpack.c.bf16 %v3765_v51, %v3764_v15  ;;  %v13193_v35 = vld [vmem:[#allocation19_spill] sm:$0xff]  ;;  %v4356_v29 = vpack.c.bf16 %v3893_v50, %v3892_v41  ;;  %v3683_v49 = vmax.f32 %v13194_v62, 0.0  ;;  %v13195_v20 = vld [vmem:[#allocation21_spill] sm:$0xff]  ;;  %v3766_v3 = vld [vmem:[#allocation2 + $0x48] sm:$0xff] }
 0x65d   :  { %3732 = vst [vmem:[#allocation2 + $0x219] sm:$0xff] %v3668_v16  ;;  %v3682_v47 = vmax.f32 %v13193_v35, 0.0  ;;  %v3684_v19 = vmax.f32 %v13195_v20, 0.0  ;;  %v3685_v21 = vmax.f32 %v13196_v38, 0.0  ;;  %v3686_v61 = vmax.f32 %v13197_v31, 0.0  ;;  %v13201_v58 = vld [vmem:[#allocation27_spill] sm:$0xff] }
 0x65e   :  { %3733 = vst [vmem:[#allocation2 + $0x229] sm:$0xff] %v3669_v55  ;;  %v3688_v14 = vmax.f32 %v13199_v25, 0.0  ;;  %v3689_v32 = vmax.f32 %v13200_v26, 0.0  ;;  %v3690_v6 = vmax.f32 %v13201_v58, 0.0  ;;  %v3691_v39 = vmax.f32 %v13202_v18, 0.0  ;;  %v3767_v57 = vld [vmem:[#allocation2 + $0x50] sm:$0xff] }
 0x65f   :  { %3734 = vst [vmem:[#allocation2 + $0x231] sm:$0xff] %v3670_v2  ;;  %v3894_v52 = vld [vmem:[#allocation2 + $0x4a] sm:$0xff]  ;;  %v4363_v12 = vpack.c.bf16 %v3767_v57, %v3766_v3  ;;  %v3896_v46 = vld [vmem:[#allocation2 + $0x62] sm:$0xff]  ;;  %v3900_v15 = vld [vmem:[#allocation2 + $0x92] sm:$0xff] }
 0x660   :  { %3735 = vst [vmem:[#allocation2 + $0x241] sm:$0xff] %v3671_v9  ;;  %v4365_v36 = vpack.c.bf16 %v3895_v8, %v3894_v52  ;;  %v3769_v16 = vld [vmem:[#allocation2 + $0x68] sm:$0xff]  ;;  %v3901_v51 = vld [vmem:[#allocation2 + $0x9a] sm:$0xff]  ;;  %v3775_v50 = vld [vmem:[#allocation2 + $0xb0] sm:$0xff] }
 0x661   :  { %3736 = vst [vmem:[#allocation2 + $0x249] sm:$0xff] %v3672_v44  ;;  %5390 = vmatmul.bf16.gmra.mxu2 %v10602_v63  ;;  %v3687_v63 = vmax.f32 %v13198_v33, 0.0  ;;  %v3897_v55 = vld [vmem:[#allocation2 + $0x6a] sm:$0xff]  ;;  %v4372_v2 = vpack.c.bf16 %v3769_v16, %v3768_v40  ;;  %v3770_v44 = vld [vmem:[#allocation2 + $0x78] sm:$0xff] }
 0x662   :  { %3737 = vst [vmem:[#allocation2 + $0x259] sm:$0xff] %v3673_v11  ;;  %v4374_v9 = vpack.c.bf16 %v3897_v55, %v3896_v46  ;;  %v3771_v11 = vld [vmem:[#allocation2 + $0x80] sm:$0xff]  ;;  %v8020_v41 = vld [vmem:[%s12684_s5 + $0x128] sm:$0xff]  ;;  %v3778_v26 = vld [vmem:[#allocation2 + $0xd8] sm:$0xff] }
 0x663   :  { %3738 = vst [vmem:[#allocation2 + $0x261] sm:$0xff] %v3674_v1  ;;  %v3898_v1 = vld [vmem:[#allocation2 + $0x7a] sm:$0xff]  ;;  %v3902_v22 = vld [vmem:[#allocation2 + $0xaa] sm:$0xff]  ;;  %5881 = vmatpush.bf16.msrb.mxu1 %v8020_v41 }
 0x664   :  { %3739 = vst [vmem:[#allocation2 + $0x271] sm:$0xff] %v3675_v48  ;;  %5221 = vmatmul.bf16.gmra.mxu1 %v4354_v13  ;;  %v3899_v48 = vld [vmem:[#allocation2 + $0x82] sm:$0xff]  ;;  %v3905_v62 = vld [vmem:[#allocation2 + $0xca] sm:$0xff] }
 0x665   :  { %3740 = vst [vmem:[#allocation2 + $0x279] sm:$0xff] %v3676_v23  ;;  %v4383_v23 = vpack.c.bf16 %v3899_v48, %v3898_v1  ;;  %v3777_v35 = vld [vmem:[#allocation2 + $0xc8] sm:$0xff]  ;;  %v3908_v1 = vld [vmem:[#allocation2 + $0xf2] sm:$0xff]  ;;  %v3909_v48 = vld [vmem:[#allocation2 + $0xfa] sm:$0xff] }
 0x666   :  { %3741 = vst [vmem:[#allocation2 + $0x289] sm:$0xff] %v3677_v59  ;;  %v3772_v59 = vld [vmem:[#allocation2 + $0x90] sm:$0xff] }
 0x667   :  { %3742 = vst [vmem:[#allocation2 + $0x291] sm:$0xff] %v3678_v56  ;;  %v3773_v56 = vld [vmem:[#allocation2 + $0x98] sm:$0xff] }
 0x668   :  { %3743 = vst [vmem:[#allocation2 + $0x2a1] sm:$0xff] %v3679_v10  ;;  %v4392_v10 = vpack.c.bf16 %v3901_v51, %v3900_v15  ;;  %v4428_v51 = vpack.c.bf16 %v3909_v48, %v3908_v1 }
 0x669   :  { %3744 = vst [vmem:[#allocation2 + $0x2a9] sm:$0xff] %v3680_v30  ;;  %5559 = vmatmul.bf16.gmra.mxu3 %v4356_v29  ;;  %v3903_v30 = vld [vmem:[#allocation2 + $0xb2] sm:$0xff]  ;;  %v3904_v29 = vld [vmem:[#allocation2 + $0xc2] sm:$0xff] }
 0x66a   :  { %3745 = vst [vmem:[#allocation2 + $0x2b9] sm:$0xff] %v3681_v42  ;;  %v4401_v42 = vpack.c.bf16 %v3903_v30, %v3902_v22 }
 0x66b   :  { %3746 = vst [vmem:[#allocation2 + $0x2c1] sm:$0xff] %v3682_v47  ;;  %5723 = vmatmul.bf16.gmra.mxu0 %v4354_v13  ;;  %v3776_v13 = vld [vmem:[#allocation2 + $0xc0] sm:$0xff] }
 0x66c   :  { %3747 = vst [vmem:[#allocation2 + $0x2d1] sm:$0xff] %v3683_v49  ;;  %v4408_v20 = vpack.c.bf16 %v3777_v35, %v3776_v13  ;;  %v3782_v35 = vld [vmem:[#allocation2 + $0x108] sm:$0xff] }
 0x66d   :  { %3748 = vst [vmem:[#allocation2 + $0x2d9] sm:$0xff] %v3684_v19 }
 0x66e   :  { %3749 = vst [vmem:[#allocation2 + $0x2e9] sm:$0xff] %v3685_v21 }
 0x66f   :  { %3750 = vst [vmem:[#allocation2 + $0x2f1] sm:$0xff] %v3686_v61 }
 0x670   :  { %3751 = vst [vmem:[#allocation2 + $0x301] sm:$0xff] %v3687_v63 }
 0x671   :  { %3752 = vst [vmem:[#allocation2 + $0x309] sm:$0xff] %v3688_v14  ;;  %5395 = vmatmul.bf16.gmra.mxu2 %v10608_v45  ;;  %v4381_v45 = vpack.c.bf16 %v3771_v11, %v3770_v44  ;;  %v3781_v44 = vld [vmem:[#allocation2 + $0xf8] sm:$0xff] }
 0x672   :  { %3753 = vst [vmem:[#allocation2 + $0x319] sm:$0xff] %v3689_v32  ;;  %v3779_v32 = vld [vmem:[#allocation2 + $0xe0] sm:$0xff] }
 0x673   :  { %3754 = vst [vmem:[#allocation2 + $0x321] sm:$0xff] %v3690_v6  ;;  %v3906_v6 = vld [vmem:[#allocation2 + $0xda] sm:$0xff] }
 0x674   :  { %3755 = vst [vmem:[#allocation2 + $0x331] sm:$0xff] %v3691_v39  ;;  %5226 = vmatmul.bf16.gmra.mxu1 %v4363_v12  ;;  %v4417_v39 = vpack.c.bf16 %v3779_v32, %v3778_v26  ;;  %v4419_v3 = vpack.c.bf16 %v3907_v24, %v3906_v6 }
 0x679   :  { %5564 = vmatmul.bf16.gmra.mxu3 %v4365_v36 }
 0x67b   :  { %5728 = vmatmul.bf16.gmra.mxu0 %v4363_v12 }
 0x681   :  { %5400 = vmatmul.bf16.gmra.mxu2 %v10614_v53  ;;  %v4390_v53 = vpack.c.bf16 %v3773_v56, %v3772_v59 }
 0x684   :  { %5231 = vmatmul.bf16.gmra.mxu1 %v4372_v2 }
 0x689   :  { %5569 = vmatmul.bf16.gmra.mxu3 %v4374_v9  ;;  %v3780_v9 = vld [vmem:[#allocation2 + $0xf0] sm:$0xff] }
 0x68a   :  { %v4426_v15 = vpack.c.bf16 %v3781_v44, %v3780_v9 }
 0x68b   :  { %5733 = vmatmul.bf16.gmra.mxu0 %v4372_v2 }
 0x691   :  { %5405 = vmatmul.bf16.gmra.mxu2 %v10620_v37  ;;  %v3774_v37 = vld [vmem:[#allocation2 + $0xa8] sm:$0xff] }
 0x692   :  { %v4399_v54 = vpack.c.bf16 %v3775_v50, %v3774_v37 }
 0x694   :  { %5236 = vmatmul.bf16.gmra.mxu1 %v4381_v45 }
 0x699   :  { %5574 = vmatmul.bf16.gmra.mxu3 %v4383_v23 }
 0x69b   :  { %5738 = vmatmul.bf16.gmra.mxu0 %v4381_v45 }
 0x6a1   :  { %5410 = vmatmul.bf16.gmra.mxu2 %v10626_v28  ;;  %v10720_v28 = vld [vmem:[%s12686_s6] ss:$0 sm:$0xff] }
 0x6a4   :  { %5241 = vmatmul.bf16.gmra.mxu1 %v4390_v53 }
 0x6a9   :  { %5579 = vmatmul.bf16.gmra.mxu3 %v4392_v10 }
 0x6ab   :  { %5743 = vmatmul.bf16.gmra.mxu0 %v4390_v53 }
 0x6b1   :  { %5415 = vmatmul.bf16.gmra.mxu2 %v10632_v7  ;;  %v4410_v7 = vpack.c.bf16 %v3905_v62, %v3904_v29 }
 0x6b4   :  { %5246 = vmatmul.bf16.gmra.mxu1 %v4399_v54 }
 0x6b9   :  { %5584 = vmatmul.bf16.gmra.mxu3 %v4401_v42  ;;  %v8019_v42 = vld [vmem:[%s12684_s5 + $0x120] sm:$0xff] }
 0x6ba   :  { %5882 = vmatpush.bf16.msrb.mxu1 %v8019_v42 }
 0x6bb   :  { %5748 = vmatmul.bf16.gmra.mxu0 %v4399_v54 }
 0x6c0   :  { %v5212_v47 = vpop.f32.mrf.mxu1 }
 0x6c1   :  { %v5213_v49 = vadd.f32 %v10720_v28, %v5212_v47  ;;  %5420 = vmatmul.bf16.gmra.mxu2 %v10638_v17  ;;  %v3783_v47 = vld [vmem:[#allocation2 + $0x110] sm:$0xff] }
 0x6c3   :  { %v5550_v21 = vpop.f32.mrf.mxu3 }
 0x6c4   :  { %5251 = vmatmul.bf16.gmra.mxu1 %v4408_v20  ;;  %v5381_v19 = vpop.f32.mrf.mxu2 }
 0x6c5   :  { %v5382_v38 = vadd.f32 %v5381_v19, %v5213_v49  ;;  %v3910_v49 = vld [vmem:[#allocation2 + $0x10a] sm:$0xff] }
 0x6c7   :  { %v5551_v31 = vadd.f32 %v5550_v21, %v5382_v38 }
 0x6c8   :  { %v5214_v61 = vpop.f32.mrf.mxu1 }
 0x6c9   :  { %5589 = vmatmul.bf16.gmra.mxu3 %v4410_v7  ;;  %v5215_v33 = vadd.f32 %v10720_v28, %v5214_v61 }
 0x6cb   :  { %5753 = vmatmul.bf16.gmra.mxu0 %v4408_v20  ;;  %v5552_v14 = vpop.f32.mrf.mxu3  ;;  %v3911_v20 = vld [vmem:[#allocation2 + $0x112] sm:$0xff] }
 0x6cc   :  { %v5383_v63 = vpop.f32.mrf.mxu2  ;;  %v4437_v61 = vpack.c.bf16 %v3911_v20, %v3910_v49 }
 0x6cd   :  { %v5384_v25 = vadd.f32 %v5383_v63, %v5215_v33 }
 0x6cf   :  { %v5553_v58 = vadd.f32 %v5552_v14, %v5384_v25 }
 0x6d1   :  { %v5217_v17 = vpop.f32.mrf.mxu1  ;;  %5425 = vmatmul.bf16.gmra.mxu2 %v10644_v5 }
 0x6d2   :  { %v5218_v18 = vadd.f32 %v10720_v28, %v5217_v17 }
 0x6d4   :  { %5256 = vmatmul.bf16.gmra.mxu1 %v4417_v39  ;;  %v5386_v57 = vpop.f32.mrf.mxu2 }
 0x6d5   :  { %v5387_v52 = vadd.f32 %v5386_v57, %v5218_v18  ;;  %v3784_v18 = vld [vmem:[#allocation2 + $0x120] sm:$0xff] }
 0x6d6   :  { %v3912_v57 = vld [vmem:[#allocation2 + $0x122] sm:$0xff] }
 0x6d8   :  { %v5719_v8 = vpop.f32.mrf.mxu0 }
 0x6d9   :  { %5594 = vmatmul.bf16.gmra.mxu3 %v4419_v3  ;;  %v10727_v36 = vadd.f32 %v5719_v8, %v5551_v31  ;;  %v5219_v16 = vpop.f32.mrf.mxu1  ;;  %v4435_v31 = vpack.c.bf16 %v3783_v47, %v3782_v35 }
 0x6da   :  { %v5220_v46 = vadd.f32 %v10720_v28, %v5219_v16 }
 0x6db   :  { %5758 = vmatmul.bf16.gmra.mxu0 %v4417_v39  ;;  %v3785_v39 = vld [vmem:[#allocation2 + $0x128] sm:$0xff] }
 0x6dc   :  { %v5555_v12 = vpop.f32.mrf.mxu3  ;;  %v5388_v55 = vpop.f32.mrf.mxu2 }
 0x6dd   :  { %v5556_v40 = vadd.f32 %v5555_v12, %v5387_v52  ;;  %v5389_v2 = vadd.f32 %v5388_v55, %v5220_v46  ;;  %v3913_v52 = vld [vmem:[#allocation2 + $0x12a] sm:$0xff]  ;;  %v4444_v46 = vpack.c.bf16 %v3785_v39, %v3784_v18 }
 0x6de   :  { %v4446_v55 = vpack.c.bf16 %v3913_v52, %v3912_v57 }
 0x6e0   :  { %v5721_v11 = vpop.f32.mrf.mxu0 }
 0x6e1   :  { %v10730_v45 = vadd.f32 %v5721_v11, %v5553_v58  ;;  %v5222_v59 = vpop.f32.mrf.mxu1  ;;  %5430 = vmatmul.bf16.gmra.mxu2 %v10651_v60 }
 0x6e2   :  { %v5223_v56 = vadd.f32 %v10720_v28, %v5222_v59 }
 0x6e4   :  { %v5557_v5 = vpop.f32.mrf.mxu3  ;;  %5261 = vmatmul.bf16.gmra.mxu1 %v4426_v15  ;;  %v5391_v53 = vpop.f32.mrf.mxu2 }
 0x6e5   :  { %v5558_v23 = vadd.f32 %v5557_v5, %v5389_v2  ;;  %v5392_v10 = vadd.f32 %v5391_v53, %v5223_v56 }
 0x6e8   :  { %v5724_v41 = vpop.f32.mrf.mxu0 }
 0x6e9   :  { %5599 = vmatmul.bf16.gmra.mxu3 %v4428_v51  ;;  %v10734_v50 = vadd.f32 %v5724_v41, %v5556_v40  ;;  %v5224_v30 = vpop.f32.mrf.mxu1  ;;  %v3787_v51 = vld [vmem:[#allocation2 + $0x140] sm:$0xff] }
 0x6ea   :  { %v5225_v54 = vadd.f32 %v10720_v28, %v5224_v30  ;;  %v3915_v41 = vld [vmem:[#allocation2 + $0x142] sm:$0xff] }
 0x6eb   :  { %5763 = vmatmul.bf16.gmra.mxu0 %v4426_v15  ;;  %v3786_v15 = vld [vmem:[#allocation2 + $0x138] sm:$0xff] }
 0x6ec   :  { %v5560_v37 = vpop.f32.mrf.mxu3  ;;  %v5393_v13 = vpop.f32.mrf.mxu2  ;;  %v4453_v42 = vpack.c.bf16 %v3787_v51, %v3786_v15 }
 0x6ed   :  { %v5561_v22 = vadd.f32 %v5560_v37, %v5392_v10  ;;  %v5394_v60 = vadd.f32 %v5393_v13, %v5225_v54  ;;  %v3914_v10 = vld [vmem:[#allocation2 + $0x13a] sm:$0xff] }
 0x6ee   :  { %v4455_v13 = vpack.c.bf16 %v3915_v41, %v3914_v10 }
 0x6f0   :  { %v5726_v29 = vpop.f32.mrf.mxu0 }
 0x6f1   :  { %v10740_v7 = vadd.f32 %v5726_v29, %v5558_v23  ;;  %v5227_v38 = vpop.f32.mrf.mxu1  ;;  %5435 = vmatmul.bf16.gmra.mxu2 %v10657_v0 }
 0x6f2   :  { %v5228_v21 = vadd.f32 %v10720_v28, %v5227_v38 }
 0x6f4   :  { %v5562_v62 = vpop.f32.mrf.mxu3  ;;  %5266 = vmatmul.bf16.gmra.mxu1 %v4435_v31  ;;  %v5396_v33 = vpop.f32.mrf.mxu2 }
 0x6f5   :  { %v5563_v19 = vadd.f32 %v5562_v62, %v5394_v60  ;;  %v5397_v63 = vadd.f32 %v5396_v33, %v5228_v21 }
 0x6f8   :  { %v5729_v25 = vpop.f32.mrf.mxu0 }
 0x6f9   :  { %5604 = vmatmul.bf16.gmra.mxu3 %v4437_v61  ;;  %v10744_v26 = vadd.f32 %v5729_v25, %v5561_v22  ;;  %v5229_v58 = vpop.f32.mrf.mxu1  ;;  %v3789_v61 = vld [vmem:[#allocation2 + $0x158] sm:$0xff] }
 0x6fa   :  { %v5230_v6 = vadd.f32 %v10720_v28, %v5229_v58  ;;  %v3917_v25 = vld [vmem:[#allocation2 + $0x15a] sm:$0xff] }
 0x6fb   :  { %5768 = vmatmul.bf16.gmra.mxu0 %v4435_v31  ;;  %v3788_v31 = vld [vmem:[#allocation2 + $0x150] sm:$0xff] }
 0x6fc   :  { %v5565_v14 = vpop.f32.mrf.mxu3  ;;  %v5398_v24 = vpop.f32.mrf.mxu2 }
 0x6fd   :  { %v5566_v32 = vadd.f32 %v5565_v14, %v5397_v63  ;;  %v5399_v17 = vadd.f32 %v5398_v24, %v5230_v6  ;;  %v3916_v63 = vld [vmem:[#allocation2 + $0x152] sm:$0xff]  ;;  %v4462_v24 = vpack.c.bf16 %v3789_v61, %v3788_v31 }
 0x700   :  { %v5731_v3 = vpop.f32.mrf.mxu0 }
 0x701   :  { %v10747_v8 = vadd.f32 %v5731_v3, %v5563_v19  ;;  %v5232_v40 = vpop.f32.mrf.mxu1  ;;  %5440 = vmatmul.bf16.gmra.mxu2 %v10667_v43 }
 0x702   :  { %v5233_v16 = vadd.f32 %v10720_v28, %v5232_v40 }
 0x704   :  { %v5567_v0 = vpop.f32.mrf.mxu3  ;;  %5271 = vmatmul.bf16.gmra.mxu1 %v4444_v46  ;;  %v5401_v2 = vpop.f32.mrf.mxu2 }
 0x705   :  { %v5568_v12 = vadd.f32 %v5567_v0, %v5399_v17  ;;  %v5402_v9 = vadd.f32 %v5401_v2, %v5233_v16  ;;  %v4464_v17 = vpack.c.bf16 %v3917_v25, %v3916_v63  ;;  %v8018_v16 = vld [vmem:[%s12684_s5 + $0x118] sm:$0xff]  ;;  %v3791_v2 = vld [vmem:[#allocation2 + $0x170] sm:$0xff] }
 0x706   :  { %5883 = vmatpush.bf16.msrb.mxu1 %v8018_v16  ;;  %v3858_v16 = vld [vmem:[#allocation2 + $0x1c9] sm:$0xff] }
 0x708   :  { %v5734_v44 = vpop.f32.mrf.mxu0 }
 0x709   :  { %5609 = vmatmul.bf16.gmra.mxu3 %v4446_v55  ;;  %v10751_v5 = vadd.f32 %v5734_v44, %v5566_v32  ;;  %v5234_v48 = vpop.f32.mrf.mxu1  ;;  %v3790_v55 = vld [vmem:[#allocation2 + $0x168] sm:$0xff] }
 0x70a   :  { %v5235_v23 = vadd.f32 %v10720_v28, %v5234_v48  ;;  %v4471_v15 = vpack.c.bf16 %v3791_v2, %v3790_v55  ;;  %v3794_v55 = vld [vmem:[#allocation2 + $0x1c8] sm:$0xff]  ;;  %v3795_v2 = vld [vmem:[#allocation2 + $0x1d0] sm:$0xff] }
 0x70b   :  { %5773 = vmatmul.bf16.gmra.mxu0 %v4444_v46 }
 0x70c   :  { %v5570_v11 = vpop.f32.mrf.mxu3  ;;  %v5403_v59 = vpop.f32.mrf.mxu2 }
 0x70d   :  { %v5571_v1 = vadd.f32 %v5570_v11, %v5402_v9  ;;  %v5404_v56 = vadd.f32 %v5403_v59, %v5235_v23  ;;  %v3918_v11 = vld [vmem:[#allocation2 + $0x16a] sm:$0xff] }
 0x710   :  { %v5736_v53 = vpop.f32.mrf.mxu0 }
 0x711   :  { %v10754_v37 = vadd.f32 %v5736_v53, %v5568_v12  ;;  %v5237_v30 = vpop.f32.mrf.mxu1  ;;  %5445 = vmatmul.bf16.gmra.mxu2 %v10673_v4 }
 0x712   :  { %v5238_v54 = vadd.f32 %v10720_v28, %v5237_v30 }
 0x714   :  { %v5572_v43 = vpop.f32.mrf.mxu3  ;;  %5276 = vmatmul.bf16.gmra.mxu1 %v4453_v42  ;;  %v5406_v60 = vpop.f32.mrf.mxu2 }
 0x715   :  { %v5573_v22 = vadd.f32 %v5572_v43, %v5404_v56  ;;  %v5407_v35 = vadd.f32 %v5406_v60, %v5238_v54  ;;  %v3857_v60 = vld [vmem:[#allocation2 + $0x1b9] sm:$0xff] }
 0x718   :  { %v5739_v47 = vpop.f32.mrf.mxu0 }
 0x719   :  { %5614 = vmatmul.bf16.gmra.mxu3 %v4455_v13  ;;  %v10758_v62 = vadd.f32 %v5739_v47, %v5571_v1  ;;  %v5239_v20 = vpop.f32.mrf.mxu1  ;;  %v3919_v1 = vld [vmem:[#allocation2 + $0x172] sm:$0xff] }
 0x71a   :  { %v5240_v19 = vadd.f32 %v10720_v28, %v5239_v20  ;;  %v4473_v51 = vpack.c.bf16 %v3919_v1, %v3918_v11  ;;  %v3856_v13 = vld [vmem:[#allocation2 + $0x1b1] sm:$0xff]  ;;  %v3921_v20 = vld [vmem:[#allocation2 + $0x1ba] sm:$0xff] }
 0x71b   :  { %5778 = vmatmul.bf16.gmra.mxu0 %v4453_v42  ;;  %v3792_v47 = vld [vmem:[#allocation2 + $0x1b0] sm:$0xff] }
 0x71c   :  { %v5575_v29 = vpop.f32.mrf.mxu3  ;;  %v5408_v38 = vpop.f32.mrf.mxu2  ;;  %v3922_v1 = vld [vmem:[#allocation2 + $0x1ca] sm:$0xff] }
 0x71d   :  { %v5576_v49 = vadd.f32 %v5575_v29, %v5407_v35  ;;  %v5409_v21 = vadd.f32 %v5408_v38, %v5240_v19 }
 0x720   :  { %v5741_v33 = vpop.f32.mrf.mxu0 }
 0x721   :  { %v10761_v14 = vadd.f32 %v5741_v33, %v5573_v22  ;;  %v5242_v58 = vpop.f32.mrf.mxu1  ;;  %5450 = vmatmul.bf16.gmra.mxu2 %v10678_v27 }
 0x722   :  { %v5243_v6 = vadd.f32 %v10720_v28, %v5242_v58  ;;  %v3982_v58 = vld [vmem:[#allocation2 + $0x180] sm:$0xff] }
 0x724   :  { %v5577_v4 = vpop.f32.mrf.mxu3  ;;  %5281 = vmatmul.bf16.gmra.mxu1 %v4462_v24  ;;  %v5411_v18 = vpop.f32.mrf.mxu2 }
 0x725   :  { %v5578_v32 = vadd.f32 %v5577_v4, %v5409_v21  ;;  %v5412_v39 = vadd.f32 %v5411_v18, %v5243_v6  ;;  %v13203_v21 = vld [vmem:[#allocation29_spill] sm:$0xff]  ;;  %v3983_v6 = vld [vmem:[#allocation2 + $0x188] sm:$0xff] }
 0x726   :  { %v4480_v31 = vpack.c.bf16 %v13203_v21, %v3792_v47 }
 0x728   :  { %v5744_v3 = vpop.f32.mrf.mxu0 }
 0x729   :  { %5619 = vmatmul.bf16.gmra.mxu3 %v4464_v17  ;;  %v10765_v57 = vadd.f32 %v5744_v3, %v5576_v49  ;;  %v5244_v12 = vpop.f32.mrf.mxu1  ;;  %v3920_v49 = vld [vmem:[#allocation2 + $0x1b2] sm:$0xff]  ;;  %v4474_v3 = vpack.c.bf16 %v3983_v6, %v3982_v58 }
 0x72a   :  { %v5245_v40 = vadd.f32 %v10720_v28, %v5244_v12  ;;  %v4482_v63 = vpack.c.bf16 %v3921_v20, %v3920_v49  ;;  %v3796_v20 = vld [vmem:[#allocation2 + $0x1e0] sm:$0xff] }
 0x72b   :  { %5783 = vmatmul.bf16.gmra.mxu0 %v4462_v24 }
 0x72c   :  { %v5580_v0 = vpop.f32.mrf.mxu3  ;;  %v5413_v46 = vpop.f32.mrf.mxu2 }
 0x72d   :  { %v5581_v52 = vadd.f32 %v5580_v0, %v5412_v39  ;;  %v5414_v27 = vadd.f32 %v5413_v46, %v5245_v40  ;;  %v3859_v46 = vld [vmem:[#allocation2 + $0x1d1] sm:$0xff] }
 0x72e   :  { %v4490_v11 = vpack.c.bf16 %v3859_v46, %v3858_v16  ;;  %v8017_v46 = vld [vmem:[%s12684_s5 + $0x110] sm:$0xff] }
 0x72f   :  { %5884 = vmatpush.bf16.msrb.mxu1 %v8017_v46 }
 0x730   :  { %v5746_v9 = vpop.f32.mrf.mxu0 }
 0x731   :  { %v10771_v48 = vadd.f32 %v5746_v9, %v5578_v32  ;;  %v5247_v59 = vpop.f32.mrf.mxu1  ;;  %5455 = vmatmul.bf16.gmra.mxu2 %v10681_v34  ;;  %v4481_v34 = vpack.c.bf16 %v3857_v60, %v3856_v13 }
 0x732   :  { %v5248_v56 = vadd.f32 %v10720_v28, %v5247_v59 }
 0x734   :  { %v5582_v44 = vpop.f32.mrf.mxu3  ;;  %5286 = vmatmul.bf16.gmra.mxu1 %v4471_v15  ;;  %v5416_v53 = vpop.f32.mrf.mxu2 }
 0x735   :  { %v5583_v23 = vadd.f32 %v5582_v44, %v5414_v27  ;;  %v5417_v43 = vadd.f32 %v5416_v53, %v5248_v56  ;;  %v4489_v53 = vpack.c.bf16 %v3795_v2, %v3794_v55  ;;  %v3862_v55 = vld [vmem:[#allocation2 + $0x1f9] sm:$0xff]  ;;  %v3863_v2 = vld [vmem:[#allocation2 + $0x201] sm:$0xff] }
 0x738   :  { %v5749_v10 = vpop.f32.mrf.mxu0 }
 0x739   :  { %5624 = vmatmul.bf16.gmra.mxu3 %v4473_v51  ;;  %v10775_v22 = vadd.f32 %v5749_v10, %v5581_v52  ;;  %v5249_v54 = vpop.f32.mrf.mxu1 }
 0x73a   :  { %v5250_v42 = vadd.f32 %v10720_v28, %v5249_v54 }
 0x73b   :  { %5788 = vmatmul.bf16.gmra.mxu0 %v4471_v15 }
 0x73c   :  { %v5585_v41 = vpop.f32.mrf.mxu3  ;;  %v5418_v35 = vpop.f32.mrf.mxu2 }
 0x73d   :  { %v5586_v30 = vadd.f32 %v5585_v41, %v5417_v43  ;;  %v5419_v29 = vadd.f32 %v5418_v35, %v5250_v42 }
 0x740   :  { %v5751_v19 = vpop.f32.mrf.mxu0 }
 0x741   :  { %v10779_v61 = vadd.f32 %v5751_v19, %v5583_v23  ;;  %v5252_v4 = vpop.f32.mrf.mxu1  ;;  %5460 = vmatmul.bf16.gmra.mxu2 %v4481_v34  ;;  %v3923_v23 = vld [vmem:[#allocation2 + $0x1d2] sm:$0xff]  ;;  %v3861_v34 = vld [vmem:[#allocation2 + $0x1e9] sm:$0xff] }
 0x742   :  { %v5253_v25 = vadd.f32 %v10720_v28, %v5252_v4  ;;  %v4491_v43 = vpack.c.bf16 %v3923_v23, %v3922_v1  ;;  %v3797_v19 = vld [vmem:[#allocation2 + $0x1e8] sm:$0xff] }
 0x743   :  { %v3925_v4 = vld [vmem:[#allocation2 + $0x1ea] sm:$0xff]  ;;  %v4498_v6 = vpack.c.bf16 %v3797_v19, %v3796_v20 }
 0x744   :  { %v5587_v38 = vpop.f32.mrf.mxu3  ;;  %5291 = vmatmul.bf16.gmra.mxu1 %v4480_v31  ;;  %v5421_v32 = vpop.f32.mrf.mxu2 }
 0x745   :  { %v5588_v33 = vadd.f32 %v5587_v38, %v5419_v29  ;;  %v5422_v24 = vadd.f32 %v5421_v32, %v5253_v25  ;;  %v3860_v29 = vld [vmem:[#allocation2 + $0x1e1] sm:$0xff] }
 0x746   :  { %v4499_v31 = vpack.c.bf16 %v3861_v34, %v3860_v29 }
 0x748   :  { %v5754_v17 = vpop.f32.mrf.mxu0 }
 0x749   :  { %5629 = vmatmul.bf16.gmra.mxu3 %v4482_v63  ;;  %v10782_v39 = vadd.f32 %v5754_v17, %v5586_v30  ;;  %v5254_v52 = vpop.f32.mrf.mxu1 }
 0x74a   :  { %v5255_v12 = vadd.f32 %v10720_v28, %v5254_v52 }
 0x74b   :  { %5793 = vmatmul.bf16.gmra.mxu0 %v4474_v3 }
 0x74c   :  { %v5590_v18 = vpop.f32.mrf.mxu3  ;;  %v5423_v40 = vpop.f32.mrf.mxu2 }
 0x74d   :  { %v5591_v0 = vadd.f32 %v5590_v18, %v5422_v24  ;;  %v5424_v27 = vadd.f32 %v5423_v40, %v5255_v12 }
 0x750   :  { %v5756_v9 = vpop.f32.mrf.mxu0 }
 0x751   :  { %v10785_v59 = vadd.f32 %v5756_v9, %v5588_v33  ;;  %v5257_v15 = vpop.f32.mrf.mxu1  ;;  %5465 = vmatmul.bf16.gmra.mxu2 %v4490_v11  ;;  %v3924_v33 = vld [vmem:[#allocation2 + $0x1e2] sm:$0xff] }
 0x752   :  { %v5258_v51 = vadd.f32 %v10720_v28, %v5257_v15  ;;  %v4500_v24 = vpack.c.bf16 %v3925_v4, %v3924_v33  ;;  %v3799_v11 = vld [vmem:[#allocation2 + $0x200] sm:$0xff]  ;;  %v3800_v33 = vld [vmem:[#allocation2 + $0x210] sm:$0xff]  ;;  %v3801_v4 = vld [vmem:[#allocation2 + $0x218] sm:$0xff] }
 0x753   :  { %v3926_v15 = vld [vmem:[#allocation2 + $0x1fa] sm:$0xff] }
 0x754   :  { %v5592_v44 = vpop.f32.mrf.mxu3  ;;  %5296 = vmatmul.bf16.gmra.mxu1 %v4489_v53  ;;  %v5426_v10 = vpop.f32.mrf.mxu2 }
 0x755   :  { %v5593_v56 = vadd.f32 %v5592_v44, %v5424_v27  ;;  %v5427_v41 = vadd.f32 %v5426_v10, %v5258_v51  ;;  %v3798_v44 = vld [vmem:[#allocation2 + $0x1f8] sm:$0xff]  ;;  %v3927_v51 = vld [vmem:[#allocation2 + $0x202] sm:$0xff] }
 0x758   :  { %v5759_v30 = vpop.f32.mrf.mxu0 }
 0x759   :  { %5634 = vmatmul.bf16.gmra.mxu3 %v4491_v43  ;;  %v10788_v42 = vadd.f32 %v5759_v30, %v5591_v0  ;;  %v5259_v60 = vpop.f32.mrf.mxu1  ;;  %v4507_v30 = vpack.c.bf16 %v3799_v11, %v3798_v44 }
 0x75a   :  { %v5260_v35 = vadd.f32 %v10720_v28, %v5259_v60 }
 0x75b   :  { %5798 = vmatmul.bf16.gmra.mxu0 %v4489_v53 }
 0x75c   :  { %v5595_v54 = vpop.f32.mrf.mxu3  ;;  %v5428_v47 = vpop.f32.mrf.mxu2 }
 0x75d   :  { %v5596_v13 = vadd.f32 %v5595_v54, %v5427_v41  ;;  %v5429_v49 = vadd.f32 %v5428_v47, %v5260_v35  ;;  %v4509_v54 = vpack.c.bf16 %v3927_v51, %v3926_v15  ;;  %v3802_v51 = vld [vmem:[#allocation2 + $0x228] sm:$0xff] }
 0x760   :  { %v5761_v38 = vpop.f32.mrf.mxu0 }
 0x761   :  { %v10791_v63 = vadd.f32 %v5761_v38, %v5593_v56  ;;  %v5262_v32 = vpop.f32.mrf.mxu1  ;;  %5470 = vmatmul.bf16.gmra.mxu2 %v4499_v31  ;;  %v4508_v56 = vpack.c.bf16 %v3863_v2, %v3862_v55  ;;  %v3864_v38 = vld [vmem:[#allocation2 + $0x211] sm:$0xff] }
 0x762   :  { %v5263_v58 = vadd.f32 %v10720_v28, %v5262_v32 }
 0x764   :  { %v5597_v21 = vpop.f32.mrf.mxu3  ;;  %5301 = vmatmul.bf16.gmra.mxu1 %v4498_v6  ;;  %v5431_v17 = vpop.f32.mrf.mxu2 }
 0x765   :  { %v5598_v25 = vadd.f32 %v5597_v21, %v5429_v49  ;;  %v5432_v18 = vadd.f32 %v5431_v17, %v5263_v58  ;;  %v3865_v21 = vld [vmem:[#allocation2 + $0x219] sm:$0xff] }
 0x766   :  { %v4517_v58 = vpack.c.bf16 %v3865_v21, %v3864_v38 }
 0x768   :  { %v5764_v3 = vpop.f32.mrf.mxu0 }
 0x769   :  { %5639 = vmatmul.bf16.gmra.mxu3 %v4500_v24  ;;  %v10794_v52 = vadd.f32 %v5764_v3, %v5596_v13  ;;  %v5264_v40 = vpop.f32.mrf.mxu1  ;;  %v3929_v24 = vld [vmem:[#allocation2 + $0x21a] sm:$0xff] }
 0x76a   :  { %v5265_v16 = vadd.f32 %v10720_v28, %v5264_v40 }
 0x76b   :  { %5803 = vmatmul.bf16.gmra.mxu0 %v4498_v6  ;;  %v3928_v6 = vld [vmem:[#allocation2 + $0x212] sm:$0xff] }
 0x76c   :  { %v5600_v0 = vpop.f32.mrf.mxu3  ;;  %v5433_v27 = vpop.f32.mrf.mxu2  ;;  %v4518_v40 = vpack.c.bf16 %v3929_v24, %v3928_v6  ;;  %v3868_v6 = vld [vmem:[#allocation2 + $0x241] sm:$0xff]  ;;  %v3869_v24 = vld [vmem:[#allocation2 + $0x249] sm:$0xff] }
 0x76d   :  { %v5601_v12 = vadd.f32 %v5600_v0, %v5432_v18  ;;  %v5434_v9 = vadd.f32 %v5433_v27, %v5265_v16 }
 0x770   :  { %v5766_v1 = vpop.f32.mrf.mxu0 }
 0x771   :  { %v10800_v53 = vadd.f32 %v5766_v1, %v5598_v25  ;;  %v5267_v10 = vpop.f32.mrf.mxu1  ;;  %5475 = vmatmul.bf16.gmra.mxu2 %v4508_v56  ;;  %v3867_v56 = vld [vmem:[#allocation2 + $0x231] sm:$0xff] }
 0x772   :  { %v5268_v41 = vadd.f32 %v10720_v28, %v5267_v10 }
 0x774   :  { %v5602_v23 = vpop.f32.mrf.mxu3  ;;  %5306 = vmatmul.bf16.gmra.mxu1 %v4507_v30  ;;  %v5436_v13 = vpop.f32.mrf.mxu2 }
 0x775   :  { %v5603_v43 = vadd.f32 %v5602_v23, %v5434_v9  ;;  %v5437_v60 = vadd.f32 %v5436_v13, %v5268_v41  ;;  %v3866_v23 = vld [vmem:[#allocation2 + $0x229] sm:$0xff]  ;;  %v3931_v13 = vld [vmem:[#allocation2 + $0x232] sm:$0xff] }
 0x778   :  { %v5769_v35 = vpop.f32.mrf.mxu0 }
 0x779   :  { %5644 = vmatmul.bf16.gmra.mxu3 %v4509_v54  ;;  %v10803_v29 = vadd.f32 %v5769_v35, %v5601_v12  ;;  %v5269_v49 = vpop.f32.mrf.mxu1  ;;  %v4516_v12 = vpack.c.bf16 %v3801_v4, %v3800_v33  ;;  %v3930_v54 = vld [vmem:[#allocation2 + $0x22a] sm:$0xff] }
 0x77a   :  { %v5270_v20 = vadd.f32 %v10720_v28, %v5269_v49 }
 0x77b   :  { %5808 = vmatmul.bf16.gmra.mxu0 %v4507_v30  ;;  %v4526_v30 = vpack.c.bf16 %v3867_v56, %v3866_v23 }
 0x77c   :  { %v5605_v47 = vpop.f32.mrf.mxu3  ;;  %v5438_v19 = vpop.f32.mrf.mxu2 }
 0x77d   :  { %v5606_v34 = vadd.f32 %v5605_v47, %v5437_v60  ;;  %v5439_v31 = vadd.f32 %v5438_v19, %v5270_v20  ;;  %v4527_v20 = vpack.c.bf16 %v3931_v13, %v3930_v54  ;;  %v8016_v13 = vld [vmem:[%s12684_s5 + $0x108] sm:$0xff] }
 0x77e   :  { %5885 = vmatpush.bf16.msrb.mxu1 %v8016_v13  ;;  %v3936_v13 = vld [vmem:[#allocation2 + $0x272] sm:$0xff] }
 0x780   :  { %v5771_v25 = vpop.f32.mrf.mxu0 }
 0x781   :  { %v10806_v17 = vadd.f32 %v5771_v25, %v5603_v43  ;;  %v5272_v3 = vpop.f32.mrf.mxu1  ;;  %5480 = vmatmul.bf16.gmra.mxu2 %v4517_v58  ;;  %v3803_v43 = vld [vmem:[#allocation2 + $0x230] sm:$0xff] }
 0x782   :  { %v5273_v0 = vadd.f32 %v10720_v28, %v5272_v3  ;;  %v4525_v49 = vpack.c.bf16 %v3803_v43, %v3802_v51  ;;  %v3804_v3 = vld [vmem:[#allocation2 + $0x240] sm:$0xff] }
 0x784   :  { %v5607_v32 = vpop.f32.mrf.mxu3  ;;  %5311 = vmatmul.bf16.gmra.mxu1 %v4516_v12  ;;  %v5441_v16 = vpop.f32.mrf.mxu2 }
 0x785   :  { %v5608_v18 = vadd.f32 %v5607_v32, %v5439_v31  ;;  %v5442_v46 = vadd.f32 %v5441_v16, %v5273_v0  ;;  %v3805_v0 = vld [vmem:[#allocation2 + $0x248] sm:$0xff]  ;;  %v4535_v16 = vpack.c.bf16 %v3869_v24, %v3868_v6 }
 0x788   :  { %v5774_v27 = vpop.f32.mrf.mxu0 }
 0x789   :  { %5649 = vmatmul.bf16.gmra.mxu3 %v4518_v40  ;;  %v10809_v2 = vadd.f32 %v5774_v27, %v5606_v34  ;;  %v5274_v44 = vpop.f32.mrf.mxu1  ;;  %v3933_v27 = vld [vmem:[#allocation2 + $0x24a] sm:$0xff] }
 0x78a   :  { %v5275_v11 = vadd.f32 %v10720_v28, %v5274_v44 }
 0x78b   :  { %5813 = vmatmul.bf16.gmra.mxu0 %v4516_v12 }
 0x78c   :  { %v5610_v55 = vpop.f32.mrf.mxu3  ;;  %v5443_v1 = vpop.f32.mrf.mxu2 }
 0x78d   :  { %v5611_v9 = vadd.f32 %v5610_v55, %v5442_v46  ;;  %v5444_v15 = vadd.f32 %v5443_v1, %v5275_v11  ;;  %v3932_v46 = vld [vmem:[#allocation2 + $0x242] sm:$0xff]  ;;  %v4534_v1 = vpack.c.bf16 %v3805_v0, %v3804_v3 }
 0x78e   :  { %v4536_v23 = vpack.c.bf16 %v3933_v27, %v3932_v46 }
 0x790   :  { %v5776_v10 = vpop.f32.mrf.mxu0 }
 0x791   :  { %v10812_v60 = vadd.f32 %v5776_v10, %v5608_v18  ;;  %v5277_v47 = vpop.f32.mrf.mxu1  ;;  %5485 = vmatmul.bf16.gmra.mxu2 %v4526_v30 }
 0x792   :  { %v5278_v34 = vadd.f32 %v10720_v28, %v5277_v47  ;;  %v3870_v47 = vld [vmem:[#allocation2 + $0x259] sm:$0xff] }
 0x794   :  { %v5612_v41 = vpop.f32.mrf.mxu3  ;;  %5316 = vmatmul.bf16.gmra.mxu1 %v4525_v49  ;;  %v5446_v19 = vpop.f32.mrf.mxu2 }
 0x795   :  { %v5613_v35 = vadd.f32 %v5612_v41, %v5444_v15  ;;  %v5447_v38 = vadd.f32 %v5446_v19, %v5278_v34  ;;  %v3871_v34 = vld [vmem:[#allocation2 + $0x261] sm:$0xff] }
 0x796   :  { %v3807_v19 = vld [vmem:[#allocation2 + $0x260] sm:$0xff] }
 0x798   :  { %v5779_v21 = vpop.f32.mrf.mxu0 }
 0x799   :  { %5654 = vmatmul.bf16.gmra.mxu3 %v4527_v20  ;;  %v10815_v33 = vadd.f32 %v5779_v21, %v5611_v9  ;;  %v5279_v25 = vpop.f32.mrf.mxu1  ;;  %v3806_v20 = vld [vmem:[#allocation2 + $0x258] sm:$0xff] }
 0x79a   :  { %v5280_v32 = vadd.f32 %v10720_v28, %v5279_v25  ;;  %v3935_v25 = vld [vmem:[#allocation2 + $0x262] sm:$0xff] }
 0x79b   :  { %5818 = vmatmul.bf16.gmra.mxu0 %v4525_v49 }
 0x79c   :  { %v5615_v31 = vpop.f32.mrf.mxu3  ;;  %v5448_v58 = vpop.f32.mrf.mxu2 }
 0x79d   :  { %v5616_v4 = vadd.f32 %v5615_v31, %v5447_v38  ;;  %v5449_v18 = vadd.f32 %v5448_v58, %v5280_v32  ;;  %v4544_v31 = vpack.c.bf16 %v3871_v34, %v3870_v47 }
 0x7a0   :  { %v5781_v12 = vpop.f32.mrf.mxu0 }
 0x7a1   :  { %v10818_v55 = vadd.f32 %v5781_v12, %v5613_v35  ;;  %v5282_v44 = vpop.f32.mrf.mxu1  ;;  %5490 = vmatmul.bf16.gmra.mxu2 %v4535_v16 }
 0x7a2   :  { %v5283_v11 = vadd.f32 %v10720_v28, %v5282_v44 }
 0x7a4   :  { %v5617_v40 = vpop.f32.mrf.mxu3  ;;  %5321 = vmatmul.bf16.gmra.mxu1 %v4534_v1  ;;  %v5451_v56 = vpop.f32.mrf.mxu2 }
 0x7a5   :  { %v5618_v9 = vadd.f32 %v5617_v40, %v5449_v18  ;;  %v5452_v15 = vadd.f32 %v5451_v56, %v5283_v11  ;;  %v4543_v18 = vpack.c.bf16 %v3807_v19, %v3806_v20 }
 0x7a8   :  { %v5784_v51 = vpop.f32.mrf.mxu0 }
 0x7a9   :  { %5659 = vmatmul.bf16.gmra.mxu3 %v4536_v23  ;;  %v10821_v10 = vadd.f32 %v5784_v51, %v5616_v4  ;;  %v5284_v30 = vpop.f32.mrf.mxu1  ;;  %v3934_v4 = vld [vmem:[#allocation2 + $0x25a] sm:$0xff] }
 0x7aa   :  { %v5285_v54 = vadd.f32 %v10720_v28, %v5284_v30  ;;  %v4545_v3 = vpack.c.bf16 %v3935_v25, %v3934_v4  ;;  %v3873_v23 = vld [vmem:[#allocation2 + $0x279] sm:$0xff] }
 0x7ab   :  { %5823 = vmatmul.bf16.gmra.mxu0 %v4534_v1  ;;  %v3872_v1 = vld [vmem:[#allocation2 + $0x271] sm:$0xff] }
 0x7ac   :  { %v5620_v43 = vpop.f32.mrf.mxu3  ;;  %v5453_v35 = vpop.f32.mrf.mxu2  ;;  %v3809_v51 = vld [vmem:[#allocation2 + $0x278] sm:$0xff] }
 0x7ad   :  { %v5621_v41 = vadd.f32 %v5620_v43, %v5452_v15  ;;  %v5454_v49 = vadd.f32 %v5453_v35, %v5285_v54  ;;  %v3808_v15 = vld [vmem:[#allocation2 + $0x270] sm:$0xff]  ;;  %v4553_v54 = vpack.c.bf16 %v3873_v23, %v3872_v1  ;;  %v3937_v35 = vld [vmem:[#allocation2 + $0x27a] sm:$0xff] }
 0x7ae   :  { %v4552_v20 = vpack.c.bf16 %v3809_v51, %v3808_v15  ;;  %v4554_v19 = vpack.c.bf16 %v3937_v35, %v3936_v13  ;;  %v3938_v1 = vld [vmem:[#allocation2 + $0x28a] sm:$0xff]  ;;  %v3939_v23 = vld [vmem:[#allocation2 + $0x292] sm:$0xff] }
 0x7b0   :  { %v5786_v38 = vpop.f32.mrf.mxu0 }
 0x7b1   :  { %v10827_v32 = vadd.f32 %v5786_v38, %v5618_v9  ;;  %v5287_v6 = vpop.f32.mrf.mxu1  ;;  %5495 = vmatmul.bf16.gmra.mxu2 %v4544_v31 }
 0x7b2   :  { %v5288_v24 = vadd.f32 %v10720_v28, %v5287_v6 }
 0x7b4   :  { %v5622_v21 = vpop.f32.mrf.mxu3  ;;  %5326 = vmatmul.bf16.gmra.mxu1 %v4543_v18  ;;  %v5456_v0 = vpop.f32.mrf.mxu2 }
 0x7b5   :  { %v5623_v58 = vadd.f32 %v5622_v21, %v5454_v49  ;;  %v5457_v12 = vadd.f32 %v5456_v0, %v5288_v24  ;;  %v3875_v0 = vld [vmem:[#allocation2 + $0x291] sm:$0xff] }
 0x7b8   :  { %v5789_v40 = vpop.f32.mrf.mxu0 }
 0x7b9   :  { %5664 = vmatmul.bf16.gmra.mxu3 %v4545_v3  ;;  %v10830_v46 = vadd.f32 %v5789_v40, %v5621_v41  ;;  %v5289_v44 = vpop.f32.mrf.mxu1  ;;  %v3874_v3 = vld [vmem:[#allocation2 + $0x289] sm:$0xff] }
 0x7ba   :  { %v5290_v9 = vadd.f32 %v10720_v28, %v5289_v44  ;;  %v3810_v40 = vld [vmem:[#allocation2 + $0x288] sm:$0xff] }
 0x7bb   :  { %5828 = vmatmul.bf16.gmra.mxu0 %v4543_v18 }
 0x7bc   :  { %v5625_v16 = vpop.f32.mrf.mxu3  ;;  %v5458_v11 = vpop.f32.mrf.mxu2 }
 0x7bd   :  { %v5626_v27 = vadd.f32 %v5625_v16, %v5457_v12  ;;  %v5459_v56 = vadd.f32 %v5458_v11, %v5290_v9  ;;  %v3811_v16 = vld [vmem:[#allocation2 + $0x290] sm:$0xff]  ;;  %v4562_v11 = vpack.c.bf16 %v3875_v0, %v3874_v3 }
 0x7c0   :  { %v5791_v43 = vpop.f32.mrf.mxu0 }
 0x7c1   :  { %v10833_v47 = vadd.f32 %v5791_v43, %v5623_v58  ;;  %v5292_v34 = vpop.f32.mrf.mxu1  ;;  %5500 = vmatmul.bf16.gmra.mxu2 %v4553_v54  ;;  %v4561_v43 = vpack.c.bf16 %v3811_v16, %v3810_v40  ;;  %v3941_v40 = vld [vmem:[#allocation2 + $0x2aa] sm:$0xff] }
 0x7c2   :  { %v5293_v49 = vadd.f32 %v10720_v28, %v5292_v34 }
 0x7c4   :  { %v5627_v30 = vpop.f32.mrf.mxu3  ;;  %5331 = vmatmul.bf16.gmra.mxu1 %v4552_v20  ;;  %v5461_v38 = vpop.f32.mrf.mxu2 }
 0x7c5   :  { %v5628_v41 = vadd.f32 %v5627_v30, %v5459_v56  ;;  %v5462_v21 = vadd.f32 %v5461_v38, %v5293_v49  ;;  %v4563_v30 = vpack.c.bf16 %v3939_v23, %v3938_v1 }
 0x7c8   :  { %v5794_v31 = vpop.f32.mrf.mxu0 }
 0x7c9   :  { %5669 = vmatmul.bf16.gmra.mxu3 %v4554_v19  ;;  %v10836_v25 = vadd.f32 %v5794_v31, %v5626_v27  ;;  %v5294_v24 = vpop.f32.mrf.mxu1  ;;  %v3877_v31 = vld [vmem:[#allocation2 + $0x2a9] sm:$0xff] }
 0x7ca   :  { %v5295_v58 = vadd.f32 %v10720_v28, %v5294_v24  ;;  %v3812_v24 = vld [vmem:[#allocation2 + $0x2a0] sm:$0xff] }
 0x7cb   :  { %5833 = vmatmul.bf16.gmra.mxu0 %v4552_v20 }
 0x7cc   :  { %v5630_v4 = vpop.f32.mrf.mxu3  ;;  %v5463_v18 = vpop.f32.mrf.mxu2 }
 0x7cd   :  { %v5631_v6 = vadd.f32 %v5630_v4, %v5462_v21  ;;  %v5464_v12 = vadd.f32 %v5463_v18, %v5295_v58  ;;  %v3876_v21 = vld [vmem:[#allocation2 + $0x2a1] sm:$0xff] }
 0x7ce   :  { %v3813_v58 = vld [vmem:[#allocation2 + $0x2a8] sm:$0xff]  ;;  %v4571_v0 = vpack.c.bf16 %v3877_v31, %v3876_v21  ;;  %v3814_v21 = vld [vmem:[#allocation2 + $0x2b8] sm:$0xff]  ;;  %v3815_v31 = vld [vmem:[#allocation2 + $0x2c0] sm:$0xff] }
 0x7d0   :  { %v5796_v44 = vpop.f32.mrf.mxu0 }
 0x7d1   :  { %v10839_v56 = vadd.f32 %v5796_v44, %v5628_v41  ;;  %v5297_v15 = vpop.f32.mrf.mxu1  ;;  %5505 = vmatmul.bf16.gmra.mxu2 %v4562_v11  ;;  %v4570_v11 = vpack.c.bf16 %v3813_v58, %v3812_v24  ;;  %v3942_v58 = vld [vmem:[#allocation2 + $0x2ba] sm:$0xff] }
 0x7d2   :  { %v5298_v51 = vadd.f32 %v10720_v28, %v5297_v15 }
 0x7d4   :  { %v5632_v9 = vpop.f32.mrf.mxu3  ;;  %5336 = vmatmul.bf16.gmra.mxu1 %v4561_v43  ;;  %v5466_v54 = vpop.f32.mrf.mxu2 }
 0x7d5   :  { %v5633_v27 = vadd.f32 %v5632_v9, %v5464_v12  ;;  %v5467_v13 = vadd.f32 %v5466_v54, %v5298_v51  ;;  %v3940_v12 = vld [vmem:[#allocation2 + $0x2a2] sm:$0xff] }
 0x7d6   :  { %v4572_v1 = vpack.c.bf16 %v3941_v40, %v3940_v12 }
 0x7d8   :  { %v5799_v35 = vpop.f32.mrf.mxu0 }
 0x7d9   :  { %5674 = vmatmul.bf16.gmra.mxu3 %v4563_v30  ;;  %v10842_v49 = vadd.f32 %v5799_v35, %v5631_v6  ;;  %v5299_v19 = vpop.f32.mrf.mxu1  ;;  %v8015_v35 = vld [vmem:[%s12684_s5 + $0x100] sm:$0xff] }
 0x7da   :  { %v5300_v41 = vadd.f32 %v10720_v28, %v5299_v19  ;;  %v10850_v28 = vld [vmem:[%s12686_s6] ss:$0 sm:$0xff]  ;;  %5886 = vmatpush.bf16.msrb.mxu1 %v8015_v35  ;;  %v3880_v35 = vld [vmem:[#allocation2 + $0x2d1] sm:$0xff] }
 0x7db   :  { %5838 = vmatmul.bf16.gmra.mxu0 %v4561_v43  ;;  %v3878_v19 = vld [vmem:[#allocation2 + $0x2b9] sm:$0xff] }
 0x7dc   :  { %v5635_v34 = vpop.f32.mrf.mxu3  ;;  %v5468_v38 = vpop.f32.mrf.mxu2 }
 0x7dd   :  { %v5636_v20 = vadd.f32 %v5635_v34, %v5467_v13  ;;  %v5469_v4 = vadd.f32 %v5468_v38, %v5300_v41  ;;  %v3879_v41 = vld [vmem:[#allocation2 + $0x2c1] sm:$0xff] }
 0x7e0   :  { %v5801_v18 = vpop.f32.mrf.mxu0 }
 0x7e1   :  { %v10845_v16 = vadd.f32 %v5801_v18, %v5633_v27  ;;  %v5302_v44 = vpop.f32.mrf.mxu1  ;;  %5510 = vmatmul.bf16.gmra.mxu2 %v4571_v0  ;;  %v3943_v18 = vld [vmem:[#allocation2 + $0x2c2] sm:$0xff] }
 0x7e2   :  { %v5303_v9 = vadd.f32 %v10850_v28, %v5302_v44  ;;  %v4579_v44 = vpack.c.bf16 %v3815_v31, %v3814_v21 }
 0x7e4   :  { %v5637_v3 = vpop.f32.mrf.mxu3  ;;  %5341 = vmatmul.bf16.gmra.mxu1 %v4570_v11  ;;  %v5471_v23 = vpop.f32.mrf.mxu2 }
 0x7e5   :  { %v5638_v6 = vadd.f32 %v5637_v3, %v5469_v4  ;;  %v5472_v15 = vadd.f32 %v5471_v23, %v5303_v9  ;;  %v4581_v9 = vpack.c.bf16 %v3943_v18, %v3942_v58 }
 0x7e8   :  { %v5804_v51 = vpop.f32.mrf.mxu0 }
 0x7e9   :  { %5679 = vmatmul.bf16.gmra.mxu3 %v4572_v1  ;;  %v10853_v27 = vadd.f32 %v5804_v51, %v5636_v20  ;;  %v5304_v54 = vpop.f32.mrf.mxu1  ;;  %v4580_v20 = vpack.c.bf16 %v3879_v41, %v3878_v19  ;;  %v3816_v41 = vld [vmem:[#allocation2 + $0x2d0] sm:$0xff] }
 0x7ea   :  { %v5305_v13 = vadd.f32 %v10850_v28, %v5304_v54 }
 0x7eb   :  { %5843 = vmatmul.bf16.gmra.mxu0 %v4570_v11 }
 0x7ec   :  { %v5640_v43 = vpop.f32.mrf.mxu3  ;;  %v5473_v34 = vpop.f32.mrf.mxu2 }
 0x7ed   :  { %v5641_v30 = vadd.f32 %v5640_v43, %v5472_v15  ;;  %v5474_v38 = vadd.f32 %v5473_v34, %v5305_v13  ;;  %v3881_v34 = vld [vmem:[#allocation2 + $0x2d9] sm:$0xff] }
 0x7f0   :  { %v5806_v4 = vpop.f32.mrf.mxu0 }
 0x7f1   :  { %v10859_v3 = vadd.f32 %v5806_v4, %v5638_v6  ;;  %v5307_v12 = vpop.f32.mrf.mxu1  ;;  %5515 = vmatmul.bf16.gmra.mxu2 %v4580_v20  ;;  %v4589_v4 = vpack.c.bf16 %v3881_v34, %v3880_v35  ;;  %v3945_v20 = vld [vmem:[#allocation2 + $0x2da] sm:$0xff] }
 0x7f2   :  { %v5308_v40 = vadd.f32 %v10850_v28, %v5307_v12  ;;  %v8038_v35 = vld [vmem:[%s12684_s5 + $0x1b8] sm:$0xff] }
 0x7f3   :  { %6217 = vmatpush.bf16.msra.mxu3 %v8038_v35 }
 0x7f4   :  { %v5642_v24 = vpop.f32.mrf.mxu3  ;;  %5346 = vmatmul.bf16.gmra.mxu1 %v4579_v44  ;;  %v5476_v11 = vpop.f32.mrf.mxu2 }
 0x7f5   :  { %v5643_v0 = vadd.f32 %v5642_v24, %v5474_v38  ;;  %v5477_v1 = vadd.f32 %v5476_v11, %v5308_v40  ;;  %v3817_v38 = vld [vmem:[#allocation2 + $0x2d8] sm:$0xff] }
 0x7f6   :  { %v3944_v24 = vld [vmem:[#allocation2 + $0x2d2] sm:$0xff]  ;;  %v4588_v40 = vpack.c.bf16 %v3817_v38, %v3816_v41  ;;  %v3818_v38 = vld [vmem:[#allocation2 + $0x2e8] sm:$0xff] }
 0x7f7   :  { %v3883_v41 = vld [vmem:[#allocation2 + $0x2f1] sm:$0xff] }
 0x7f8   :  { %v5809_v23 = vpop.f32.mrf.mxu0 }
 0x7f9   :  { %5684 = vmatmul.bf16.gmra.mxu3 %v4581_v9  ;;  %v10862_v51 = vadd.f32 %v5809_v23, %v5641_v30  ;;  %v5309_v54 = vpop.f32.mrf.mxu1 }
 0x7fa   :  { %v5310_v6 = vadd.f32 %v10850_v28, %v5309_v54 }
 0x7fb   :  { %5848 = vmatmul.bf16.gmra.mxu0 %v4579_v44  ;;  %v4590_v44 = vpack.c.bf16 %v3945_v20, %v3944_v24  ;;  %v3946_v20 = vld [vmem:[#allocation2 + $0x2ea] sm:$0xff] }
 0x7fc   :  { %v5645_v15 = vpop.f32.mrf.mxu3  ;;  %v5478_v13 = vpop.f32.mrf.mxu2 }
 0x7fd   :  { %v5646_v43 = vadd.f32 %v5645_v15, %v5477_v1  ;;  %v5479_v19 = vadd.f32 %v5478_v13, %v5310_v6  ;;  %v8030_v13 = vld [vmem:[%s12684_s5 + $0x178] sm:$0xff] }
 0x7fe   :  { %6048 = vmatpush.bf16.msra.mxu2 %v8030_v13 }
 0x800   :  { %v5811_v21 = vpop.f32.mrf.mxu0 }
 0x801   :  { %v10865_v58 = vadd.f32 %v5811_v21, %v5643_v0  ;;  %v5312_v18 = vpop.f32.mrf.mxu1  ;;  %5520 = vmatmul.bf16.gmra.mxu2 %v4589_v4  ;;  %v3819_v21 = vld [vmem:[#allocation2 + $0x2f0] sm:$0xff] }
 0x802   :  { %v5313_v12 = vadd.f32 %v10850_v28, %v5312_v18  ;;  %v3947_v18 = vld [vmem:[#allocation2 + $0x2f2] sm:$0xff] }
 0x804   :  { %v5647_v31 = vpop.f32.mrf.mxu3  ;;  %5351 = vmatmul.bf16.gmra.mxu1 %v4588_v40  ;;  %v5481_v9 = vpop.f32.mrf.mxu2 }
 0x805   :  { %v5648_v30 = vadd.f32 %v5647_v31, %v5479_v19  ;;  %v5482_v11 = vadd.f32 %v5481_v9, %v5313_v12  ;;  %v3882_v19 = vld [vmem:[#allocation2 + $0x2e9] sm:$0xff] }
 0x806   :  { %v4598_v24 = vpack.c.bf16 %v3883_v41, %v3882_v19  ;;  %v8029_v9 = vld [vmem:[%s12684_s5 + $0x170] sm:$0xff] }
 0x807   :  { %6049 = vmatpush.bf16.msra.mxu2 %v8029_v9  ;;  %v3885_v9 = vld [vmem:[#allocation2 + $0x309] sm:$0xff] }
 0x808   :  { %v5814_v1 = vpop.f32.mrf.mxu0 }
 0x809   :  { %5689 = vmatmul.bf16.gmra.mxu3 %v4590_v44  ;;  %v10868_v15 = vadd.f32 %v5814_v1, %v5646_v43  ;;  %v5314_v6 = vpop.f32.mrf.mxu1 }
 0x80a   :  { %v5315_v0 = vadd.f32 %v10850_v28, %v5314_v6  ;;  %v4599_v6 = vpack.c.bf16 %v3947_v18, %v3946_v20  ;;  %v8034_v20 = vld [vmem:[%s12684_s5 + $0x198] sm:$0xff] }
 0x80b   :  { %5853 = vmatmul.bf16.gmra.mxu0 %v4588_v40 }
 0x80c   :  { %v5650_v23 = vpop.f32.mrf.mxu3  ;;  %v5483_v34 = vpop.f32.mrf.mxu2 }
 0x80d   :  { %v5651_v54 = vadd.f32 %v5650_v23, %v5482_v11  ;;  %v5484_v43 = vadd.f32 %v5483_v34, %v5315_v0  ;;  %v8037_v11 = vld [vmem:[%s12684_s5 + $0x1b0] sm:$0xff]  ;;  %v4597_v23 = vpack.c.bf16 %v3819_v21, %v3818_v38  ;;  %v8036_v0 = vld [vmem:[%s12684_s5 + $0x1a8] sm:$0xff]  ;;  %v8027_v21 = vld [vmem:[%s12684_s5 + $0x160] sm:$0xff] }
 0x80e   :  { %6218 = vmatpush.bf16.msra.mxu3 %v8037_v11 }
 0x810   :  { %v5816_v31 = vpop.f32.mrf.mxu0 }
 0x811   :  { %v10877_v12 = vadd.f32 %v5816_v31, %v5648_v30  ;;  %v5317_v44 = vpop.f32.mrf.mxu1  ;;  %5525 = vmatmul.bf16.gmra.mxu2 %v4598_v24  ;;  %v8028_v30 = vld [vmem:[%s12684_s5 + $0x168] sm:$0xff]  ;;  %v8035_v31 = vld [vmem:[%s12684_s5 + $0x1a0] sm:$0xff]  ;;  %v8026_v24 = vld [vmem:[%s12684_s5 + $0x158] sm:$0xff] }
 0x812   :  { %v5318_v1 = vadd.f32 %v10850_v28, %v5317_v44  ;;  %6050 = vmatpush.bf16.msra.mxu2 %v8028_v30  ;;  %6219 = vmatpush.bf16.msra.mxu3 %v8036_v0  ;;  %v3884_v44 = vld [vmem:[#allocation2 + $0x301] sm:$0xff] }
 0x813   :  { %13204 = vst [vmem:[#allocation30_spill] sm:$0xff] %v10877_v12  ;;  %v4607_v0 = vpack.c.bf16 %v3885_v9, %v3884_v44  ;;  %v8032_v44 = vld [vmem:[%s12684_s5 + $0x188] sm:$0xff] }
 0x814   :  { %v5652_v4 = vpop.f32.mrf.mxu3  ;;  %5356 = vmatmul.bf16.gmra.mxu1 %v4597_v23  ;;  %v5486_v13 = vpop.f32.mrf.mxu2 }
 0x815   :  { %v5653_v40 = vadd.f32 %v5652_v4, %v5484_v43  ;;  %v5487_v35 = vadd.f32 %v5486_v13, %v5318_v1  ;;  %v3820_v1 = vld [vmem:[#allocation2 + $0x300] sm:$0xff] }
 0x816   :  { %6051 = vmatpush.bf16.msra.mxu2 %v8027_v21  ;;  %6220 = vmatpush.bf16.msra.mxu3 %v8035_v31  ;;  %v3948_v13 = vld [vmem:[#allocation2 + $0x302] sm:$0xff]  ;;  %v8025_v21 = vld [vmem:[%s12684_s5 + $0x150] sm:$0xff] }
 0x817   :  { %v8033_v31 = vld [vmem:[%s12684_s5 + $0x190] sm:$0xff] }
 0x818   :  { %v5819_v34 = vpop.f32.mrf.mxu0 }
 0x819   :  { %5694 = vmatmul.bf16.gmra.mxu3 %v4599_v6  ;;  %v10892_v41 = vadd.f32 %v5819_v34, %v5651_v54  ;;  %v5319_v38 = vpop.f32.mrf.mxu1  ;;  %v8046_v54 = vld [vmem:[%s12684_s5 + $0x1f8] sm:$0xff] }
 0x81a   :  { %v5320_v4 = vadd.f32 %v10850_v28, %v5319_v38  ;;  %6386 = vmatpush.bf16.msra.mxu0 %v8046_v54  ;;  %6052 = vmatpush.bf16.msra.mxu2 %v8026_v24 }
 0x81b   :  { %13205 = vst [vmem:[#allocation31_spill] sm:$0xff] %v10892_v41  ;;  %5858 = vmatmul.bf16.gmra.mxu0 %v4597_v23  ;;  %v3821_v23 = vld [vmem:[#allocation2 + $0x308] sm:$0xff]  ;;  %6221 = vmatpush.bf16.msra.mxu3 %v8034_v20 }
 0x81c   :  { %v5655_v19 = vpop.f32.mrf.mxu3  ;;  %v5488_v18 = vpop.f32.mrf.mxu2  ;;  %v4606_v54 = vpack.c.bf16 %v3821_v23, %v3820_v1  ;;  %v8024_v20 = vld [vmem:[%s12684_s5 + $0x148] sm:$0xff] }
 0x81d   :  { %v5656_v43 = vadd.f32 %v5655_v19, %v5487_v35  ;;  %v5489_v11 = vadd.f32 %v5488_v18, %v5320_v4  ;;  %v3949_v35 = vld [vmem:[#allocation2 + $0x30a] sm:$0xff] }
 0x81e   :  { %v8045_v4 = vld [vmem:[%s12684_s5 + $0x1f0] sm:$0xff]  ;;  %6053 = vmatpush.bf16.msra.mxu2 %v8025_v21  ;;  %v8044_v18 = vld [vmem:[%s12684_s5 + $0x1e8] sm:$0xff] }
 0x81f   :  { %6387 = vmatpush.bf16.msra.mxu0 %v8045_v4  ;;  %6222 = vmatpush.bf16.msra.mxu3 %v8033_v31  ;;  %v8042_v31 = vld [vmem:[%s12684_s5 + $0x1d8] sm:$0xff] }
 0x820   :  { %v5821_v6 = vpop.f32.mrf.mxu0 }
 0x821   :  { %v10910_v34 = vadd.f32 %v5821_v6, %v5653_v40  ;;  %v5322_v38 = vpop.f32.mrf.mxu1  ;;  %5530 = vmatmul.bf16.gmra.mxu2 %v4607_v0  ;;  %v4608_v40 = vpack.c.bf16 %v3949_v35, %v3948_v13  ;;  %v8023_v13 = vld [vmem:[%s12684_s5 + $0x140] sm:$0xff] }
 0x822   :  { %v5323_v24 = vadd.f32 %v10850_v28, %v5322_v38  ;;  %6054 = vmatpush.bf16.msra.mxu2 %v8024_v20  ;;  %v8031_v35 = vld [vmem:[%s12684_s5 + $0x180] sm:$0xff] }
 0x823   :  { %13206 = vst [vmem:[#allocation32_spill] sm:$0xff] %v10910_v34  ;;  %6388 = vmatpush.bf16.msra.mxu0 %v8044_v18  ;;  %6223 = vmatpush.bf16.msra.mxu3 %v8032_v44  ;;  %v8043_v38 = vld [vmem:[%s12684_s5 + $0x1e0] sm:$0xff]  ;;  %v3822_v18 = vld [vmem:[#allocation2 + $0x318] sm:$0xff] }
 0x824   :  { %v5657_v30 = vpop.f32.mrf.mxu3  ;;  %5361 = vmatmul.bf16.gmra.mxu1 %v4606_v54  ;;  %v5491_v9 = vpop.f32.mrf.mxu2  ;;  %v3823_v44 = vld [vmem:[#allocation2 + $0x320] sm:$0xff] }
 0x825   :  { %v5658_v19 = vadd.f32 %v5657_v30, %v5489_v11  ;;  %v5492_v11 = vadd.f32 %v5491_v9, %v5323_v24  ;;  %v3886_v24 = vld [vmem:[#allocation2 + $0x319] sm:$0xff] }
 0x826   :  { %6055 = vmatpush.bf16.msra.mxu2 %v8023_v13 }
 0x827   :  { %6224 = vmatpush.bf16.msra.mxu3 %v8031_v35  ;;  %6389 = vmatpush.bf16.msra.mxu0 %v8043_v38  ;;  %v8041_v38 = vld [vmem:[%s12684_s5 + $0x1d0] sm:$0xff] }
 0x828   :  { %v5824_v1 = vpop.f32.mrf.mxu0 }
 0x829   :  { %5699 = vmatmul.bf16.gmra.mxu3 %v4608_v40  ;;  %v10931_v6 = vadd.f32 %v5824_v1, %v5656_v43  ;;  %v5324_v0 = vpop.f32.mrf.mxu1  ;;  %v8054_v43 = vld [vmem:[%s12684_s5 + $0x238] sm:$0xff]  ;;  %v3887_v40 = vld [vmem:[#allocation2 + $0x321] sm:$0xff] }
 0x82a   :  { %v5325_v21 = vadd.f32 %v10850_v28, %v5324_v0  ;;  %6555 = vmatpush.bf16.msra.mxu1 %v8054_v43  ;;  %v3950_v1 = vld [vmem:[#allocation2 + $0x31a] sm:$0xff]  ;;  %v4615_v43 = vpack.c.bf16 %v3823_v44, %v3822_v18 }
 0x82b   :  { %13207 = vst [vmem:[#allocation35_spill] sm:$0xff] %v10931_v6  ;;  %5863 = vmatmul.bf16.gmra.mxu0 %v4606_v54  ;;  %v8039_v18 = vld [vmem:[%s12684_s5 + $0x1c0] sm:$0xff] }
 0x82c   :  { %v5660_v23 = vpop.f32.mrf.mxu3  ;;  %v5493_v4 = vpop.f32.mrf.mxu2  ;;  %6390 = vmatpush.bf16.msra.mxu0 %v8042_v31 }
 0x82d   :  { %v5661_v30 = vadd.f32 %v5660_v23, %v5492_v11  ;;  %v5494_v20 = vadd.f32 %v5493_v4, %v5325_v21  ;;  %v4616_v11 = vpack.c.bf16 %v3887_v40, %v3886_v24  ;;  %v3951_v23 = vld [vmem:[#allocation2 + $0x322] sm:$0xff] }
 0x82e   :  { %v4617_v21 = vpack.c.bf16 %v3951_v23, %v3950_v1  ;;  %v8040_v4 = vld [vmem:[%s12684_s5 + $0x1c8] sm:$0xff]  ;;  %v4080_v1 = vld [vmem:[#allocation2 + $0x1a] sm:$0xff] }
 0x82f   :  { %v4081_v23 = vld [vmem:[#allocation2 + $0x22] sm:$0xff] }
 0x830   :  { %v5826_v9 = vpop.f32.mrf.mxu0  ;;  %6391 = vmatpush.bf16.msra.mxu0 %v8041_v38  ;;  %v4017_v38 = vld [vmem:[#allocation2 + $0x21] sm:$0xff] }
 0x831   :  { %v10949_v0 = vadd.f32 %v5826_v9, %v5658_v19  ;;  %v5327_v35 = vpop.f32.mrf.mxu1  ;;  %5535 = vmatmul.bf16.gmra.mxu2 %v4616_v11 }
 0x832   :  { %v5328_v6 = vadd.f32 %v10850_v28, %v5327_v35 }
 0x833   :  { %13208 = vst [vmem:[#allocation36_spill] sm:$0xff] %v10949_v0 }
 0x834   :  { %v5662_v54 = vpop.f32.mrf.mxu3  ;;  %5366 = vmatmul.bf16.gmra.mxu1 %v4615_v43  ;;  %v5496_v19 = vpop.f32.mrf.mxu2  ;;  %6392 = vmatpush.bf16.msra.mxu0 %v8040_v4 }
 0x835   :  { %v5663_v13 = vadd.f32 %v5662_v54, %v5494_v20  ;;  %v5497_v31 = vadd.f32 %v5496_v19, %v5328_v6  ;;  %v4016_v6 = vld [vmem:[#allocation2 + $0x19] sm:$0xff]  ;;  %v4144_v19 = vld [vmem:[#allocation2 + $0x30] sm:$0xff] }
 0x838   :  { %v5829_v24 = vpop.f32.mrf.mxu0  ;;  %6393 = vmatpush.bf16.msra.mxu0 %v8039_v18 }
 0x839   :  { %5704 = vmatmul.bf16.gmra.mxu3 %v4617_v21  ;;  %v10958_v20 = vadd.f32 %v5829_v24, %v5661_v30  ;;  %v5329_v54 = vpop.f32.mrf.mxu1  ;;  %v4341_v30 = vpack.c.bf16 %v4081_v23, %v4080_v1 }
 0x83a   :  { %v5330_v44 = vadd.f32 %v10850_v28, %v5329_v54  ;;  %v4340_v54 = vpack.c.bf16 %v4017_v38, %v4016_v6  ;;  %v4082_v6 = vld [vmem:[#allocation2 + $0x32] sm:$0xff]  ;;  %v4083_v38 = vld [vmem:[#allocation2 + $0x3a] sm:$0xff] }
 0x83b   :  { %13209 = vst [vmem:[#allocation37_spill] sm:$0xff] %v10958_v20  ;;  %5868 = vmatmul.bf16.gmra.mxu0 %v4615_v43 }
 0x83c   :  { %v5665_v40 = vpop.f32.mrf.mxu3  ;;  %v5498_v11 = vpop.f32.mrf.mxu2 }
 0x83d   :  { %v5666_v9 = vadd.f32 %v5665_v40, %v5497_v31  ;;  %v5499_v35 = vadd.f32 %v5498_v11, %v5330_v44  ;;  %v4145_v31 = vld [vmem:[#allocation2 + $0x38] sm:$0xff]  ;;  %v4014_v44 = vld [vmem:[#allocation2 + $0x330] sm:$0xff] }
 0x83e   :  { %v4342_v43 = vpack.c.bf16 %v4145_v31, %v4144_v19  ;;  %v4015_v11 = vld [vmem:[#allocation2 + $0x338] sm:$0xff] }
 0x83f   :  { %v4618_v23 = vpack.c.bf16 %v4015_v11, %v4014_v44  ;;  %v4019_v19 = vld [vmem:[#allocation2 + $0x39] sm:$0xff] }
 0x840   :  { %v5831_v21 = vpop.f32.mrf.mxu0 }
 0x841   :  { %v10964_v24 = vadd.f32 %v5831_v21, %v5663_v13  ;;  %v5332_v20 = vpop.f32.mrf.mxu1  ;;  %6056 = vmatmul.bf16.vlgmr.msra.gmra.mxu2 %v4341_v30  ;;  %v4018_v30 = vld [vmem:[#allocation2 + $0x31] sm:$0xff] }
 0x842   :  { %v5333_v0 = vadd.f32 %v10850_v28, %v5332_v20 }
 0x843   :  { %13210 = vst [vmem:[#allocation33_spill] sm:$0xff] %v10964_v24 }
 0x844   :  { %v5667_v4 = vpop.f32.mrf.mxu3  ;;  %5887 = vmatmul.bf16.vlgmr.msrb.gmra.mxu1 %v4340_v54  ;;  %v5501_v18 = vpop.f32.mrf.mxu2 }
 0x845   :  { %v5668_v40 = vadd.f32 %v5667_v4, %v5499_v35  ;;  %v5502_v34 = vadd.f32 %v5501_v18, %v5333_v0  ;;  %v4146_v0 = vld [vmem:[#allocation2 + $0x48] sm:$0xff]  ;;  %v4147_v18 = vld [vmem:[#allocation2 + $0x50] sm:$0xff] }
 0x846   :  { %v4351_v44 = vpack.c.bf16 %v4147_v18, %v4146_v0 }
 0x848   :  { %v5834_v41 = vpop.f32.mrf.mxu0 }
 0x849   :  { %6225 = vmatmul.bf16.vlgmr.msra.gmra.mxu3 %v4342_v43  ;;  %v10967_v1 = vadd.f32 %v5834_v41, %v5666_v9  ;;  %v5334_v21 = vpop.f32.mrf.mxu1  ;;  %v4350_v43 = vpack.c.bf16 %v4083_v38, %v4082_v6 }
 0x84a   :  { %v5335_v35 = vadd.f32 %v10850_v28, %v5334_v21 }
 0x84b   :  { %5873 = vmatmul.bf16.gmra.mxu0 %v4618_v23 }
 0x84c   :  { %v5670_v12 = vpop.f32.mrf.mxu3  ;;  %v5503_v20 = vpop.f32.mrf.mxu2 }
 0x84d   :  { %v5671_v13 = vadd.f32 %v5670_v12, %v5502_v34  ;;  %v5504_v4 = vadd.f32 %v5503_v20, %v5335_v35  ;;  %v4349_v34 = vpack.c.bf16 %v4019_v19, %v4018_v30  ;;  %v4020_v30 = vld [vmem:[#allocation2 + $0x49] sm:$0xff]  ;;  %v4021_v19 = vld [vmem:[#allocation2 + $0x51] sm:$0xff] }
 0x850   :  { %v5836_v31 = vpop.f32.mrf.mxu0 }
 0x851   :  { %v10970_v24 = vadd.f32 %v5836_v31, %v5668_v40  ;;  %v5337_v9 = vpop.f32.mrf.mxu1  ;;  %6061 = vmatmul.bf16.gmra.mxu2 %v4350_v43  ;;  %v4084_v31 = vld [vmem:[#allocation2 + $0x4a] sm:$0xff] }
 0x852   :  { %v5338_v12 = vadd.f32 %v10850_v28, %v5337_v9 }
 0x853   :  { %13211 = vst [vmem:[#allocation38_spill] sm:$0xff] %v10970_v24 }
 0x854   :  { %v5672_v54 = vpop.f32.mrf.mxu3  ;;  %5892 = vmatmul.bf16.gmra.mxu1 %v4349_v34  ;;  %v5506_v11 = vpop.f32.mrf.mxu2 }
 0x855   :  { %v5673_v41 = vadd.f32 %v5672_v54, %v5504_v4  ;;  %v5507_v23 = vadd.f32 %v5506_v11, %v5338_v12  ;;  %v4085_v54 = vld [vmem:[#allocation2 + $0x52] sm:$0xff]  ;;  %v4149_v12 = vld [vmem:[#allocation2 + $0x68] sm:$0xff] }
 0x856   :  { %v4359_v18 = vpack.c.bf16 %v4085_v54, %v4084_v31 }
 0x858   :  { %v5839_v21 = vpop.f32.mrf.mxu0 }
 0x859   :  { %6230 = vmatmul.bf16.gmra.mxu3 %v4351_v44  ;;  %v10973_v20 = vadd.f32 %v5839_v21, %v5671_v13  ;;  %v5339_v38 = vpop.f32.mrf.mxu1  ;;  %v4148_v44 = vld [vmem:[#allocation2 + $0x60] sm:$0xff] }
 0x85a   :  { %v5340_v40 = vadd.f32 %v10850_v28, %v5339_v38 }
 0x85b   :  { %13212 = vst [vmem:[#allocation39_spill] sm:$0xff] %v10973_v20  ;;  %6394 = vmatmul.bf16.vlgmr.msra.gmra.mxu0 %v4349_v34  ;;  %v4360_v34 = vpack.c.bf16 %v4149_v12, %v4148_v44  ;;  %v4023_v44 = vld [vmem:[#allocation2 + $0x69] sm:$0xff] }
 0x85c   :  { %v5675_v35 = vpop.f32.mrf.mxu3  ;;  %v5508_v4 = vpop.f32.mrf.mxu2 }
 0x85d   :  { %v5676_v6 = vadd.f32 %v5675_v35, %v5507_v23  ;;  %v5509_v9 = vadd.f32 %v5508_v4, %v5340_v40  ;;  %v4358_v35 = vpack.c.bf16 %v4021_v19, %v4020_v30  ;;  %v4086_v19 = vld [vmem:[#allocation2 + $0x62] sm:$0xff] }
 0x860   :  { %v5841_v43 = vpop.f32.mrf.mxu0 }
 0x861   :  { %v10976_v11 = vadd.f32 %v5841_v43, %v5673_v41  ;;  %v5342_v21 = vpop.f32.mrf.mxu1  ;;  %6066 = vmatmul.bf16.gmra.mxu2 %v4359_v18  ;;  %v4087_v43 = vld [vmem:[#allocation2 + $0x6a] sm:$0xff]  ;;  %v4022_v18 = vld [vmem:[#allocation2 + $0x61] sm:$0xff] }
 0x862   :  { %v5343_v23 = vadd.f32 %v10850_v28, %v5342_v21 }
 0x863   :  { %13213 = vst [vmem:[#allocation40_spill] sm:$0xff] %v10976_v11 }
 0x864   :  { %v5677_v0 = vpop.f32.mrf.mxu3  ;;  %5897 = vmatmul.bf16.gmra.mxu1 %v4358_v35  ;;  %v5511_v38 = vpop.f32.mrf.mxu2 }
 0x865   :  { %v5678_v13 = vadd.f32 %v5677_v0, %v5509_v9  ;;  %v5512_v40 = vadd.f32 %v5511_v38, %v5343_v23  ;;  %v8053_v9 = vld [vmem:[%s12684_s5 + $0x230] sm:$0xff]  ;;  %v4150_v23 = vld [vmem:[#allocation2 + $0x78] sm:$0xff] }
 0x866   :  { %6556 = vmatpush.bf16.msra.mxu1 %v8053_v9 }
 0x868   :  { %v5844_v4 = vpop.f32.mrf.mxu0 }
 0x869   :  { %6235 = vmatmul.bf16.gmra.mxu3 %v4360_v34  ;;  %v10979_v24 = vadd.f32 %v5844_v4, %v5676_v6  ;;  %v5344_v54 = vpop.f32.mrf.mxu1  ;;  %v4368_v6 = vpack.c.bf16 %v4087_v43, %v4086_v19  ;;  %v4367_v4 = vpack.c.bf16 %v4023_v44, %v4022_v18  ;;  %v4024_v18 = vld [vmem:[#allocation2 + $0x79] sm:$0xff]  ;;  %v4025_v44 = vld [vmem:[#allocation2 + $0x81] sm:$0xff] }
 0x86a   :  { %v5345_v41 = vadd.f32 %v10850_v28, %v5344_v54 }
 0x86b   :  { %13214 = vst [vmem:[#allocation41_spill] sm:$0xff] %v10979_v24  ;;  %6399 = vmatmul.bf16.gmra.mxu0 %v4358_v35 }
 0x86c   :  { %v5680_v20 = vpop.f32.mrf.mxu3  ;;  %v5513_v30 = vpop.f32.mrf.mxu2 }
 0x86d   :  { %v5681_v31 = vadd.f32 %v5680_v20, %v5512_v40  ;;  %v5514_v0 = vadd.f32 %v5513_v30, %v5345_v41  ;;  %v4151_v20 = vld [vmem:[#allocation2 + $0x80] sm:$0xff] }
 0x86e   :  { %v4369_v54 = vpack.c.bf16 %v4151_v20, %v4150_v23 }
 0x870   :  { %v5846_v12 = vpop.f32.mrf.mxu0 }
 0x871   :  { %v10985_v34 = vadd.f32 %v5846_v12, %v5678_v13  ;;  %v5347_v35 = vpop.f32.mrf.mxu1  ;;  %6071 = vmatmul.bf16.gmra.mxu2 %v4368_v6  ;;  %v4088_v12 = vld [vmem:[#allocation2 + $0x7a] sm:$0xff] }
 0x872   :  { %v5348_v40 = vadd.f32 %v10850_v28, %v5347_v35 }
 0x873   :  { %13215 = vst [vmem:[#allocation42_spill] sm:$0xff] %v10985_v34 }
 0x874   :  { %v5682_v21 = vpop.f32.mrf.mxu3  ;;  %5902 = vmatmul.bf16.gmra.mxu1 %v4367_v4  ;;  %v5516_v9 = vpop.f32.mrf.mxu2 }
 0x875   :  { %v5683_v38 = vadd.f32 %v5682_v21, %v5514_v0  ;;  %v5517_v41 = vadd.f32 %v5516_v9, %v5348_v40  ;;  %v4089_v21 = vld [vmem:[#allocation2 + $0x82] sm:$0xff]  ;;  %v4153_v40 = vld [vmem:[#allocation2 + $0x98] sm:$0xff] }
 0x876   :  { %v4377_v20 = vpack.c.bf16 %v4089_v21, %v4088_v12 }
 0x878   :  { %v5849_v30 = vpop.f32.mrf.mxu0 }
 0x879   :  { %6240 = vmatmul.bf16.gmra.mxu3 %v4369_v54  ;;  %v10988_v11 = vadd.f32 %v5849_v30, %v5681_v31  ;;  %v5349_v43 = vpop.f32.mrf.mxu1  ;;  %v4152_v54 = vld [vmem:[#allocation2 + $0x90] sm:$0xff] }
 0x87a   :  { %v5350_v13 = vadd.f32 %v10850_v28, %v5349_v43 }
 0x87b   :  { %13216 = vst [vmem:[#allocation43_spill] sm:$0xff] %v10988_v11  ;;  %6404 = vmatmul.bf16.gmra.mxu0 %v4367_v4  ;;  %v4378_v4 = vpack.c.bf16 %v4153_v40, %v4152_v54 }
 0x87c   :  { %v5685_v24 = vpop.f32.mrf.mxu3  ;;  %v5518_v0 = vpop.f32.mrf.mxu2 }
 0x87d   :  { %v5686_v19 = vadd.f32 %v5685_v24, %v5517_v41  ;;  %v5519_v35 = vadd.f32 %v5518_v0, %v5350_v13  ;;  %v4376_v41 = vpack.c.bf16 %v4025_v44, %v4024_v18  ;;  %v4026_v18 = vld [vmem:[#allocation2 + $0x91] sm:$0xff]  ;;  %v4027_v44 = vld [vmem:[#allocation2 + $0x99] sm:$0xff] }
 0x880   :  { %v5851_v6 = vpop.f32.mrf.mxu0 }
 0x881   :  { %v10991_v9 = vadd.f32 %v5851_v6, %v5683_v38  ;;  %v5352_v30 = vpop.f32.mrf.mxu1  ;;  %6076 = vmatmul.bf16.gmra.mxu2 %v4377_v20  ;;  %v4090_v6 = vld [vmem:[#allocation2 + $0x92] sm:$0xff] }
 0x882   :  { %v5353_v24 = vadd.f32 %v10850_v28, %v5352_v30 }
 0x883   :  { %13217 = vst [vmem:[#allocation44_spill] sm:$0xff] %v10991_v9 }
 0x884   :  { %v5687_v23 = vpop.f32.mrf.mxu3  ;;  %5907 = vmatmul.bf16.gmra.mxu1 %v4376_v41  ;;  %v5521_v43 = vpop.f32.mrf.mxu2 }
 0x885   :  { %v5688_v31 = vadd.f32 %v5687_v23, %v5519_v35  ;;  %v5522_v13 = vadd.f32 %v5521_v43, %v5353_v24  ;;  %v4091_v23 = vld [vmem:[#allocation2 + $0x9a] sm:$0xff]  ;;  %v4155_v24 = vld [vmem:[#allocation2 + $0xb0] sm:$0xff] }
 0x886   :  { %v4386_v40 = vpack.c.bf16 %v4091_v23, %v4090_v6 }
 0x888   :  { %v5854_v0 = vpop.f32.mrf.mxu0 }
 0x889   :  { %6245 = vmatmul.bf16.gmra.mxu3 %v4378_v4  ;;  %v10994_v34 = vadd.f32 %v5854_v0, %v5686_v19  ;;  %v5354_v21 = vpop.f32.mrf.mxu1  ;;  %v4154_v4 = vld [vmem:[#allocation2 + $0xa8] sm:$0xff] }
 0x88a   :  { %v5355_v38 = vadd.f32 %v10850_v28, %v5354_v21 }
 0x88b   :  { %13218 = vst [vmem:[#allocation45_spill] sm:$0xff] %v10994_v34  ;;  %6409 = vmatmul.bf16.gmra.mxu0 %v4376_v41  ;;  %v4387_v41 = vpack.c.bf16 %v4155_v24, %v4154_v4 }
 0x88c   :  { %v5690_v11 = vpop.f32.mrf.mxu3  ;;  %v5523_v35 = vpop.f32.mrf.mxu2 }
 0x88d   :  { %v5691_v12 = vadd.f32 %v5690_v11, %v5522_v13  ;;  %v5524_v30 = vadd.f32 %v5523_v35, %v5355_v38  ;;  %v4385_v13 = vpack.c.bf16 %v4027_v44, %v4026_v18  ;;  %v4028_v18 = vld [vmem:[#allocation2 + $0xa9] sm:$0xff]  ;;  %v4029_v44 = vld [vmem:[#allocation2 + $0xb1] sm:$0xff] }
 0x890   :  { %v5856_v20 = vpop.f32.mrf.mxu0 }
 0x891   :  { %v10997_v43 = vadd.f32 %v5856_v20, %v5688_v31  ;;  %v5357_v0 = vpop.f32.mrf.mxu1  ;;  %6081 = vmatmul.bf16.gmra.mxu2 %v4386_v40  ;;  %v4092_v20 = vld [vmem:[#allocation2 + $0xaa] sm:$0xff] }
 0x892   :  { %v5358_v11 = vadd.f32 %v10850_v28, %v5357_v0 }
 0x893   :  { %13219 = vst [vmem:[#allocation46_spill] sm:$0xff] %v10997_v43 }
 0x894   :  { %v5692_v54 = vpop.f32.mrf.mxu3  ;;  %5912 = vmatmul.bf16.gmra.mxu1 %v4385_v13  ;;  %v5526_v21 = vpop.f32.mrf.mxu2 }
 0x895   :  { %v5693_v19 = vadd.f32 %v5692_v54, %v5524_v30  ;;  %v5527_v38 = vadd.f32 %v5526_v21, %v5358_v11  ;;  %v4093_v54 = vld [vmem:[#allocation2 + $0xb2] sm:$0xff]  ;;  %v4157_v11 = vld [vmem:[#allocation2 + $0xc8] sm:$0xff] }
 0x896   :  { %v4395_v24 = vpack.c.bf16 %v4093_v54, %v4092_v20 }
 0x898   :  { %v5859_v35 = vpop.f32.mrf.mxu0 }
 0x899   :  { %6250 = vmatmul.bf16.gmra.mxu3 %v4387_v41  ;;  %v11000_v9 = vadd.f32 %v5859_v35, %v5691_v12  ;;  %v5359_v23 = vpop.f32.mrf.mxu1  ;;  %v4156_v41 = vld [vmem:[#allocation2 + $0xc0] sm:$0xff] }
 0x89a   :  { %v5360_v31 = vadd.f32 %v10850_v28, %v5359_v23 }
 0x89b   :  { %13220 = vst [vmem:[#allocation47_spill] sm:$0xff] %v11000_v9  ;;  %6414 = vmatmul.bf16.gmra.mxu0 %v4385_v13  ;;  %v4396_v13 = vpack.c.bf16 %v4157_v11, %v4156_v41  ;;  %v4031_v41 = vld [vmem:[#allocation2 + $0xc9] sm:$0xff] }
 0x89c   :  { %v5695_v34 = vpop.f32.mrf.mxu3  ;;  %v5528_v30 = vpop.f32.mrf.mxu2 }
 0x89d   :  { %v5696_v6 = vadd.f32 %v5695_v34, %v5527_v38  ;;  %v5529_v0 = vadd.f32 %v5528_v30, %v5360_v31  ;;  %v4394_v38 = vpack.c.bf16 %v4029_v44, %v4028_v18  ;;  %v4094_v44 = vld [vmem:[#allocation2 + $0xc2] sm:$0xff] }
 0x8a0   :  { %v5861_v40 = vpop.f32.mrf.mxu0 }
 0x8a1   :  { %v11003_v21 = vadd.f32 %v5861_v40, %v5693_v19  ;;  %v5362_v35 = vpop.f32.mrf.mxu1  ;;  %6086 = vmatmul.bf16.gmra.mxu2 %v4395_v24  ;;  %v4095_v40 = vld [vmem:[#allocation2 + $0xca] sm:$0xff]  ;;  %v4030_v24 = vld [vmem:[#allocation2 + $0xc1] sm:$0xff] }
 0x8a2   :  { %v5363_v34 = vadd.f32 %v10850_v28, %v5362_v35 }
 0x8a3   :  { %13221 = vst [vmem:[#allocation48_spill] sm:$0xff] %v11003_v21 }
 0x8a4   :  { %v5697_v4 = vpop.f32.mrf.mxu3  ;;  %5917 = vmatmul.bf16.gmra.mxu1 %v4394_v38  ;;  %v5531_v23 = vpop.f32.mrf.mxu2 }
 0x8a5   :  { %v5698_v12 = vadd.f32 %v5697_v4, %v5529_v0  ;;  %v5532_v31 = vadd.f32 %v5531_v23, %v5363_v34  ;;  %v8052_v0 = vld [vmem:[%s12684_s5 + $0x228] sm:$0xff]  ;;  %v4158_v34 = vld [vmem:[#allocation2 + $0xd8] sm:$0xff] }
 0x8a6   :  { %6557 = vmatpush.bf16.msra.mxu1 %v8052_v0 }
 0x8a8   :  { %v5864_v30 = vpop.f32.mrf.mxu0 }
 0x8a9   :  { %6255 = vmatmul.bf16.gmra.mxu3 %v4396_v13  ;;  %v11006_v43 = vadd.f32 %v5864_v30, %v5696_v6  ;;  %v5364_v54 = vpop.f32.mrf.mxu1  ;;  %v4404_v6 = vpack.c.bf16 %v4095_v40, %v4094_v44  ;;  %v4403_v30 = vpack.c.bf16 %v4031_v41, %v4030_v24  ;;  %v4032_v24 = vld [vmem:[#allocation2 + $0xd9] sm:$0xff]  ;;  %v4033_v41 = vld [vmem:[#allocation2 + $0xe1] sm:$0xff] }
 0x8aa   :  { %v5365_v19 = vadd.f32 %v10850_v28, %v5364_v54 }
 0x8ab   :  { %13222 = vst [vmem:[#allocation49_spill] sm:$0xff] %v11006_v43  ;;  %6419 = vmatmul.bf16.gmra.mxu0 %v4394_v38 }
 0x8ac   :  { %v5700_v9 = vpop.f32.mrf.mxu3  ;;  %v5533_v18 = vpop.f32.mrf.mxu2 }
 0x8ad   :  { %v5701_v20 = vadd.f32 %v5700_v9, %v5532_v31  ;;  %v5534_v4 = vadd.f32 %v5533_v18, %v5365_v19  ;;  %v4159_v9 = vld [vmem:[#allocation2 + $0xe0] sm:$0xff] }
 0x8ae   :  { %v4405_v54 = vpack.c.bf16 %v4159_v9, %v4158_v34 }
 0x8b0   :  { %v5866_v11 = vpop.f32.mrf.mxu0 }
 0x8b1   :  { %v11012_v13 = vadd.f32 %v5866_v11, %v5698_v12  ;;  %v5367_v38 = vpop.f32.mrf.mxu1  ;;  %6091 = vmatmul.bf16.gmra.mxu2 %v4404_v6  ;;  %v4096_v11 = vld [vmem:[#allocation2 + $0xda] sm:$0xff] }
 0x8b2   :  { %v5368_v31 = vadd.f32 %v10850_v28, %v5367_v38 }
 0x8b4   :  { %v5702_v35 = vpop.f32.mrf.mxu3  ;;  %5922 = vmatmul.bf16.gmra.mxu1 %v4403_v30  ;;  %v5536_v0 = vpop.f32.mrf.mxu2 }
 0x8b5   :  { %v5703_v23 = vadd.f32 %v5702_v35, %v5534_v4  ;;  %v5537_v19 = vadd.f32 %v5536_v0, %v5368_v31  ;;  %v4097_v35 = vld [vmem:[#allocation2 + $0xe2] sm:$0xff]  ;;  %v4161_v31 = vld [vmem:[#allocation2 + $0xf8] sm:$0xff] }
 0x8b6   :  { %v4413_v9 = vpack.c.bf16 %v4097_v35, %v4096_v11 }
 0x8b8   :  { %v5869_v18 = vpop.f32.mrf.mxu0 }
 0x8b9   :  { %6260 = vmatmul.bf16.gmra.mxu3 %v4405_v54  ;;  %v11015_v21 = vadd.f32 %v5869_v18, %v5701_v20  ;;  %v5369_v40 = vpop.f32.mrf.mxu1  ;;  %v4160_v54 = vld [vmem:[#allocation2 + $0xf0] sm:$0xff] }
 0x8ba   :  { %v5370_v12 = vadd.f32 %v10850_v28, %v5369_v40  ;;  %v4414_v28 = vpack.c.bf16 %v4161_v31, %v4160_v54 }
 0x8bb   :  { %13223 = vst [vmem:[#allocation56_spill] sm:$0xff] %v11015_v21  ;;  %6424 = vmatmul.bf16.gmra.mxu0 %v4403_v30 }
 0x8bc   :  { %v5705_v43 = vpop.f32.mrf.mxu3  ;;  %v5538_v4 = vpop.f32.mrf.mxu2 }
 0x8bd   :  { %v5706_v44 = vadd.f32 %v5705_v43, %v5537_v19  ;;  %v5539_v38 = vadd.f32 %v5538_v4, %v5370_v12  ;;  %v4412_v19 = vpack.c.bf16 %v4033_v41, %v4032_v24  ;;  %v4034_v24 = vld [vmem:[#allocation2 + $0xf1] sm:$0xff]  ;;  %v4035_v41 = vld [vmem:[#allocation2 + $0xf9] sm:$0xff] }
 0x8c0   :  { %v5871_v6 = vpop.f32.mrf.mxu0 }
 0x8c1   :  { %v11018_v0 = vadd.f32 %v5871_v6, %v5703_v23  ;;  %v5888_v18 = vpop.f32.mrf.mxu1  ;;  %6096 = vmatmul.bf16.gmra.mxu2 %v4413_v9  ;;  %v4098_v6 = vld [vmem:[#allocation2 + $0xf2] sm:$0xff] }
 0x8c2   :  { %v5889_v43 = vadd.f32 %v5888_v18, %v10727_v36  ;;  %v4162_v18 = vld [vmem:[#allocation2 + $0x108] sm:$0xff] }
 0x8c4   :  { %v5707_v34 = vpop.f32.mrf.mxu3  ;;  %5927 = vmatmul.bf16.gmra.mxu1 %v4412_v19  ;;  %v6057_v30 = vpop.f32.mrf.mxu2 }
 0x8c5   :  { %v5708_v20 = vadd.f32 %v5707_v34, %v5539_v38  ;;  %v6058_v40 = vadd.f32 %v6057_v30, %v5889_v43  ;;  %v4099_v34 = vld [vmem:[#allocation2 + $0xfa] sm:$0xff]  ;;  %v4163_v43 = vld [vmem:[#allocation2 + $0x110] sm:$0xff] }
 0x8c6   :  { %v4422_v31 = vpack.c.bf16 %v4099_v34, %v4098_v6 }
 0x8c8   :  { %v5874_v12 = vpop.f32.mrf.mxu0 }
 0x8c9   :  { %6265 = vmatmul.bf16.gmra.mxu3 %v4414_v28  ;;  %v11021_v21 = vadd.f32 %v5874_v12, %v5706_v44  ;;  %v5890_v35 = vpop.f32.mrf.mxu1  ;;  %v4421_v12 = vpack.c.bf16 %v4035_v41, %v4034_v24  ;;  %v4036_v24 = vld [vmem:[#allocation2 + $0x109] sm:$0xff]  ;;  %v4037_v41 = vld [vmem:[#allocation2 + $0x111] sm:$0xff] }
 0x8ca   :  { %v5891_v23 = vadd.f32 %v5890_v35, %v10730_v45  ;;  %v4423_v45 = vpack.c.bf16 %v4163_v43, %v4162_v18 }
 0x8cb   :  { %6429 = vmatmul.bf16.gmra.mxu0 %v4412_v19 }
 0x8cc   :  { %v6226_v4 = vpop.f32.mrf.mxu3  ;;  %v6059_v38 = vpop.f32.mrf.mxu2 }
 0x8cd   :  { %v6227_v11 = vadd.f32 %v6226_v4, %v6058_v40  ;;  %v6060_v36 = vadd.f32 %v6059_v38, %v5891_v23 }
 0x8d0   :  { %v5876_v9 = vpop.f32.mrf.mxu0 }
 0x8d1   :  { %v11024_v28 = vadd.f32 %v5876_v9, %v5708_v20  ;;  %v5893_v30 = vpop.f32.mrf.mxu1  ;;  %6101 = vmatmul.bf16.gmra.mxu2 %v4422_v31  ;;  %v4100_v9 = vld [vmem:[#allocation2 + $0x10a] sm:$0xff] }
 0x8d2   :  { %v5894_v40 = vadd.f32 %v5893_v30, %v10734_v50  ;;  %v4164_v30 = vld [vmem:[#allocation2 + $0x120] sm:$0xff] }
 0x8d4   :  { %v6228_v54 = vpop.f32.mrf.mxu3  ;;  %5932 = vmatmul.bf16.gmra.mxu1 %v4421_v12  ;;  %v6062_v19 = vpop.f32.mrf.mxu2 }
 0x8d5   :  { %v6229_v44 = vadd.f32 %v6228_v54, %v6060_v36  ;;  %v6063_v4 = vadd.f32 %v6062_v19, %v5894_v40  ;;  %v4101_v54 = vld [vmem:[#allocation2 + $0x112] sm:$0xff]  ;;  %v4165_v40 = vld [vmem:[#allocation2 + $0x128] sm:$0xff] }
 0x8d6   :  { %v4431_v43 = vpack.c.bf16 %v4101_v54, %v4100_v9 }
 0x8d8   :  { %v6395_v35 = vpop.f32.mrf.mxu0 }
 0x8d9   :  { %6270 = vmatmul.bf16.gmra.mxu3 %v4423_v45  ;;  %v11027_v38 = vadd.f32 %v6395_v35, %v6227_v11  ;;  %v5895_v34 = vpop.f32.mrf.mxu1  ;;  %v4430_v35 = vpack.c.bf16 %v4037_v41, %v4036_v24  ;;  %v4102_v24 = vld [vmem:[#allocation2 + $0x122] sm:$0xff]  ;;  %v4103_v41 = vld [vmem:[#allocation2 + $0x12a] sm:$0xff] }
 0x8da   :  { %v5896_v20 = vadd.f32 %v5895_v34, %v10740_v7  ;;  %v4432_v7 = vpack.c.bf16 %v4165_v40, %v4164_v30 }
 0x8db   :  { %6434 = vmatmul.bf16.gmra.mxu0 %v4421_v12 }
 0x8dc   :  { %v6231_v23 = vpop.f32.mrf.mxu3  ;;  %v6064_v36 = vpop.f32.mrf.mxu2 }
 0x8dd   :  { %v6232_v6 = vadd.f32 %v6231_v23, %v6063_v4  ;;  %v6065_v50 = vadd.f32 %v6064_v36, %v5896_v20 }
 0x8e0   :  { %v6397_v31 = vpop.f32.mrf.mxu0 }
 0x8e1   :  { %v11030_v45 = vadd.f32 %v6397_v31, %v6229_v44  ;;  %v5898_v19 = vpop.f32.mrf.mxu1  ;;  %6106 = vmatmul.bf16.gmra.mxu2 %v4431_v43  ;;  %v4039_v43 = vld [vmem:[#allocation2 + $0x129] sm:$0xff] }
 0x8e2   :  { %v5899_v4 = vadd.f32 %v5898_v19, %v10744_v26  ;;  %v8051_v26 = vld [vmem:[%s12684_s5 + $0x220] sm:$0xff]  ;;  %v4166_v19 = vld [vmem:[#allocation2 + $0x138] sm:$0xff] }
 0x8e3   :  { %6558 = vmatpush.bf16.msra.mxu1 %v8051_v26 }
 0x8e4   :  { %v6233_v18 = vpop.f32.mrf.mxu3  ;;  %5937 = vmatmul.bf16.gmra.mxu1 %v4430_v35  ;;  %v6067_v12 = vpop.f32.mrf.mxu2 }
 0x8e5   :  { %v6234_v11 = vadd.f32 %v6233_v18, %v6065_v50  ;;  %v6068_v23 = vadd.f32 %v6067_v12, %v5899_v4  ;;  %v4038_v18 = vld [vmem:[#allocation2 + $0x121] sm:$0xff] }
 0x8e6   :  { %v4167_v4 = vld [vmem:[#allocation2 + $0x140] sm:$0xff] }
 0x8e8   :  { %v6400_v34 = vpop.f32.mrf.mxu0 }
 0x8e9   :  { %6275 = vmatmul.bf16.gmra.mxu3 %v4432_v7  ;;  %v11033_v36 = vadd.f32 %v6400_v34, %v6232_v6  ;;  %v5900_v54 = vpop.f32.mrf.mxu1  ;;  %v4440_v6 = vpack.c.bf16 %v4103_v41, %v4102_v24  ;;  %v4441_v34 = vpack.c.bf16 %v4167_v4, %v4166_v19 }
 0x8ea   :  { %v5901_v44 = vadd.f32 %v5900_v54, %v10747_v8 }
 0x8eb   :  { %6439 = vmatmul.bf16.gmra.mxu0 %v4430_v35 }
 0x8ec   :  { %v6236_v20 = vpop.f32.mrf.mxu3  ;;  %v6069_v50 = vpop.f32.mrf.mxu2 }
 0x8ed   :  { %v6237_v9 = vadd.f32 %v6236_v20, %v6068_v23  ;;  %v6070_v31 = vadd.f32 %v6069_v50, %v5901_v44  ;;  %v4439_v23 = vpack.c.bf16 %v4039_v43, %v4038_v18  ;;  %v4040_v18 = vld [vmem:[#allocation2 + $0x139] sm:$0xff]  ;;  %v4041_v43 = vld [vmem:[#allocation2 + $0x141] sm:$0xff] }
 0x8f0   :  { %v6402_v30 = vpop.f32.mrf.mxu0 }
 0x8f1   :  { %v11039_v7 = vadd.f32 %v6402_v30, %v6234_v11  ;;  %v5903_v35 = vpop.f32.mrf.mxu1  ;;  %6111 = vmatmul.bf16.gmra.mxu2 %v4440_v6  ;;  %v4104_v30 = vld [vmem:[#allocation2 + $0x13a] sm:$0xff] }
 0x8f2   :  { %v5904_v12 = vadd.f32 %v5903_v35, %v10751_v5  ;;  %v4168_v35 = vld [vmem:[#allocation2 + $0x150] sm:$0xff] }
 0x8f4   :  { %v6238_v40 = vpop.f32.mrf.mxu3  ;;  %5942 = vmatmul.bf16.gmra.mxu1 %v4439_v23  ;;  %v6072_v20 = vpop.f32.mrf.mxu2 }
 0x8f5   :  { %v6239_v8 = vadd.f32 %v6238_v40, %v6070_v31  ;;  %v6073_v54 = vadd.f32 %v6072_v20, %v5904_v12  ;;  %v4105_v40 = vld [vmem:[#allocation2 + $0x142] sm:$0xff]  ;;  %v4169_v12 = vld [vmem:[#allocation2 + $0x158] sm:$0xff] }
 0x8f6   :  { %v4449_v4 = vpack.c.bf16 %v4105_v40, %v4104_v30 }
 0x8f8   :  { %v6405_v44 = vpop.f32.mrf.mxu0 }
 0x8f9   :  { %6280 = vmatmul.bf16.gmra.mxu3 %v4441_v34  ;;  %v11042_v50 = vadd.f32 %v6405_v44, %v6237_v9  ;;  %v5905_v41 = vpop.f32.mrf.mxu1  ;;  %v4448_v44 = vpack.c.bf16 %v4041_v43, %v4040_v18  ;;  %v4042_v18 = vld [vmem:[#allocation2 + $0x151] sm:$0xff]  ;;  %v4043_v43 = vld [vmem:[#allocation2 + $0x159] sm:$0xff] }
 0x8fa   :  { %v5906_v11 = vadd.f32 %v5905_v41, %v10754_v37  ;;  %v4450_v37 = vpack.c.bf16 %v4169_v12, %v4168_v35 }
 0x8fb   :  { %6444 = vmatmul.bf16.gmra.mxu0 %v4439_v23 }
 0x8fc   :  { %v6241_v26 = vpop.f32.mrf.mxu3  ;;  %v6074_v31 = vpop.f32.mrf.mxu2 }
 0x8fd   :  { %v6242_v24 = vadd.f32 %v6241_v26, %v6073_v54  ;;  %v6075_v5 = vadd.f32 %v6074_v31, %v5906_v11 }
 0x900   :  { %v6407_v6 = vpop.f32.mrf.mxu0 }
 0x901   :  { %v11045_v34 = vadd.f32 %v6407_v6, %v6239_v8  ;;  %v5908_v20 = vpop.f32.mrf.mxu1  ;;  %6116 = vmatmul.bf16.gmra.mxu2 %v4449_v4  ;;  %v4106_v6 = vld [vmem:[#allocation2 + $0x152] sm:$0xff] }
 0x902   :  { %v5909_v54 = vadd.f32 %v5908_v20, %v10758_v62  ;;  %v4170_v20 = vld [vmem:[#allocation2 + $0x168] sm:$0xff] }
 0x904   :  { %v6243_v19 = vpop.f32.mrf.mxu3  ;;  %5947 = vmatmul.bf16.gmra.mxu1 %v4448_v44  ;;  %v6077_v23 = vpop.f32.mrf.mxu2 }
 0x905   :  { %v6244_v9 = vadd.f32 %v6243_v19, %v6075_v5  ;;  %v6078_v26 = vadd.f32 %v6077_v23, %v5909_v54  ;;  %v4107_v19 = vld [vmem:[#allocation2 + $0x15a] sm:$0xff]  ;;  %v4171_v54 = vld [vmem:[#allocation2 + $0x170] sm:$0xff] }
 0x906   :  { %v4458_v12 = vpack.c.bf16 %v4107_v19, %v4106_v6 }
 0x908   :  { %v6410_v41 = vpop.f32.mrf.mxu0 }
 0x909   :  { %6285 = vmatmul.bf16.gmra.mxu3 %v4450_v37  ;;  %v11048_v31 = vadd.f32 %v6410_v41, %v6242_v24  ;;  %v5910_v40 = vpop.f32.mrf.mxu1  ;;  %v4457_v41 = vpack.c.bf16 %v4043_v43, %v4042_v18  ;;  %v4044_v18 = vld [vmem:[#allocation2 + $0x169] sm:$0xff]  ;;  %v4045_v43 = vld [vmem:[#allocation2 + $0x171] sm:$0xff] }
 0x90a   :  { %v5911_v8 = vadd.f32 %v5910_v40, %v10761_v14  ;;  %v4459_v14 = vpack.c.bf16 %v4171_v54, %v4170_v20 }
 0x90b   :  { %6449 = vmatmul.bf16.gmra.mxu0 %v4448_v44 }
 0x90c   :  { %v6246_v11 = vpop.f32.mrf.mxu3  ;;  %v6079_v5 = vpop.f32.mrf.mxu2 }
 0x90d   :  { %v6247_v30 = vadd.f32 %v6246_v11, %v6078_v26  ;;  %v6080_v62 = vadd.f32 %v6079_v5, %v5911_v8 }
 0x910   :  { %v6412_v4 = vpop.f32.mrf.mxu0 }
 0x911   :  { %v11051_v37 = vadd.f32 %v6412_v4, %v6244_v9  ;;  %v5913_v23 = vpop.f32.mrf.mxu1  ;;  %6121 = vmatmul.bf16.gmra.mxu2 %v4458_v12  ;;  %v4108_v4 = vld [vmem:[#allocation2 + $0x16a] sm:$0xff] }
 0x912   :  { %v5914_v26 = vadd.f32 %v5913_v23, %v10765_v57  ;;  %v4172_v23 = vld [vmem:[#allocation2 + $0x180] sm:$0xff] }
 0x914   :  { %v6248_v35 = vpop.f32.mrf.mxu3  ;;  %5952 = vmatmul.bf16.gmra.mxu1 %v4457_v41  ;;  %v6082_v44 = vpop.f32.mrf.mxu2 }
 0x915   :  { %v6249_v24 = vadd.f32 %v6248_v35, %v6080_v62  ;;  %v6083_v11 = vadd.f32 %v6082_v44, %v5914_v26  ;;  %v4109_v35 = vld [vmem:[#allocation2 + $0x172] sm:$0xff]  ;;  %v4173_v26 = vld [vmem:[#allocation2 + $0x188] sm:$0xff] }
 0x916   :  { %v4467_v54 = vpack.c.bf16 %v4109_v35, %v4108_v4 }
 0x918   :  { %v6415_v40 = vpop.f32.mrf.mxu0 }
 0x919   :  { %6290 = vmatmul.bf16.gmra.mxu3 %v4459_v14  ;;  %v11054_v5 = vadd.f32 %v6415_v40, %v6247_v30  ;;  %v5915_v19 = vpop.f32.mrf.mxu1  ;;  %v4466_v40 = vpack.c.bf16 %v4045_v43, %v4044_v18  ;;  %v4110_v18 = vld [vmem:[#allocation2 + $0x182] sm:$0xff]  ;;  %v4111_v43 = vld [vmem:[#allocation2 + $0x18a] sm:$0xff] }
 0x91a   :  { %v5916_v9 = vadd.f32 %v5915_v19, %v10771_v48  ;;  %v4468_v48 = vpack.c.bf16 %v4173_v26, %v4172_v23  ;;  %v4047_v23 = vld [vmem:[#allocation2 + $0x189] sm:$0xff] }
 0x91b   :  { %6454 = vmatmul.bf16.gmra.mxu0 %v4457_v41 }
 0x91c   :  { %v6251_v8 = vpop.f32.mrf.mxu3  ;;  %v6084_v62 = vpop.f32.mrf.mxu2 }
 0x91d   :  { %v6252_v6 = vadd.f32 %v6251_v8, %v6083_v11  ;;  %v6085_v57 = vadd.f32 %v6084_v62, %v5916_v9 }
 0x920   :  { %v6417_v12 = vpop.f32.mrf.mxu0 }
 0x921   :  { %v11057_v14 = vadd.f32 %v6417_v12, %v6249_v24  ;;  %v5918_v44 = vpop.f32.mrf.mxu1  ;;  %6126 = vmatmul.bf16.gmra.mxu2 %v4467_v54  ;;  %v4046_v54 = vld [vmem:[#allocation2 + $0x181] sm:$0xff] }
 0x922   :  { %v5919_v11 = vadd.f32 %v5918_v44, %v10775_v22  ;;  %v8050_v22 = vld [vmem:[%s12684_s5 + $0x218] sm:$0xff]  ;;  %v4476_v44 = vpack.c.bf16 %v4111_v43, %v4110_v18 }
 0x923   :  { %6559 = vmatpush.bf16.msra.mxu1 %v8050_v22 }
 0x924   :  { %v6253_v20 = vpop.f32.mrf.mxu3  ;;  %5957 = vmatmul.bf16.gmra.mxu1 %v4466_v40  ;;  %v6087_v41 = vpop.f32.mrf.mxu2 }
 0x925   :  { %v6254_v30 = vadd.f32 %v6253_v20, %v6085_v57  ;;  %v6088_v8 = vadd.f32 %v6087_v41, %v5919_v11  ;;  %v4174_v20 = vld [vmem:[#allocation2 + $0x198] sm:$0xff] }
 0x928   :  { %v6420_v19 = vpop.f32.mrf.mxu0 }
 0x929   :  { %6295 = vmatmul.bf16.gmra.mxu3 %v4468_v48  ;;  %v11060_v62 = vadd.f32 %v6420_v19, %v6252_v6  ;;  %v5920_v35 = vpop.f32.mrf.mxu1  ;;  %v4475_v19 = vpack.c.bf16 %v4047_v23, %v4046_v54  ;;  %v4049_v54 = vld [vmem:[#allocation2 + $0x1d1] sm:$0xff] }
 0x92a   :  { %v5921_v24 = vadd.f32 %v5920_v35, %v10779_v61 }
 0x92b   :  { %6459 = vmatmul.bf16.gmra.mxu0 %v4466_v40  ;;  %v11068_v40 = vld [vmem:[#allocation2 + $0x1b8] sm:$0xff] }
 0x92c   :  { %v6256_v9 = vpop.f32.mrf.mxu3  ;;  %v6089_v57 = vpop.f32.mrf.mxu2  ;;  %v4477_v41 = vpack.c.bf16 %v11068_v40, %v4174_v20  ;;  %v4113_v20 = vld [vmem:[#allocation2 + $0x1d2] sm:$0xff] }
 0x92d   :  { %v6257_v4 = vadd.f32 %v6256_v9, %v6088_v8  ;;  %v6090_v12 = vadd.f32 %v6089_v57, %v5921_v24 }
 0x930   :  { %v6422_v26 = vpop.f32.mrf.mxu0 }
 0x931   :  { %v11066_v11 = vadd.f32 %v6422_v26, %v6254_v30  ;;  %v5923_v61 = vpop.f32.mrf.mxu1  ;;  %6131 = vmatmul.bf16.gmra.mxu2 %v4476_v44  ;;  %v4112_v26 = vld [vmem:[#allocation2 + $0x1ca] sm:$0xff] }
 0x932   :  { %v5924_v8 = vadd.f32 %v5923_v61, %v10782_v39  ;;  %v4048_v39 = vld [vmem:[#allocation2 + $0x1c9] sm:$0xff]  ;;  %v4485_v61 = vpack.c.bf16 %v4113_v20, %v4112_v26 }
 0x933   :  { %13224 = vst [vmem:[#allocation57_spill] sm:$0xff] %v11066_v11 }
 0x934   :  { %v6258_v6 = vpop.f32.mrf.mxu3  ;;  %5962 = vmatmul.bf16.gmra.mxu1 %v4475_v19  ;;  %v6092_v9 = vpop.f32.mrf.mxu2 }
 0x935   :  { %v6259_v48 = vadd.f32 %v6258_v6, %v6090_v12  ;;  %v6093_v35 = vadd.f32 %v6092_v9, %v5924_v8  ;;  %v4177_v8 = vld [vmem:[#allocation2 + $0x1e8] sm:$0xff] }
 0x938   :  { %v6425_v24 = vpop.f32.mrf.mxu0 }
 0x939   :  { %6300 = vmatmul.bf16.gmra.mxu3 %v4477_v41  ;;  %v11072_v57 = vadd.f32 %v6425_v24, %v6257_v4  ;;  %v5925_v18 = vpop.f32.mrf.mxu1  ;;  %v4176_v41 = vld [vmem:[#allocation2 + $0x1e0] sm:$0xff] }
 0x93a   :  { %v5926_v43 = vadd.f32 %v5925_v18, %v10785_v59  ;;  %v4486_v59 = vpack.c.bf16 %v4177_v8, %v4176_v41  ;;  %v4239_v18 = vld [vmem:[#allocation2 + $0x1a1] sm:$0xff]  ;;  %v4051_v41 = vld [vmem:[#allocation2 + $0x1e9] sm:$0xff] }
 0x93b   :  { %13225 = vst [vmem:[#allocation58_spill] sm:$0xff] %v11072_v57  ;;  %6464 = vmatmul.bf16.gmra.mxu0 %v4475_v19  ;;  %v4238_v19 = vld [vmem:[#allocation2 + $0x199] sm:$0xff] }
 0x93c   :  { %v6261_v22 = vpop.f32.mrf.mxu3  ;;  %v6094_v12 = vpop.f32.mrf.mxu2  ;;  %v4478_v57 = vpack.c.bf16 %v4239_v18, %v4238_v19 }
 0x93d   :  { %v6262_v30 = vadd.f32 %v6261_v22, %v6093_v35  ;;  %v6095_v6 = vadd.f32 %v6094_v12, %v5926_v43  ;;  %v4484_v22 = vpack.c.bf16 %v4049_v54, %v4048_v39  ;;  %v4114_v39 = vld [vmem:[#allocation2 + $0x1e2] sm:$0xff]  ;;  %v4115_v54 = vld [vmem:[#allocation2 + $0x1ea] sm:$0xff] }
 0x940   :  { %v6427_v23 = vpop.f32.mrf.mxu0 }
 0x941   :  { %v11075_v9 = vadd.f32 %v6427_v23, %v6259_v48  ;;  %v5928_v24 = vpop.f32.mrf.mxu1  ;;  %6136 = vmatmul.bf16.gmra.mxu2 %v4485_v61  ;;  %v4050_v61 = vld [vmem:[#allocation2 + $0x1e1] sm:$0xff] }
 0x942   :  { %v5929_v35 = vadd.f32 %v5928_v24, %v10788_v42 }
 0x944   :  { %v6263_v44 = vpop.f32.mrf.mxu3  ;;  %5967 = vmatmul.bf16.gmra.mxu1 %v4484_v22  ;;  %v6097_v43 = vpop.f32.mrf.mxu2  ;;  %v4494_v22 = vpack.c.bf16 %v4115_v54, %v4114_v39 }
 0x945   :  { %v6264_v4 = vadd.f32 %v6263_v44, %v6095_v6  ;;  %v6098_v12 = vadd.f32 %v6097_v43, %v5929_v35  ;;  %v4178_v35 = vld [vmem:[#allocation2 + $0x1f8] sm:$0xff]  ;;  %v4493_v43 = vpack.c.bf16 %v4051_v41, %v4050_v61  ;;  %v4053_v41 = vld [vmem:[#allocation2 + $0x201] sm:$0xff] }
 0x946   :  { %v4052_v61 = vld [vmem:[#allocation2 + $0x1f9] sm:$0xff] }
 0x948   :  { %v6430_v11 = vpop.f32.mrf.mxu0 }
 0x949   :  { %6305 = vmatmul.bf16.gmra.mxu3 %v4486_v59  ;;  %v11078_v20 = vadd.f32 %v6430_v11, %v6262_v30  ;;  %v5930_v23 = vpop.f32.mrf.mxu1  ;;  %v4179_v59 = vld [vmem:[#allocation2 + $0x200] sm:$0xff] }
 0x94a   :  { %v5931_v6 = vadd.f32 %v5930_v23, %v10791_v63  ;;  %v4495_v63 = vpack.c.bf16 %v4179_v59, %v4178_v35  ;;  %v4180_v59 = vld [vmem:[#allocation2 + $0x210] sm:$0xff] }
 0x94b   :  { %6469 = vmatmul.bf16.gmra.mxu0 %v4478_v57 }
 0x94c   :  { %v6266_v26 = vpop.f32.mrf.mxu3  ;;  %v6099_v42 = vpop.f32.mrf.mxu2 }
 0x94d   :  { %v6267_v48 = vadd.f32 %v6266_v26, %v6098_v12  ;;  %v6100_v44 = vadd.f32 %v6099_v42, %v5931_v6 }
 0x950   :  { %v6432_v8 = vpop.f32.mrf.mxu0 }
 0x951   :  { %v11081_v19 = vadd.f32 %v6432_v8, %v6264_v4  ;;  %v5933_v30 = vpop.f32.mrf.mxu1  ;;  %6141 = vmatmul.bf16.gmra.mxu2 %v4494_v22  ;;  %v4117_v8 = vld [vmem:[#allocation2 + $0x202] sm:$0xff] }
 0x952   :  { %v5934_v18 = vadd.f32 %v5933_v30, %v10794_v52  ;;  %v4181_v30 = vld [vmem:[#allocation2 + $0x218] sm:$0xff] }
 0x954   :  { %v6268_v24 = vpop.f32.mrf.mxu3  ;;  %5972 = vmatmul.bf16.gmra.mxu1 %v4493_v43  ;;  %v6102_v57 = vpop.f32.mrf.mxu2 }
 0x955   :  { %v6269_v11 = vadd.f32 %v6268_v24, %v6100_v44  ;;  %v6103_v12 = vadd.f32 %v6102_v57, %v5934_v18  ;;  %v4116_v44 = vld [vmem:[#allocation2 + $0x1fa] sm:$0xff] }
 0x956   :  { %v4503_v35 = vpack.c.bf16 %v4117_v8, %v4116_v44 }
 0x958   :  { %v6435_v26 = vpop.f32.mrf.mxu0 }
 0x959   :  { %6310 = vmatmul.bf16.gmra.mxu3 %v4495_v63  ;;  %v11084_v6 = vadd.f32 %v6435_v26, %v6267_v48  ;;  %v5935_v39 = vpop.f32.mrf.mxu1 }
 0x95a   :  { %v5936_v4 = vadd.f32 %v5935_v39, %v10800_v53  ;;  %v4504_v53 = vpack.c.bf16 %v4181_v30, %v4180_v59  ;;  %v4182_v30 = vld [vmem:[#allocation2 + $0x228] sm:$0xff] }
 0x95b   :  { %6474 = vmatmul.bf16.gmra.mxu0 %v4493_v43 }
 0x95c   :  { %v6271_v23 = vpop.f32.mrf.mxu3  ;;  %v6104_v54 = vpop.f32.mrf.mxu2 }
 0x95d   :  { %v6272_v42 = vadd.f32 %v6271_v23, %v6103_v12  ;;  %v6105_v52 = vadd.f32 %v6104_v54, %v5936_v4  ;;  %v4502_v12 = vpack.c.bf16 %v4053_v41, %v4052_v61  ;;  %v4119_v61 = vld [vmem:[#allocation2 + $0x21a] sm:$0xff] }
 0x960   :  { %v6437_v24 = vpop.f32.mrf.mxu0 }
 0x961   :  { %v11087_v18 = vadd.f32 %v6437_v24, %v6269_v11  ;;  %v5938_v63 = vpop.f32.mrf.mxu1  ;;  %6146 = vmatmul.bf16.gmra.mxu2 %v4503_v35  ;;  %v4054_v24 = vld [vmem:[#allocation2 + $0x211] sm:$0xff] }
 0x962   :  { %v5939_v57 = vadd.f32 %v5938_v63, %v10803_v29  ;;  %v8049_v29 = vld [vmem:[%s12684_s5 + $0x210] sm:$0xff] }
 0x963   :  { %6560 = vmatpush.bf16.msra.mxu1 %v8049_v29  ;;  %v4183_v63 = vld [vmem:[#allocation2 + $0x230] sm:$0xff] }
 0x964   :  { %v6273_v22 = vpop.f32.mrf.mxu3  ;;  %5977 = vmatmul.bf16.gmra.mxu1 %v4502_v12  ;;  %v6107_v43 = vpop.f32.mrf.mxu2 }
 0x965   :  { %v6274_v48 = vadd.f32 %v6273_v22, %v6105_v52  ;;  %v6108_v26 = vadd.f32 %v6107_v43, %v5939_v57  ;;  %v4118_v52 = vld [vmem:[#allocation2 + $0x212] sm:$0xff] }
 0x966   :  { %v4055_v22 = vld [vmem:[#allocation2 + $0x219] sm:$0xff] }
 0x967   :  { %v4511_v43 = vpack.c.bf16 %v4055_v22, %v4054_v24  ;;  %v4056_v24 = vld [vmem:[#allocation2 + $0x229] sm:$0xff]  ;;  %v4057_v22 = vld [vmem:[#allocation2 + $0x231] sm:$0xff] }
 0x968   :  { %v6440_v23 = vpop.f32.mrf.mxu0 }
 0x969   :  { %6315 = vmatmul.bf16.gmra.mxu3 %v4504_v53  ;;  %v11090_v4 = vadd.f32 %v6440_v23, %v6272_v42  ;;  %v5940_v44 = vpop.f32.mrf.mxu1  ;;  %v4512_v42 = vpack.c.bf16 %v4119_v61, %v4118_v52 }
 0x96a   :  { %v5941_v11 = vadd.f32 %v5940_v44, %v10806_v17 }
 0x96b   :  { %6479 = vmatmul.bf16.gmra.mxu0 %v4502_v12 }
 0x96c   :  { %v6276_v39 = vpop.f32.mrf.mxu3  ;;  %v6109_v8 = vpop.f32.mrf.mxu2 }
 0x96d   :  { %v6277_v54 = vadd.f32 %v6276_v39, %v6108_v26  ;;  %v6110_v41 = vadd.f32 %v6109_v8, %v5941_v11  ;;  %v4513_v26 = vpack.c.bf16 %v4183_v63, %v4182_v30  ;;  %v4184_v63 = vld [vmem:[#allocation2 + $0x240] sm:$0xff] }
 0x970   :  { %v6442_v35 = vpop.f32.mrf.mxu0 }
 0x971   :  { %v11096_v57 = vadd.f32 %v6442_v35, %v6274_v48  ;;  %v5943_v12 = vpop.f32.mrf.mxu1  ;;  %6151 = vmatmul.bf16.gmra.mxu2 %v4512_v42  ;;  %v4121_v35 = vld [vmem:[#allocation2 + $0x232] sm:$0xff] }
 0x972   :  { %v5944_v53 = vadd.f32 %v5943_v12, %v10809_v2  ;;  %v4185_v12 = vld [vmem:[#allocation2 + $0x248] sm:$0xff] }
 0x974   :  { %v6278_v59 = vpop.f32.mrf.mxu3  ;;  %5982 = vmatmul.bf16.gmra.mxu1 %v4511_v43  ;;  %v6112_v23 = vpop.f32.mrf.mxu2 }
 0x975   :  { %v6279_v17 = vadd.f32 %v6278_v59, %v6110_v41  ;;  %v6113_v39 = vadd.f32 %v6112_v23, %v5944_v53  ;;  %v4120_v41 = vld [vmem:[#allocation2 + $0x22a] sm:$0xff] }
 0x976   :  { %v4521_v30 = vpack.c.bf16 %v4121_v35, %v4120_v41 }
 0x978   :  { %v6445_v44 = vpop.f32.mrf.mxu0 }
 0x979   :  { %6320 = vmatmul.bf16.gmra.mxu3 %v4513_v26  ;;  %v11099_v29 = vadd.f32 %v6445_v44, %v6277_v54  ;;  %v5945_v52 = vpop.f32.mrf.mxu1 }
 0x97a   :  { %v5946_v48 = vadd.f32 %v5945_v52, %v10812_v60  ;;  %v4522_v60 = vpack.c.bf16 %v4185_v12, %v4184_v63  ;;  %v4186_v12 = vld [vmem:[#allocation2 + $0x258] sm:$0xff] }
 0x97b   :  { %6484 = vmatmul.bf16.gmra.mxu0 %v4511_v43 }
 0x97c   :  { %v6281_v11 = vpop.f32.mrf.mxu3  ;;  %v6114_v61 = vpop.f32.mrf.mxu2 }
 0x97d   :  { %v6282_v8 = vadd.f32 %v6281_v11, %v6113_v39  ;;  %v6115_v2 = vadd.f32 %v6114_v61, %v5946_v48  ;;  %v4520_v39 = vpack.c.bf16 %v4057_v22, %v4056_v24  ;;  %v4058_v24 = vld [vmem:[#allocation2 + $0x241] sm:$0xff]  ;;  %v4059_v22 = vld [vmem:[#allocation2 + $0x249] sm:$0xff] }
 0x980   :  { %v6447_v59 = vpop.f32.mrf.mxu0 }
 0x981   :  { %v11102_v53 = vadd.f32 %v6447_v59, %v6279_v17  ;;  %v5948_v26 = vpop.f32.mrf.mxu1  ;;  %6156 = vmatmul.bf16.gmra.mxu2 %v4521_v30  ;;  %v4123_v59 = vld [vmem:[#allocation2 + $0x24a] sm:$0xff] }
 0x982   :  { %v5949_v23 = vadd.f32 %v5948_v26, %v10815_v33  ;;  %v4187_v26 = vld [vmem:[#allocation2 + $0x260] sm:$0xff] }
 0x984   :  { %v6283_v42 = vpop.f32.mrf.mxu3  ;;  %5987 = vmatmul.bf16.gmra.mxu1 %v4520_v39  ;;  %v6117_v43 = vpop.f32.mrf.mxu2 }
 0x985   :  { %v6284_v54 = vadd.f32 %v6283_v42, %v6115_v2  ;;  %v6118_v44 = vadd.f32 %v6117_v43, %v5949_v23  ;;  %v4122_v2 = vld [vmem:[#allocation2 + $0x242] sm:$0xff] }
 0x986   :  { %v4530_v63 = vpack.c.bf16 %v4123_v59, %v4122_v2 }
 0x988   :  { %v6450_v11 = vpop.f32.mrf.mxu0 }
 0x989   :  { %6325 = vmatmul.bf16.gmra.mxu3 %v4522_v60  ;;  %v11105_v48 = vadd.f32 %v6450_v11, %v6282_v8  ;;  %v5950_v41 = vpop.f32.mrf.mxu1 }
 0x98a   :  { %v5951_v17 = vadd.f32 %v5950_v41, %v10818_v55  ;;  %v4531_v55 = vpack.c.bf16 %v4187_v26, %v4186_v12  ;;  %v4188_v26 = vld [vmem:[#allocation2 + $0x270] sm:$0xff] }
 0x98b   :  { %6489 = vmatmul.bf16.gmra.mxu0 %v4520_v39 }
 0x98c   :  { %v6286_v52 = vpop.f32.mrf.mxu3  ;;  %v6119_v35 = vpop.f32.mrf.mxu2 }
 0x98d   :  { %v6287_v61 = vadd.f32 %v6286_v52, %v6118_v44  ;;  %v6120_v33 = vadd.f32 %v6119_v35, %v5951_v17  ;;  %v4529_v44 = vpack.c.bf16 %v4059_v22, %v4058_v24  ;;  %v4060_v24 = vld [vmem:[#allocation2 + $0x259] sm:$0xff]  ;;  %v4061_v22 = vld [vmem:[#allocation2 + $0x261] sm:$0xff] }
 0x990   :  { %v6452_v42 = vpop.f32.mrf.mxu0 }
 0x991   :  { %v11108_v23 = vadd.f32 %v6452_v42, %v6284_v54  ;;  %v5953_v60 = vpop.f32.mrf.mxu1  ;;  %6161 = vmatmul.bf16.gmra.mxu2 %v4530_v63  ;;  %v4125_v42 = vld [vmem:[#allocation2 + $0x262] sm:$0xff] }
 0x992   :  { %v5954_v43 = vadd.f32 %v5953_v60, %v10821_v10  ;;  %v4189_v60 = vld [vmem:[#allocation2 + $0x278] sm:$0xff] }
 0x994   :  { %v6288_v30 = vpop.f32.mrf.mxu3  ;;  %5992 = vmatmul.bf16.gmra.mxu1 %v4529_v44  ;;  %v6122_v39 = vpop.f32.mrf.mxu2 }
 0x995   :  { %v6289_v8 = vadd.f32 %v6288_v30, %v6120_v33  ;;  %v6123_v11 = vadd.f32 %v6122_v39, %v5954_v43  ;;  %v4124_v33 = vld [vmem:[#allocation2 + $0x25a] sm:$0xff] }
 0x996   :  { %v4539_v12 = vpack.c.bf16 %v4125_v42, %v4124_v33 }
 0x998   :  { %v6455_v52 = vpop.f32.mrf.mxu0 }
 0x999   :  { %6330 = vmatmul.bf16.gmra.mxu3 %v4531_v55  ;;  %v11111_v17 = vadd.f32 %v6455_v52, %v6287_v61  ;;  %v5955_v2 = vpop.f32.mrf.mxu1 }
 0x99a   :  { %v5956_v54 = vadd.f32 %v5955_v2, %v10827_v32  ;;  %v4540_v32 = vpack.c.bf16 %v4189_v60, %v4188_v26  ;;  %v4190_v60 = vld [vmem:[#allocation2 + $0x288] sm:$0xff] }
 0x99b   :  { %6494 = vmatmul.bf16.gmra.mxu0 %v4529_v44 }
 0x99c   :  { %v6291_v41 = vpop.f32.mrf.mxu3  ;;  %v6124_v59 = vpop.f32.mrf.mxu2 }
 0x99d   :  { %v6292_v35 = vadd.f32 %v6291_v41, %v6123_v11  ;;  %v6125_v10 = vadd.f32 %v6124_v59, %v5956_v54  ;;  %v4538_v11 = vpack.c.bf16 %v4061_v22, %v4060_v24  ;;  %v4127_v24 = vld [vmem:[#allocation2 + $0x27a] sm:$0xff] }
 0x9a0   :  { %v6457_v30 = vpop.f32.mrf.mxu0 }
 0x9a1   :  { %v11114_v43 = vadd.f32 %v6457_v30, %v6289_v8  ;;  %v5958_v55 = vpop.f32.mrf.mxu1  ;;  %6166 = vmatmul.bf16.gmra.mxu2 %v4539_v12  ;;  %v4062_v30 = vld [vmem:[#allocation2 + $0x271] sm:$0xff] }
 0x9a2   :  { %v5959_v39 = vadd.f32 %v5958_v55, %v10830_v46  ;;  %v8048_v46 = vld [vmem:[%s12684_s5 + $0x208] sm:$0xff]  ;;  %v4191_v55 = vld [vmem:[#allocation2 + $0x290] sm:$0xff] }
 0x9a3   :  { %6561 = vmatpush.bf16.msra.mxu1 %v8048_v46 }
 0x9a4   :  { %v6293_v63 = vpop.f32.mrf.mxu3  ;;  %5997 = vmatmul.bf16.gmra.mxu1 %v4538_v11  ;;  %v6127_v44 = vpop.f32.mrf.mxu2 }
 0x9a5   :  { %v6294_v61 = vadd.f32 %v6293_v63, %v6125_v10  ;;  %v6128_v52 = vadd.f32 %v6127_v44, %v5959_v39  ;;  %v4126_v10 = vld [vmem:[#allocation2 + $0x272] sm:$0xff] }
 0x9a6   :  { %v4063_v63 = vld [vmem:[#allocation2 + $0x279] sm:$0xff] }
 0x9a7   :  { %v4547_v44 = vpack.c.bf16 %v4063_v63, %v4062_v30  ;;  %v4064_v30 = vld [vmem:[#allocation2 + $0x289] sm:$0xff]  ;;  %v4065_v63 = vld [vmem:[#allocation2 + $0x291] sm:$0xff] }
 0x9a8   :  { %v6460_v41 = vpop.f32.mrf.mxu0 }
 0x9a9   :  { %6335 = vmatmul.bf16.gmra.mxu3 %v4540_v32  ;;  %v11117_v54 = vadd.f32 %v6460_v41, %v6292_v35  ;;  %v5960_v33 = vpop.f32.mrf.mxu1  ;;  %v4548_v35 = vpack.c.bf16 %v4127_v24, %v4126_v10 }
 0x9aa   :  { %v5961_v8 = vadd.f32 %v5960_v33, %v10833_v47 }
 0x9ab   :  { %6499 = vmatmul.bf16.gmra.mxu0 %v4538_v11 }
 0x9ac   :  { %v6296_v2 = vpop.f32.mrf.mxu3  ;;  %v6129_v42 = vpop.f32.mrf.mxu2 }
 0x9ad   :  { %v6297_v59 = vadd.f32 %v6296_v2, %v6128_v52  ;;  %v6130_v22 = vadd.f32 %v6129_v42, %v5961_v8  ;;  %v4549_v52 = vpack.c.bf16 %v4191_v55, %v4190_v60  ;;  %v4192_v55 = vld [vmem:[#allocation2 + $0x2a0] sm:$0xff] }
 0x9b0   :  { %v6462_v12 = vpop.f32.mrf.mxu0 }
 0x9b1   :  { %v11123_v39 = vadd.f32 %v6462_v12, %v6294_v61  ;;  %v5963_v11 = vpop.f32.mrf.mxu1  ;;  %6171 = vmatmul.bf16.gmra.mxu2 %v4548_v35  ;;  %v4129_v12 = vld [vmem:[#allocation2 + $0x292] sm:$0xff] }
 0x9b2   :  { %v5964_v32 = vadd.f32 %v5963_v11, %v10836_v25  ;;  %v4193_v11 = vld [vmem:[#allocation2 + $0x2a8] sm:$0xff] }
 0x9b4   :  { %v6298_v26 = vpop.f32.mrf.mxu3  ;;  %6002 = vmatmul.bf16.gmra.mxu1 %v4547_v44  ;;  %v6132_v41 = vpop.f32.mrf.mxu2 }
 0x9b5   :  { %v6299_v47 = vadd.f32 %v6298_v26, %v6130_v22  ;;  %v6133_v2 = vadd.f32 %v6132_v41, %v5964_v32  ;;  %v4128_v22 = vld [vmem:[#allocation2 + $0x28a] sm:$0xff] }
 0x9b6   :  { %v4557_v60 = vpack.c.bf16 %v4129_v12, %v4128_v22 }
 0x9b8   :  { %v6465_v33 = vpop.f32.mrf.mxu0 }
 0x9b9   :  { %6340 = vmatmul.bf16.gmra.mxu3 %v4549_v52  ;;  %v11126_v46 = vadd.f32 %v6465_v33, %v6297_v59  ;;  %v5965_v10 = vpop.f32.mrf.mxu1 }
 0x9ba   :  { %v5966_v61 = vadd.f32 %v5965_v10, %v10839_v56  ;;  %v4558_v56 = vpack.c.bf16 %v4193_v11, %v4192_v55  ;;  %v4194_v11 = vld [vmem:[#allocation2 + $0x2b8] sm:$0xff] }
 0x9bb   :  { %6504 = vmatmul.bf16.gmra.mxu0 %v4547_v44 }
 0x9bc   :  { %v6301_v8 = vpop.f32.mrf.mxu3  ;;  %v6134_v24 = vpop.f32.mrf.mxu2 }
 0x9bd   :  { %v6302_v42 = vadd.f32 %v6301_v8, %v6133_v2  ;;  %v6135_v25 = vadd.f32 %v6134_v24, %v5966_v61  ;;  %v4556_v2 = vpack.c.bf16 %v4065_v63, %v4064_v30  ;;  %v4066_v30 = vld [vmem:[#allocation2 + $0x2a1] sm:$0xff]  ;;  %v4067_v63 = vld [vmem:[#allocation2 + $0x2a9] sm:$0xff] }
 0x9c0   :  { %v6467_v26 = vpop.f32.mrf.mxu0 }
 0x9c1   :  { %v11129_v32 = vadd.f32 %v6467_v26, %v6299_v47  ;;  %v5968_v52 = vpop.f32.mrf.mxu1  ;;  %6176 = vmatmul.bf16.gmra.mxu2 %v4557_v60  ;;  %v4131_v26 = vld [vmem:[#allocation2 + $0x2aa] sm:$0xff] }
 0x9c2   :  { %v5969_v41 = vadd.f32 %v5968_v52, %v10842_v49  ;;  %v4195_v52 = vld [vmem:[#allocation2 + $0x2c0] sm:$0xff] }
 0x9c4   :  { %v6303_v35 = vpop.f32.mrf.mxu3  ;;  %6007 = vmatmul.bf16.gmra.mxu1 %v4556_v2  ;;  %v6137_v44 = vpop.f32.mrf.mxu2 }
 0x9c5   :  { %v6304_v59 = vadd.f32 %v6303_v35, %v6135_v25  ;;  %v6138_v33 = vadd.f32 %v6137_v44, %v5969_v41  ;;  %v4130_v25 = vld [vmem:[#allocation2 + $0x2a2] sm:$0xff] }
 0x9c6   :  { %v4566_v55 = vpack.c.bf16 %v4131_v26, %v4130_v25 }
 0x9c8   :  { %v6470_v8 = vpop.f32.mrf.mxu0 }
 0x9c9   :  { %6345 = vmatmul.bf16.gmra.mxu3 %v4558_v56  ;;  %v11132_v61 = vadd.f32 %v6470_v8, %v6302_v42  ;;  %v5970_v22 = vpop.f32.mrf.mxu1 }
 0x9ca   :  { %v5971_v47 = vadd.f32 %v5970_v22, %v10845_v16  ;;  %v4567_v16 = vpack.c.bf16 %v4195_v52, %v4194_v11  ;;  %v4196_v52 = vld [vmem:[#allocation2 + $0x2d0] sm:$0xff] }
 0x9cb   :  { %6509 = vmatmul.bf16.gmra.mxu0 %v4556_v2 }
 0x9cc   :  { %v6306_v10 = vpop.f32.mrf.mxu3  ;;  %v6139_v12 = vpop.f32.mrf.mxu2 }
 0x9cd   :  { %v6307_v24 = vadd.f32 %v6306_v10, %v6138_v33  ;;  %v6140_v49 = vadd.f32 %v6139_v12, %v5971_v47  ;;  %v4565_v33 = vpack.c.bf16 %v4067_v63, %v4066_v30  ;;  %v4068_v30 = vld [vmem:[#allocation2 + $0x2b9] sm:$0xff]  ;;  %v4069_v63 = vld [vmem:[#allocation2 + $0x2c1] sm:$0xff] }
 0x9d0   :  { %v6472_v35 = vpop.f32.mrf.mxu0 }
 0x9d1   :  { %v11135_v41 = vadd.f32 %v6472_v35, %v6304_v59  ;;  %v5973_v56 = vpop.f32.mrf.mxu1  ;;  %6181 = vmatmul.bf16.gmra.mxu2 %v4566_v55  ;;  %v4133_v35 = vld [vmem:[#allocation2 + $0x2c2] sm:$0xff] }
 0x9d2   :  { %v5974_v44 = vadd.f32 %v5973_v56, %v10853_v27  ;;  %v4197_v56 = vld [vmem:[#allocation2 + $0x2d8] sm:$0xff] }
 0x9d4   :  { %v6308_v60 = vpop.f32.mrf.mxu3  ;;  %6012 = vmatmul.bf16.gmra.mxu1 %v4565_v33  ;;  %v6142_v2 = vpop.f32.mrf.mxu2 }
 0x9d5   :  { %v6309_v42 = vadd.f32 %v6308_v60, %v6140_v49  ;;  %v6143_v8 = vadd.f32 %v6142_v2, %v5974_v44  ;;  %v4132_v49 = vld [vmem:[#allocation2 + $0x2ba] sm:$0xff] }
 0x9d6   :  { %v4575_v11 = vpack.c.bf16 %v4133_v35, %v4132_v49 }
 0x9d8   :  { %v6475_v10 = vpop.f32.mrf.mxu0 }
 0x9d9   :  { %6350 = vmatmul.bf16.gmra.mxu3 %v4567_v16  ;;  %v11138_v47 = vadd.f32 %v6475_v10, %v6307_v24  ;;  %v5975_v25 = vpop.f32.mrf.mxu1 }
 0x9da   :  { %v5976_v59 = vadd.f32 %v5975_v25, %v10859_v3  ;;  %v4576_v3 = vpack.c.bf16 %v4197_v56, %v4196_v52  ;;  %v4198_v56 = vld [vmem:[#allocation2 + $0x2e8] sm:$0xff] }
 0x9db   :  { %6514 = vmatmul.bf16.gmra.mxu0 %v4565_v33 }
 0x9dc   :  { %v6311_v22 = vpop.f32.mrf.mxu3  ;;  %v6144_v26 = vpop.f32.mrf.mxu2 }
 0x9dd   :  { %v6312_v12 = vadd.f32 %v6311_v22, %v6143_v8  ;;  %v6145_v27 = vadd.f32 %v6144_v26, %v5976_v59  ;;  %v4574_v8 = vpack.c.bf16 %v4069_v63, %v4068_v30  ;;  %v4135_v30 = vld [vmem:[#allocation2 + $0x2da] sm:$0xff] }
 0x9e0   :  { %v6477_v60 = vpop.f32.mrf.mxu0 }
 0x9e1   :  { %v11141_v44 = vadd.f32 %v6477_v60, %v6309_v42  ;;  %v5978_v16 = vpop.f32.mrf.mxu1  ;;  %6186 = vmatmul.bf16.gmra.mxu2 %v4575_v11  ;;  %v4070_v60 = vld [vmem:[#allocation2 + $0x2d1] sm:$0xff] }
 0x9e2   :  { %v5979_v2 = vadd.f32 %v5978_v16, %v10862_v51  ;;  %v8047_v51 = vld [vmem:[%s12684_s5 + $0x200] sm:$0xff]  ;;  %v4199_v16 = vld [vmem:[#allocation2 + $0x2f0] sm:$0xff] }
 0x9e3   :  { %6562 = vmatpush.bf16.msra.mxu1 %v8047_v51 }
 0x9e4   :  { %v6313_v55 = vpop.f32.mrf.mxu3  ;;  %6017 = vmatmul.bf16.gmra.mxu1 %v4574_v8  ;;  %v6147_v33 = vpop.f32.mrf.mxu2 }
 0x9e5   :  { %v6314_v24 = vadd.f32 %v6313_v55, %v6145_v27  ;;  %v6148_v10 = vadd.f32 %v6147_v33, %v5979_v2  ;;  %v4134_v27 = vld [vmem:[#allocation2 + $0x2d2] sm:$0xff] }
 0x9e6   :  { %v4071_v55 = vld [vmem:[#allocation2 + $0x2d9] sm:$0xff] }
 0x9e7   :  { %v4583_v33 = vpack.c.bf16 %v4071_v55, %v4070_v60  ;;  %v4072_v60 = vld [vmem:[#allocation2 + $0x2e9] sm:$0xff]  ;;  %v4073_v55 = vld [vmem:[#allocation2 + $0x2f1] sm:$0xff] }
 0x9e8   :  { %v6480_v22 = vpop.f32.mrf.mxu0 }
 0x9e9   :  { %6355 = vmatmul.bf16.gmra.mxu3 %v4576_v3  ;;  %v11144_v59 = vadd.f32 %v6480_v22, %v6312_v12  ;;  %v5980_v49 = vpop.f32.mrf.mxu1  ;;  %v4584_v12 = vpack.c.bf16 %v4135_v30, %v4134_v27  ;;  %v13228_v30 = vld [vmem:[#allocation30_spill] sm:$0xff] }
 0x9ea   :  { %v5981_v42 = vadd.f32 %v5980_v49, %v10865_v58 }
 0x9eb   :  { %6519 = vmatmul.bf16.gmra.mxu0 %v4574_v8 }
 0x9ec   :  { %v6316_v25 = vpop.f32.mrf.mxu3  ;;  %v6149_v35 = vpop.f32.mrf.mxu2 }
 0x9ed   :  { %v6317_v26 = vadd.f32 %v6316_v25, %v6148_v10  ;;  %v6150_v63 = vadd.f32 %v6149_v35, %v5981_v42  ;;  %v4585_v10 = vpack.c.bf16 %v4199_v16, %v4198_v56 }
 0x9f0   :  { %v6482_v11 = vpop.f32.mrf.mxu0 }
 0x9f1   :  { %v11150_v2 = vadd.f32 %v6482_v11, %v6314_v24  ;;  %v5983_v8 = vpop.f32.mrf.mxu1  ;;  %6191 = vmatmul.bf16.gmra.mxu2 %v4584_v12  ;;  %v4136_v11 = vld [vmem:[#allocation2 + $0x2ea] sm:$0xff] }
 0x9f2   :  { %v5984_v3 = vadd.f32 %v5983_v8, %v10868_v15  ;;  %v4200_v8 = vld [vmem:[#allocation2 + $0x300] sm:$0xff] }
 0x9f3   :  { %13226 = vst [vmem:[#allocation60_spill] sm:$0xff] %v11150_v2  ;;  %v13232_v2 = vld [vmem:[#allocation32_spill] sm:$0xff] }
 0x9f4   :  { %v6318_v52 = vpop.f32.mrf.mxu3  ;;  %6022 = vmatmul.bf16.gmra.mxu1 %v4583_v33  ;;  %v6152_v22 = vpop.f32.mrf.mxu2 }
 0x9f5   :  { %v6319_v58 = vadd.f32 %v6318_v52, %v6150_v63  ;;  %v6153_v25 = vadd.f32 %v6152_v22, %v5984_v3  ;;  %v4137_v52 = vld [vmem:[#allocation2 + $0x2f2] sm:$0xff]  ;;  %v4201_v3 = vld [vmem:[#allocation2 + $0x308] sm:$0xff] }
 0x9f6   :  { %v4593_v16 = vpack.c.bf16 %v4137_v52, %v4136_v11 }
 0x9f8   :  { %v6485_v49 = vpop.f32.mrf.mxu0 }
 0x9f9   :  { %6360 = vmatmul.bf16.gmra.mxu3 %v4585_v10  ;;  %v11153_v51 = vadd.f32 %v6485_v49, %v6317_v26  ;;  %v5985_v27 = vpop.f32.mrf.mxu1 }
 0x9fa   :  { %v5986_v24 = vadd.f32 %v5985_v27, %v13228_v30 }
 0x9fb   :  { %13227 = vst [vmem:[#allocation3_spill] sm:$0xff] %v11153_v51  ;;  %6524 = vmatmul.bf16.gmra.mxu0 %v4583_v33  ;;  %v4594_v33 = vpack.c.bf16 %v4201_v3, %v4200_v8 }
 0x9fc   :  { %v6321_v42 = vpop.f32.mrf.mxu3  ;;  %v6154_v63 = vpop.f32.mrf.mxu2 }
 0x9fd   :  { %v6322_v35 = vadd.f32 %v6321_v42, %v6153_v25  ;;  %v6155_v15 = vadd.f32 %v6154_v63, %v5986_v24  ;;  %v13230_v25 = vld [vmem:[#allocation31_spill] sm:$0xff]  ;;  %v4592_v42 = vpack.c.bf16 %v4073_v55, %v4072_v60  ;;  %v4075_v55 = vld [vmem:[#allocation2 + $0x309] sm:$0xff] }
 0x9fe   :  { %v4074_v60 = vld [vmem:[#allocation2 + $0x301] sm:$0xff] }
 0xa00   :  { %v6487_v12 = vpop.f32.mrf.mxu0 }
 0xa01   :  { %v11156_v10 = vadd.f32 %v6487_v12, %v6319_v58  ;;  %v5988_v22 = vpop.f32.mrf.mxu1  ;;  %6196 = vmatmul.bf16.gmra.mxu2 %v4593_v16  ;;  %v4138_v12 = vld [vmem:[#allocation2 + $0x302] sm:$0xff] }
 0xa02   :  { %v5989_v49 = vadd.f32 %v5988_v22, %v13230_v25  ;;  %v4202_v25 = vld [vmem:[#allocation2 + $0x318] sm:$0xff] }
 0xa03   :  { %13229 = vst [vmem:[#allocation7_spill] sm:$0xff] %v11156_v10  ;;  %v13236_v10 = vld [vmem:[#allocation36_spill] sm:$0xff] }
 0xa04   :  { %v6323_v56 = vpop.f32.mrf.mxu3  ;;  %6027 = vmatmul.bf16.gmra.mxu1 %v4592_v42  ;;  %v6157_v27 = vpop.f32.mrf.mxu2 }
 0xa05   :  { %v6324_v26 = vadd.f32 %v6323_v56, %v6155_v15  ;;  %v6158_v30 = vadd.f32 %v6157_v27, %v5989_v49  ;;  %v4139_v56 = vld [vmem:[#allocation2 + $0x30a] sm:$0xff]  ;;  %v4203_v49 = vld [vmem:[#allocation2 + $0x320] sm:$0xff] }
 0xa06   :  { %v4602_v3 = vpack.c.bf16 %v4139_v56, %v4138_v12 }
 0xa08   :  { %v6490_v24 = vpop.f32.mrf.mxu0 }
 0xa09   :  { %6365 = vmatmul.bf16.gmra.mxu3 %v4594_v33  ;;  %v11159_v51 = vadd.f32 %v6490_v24, %v6322_v35  ;;  %v5990_v52 = vpop.f32.mrf.mxu1 }
 0xa0a   :  { %v5991_v58 = vadd.f32 %v5990_v52, %v13232_v2  ;;  %v4603_v2 = vpack.c.bf16 %v4203_v49, %v4202_v25 }
 0xa0b   :  { %13231 = vst [vmem:[#allocation8_spill] sm:$0xff] %v11159_v51  ;;  %6529 = vmatmul.bf16.gmra.mxu0 %v4592_v42 }
 0xa0c   :  { %v6326_v63 = vpop.f32.mrf.mxu3  ;;  %v6159_v15 = vpop.f32.mrf.mxu2 }
 0xa0d   :  { %v6327_v11 = vadd.f32 %v6326_v63, %v6158_v30  ;;  %v6160_v22 = vadd.f32 %v6159_v15, %v5991_v58  ;;  %v13234_v30 = vld [vmem:[#allocation35_spill] sm:$0xff]  ;;  %v4601_v63 = vpack.c.bf16 %v4075_v55, %v4074_v60 }
 0xa0e   :  { %v4076_v60 = vld [vmem:[#allocation2 + $0x319] sm:$0xff]  ;;  %v4077_v55 = vld [vmem:[#allocation2 + $0x321] sm:$0xff] }
 0xa10   :  { %v6492_v16 = vpop.f32.mrf.mxu0 }
 0xa11   :  { %v11162_v33 = vadd.f32 %v6492_v16, %v6324_v26  ;;  %v5993_v27 = vpop.f32.mrf.mxu1  ;;  %6201 = vmatmul.bf16.gmra.mxu2 %v4602_v3  ;;  %v4140_v16 = vld [vmem:[#allocation2 + $0x31a] sm:$0xff] }
 0xa12   :  { %v5994_v24 = vadd.f32 %v5993_v27, %v13234_v30  ;;  %v4204_v30 = vld [vmem:[#allocation2 + $0x330] sm:$0xff] }
 0xa13   :  { %13233 = vst [vmem:[#allocation50_spill] sm:$0xff] %v11162_v33  ;;  %v13238_v33 = vld [vmem:[#allocation33_spill] sm:$0xff] }
 0xa14   :  { %v6328_v8 = vpop.f32.mrf.mxu3  ;;  %6032 = vmatmul.bf16.gmra.mxu1 %v4601_v63  ;;  %v6162_v42 = vpop.f32.mrf.mxu2 }
 0xa15   :  { %v6329_v35 = vadd.f32 %v6328_v8, %v6160_v22  ;;  %v6163_v52 = vadd.f32 %v6162_v42, %v5994_v24  ;;  %v4141_v8 = vld [vmem:[#allocation2 + $0x322] sm:$0xff]  ;;  %v4205_v24 = vld [vmem:[#allocation2 + $0x338] sm:$0xff] }
 0xa16   :  { %v4611_v49 = vpack.c.bf16 %v4141_v8, %v4140_v16 }
 0xa18   :  { %v6495_v58 = vpop.f32.mrf.mxu0 }
 0xa19   :  { %6370 = vmatmul.bf16.gmra.mxu3 %v4603_v2  ;;  %v11165_v51 = vadd.f32 %v6495_v58, %v6327_v11  ;;  %v5995_v56 = vpop.f32.mrf.mxu1 }
 0xa1a   :  { %v5996_v26 = vadd.f32 %v5995_v56, %v13236_v10  ;;  %v4612_v10 = vpack.c.bf16 %v4205_v24, %v4204_v30 }
 0xa1b   :  { %13235 = vst [vmem:[#allocation51_spill] sm:$0xff] %v11165_v51  ;;  %6534 = vmatmul.bf16.gmra.mxu0 %v4601_v63 }
 0xa1c   :  { %v6331_v15 = vpop.f32.mrf.mxu3  ;;  %v6164_v22 = vpop.f32.mrf.mxu2 }
 0xa1d   :  { %v6332_v12 = vadd.f32 %v6331_v15, %v6163_v52  ;;  %v6165_v27 = vadd.f32 %v6164_v22, %v5996_v26  ;;  %v13237_v52 = vld [vmem:[#allocation37_spill] sm:$0xff]  ;;  %v4610_v15 = vpack.c.bf16 %v4077_v55, %v4076_v60  ;;  %v4206_v60 = vld [vmem:[#allocation2 + $0x348] sm:$0xff] }
 0xa1e   :  { %v4078_v55 = vld [vmem:[#allocation2 + $0x331] sm:$0xff] }
 0xa20   :  { %v6497_v3 = vpop.f32.mrf.mxu0 }
 0xa21   :  { %v11168_v2 = vadd.f32 %v6497_v3, %v6329_v35  ;;  %v5998_v42 = vpop.f32.mrf.mxu1  ;;  %6206 = vmatmul.bf16.gmra.mxu2 %v4611_v49  ;;  %v4142_v3 = vld [vmem:[#allocation2 + $0x332] sm:$0xff] }
 0xa22   :  { %v5999_v58 = vadd.f32 %v5998_v42, %v13237_v52  ;;  %v4079_v49 = vld [vmem:[#allocation2 + $0x339] sm:$0xff] }
 0xa24   :  { %v6333_v25 = vpop.f32.mrf.mxu3  ;;  %6037 = vmatmul.bf16.gmra.mxu1 %v4610_v15  ;;  %v6167_v63 = vpop.f32.mrf.mxu2 }
 0xa25   :  { %v6334_v11 = vadd.f32 %v6333_v25, %v6165_v27  ;;  %v6168_v56 = vadd.f32 %v6167_v63, %v5999_v58  ;;  %v4143_v25 = vld [vmem:[#allocation2 + $0x33a] sm:$0xff]  ;;  %v4621_v63 = vpack.c.bf16 %v11068_v40, %v4206_v60  ;;  %v4272_v60 = vld [vmem:[#allocation2 + $0x32] sm:$0xff] }
 0xa26   :  { %v11174_v52 = vpack.c.bf16 %v4143_v25, %v4142_v3  ;;  %v13241_v3 = vld [vmem:[#allocation38_spill] sm:$0xff] }
 0xa28   :  { %v6500_v26 = vpop.f32.mrf.mxu0  ;;  %13239 = vst [vmem:[#allocation52_spill] sm:$0xff] %v11174_v52 }
 0xa29   :  { %6375 = vmatmul.bf16.gmra.mxu3 %v4612_v10  ;;  %v11171_v51 = vadd.f32 %v6500_v26, %v6332_v12  ;;  %v6000_v8 = vpop.f32.mrf.mxu1 }
 0xa2a   :  { %v6001_v35 = vadd.f32 %v6000_v8, %v13238_v33 }
 0xa2b   :  { %6539 = vmatmul.bf16.gmra.mxu0 %v4610_v15  ;;  %v4619_v15 = vpack.c.bf16 %v4079_v49, %v4078_v55 }
 0xa2c   :  { %v6336_v22 = vpop.f32.mrf.mxu3  ;;  %v6169_v27 = vpop.f32.mrf.mxu2 }
 0xa2d   :  { %v6337_v16 = vadd.f32 %v6336_v22, %v6168_v56  ;;  %v6170_v42 = vadd.f32 %v6169_v27, %v6001_v35 }
 0xa30   :  { %v6502_v30 = vpop.f32.mrf.mxu0 }
 0xa31   :  { %v11176_v58 = vadd.f32 %v6502_v30, %v6334_v11  ;;  %v6003_v10 = vpop.f32.mrf.mxu1  ;;  %6211 = vmatmul.bf16.gmra.mxu2 %v11174_v52 }
 0xa32   :  { %v6004_v33 = vadd.f32 %v6003_v10, %v10967_v1  ;;  %v4273_v1 = vld [vmem:[#allocation2 + $0x3a] sm:$0xff] }
 0xa34   :  { %v6338_v24 = vpop.f32.mrf.mxu3  ;;  %6042 = vmatmul.bf16.gmra.mxu1 %v4619_v15  ;;  %v6172_v56 = vpop.f32.mrf.mxu2 }
 0xa35   :  { %v6339_v12 = vadd.f32 %v6338_v24, %v6170_v42  ;;  %v6173_v26 = vadd.f32 %v6172_v56, %v6004_v33  ;;  %v4344_v56 = vpack.c.bf16 %v4273_v1, %v4272_v60 }
 0xa38   :  { %v6505_v22 = vpop.f32.mrf.mxu0 }
 0xa39   :  { %6380 = vmatmul.bf16.gmra.mxu3 %v4621_v63  ;;  %v11181_v35 = vadd.f32 %v6505_v22, %v6337_v16  ;;  %v6005_v11 = vpop.f32.mrf.mxu1  ;;  %v13243_v63 = vld [vmem:[#allocation39_spill] sm:$0xff]  ;;  %v4270_v16 = vld [vmem:[#allocation2 + $0x349] sm:$0xff]  ;;  %v4271_v22 = vld [vmem:[#allocation2 + $0x351] sm:$0xff] }
 0xa3a   :  { %v6006_v25 = vadd.f32 %v6005_v11, %v13241_v3  ;;  %v4622_v11 = vpack.c.bf16 %v4271_v22, %v4270_v16  ;;  %v13247_v16 = vld [vmem:[#allocation41_spill] sm:$0xff] }
 0xa3b   :  { %13240 = vst [vmem:[#allocation53_spill] sm:$0xff] %v11181_v35  ;;  %6544 = vmatmul.bf16.gmra.mxu0 %v4619_v15  ;;  %v13245_v35 = vld [vmem:[#allocation40_spill] sm:$0xff] }
 0xa3c   :  { %v6341_v8 = vpop.f32.mrf.mxu3  ;;  %v6174_v42 = vpop.f32.mrf.mxu2 }
 0xa3d   :  { %v6342_v27 = vadd.f32 %v6341_v8, %v6173_v26  ;;  %v6175_v40 = vadd.f32 %v6174_v42, %v6006_v25 }
 0xa40   :  { %v6507_v55 = vpop.f32.mrf.mxu0 }
 0xa41   :  { %v11184_v30 = vadd.f32 %v6507_v55, %v6339_v12  ;;  %v6008_v10 = vpop.f32.mrf.mxu1 }
 0xa42   :  { %v6009_v33 = vadd.f32 %v6008_v10, %v13243_v63  ;;  %v4275_v10 = vld [vmem:[#allocation2 + $0x52] sm:$0xff] }
 0xa43   :  { %13242 = vst [vmem:[#allocation54_spill] sm:$0xff] %v11184_v30 }
 0xa44   :  { %v6343_v49 = vpop.f32.mrf.mxu3  ;;  %6563 = vmatmul.bf16.vlgmr.msra.gmra.mxu1 %v4344_v56  ;;  %v6177_v26 = vpop.f32.mrf.mxu2 }
 0xa45   :  { %v6344_v24 = vadd.f32 %v6343_v49, %v6175_v40  ;;  %v6178_v8 = vadd.f32 %v6177_v26, %v6009_v33  ;;  %v4274_v49 = vld [vmem:[#allocation2 + $0x4a] sm:$0xff] }
 0xa46   :  { %v4353_v26 = vpack.c.bf16 %v4275_v10, %v4274_v49 }
 0xa48   :  { %v6510_v15 = vpop.f32.mrf.mxu0 }
 0xa49   :  { %v11187_v25 = vadd.f32 %v6510_v15, %v6342_v27  ;;  %v6010_v52 = vpop.f32.mrf.mxu1 }
 0xa4a   :  { %v6011_v12 = vadd.f32 %v6010_v52, %v13245_v35 }
 0xa4b   :  { %13244 = vst [vmem:[#allocation55_spill] sm:$0xff] %v11187_v25  ;;  %6549 = vmatmul.bf16.gmra.mxu0 %v4622_v11 }
 0xa4c   :  { %v6346_v3 = vpop.f32.mrf.mxu3  ;;  %v6179_v40 = vpop.f32.mrf.mxu2 }
 0xa4d   :  { %v6347_v42 = vadd.f32 %v6346_v3, %v6178_v8  ;;  %v6180_v55 = vadd.f32 %v6179_v40, %v6011_v12  ;;  %v13248_v12 = vld [vmem:[#allocation42_spill] sm:$0xff] }
 0xa50   :  { %v6512_v60 = vpop.f32.mrf.mxu0 }
 0xa51   :  { %v11190_v63 = vadd.f32 %v6512_v60, %v6344_v24  ;;  %v6013_v33 = vpop.f32.mrf.mxu1  ;;  %v4276_v24 = vld [vmem:[#allocation2 + $0x62] sm:$0xff]  ;;  %v4277_v60 = vld [vmem:[#allocation2 + $0x6a] sm:$0xff] }
 0xa52   :  { %v6014_v22 = vadd.f32 %v6013_v33, %v13247_v16  ;;  %v13249_v33 = vld [vmem:[#allocation43_spill] sm:$0xff] }
 0xa53   :  { %13246 = vst [vmem:[#allocation59_spill] sm:$0xff] %v11190_v63 }
 0xa54   :  { %v6348_v1 = vpop.f32.mrf.mxu3  ;;  %6568 = vmatmul.bf16.gmra.mxu1 %v4353_v26  ;;  %v6182_v27 = vpop.f32.mrf.mxu2 }
 0xa55   :  { %v6349_v56 = vadd.f32 %v6348_v1, %v6180_v55  ;;  %v6183_v8 = vadd.f32 %v6182_v27, %v6014_v22  ;;  %v4362_v22 = vpack.c.bf16 %v4277_v60, %v4276_v24 }
 0xa58   :  { %v6515_v15 = vpop.f32.mrf.mxu0 }
 0xa59   :  { %v11193_v52 = vadd.f32 %v6515_v15, %v6347_v42  ;;  %v6015_v11 = vpop.f32.mrf.mxu1 }
 0xa5a   :  { %v6016_v40 = vadd.f32 %v6015_v11, %v13248_v12  ;;  %v13250_v11 = vld [vmem:[#allocation44_spill] sm:$0xff] }
 0xa5c   :  { %v6351_v3 = vpop.f32.mrf.mxu3  ;;  %v6184_v25 = vpop.f32.mrf.mxu2 }
 0xa5d   :  { %v6352_v35 = vadd.f32 %v6351_v3, %v6183_v8  ;;  %v6185_v30 = vadd.f32 %v6184_v25, %v6016_v40  ;;  %v4278_v40 = vld [vmem:[#allocation2 + $0x7a] sm:$0xff] }
 0xa60   :  { %v6517_v55 = vpop.f32.mrf.mxu0 }
 0xa61   :  { %v11196_v63 = vadd.f32 %v6517_v55, %v6349_v56  ;;  %v6018_v10 = vpop.f32.mrf.mxu1  ;;  %v4279_v56 = vld [vmem:[#allocation2 + $0x82] sm:$0xff] }
 0xa62   :  { %v6019_v16 = vadd.f32 %v6018_v10, %v13249_v33  ;;  %v13252_v10 = vld [vmem:[#allocation45_spill] sm:$0xff]  ;;  %v4371_v60 = vpack.c.bf16 %v4279_v56, %v4278_v40 }
 0xa63   :  { %v4282_v40 = vld [vmem:[#allocation2 + $0xaa] sm:$0xff]  ;;  %v4283_v56 = vld [vmem:[#allocation2 + $0xb2] sm:$0xff] }
 0xa64   :  { %v6353_v1 = vpop.f32.mrf.mxu3  ;;  %6573 = vmatmul.bf16.gmra.mxu1 %v4362_v22  ;;  %v6187_v42 = vpop.f32.mrf.mxu2  ;;  %v13254_v22 = vld [vmem:[#allocation46_spill] sm:$0xff] }
 0xa65   :  { %v6354_v49 = vadd.f32 %v6353_v1, %v6185_v30  ;;  %v6188_v26 = vadd.f32 %v6187_v42, %v6019_v16 }
 0xa68   :  { %v6520_v27 = vpop.f32.mrf.mxu0 }
 0xa69   :  { %v11199_v15 = vadd.f32 %v6520_v27, %v6352_v35  ;;  %v6020_v25 = vpop.f32.mrf.mxu1  ;;  %v4281_v27 = vld [vmem:[#allocation2 + $0x9a] sm:$0xff] }
 0xa6a   :  { %v11202_v12 = vadd.f32 %v6020_v25, %v13250_v11  ;;  %v13256_v25 = vld [vmem:[#allocation47_spill] sm:$0xff] }
 0xa6c   :  { %v6356_v8 = vpop.f32.mrf.mxu3  ;;  %13251 = vst [vmem:[#allocation61_spill] sm:$0xff] %v11202_v12  ;;  %v4334_v12 = vld [vmem:[#allocation2 + $0x34a] sm:$0xff] }
 0xa6d   :  { %v6357_v3 = vadd.f32 %v6356_v8, %v6188_v26  ;;  %v4280_v26 = vld [vmem:[#allocation2 + $0x92] sm:$0xff] }
 0xa70   :  { %v6522_v55 = vpop.f32.mrf.mxu0 }
 0xa71   :  { %v11204_v30 = vadd.f32 %v6522_v55, %v6354_v49  ;;  %v6023_v1 = vpop.f32.mrf.mxu1  ;;  %v4380_v49 = vpack.c.bf16 %v4281_v27, %v4280_v26  ;;  %v13263_v27 = vld [vmem:[#allocation56_spill] sm:$0xff] }
 0xa72   :  { %v11207_v24 = vadd.f32 %v6023_v1, %v13252_v10  ;;  %v13258_v1 = vld [vmem:[#allocation48_spill] sm:$0xff] }
 0xa74   :  { %13253 = vst [vmem:[#allocation4_spill] sm:$0xff] %v11207_v24  ;;  %6578 = vmatmul.bf16.gmra.mxu1 %v4371_v60  ;;  %v13260_v60 = vld [vmem:[#allocation49_spill] sm:$0xff] }
 0xa78   :  { %v6525_v33 = vpop.f32.mrf.mxu0 }
 0xa79   :  { %v11209_v16 = vadd.f32 %v6525_v33, %v6357_v3  ;;  %v6025_v35 = vpop.f32.mrf.mxu1 }
 0xa7a   :  { %v11212_v42 = vadd.f32 %v6025_v35, %v13254_v22  ;;  %v4389_v35 = vpack.c.bf16 %v4283_v56, %v4282_v40 }
 0xa7c   :  { %13255 = vst [vmem:[#allocation20_spill] sm:$0xff] %v11212_v42 }
 0xa81   :  { %v6028_v8 = vpop.f32.mrf.mxu1 }
 0xa82   :  { %v11215_v11 = vadd.f32 %v6028_v8, %v13256_v25  ;;  %v4284_v8 = vld [vmem:[#allocation2 + $0xc2] sm:$0xff]  ;;  %v4285_v25 = vld [vmem:[#allocation2 + $0xca] sm:$0xff] }
 0xa84   :  { %13257 = vst [vmem:[#allocation34_spill] sm:$0xff] %v11215_v11  ;;  %6583 = vmatmul.bf16.gmra.mxu1 %v4380_v49 }
 0xa89   :  { %v6030_v55 = vpop.f32.mrf.mxu1 }
 0xa8a   :  { %v11218_v10 = vadd.f32 %v6030_v55, %v13258_v1  ;;  %v4398_v55 = vpack.c.bf16 %v4285_v25, %v4284_v8 }
 0xa8c   :  { %13259 = vst [vmem:[#allocation6_spill] sm:$0xff] %v11218_v10 }
 0xa91   :  { %v6033_v3 = vpop.f32.mrf.mxu1 }
 0xa92   :  { %v11221_v33 = vadd.f32 %v6033_v3, %v13260_v60  ;;  %v4286_v3 = vld [vmem:[#allocation2 + $0xda] sm:$0xff]  ;;  %v4287_v60 = vld [vmem:[#allocation2 + $0xe2] sm:$0xff] }
 0xa94   :  { %13261 = vst [vmem:[#allocation11_spill] sm:$0xff] %v11221_v33  ;;  %6588 = vmatmul.bf16.gmra.mxu1 %v4389_v35  ;;  %v13297_v33 = vld [vmem:[#allocation50_spill] sm:$0xff] }
 0xa99   :  { %v6035_v22 = vpop.f32.mrf.mxu1 }
 0xa9a   :  { %v11224_v42 = vadd.f32 %v6035_v22, %v11012_v13  ;;  %v4407_v13 = vpack.c.bf16 %v4287_v60, %v4286_v3 }
 0xa9c   :  { %13262 = vst [vmem:[#allocation10_spill] sm:$0xff] %v11224_v42 }
 0xaa1   :  { %v6038_v26 = vpop.f32.mrf.mxu1 }
 0xaa2   :  { %v11227_v49 = vadd.f32 %v6038_v26, %v13263_v27  ;;  %v4288_v26 = vld [vmem:[#allocation2 + $0xf2] sm:$0xff]  ;;  %v4289_v27 = vld [vmem:[#allocation2 + $0xfa] sm:$0xff] }
 0xaa4   :  { %13264 = vst [vmem:[#allocation5_spill] sm:$0xff] %v11227_v49  ;;  %6593 = vmatmul.bf16.gmra.mxu1 %v4398_v55  ;;  %v13293_v49 = vld [vmem:[#allocation7_spill] sm:$0xff] }
 0xaa9   :  { %v6040_v1 = vpop.f32.mrf.mxu1 }
 0xaaa   :  { %v11230_v10 = vadd.f32 %v6040_v1, %v11018_v0  ;;  %v4416_v0 = vpack.c.bf16 %v4289_v27, %v4288_v26 }
 0xaac   :  { %13265 = vst [vmem:[#allocation13_spill] sm:$0xff] %v11230_v10 }
 0xab1   :  { %v6043_v40 = vpop.f32.mrf.mxu1 }
 0xab2   :  { %v11233_v56 = vadd.f32 %v6043_v40, %v11021_v21  ;;  %v4290_v21 = vld [vmem:[#allocation2 + $0x10a] sm:$0xff]  ;;  %v4291_v40 = vld [vmem:[#allocation2 + $0x112] sm:$0xff] }
 0xab4   :  { %13266 = vst [vmem:[#allocation12_spill] sm:$0xff] %v11233_v56  ;;  %6598 = vmatmul.bf16.gmra.mxu1 %v4407_v13 }
 0xab9   :  { %v6045_v35 = vpop.f32.mrf.mxu1 }
 0xaba   :  { %v11236_v22 = vadd.f32 %v6045_v35, %v11024_v28  ;;  %v4425_v28 = vpack.c.bf16 %v4291_v40, %v4290_v21 }
 0xabc   :  { %13267 = vst [vmem:[#allocation15_spill] sm:$0xff] %v11236_v22 }
 0xac1   :  { %v6564_v8 = vpop.f32.mrf.mxu1 }
 0xac2   :  { %v11239_v25 = vadd.f32 %v6564_v8, %v11027_v38  ;;  %v4292_v38 = vld [vmem:[#allocation2 + $0x122] sm:$0xff]  ;;  %v4293_v8 = vld [vmem:[#allocation2 + $0x12a] sm:$0xff] }
 0xac4   :  { %13268 = vst [vmem:[#allocation14_spill] sm:$0xff] %v11239_v25  ;;  %6603 = vmatmul.bf16.gmra.mxu1 %v4416_v0 }
 0xac9   :  { %v6566_v55 = vpop.f32.mrf.mxu1 }
 0xaca   :  { %v11242_v1 = vadd.f32 %v6566_v55, %v11030_v45  ;;  %v4434_v45 = vpack.c.bf16 %v4293_v8, %v4292_v38 }
 0xacc   :  { %13269 = vst [vmem:[#allocation9_spill] sm:$0xff] %v11242_v1 }
 0xad1   :  { %v6569_v3 = vpop.f32.mrf.mxu1 }
 0xad2   :  { %v11245_v60 = vadd.f32 %v6569_v3, %v11033_v36  ;;  %v4294_v36 = vld [vmem:[#allocation2 + $0x13a] sm:$0xff]  ;;  %v4295_v3 = vld [vmem:[#allocation2 + $0x142] sm:$0xff] }
 0xad4   :  { %6608 = vmatmul.bf16.gmra.mxu1 %v4425_v28 }
 0xad9   :  { %v6571_v13 = vpop.f32.mrf.mxu1 }
 0xada   :  { %v11248_v35 = vadd.f32 %v6571_v13, %v11039_v7  ;;  %v4443_v7 = vpack.c.bf16 %v4295_v3, %v4294_v36 }
 0xae1   :  { %v6574_v26 = vpop.f32.mrf.mxu1 }
 0xae2   :  { %v11251_v27 = vadd.f32 %v6574_v26, %v11042_v50  ;;  %v4296_v50 = vld [vmem:[#allocation2 + $0x152] sm:$0xff]  ;;  %v4297_v26 = vld [vmem:[#allocation2 + $0x15a] sm:$0xff] }
 0xae4   :  { %13270 = vst [vmem:[#allocation62_spill] sm:$0xff] %v11251_v27  ;;  %6613 = vmatmul.bf16.gmra.mxu1 %v4434_v45 }
 0xae9   :  { %v6576_v0 = vpop.f32.mrf.mxu1 }
 0xaea   :  { %v11254_v55 = vadd.f32 %v6576_v0, %v11045_v34  ;;  %v4452_v34 = vpack.c.bf16 %v4297_v26, %v4296_v50  ;;  %v13272_v26 = vld [vmem:[#allocation58_spill] sm:$0xff] }
 0xaf1   :  { %v6579_v21 = vpop.f32.mrf.mxu1 }
 0xaf2   :  { %v11257_v40 = vadd.f32 %v6579_v21, %v11048_v31  ;;  %v4298_v31 = vld [vmem:[#allocation2 + $0x16a] sm:$0xff]  ;;  %v4299_v21 = vld [vmem:[#allocation2 + $0x172] sm:$0xff] }
 0xaf4   :  { %6618 = vmatmul.bf16.gmra.mxu1 %v4443_v7 }
 0xaf9   :  { %v6581_v28 = vpop.f32.mrf.mxu1 }
 0xafa   :  { %v11260_v13 = vadd.f32 %v6581_v28, %v11051_v37  ;;  %v4461_v37 = vpack.c.bf16 %v4299_v21, %v4298_v31  ;;  %v13271_v28 = vld [vmem:[#allocation57_spill] sm:$0xff] }
 0xb01   :  { %v6584_v38 = vpop.f32.mrf.mxu1 }
 0xb02   :  { %v11263_v8 = vadd.f32 %v6584_v38, %v11054_v5  ;;  %v4300_v5 = vld [vmem:[#allocation2 + $0x182] sm:$0xff]  ;;  %v4301_v38 = vld [vmem:[#allocation2 + $0x18a] sm:$0xff] }
 0xb04   :  { %6623 = vmatmul.bf16.gmra.mxu1 %v4452_v34 }
 0xb09   :  { %v6586_v45 = vpop.f32.mrf.mxu1 }
 0xb0a   :  { %v11266_v0 = vadd.f32 %v6586_v45, %v11057_v14  ;;  %v4470_v14 = vpack.c.bf16 %v4301_v38, %v4300_v5 }
 0xb11   :  { %v6589_v36 = vpop.f32.mrf.mxu1 }
 0xb12   :  { %v11269_v3 = vadd.f32 %v6589_v36, %v11060_v62  ;;  %v4302_v62 = vld [vmem:[#allocation2 + $0x19a] sm:$0xff]  ;;  %v4303_v36 = vld [vmem:[#allocation2 + $0x1a2] sm:$0xff] }
 0xb13   :  { %v4479_v31 = vpack.c.bf16 %v4303_v36, %v4302_v62  ;;  %v4306_v62 = vld [vmem:[#allocation2 + $0x1fa] sm:$0xff] }
 0xb14   :  { %6628 = vmatmul.bf16.gmra.mxu1 %v4461_v37 }
 0xb19   :  { %v6591_v7 = vpop.f32.mrf.mxu1 }
 0xb1a   :  { %v11272_v22 = vadd.f32 %v6591_v7, %v13271_v28 }
 0xb21   :  { %v6594_v50 = vpop.f32.mrf.mxu1 }
 0xb22   :  { %v11275_v34 = vadd.f32 %v6594_v50, %v13272_v26  ;;  %v4304_v50 = vld [vmem:[#allocation2 + $0x1e2] sm:$0xff]  ;;  %v4305_v26 = vld [vmem:[#allocation2 + $0x1ea] sm:$0xff] }
 0xb24   :  { %6633 = vmatmul.bf16.gmra.mxu1 %v4470_v14 }
 0xb29   :  { %v6596_v45 = vpop.f32.mrf.mxu1 }
 0xb2a   :  { %v11278_v56 = vadd.f32 %v6596_v45, %v11075_v9  ;;  %v4488_v9 = vpack.c.bf16 %v4305_v26, %v4304_v50 }
 0xb2c   :  { %13273 = vst [vmem:[#allocation17_spill] sm:$0xff] %v11278_v56 }
 0xb31   :  { %v6599_v21 = vpop.f32.mrf.mxu1 }
 0xb32   :  { %v11281_v37 = vadd.f32 %v6599_v21, %v11078_v20  ;;  %v4307_v20 = vld [vmem:[#allocation2 + $0x202] sm:$0xff] }
 0xb34   :  { %6638 = vmatmul.bf16.gmra.mxu1 %v4479_v31 }
 0xb39   :  { %v6601_v7 = vpop.f32.mrf.mxu1 }
 0xb3a   :  { %v11284_v28 = vadd.f32 %v6601_v7, %v11081_v19  ;;  %v4497_v19 = vpack.c.bf16 %v4307_v20, %v4306_v62 }
 0xb3c   :  { %13274 = vst [vmem:[#allocation16_spill] sm:$0xff] %v11284_v28 }
 0xb41   :  { %v6604_v5 = vpop.f32.mrf.mxu1 }
 0xb42   :  { %v11287_v38 = vadd.f32 %v6604_v5, %v11084_v6  ;;  %v4308_v6 = vld [vmem:[#allocation2 + $0x212] sm:$0xff]  ;;  %v4309_v5 = vld [vmem:[#allocation2 + $0x21a] sm:$0xff] }
 0xb44   :  { %13275 = vst [vmem:[#allocation63_spill] sm:$0xff] %v11287_v38  ;;  %6643 = vmatmul.bf16.gmra.mxu1 %v4488_v9 }
 0xb49   :  { %v6606_v14 = vpop.f32.mrf.mxu1 }
 0xb4a   :  { %v11290_v45 = vadd.f32 %v6606_v14, %v11087_v18  ;;  %v4506_v18 = vpack.c.bf16 %v4309_v5, %v4308_v6 }
 0xb51   :  { %v6609_v36 = vpop.f32.mrf.mxu1 }
 0xb52   :  { %v11293_v31 = vadd.f32 %v6609_v36, %v11090_v4  ;;  %v4310_v4 = vld [vmem:[#allocation2 + $0x22a] sm:$0xff]  ;;  %v4311_v36 = vld [vmem:[#allocation2 + $0x232] sm:$0xff] }
 0xb54   :  { %13276 = vst [vmem:[#allocation19_spill] sm:$0xff] %v11293_v31  ;;  %6648 = vmatmul.bf16.gmra.mxu1 %v4497_v19 }
 0xb59   :  { %v6611_v21 = vpop.f32.mrf.mxu1 }
 0xb5a   :  { %v11296_v7 = vadd.f32 %v6611_v21, %v11096_v57  ;;  %v4515_v57 = vpack.c.bf16 %v4311_v36, %v4310_v4 }
 0xb5c   :  { %13277 = vst [vmem:[#allocation18_spill] sm:$0xff] %v11296_v7 }
 0xb61   :  { %v6614_v50 = vpop.f32.mrf.mxu1 }
 0xb62   :  { %v11299_v26 = vadd.f32 %v6614_v50, %v11099_v29  ;;  %v4312_v29 = vld [vmem:[#allocation2 + $0x242] sm:$0xff]  ;;  %v4313_v50 = vld [vmem:[#allocation2 + $0x24a] sm:$0xff] }
 0xb64   :  { %13278 = vst [vmem:[#allocation21_spill] sm:$0xff] %v11299_v26  ;;  %6653 = vmatmul.bf16.gmra.mxu1 %v4506_v18 }
 0xb69   :  { %v6616_v9 = vpop.f32.mrf.mxu1 }
 0xb6a   :  { %v11302_v14 = vadd.f32 %v6616_v9, %v11102_v53  ;;  %v4524_v53 = vpack.c.bf16 %v4313_v50, %v4312_v29 }
 0xb71   :  { %v6619_v62 = vpop.f32.mrf.mxu1 }
 0xb72   :  { %v11305_v20 = vadd.f32 %v6619_v62, %v11105_v48  ;;  %v4314_v48 = vld [vmem:[#allocation2 + $0x25a] sm:$0xff]  ;;  %v4315_v62 = vld [vmem:[#allocation2 + $0x262] sm:$0xff] }
 0xb74   :  { %6658 = vmatmul.bf16.gmra.mxu1 %v4515_v57 }
 0xb79   :  { %v6621_v19 = vpop.f32.mrf.mxu1 }
 0xb7a   :  { %v11308_v21 = vadd.f32 %v6621_v19, %v11108_v23  ;;  %v4533_v23 = vpack.c.bf16 %v4315_v62, %v4314_v48 }
 0xb7c   :  { %13279 = vst [vmem:[#allocation22_spill] sm:$0xff] %v11308_v21 }
 0xb81   :  { %v6624_v6 = vpop.f32.mrf.mxu1 }
 0xb82   :  { %v11311_v5 = vadd.f32 %v6624_v6, %v11111_v17  ;;  %v4316_v17 = vld [vmem:[#allocation2 + $0x272] sm:$0xff]  ;;  %v4317_v6 = vld [vmem:[#allocation2 + $0x27a] sm:$0xff] }
 0xb84   :  { %6663 = vmatmul.bf16.gmra.mxu1 %v4524_v53 }
 0xb89   :  { %v6626_v18 = vpop.f32.mrf.mxu1 }
 0xb8a   :  { %v11314_v9 = vadd.f32 %v6626_v18, %v11114_v43  ;;  %v4542_v43 = vpack.c.bf16 %v4317_v6, %v4316_v17 }
 0xb8c   :  { %13280 = vst [vmem:[#allocation23_spill] sm:$0xff] %v11314_v9 }
 0xb91   :  { %v6629_v4 = vpop.f32.mrf.mxu1 }
 0xb92   :  { %v11317_v36 = vadd.f32 %v6629_v4, %v11117_v54  ;;  %v4318_v54 = vld [vmem:[#allocation2 + $0x28a] sm:$0xff]  ;;  %v4319_v4 = vld [vmem:[#allocation2 + $0x292] sm:$0xff] }
 0xb94   :  { %6668 = vmatmul.bf16.gmra.mxu1 %v4533_v23 }
 0xb99   :  { %v6631_v57 = vpop.f32.mrf.mxu1 }
 0xb9a   :  { %v11320_v19 = vadd.f32 %v6631_v57, %v11123_v39  ;;  %v4551_v39 = vpack.c.bf16 %v4319_v4, %v4318_v54 }
 0xb9c   :  { %13281 = vst [vmem:[#allocation24_spill] sm:$0xff] %v11320_v19 }
 0xba1   :  { %v6634_v29 = vpop.f32.mrf.mxu1 }
 0xba2   :  { %v11323_v50 = vadd.f32 %v6634_v29, %v11126_v46  ;;  %v4320_v46 = vld [vmem:[#allocation2 + $0x2a2] sm:$0xff]  ;;  %v4321_v29 = vld [vmem:[#allocation2 + $0x2aa] sm:$0xff] }
 0xba4   :  { %13282 = vst [vmem:[#allocation25_spill] sm:$0xff] %v11323_v50  ;;  %6673 = vmatmul.bf16.gmra.mxu1 %v4542_v43 }
 0xba9   :  { %v6636_v53 = vpop.f32.mrf.mxu1 }
 0xbaa   :  { %v11326_v18 = vadd.f32 %v6636_v53, %v11129_v32  ;;  %v4560_v32 = vpack.c.bf16 %v4321_v29, %v4320_v46  ;;  %v13291_v29 = vld [vmem:[#allocation3_spill] sm:$0xff] }
 0xbac   :  { %13283 = vst [vmem:[#allocation26_spill] sm:$0xff] %v11326_v18 }
 0xbb1   :  { %v6639_v48 = vpop.f32.mrf.mxu1 }
 0xbb2   :  { %v11329_v62 = vadd.f32 %v6639_v48, %v11132_v61  ;;  %v4322_v61 = vld [vmem:[#allocation2 + $0x2ba] sm:$0xff]  ;;  %v4323_v48 = vld [vmem:[#allocation2 + $0x2c2] sm:$0xff] }
 0xbb4   :  { %13284 = vst [vmem:[#allocation27_spill] sm:$0xff] %v11329_v62  ;;  %6678 = vmatmul.bf16.gmra.mxu1 %v4551_v39 }
 0xbb9   :  { %v6641_v23 = vpop.f32.mrf.mxu1 }
 0xbba   :  { %v11332_v57 = vadd.f32 %v6641_v23, %v11135_v41  ;;  %v4569_v41 = vpack.c.bf16 %v4323_v48, %v4322_v61  ;;  %v13289_v23 = vld [vmem:[#allocation60_spill] sm:$0xff] }
 0xbbb   :  { %v13295_v48 = vld [vmem:[#allocation8_spill] sm:$0xff] }
 0xbbc   :  { %13285 = vst [vmem:[#allocation28_spill] sm:$0xff] %v11332_v57 }
 0xbc1   :  { %v6644_v17 = vpop.f32.mrf.mxu1 }
 0xbc2   :  { %v11335_v6 = vadd.f32 %v6644_v17, %v11138_v47  ;;  %v4324_v47 = vld [vmem:[#allocation2 + $0x2d2] sm:$0xff]  ;;  %v4325_v17 = vld [vmem:[#allocation2 + $0x2da] sm:$0xff] }
 0xbc4   :  { %13286 = vst [vmem:[#allocation29_spill] sm:$0xff] %v11335_v6  ;;  %6683 = vmatmul.bf16.gmra.mxu1 %v4560_v32 }
 0xbc9   :  { %v6646_v43 = vpop.f32.mrf.mxu1 }
 0xbca   :  { %v11338_v53 = vadd.f32 %v6646_v43, %v11141_v44  ;;  %v4578_v44 = vpack.c.bf16 %v4325_v17, %v4324_v47  ;;  %v13299_v17 = vld [vmem:[#allocation51_spill] sm:$0xff] }
 0xbcc   :  { %13287 = vst [vmem:[#allocation30_spill] sm:$0xff] %v11338_v53 }
 0xbd1   :  { %v6649_v54 = vpop.f32.mrf.mxu1 }
 0xbd2   :  { %v11341_v4 = vadd.f32 %v6649_v54, %v11144_v59  ;;  %v4326_v59 = vld [vmem:[#allocation2 + $0x2ea] sm:$0xff]  ;;  %v4327_v54 = vld [vmem:[#allocation2 + $0x2f2] sm:$0xff] }
 0xbd4   :  { %13288 = vst [vmem:[#allocation31_spill] sm:$0xff] %v11341_v4  ;;  %6688 = vmatmul.bf16.gmra.mxu1 %v4569_v41 }
 0xbd9   :  { %v6651_v39 = vpop.f32.mrf.mxu1 }
 0xbda   :  { %v11344_v10 = vadd.f32 %v6651_v39, %v13289_v23  ;;  %v4587_v39 = vpack.c.bf16 %v4327_v54, %v4326_v59 }
 0xbdc   :  { %13290 = vst [vmem:[#allocation32_spill] sm:$0xff] %v11344_v10 }
 0xbe1   :  { %v6654_v46 = vpop.f32.mrf.mxu1 }
 0xbe2   :  { %v11347_v32 = vadd.f32 %v6654_v46, %v13291_v29  ;;  %v4328_v46 = vld [vmem:[#allocation2 + $0x302] sm:$0xff]  ;;  %v4329_v29 = vld [vmem:[#allocation2 + $0x30a] sm:$0xff] }
 0xbe4   :  { %13292 = vst [vmem:[#allocation35_spill] sm:$0xff] %v11347_v32  ;;  %6693 = vmatmul.bf16.gmra.mxu1 %v4578_v44 }
 0xbe9   :  { %v6656_v43 = vpop.f32.mrf.mxu1 }
 0xbea   :  { %v11350_v42 = vadd.f32 %v6656_v43, %v13293_v49  ;;  %v4596_v49 = vpack.c.bf16 %v4329_v29, %v4328_v46  ;;  %v13306_v29 = vld [vmem:[#allocation52_spill] sm:$0xff] }
 0xbec   :  { %13294 = vst [vmem:[#allocation36_spill] sm:$0xff] %v11350_v42 }
 0xbf1   :  { %v6659_v61 = vpop.f32.mrf.mxu1 }
 0xbf2   :  { %v11353_v41 = vadd.f32 %v6659_v61, %v13295_v48  ;;  %v4330_v61 = vld [vmem:[#allocation2 + $0x31a] sm:$0xff]  ;;  %v4331_v48 = vld [vmem:[#allocation2 + $0x322] sm:$0xff] }
 0xbf4   :  { %13296 = vst [vmem:[#allocation37_spill] sm:$0xff] %v11353_v41  ;;  %6698 = vmatmul.bf16.gmra.mxu1 %v4587_v39 }
 0xbf9   :  { %v6661_v23 = vpop.f32.mrf.mxu1 }
 0xbfa   :  { %v11356_v11 = vadd.f32 %v6661_v23, %v13297_v33  ;;  %v4605_v33 = vpack.c.bf16 %v4331_v48, %v4330_v61  ;;  %v6794_v61 = vmul.f32 %v11242_v1, %v11242_v1  ;;  %v13309_v48 = vld [vmem:[#allocation55_spill] sm:$0xff] }
 0xbfc   :  { %13298 = vst [vmem:[#allocation33_spill] sm:$0xff] %v11356_v11 }
 0xc01   :  { %v6664_v47 = vpop.f32.mrf.mxu1 }
 0xc02   :  { %v11359_v44 = vadd.f32 %v6664_v47, %v13299_v17  ;;  %v13304_v17 = vld [vmem:[#allocation53_spill] sm:$0xff] }
 0xc04   :  { %13300 = vst [vmem:[#allocation38_spill] sm:$0xff] %v11359_v44  ;;  %6703 = vmatmul.bf16.gmra.mxu1 %v4596_v49  ;;  %v13307_v49 = vld [vmem:[#allocation54_spill] sm:$0xff] }
 0xc09   :  { %v6666_v43 = vpop.f32.mrf.mxu1 }
 0xc0a   :  { %v11362_v24 = vadd.f32 %v6666_v43, %v11168_v2 }
 0xc0c   :  { %13301 = vst [vmem:[#allocation39_spill] sm:$0xff] %v11362_v24  ;;  %v4335_v24 = vld [vmem:[#allocation2 + $0x352] sm:$0xff] }
 0xc11   :  { %v6669_v59 = vpop.f32.mrf.mxu1 }
 0xc12   :  { %v11365_v54 = vadd.f32 %v6669_v59, %v11171_v51  ;;  %v4623_v51 = vpack.c.bf16 %v4335_v24, %v4334_v12  ;;  %v6796_v24 = vmul.f32 %v11248_v35, %v11248_v35 }
 0xc14   :  { %13302 = vst [vmem:[#allocation40_spill] sm:$0xff] %v11365_v54  ;;  %6708 = vmatmul.bf16.gmra.mxu1 %v4605_v33  ;;  %v6793_v33 = vmul.f32 %v11239_v25, %v11239_v25 }
 0xc19   :  { %v6671_v39 = vpop.f32.mrf.mxu1 }
 0xc1a   :  { %v11368_v23 = vadd.f32 %v6671_v39, %v11176_v58  ;;  %v6724_v39 = vadd.f32 %v11242_v1, %v11239_v25  ;;  %v6798_v25 = vmul.f32 %v11254_v55, %v11254_v55 }
 0xc1c   :  { %13303 = vst [vmem:[#allocation41_spill] sm:$0xff] %v11368_v23  ;;  %v6725_v12 = vadd.f32 %v6724_v39, %v11245_v60 }
 0xc21   :  { %v6674_v47 = vpop.f32.mrf.mxu1 }
 0xc22   :  { %v11371_v46 = vadd.f32 %v6674_v47, %v13304_v17  ;;  %v6795_v47 = vmul.f32 %v11245_v60, %v11245_v60  ;;  %v6857_v17 = vadd.f32 %v6794_v61, %v6793_v33 }
 0xc24   :  { %13305 = vst [vmem:[#allocation42_spill] sm:$0xff] %v11371_v46  ;;  %6713 = vmatmul.bf16.gmra.mxu1 %v13306_v29  ;;  %v6858_v29 = vadd.f32 %v6857_v17, %v6795_v47  ;;  %v6799_v47 = vmul.f32 %v11257_v40, %v11257_v40 }
 0xc29   :  { %v6676_v2 = vpop.f32.mrf.mxu1 }
 0xc2a   :  { %v11375_v43 = vadd.f32 %v6676_v2, %v13307_v49  ;;  %v6726_v2 = vadd.f32 %v6725_v12, %v11248_v35  ;;  %v6797_v49 = vmul.f32 %v11251_v27, %v11251_v27 }
 0xc2c   :  { %13308 = vst [vmem:[#allocation43_spill] sm:$0xff] %v11375_v43  ;;  %v6727_v1 = vadd.f32 %v6726_v2, %v11251_v27  ;;  %v6801_v27 = vmul.f32 %v11263_v8, %v11263_v8 }
 0xc2e   :  { %v6728_v39 = vadd.f32 %v6727_v1, %v11254_v55  ;;  %v6802_v1 = vmul.f32 %v11266_v0, %v11266_v0 }
 0xc30   :  { %v6729_v12 = vadd.f32 %v6728_v39, %v11257_v40  ;;  %v6803_v39 = vmul.f32 %v11269_v3, %v11269_v3 }
 0xc31   :  { %v6679_v59 = vpop.f32.mrf.mxu1 }
 0xc32   :  { %v11380_v58 = vadd.f32 %v6679_v59, %v13309_v48  ;;  %v6859_v48 = vadd.f32 %v6858_v29, %v6796_v24  ;;  %v6800_v24 = vmul.f32 %v11260_v13, %v11260_v13  ;;  %v6730_v2 = vadd.f32 %v6729_v12, %v11260_v13 }
 0xc33   :  { %v6804_v12 = vmul.f32 %v11272_v22, %v11272_v22 }
 0xc34   :  { %13310 = vst [vmem:[#allocation44_spill] sm:$0xff] %v11380_v58  ;;  %6718 = vmatmul.bf16.gmra.mxu1 %v4623_v51  ;;  %v13311_v51 = vld [vmem:[#allocation59_spill] sm:$0xff]  ;;  %v6860_v33 = vadd.f32 %v6859_v48, %v6797_v49  ;;  %v6731_v49 = vadd.f32 %v6730_v2, %v11263_v8  ;;  %v6805_v2 = vmul.f32 %v11275_v34, %v11275_v34 }
 0xc36   :  { %v6861_v17 = vadd.f32 %v6860_v33, %v6798_v25  ;;  %v6732_v33 = vadd.f32 %v6731_v49, %v11266_v0 }
 0xc38   :  { %v6862_v29 = vadd.f32 %v6861_v17, %v6799_v47  ;;  %v6733_v17 = vadd.f32 %v6732_v33, %v11269_v3  ;;  %v6807_v33 = vmul.f32 %v11281_v37, %v11281_v37 }
 0xc39   :  { %v6681_v59 = vpop.f32.mrf.mxu1 }
 0xc3a   :  { %v11398_v61 = vadd.f32 %v6681_v59, %v13311_v51  ;;  %v6863_v51 = vadd.f32 %v6862_v29, %v6800_v24  ;;  %v6734_v29 = vadd.f32 %v6733_v17, %v11272_v22 }
 0xc3c   :  { %13312 = vst [vmem:[#allocation45_spill] sm:$0xff] %v11398_v61  ;;  %v6864_v48 = vadd.f32 %v6863_v51, %v6801_v27  ;;  %v6735_v27 = vadd.f32 %v6734_v29, %v11275_v34  ;;  %v6806_v51 = vmul.f32 %v11278_v56, %v11278_v56 }
 0xc3e   :  { %v6865_v47 = vadd.f32 %v6864_v48, %v6802_v1  ;;  %v6736_v48 = vadd.f32 %v6735_v27, %v11278_v56 }
 0xc40   :  { %v6866_v24 = vadd.f32 %v6865_v47, %v6803_v39  ;;  %v11433_v39 = vpop.f32.mrf.mxu2  ;;  %v6737_v17 = vadd.f32 %v6736_v48, %v11281_v37 }
 0xc41   :  { %v6684_v59 = vpop.f32.mrf.mxu1 }
 0xc42   :  { %v11413_v25 = vadd.f32 %v6684_v59, %v11193_v52  ;;  %v6867_v59 = vadd.f32 %v6866_v24, %v6804_v12  ;;  %v6808_v12 = vmul.f32 %v11284_v28, %v11284_v28  ;;  %v11438_v24 = vpop.f32.mrf.mxu3 }
 0xc44   :  { %v6868_v1 = vadd.f32 %v6867_v59, %v6805_v2  ;;  %v6809_v2 = vmul.f32 %v11287_v38, %v11287_v38 }
 0xc46   :  { %v6869_v47 = vadd.f32 %v6868_v1, %v6806_v51  ;;  %v6810_v51 = vmul.f32 %v11290_v45, %v11290_v45 }
 0xc48   :  { %v6870_v29 = vadd.f32 %v6869_v47, %v6807_v33  ;;  %v6811_v47 = vmul.f32 %v11293_v31, %v11293_v31 }
 0xc49   :  { %v6686_v52 = vpop.f32.mrf.mxu1 }
 0xc4a   :  { %v11428_v49 = vadd.f32 %v6686_v52, %v11196_v63  ;;  %v6738_v63 = vadd.f32 %v6737_v17, %v11284_v28  ;;  %v11443_v52 = vpop.f32.mrf.mxu0  ;;  %v6871_v27 = vadd.f32 %v6870_v29, %v6808_v12  ;;  %v6812_v12 = vmul.f32 %v11296_v7, %v11296_v7  ;;  %v11457_v29 = vpop.f32.mrf.mxu2 }
 0xc4c   :  { %v6739_v56 = vadd.f32 %v6738_v63, %v11287_v38  ;;  %v6872_v48 = vadd.f32 %v6871_v27, %v6809_v2  ;;  %v11462_v2 = vpop.f32.mrf.mxu3 }
 0xc4e   :  { %v6740_v33 = vadd.f32 %v6739_v56, %v11290_v45  ;;  %v6873_v17 = vadd.f32 %v6872_v48, %v6810_v51  ;;  %v6814_v51 = vmul.f32 %v11302_v14, %v11302_v14 }
 0xc50   :  { %v6741_v28 = vadd.f32 %v6740_v33, %v11293_v31  ;;  %v6874_v63 = vadd.f32 %v6873_v17, %v6811_v47  ;;  %v6815_v17 = vmul.f32 %v11305_v20, %v11305_v20 }
 0xc51   :  { %v6689_v59 = vpop.f32.mrf.mxu1 }
 0xc52   :  { %v11449_v1 = vadd.f32 %v6689_v59, %v11199_v15  ;;  %v6742_v38 = vadd.f32 %v6741_v28, %v11296_v7  ;;  %v6813_v15 = vmul.f32 %v11299_v26, %v11299_v26  ;;  %v6875_v59 = vadd.f32 %v6874_v63, %v6812_v12  ;;  %v11470_v33 = vpop.f32.mrf.mxu0 }
 0xc54   :  { %v6743_v27 = vadd.f32 %v6742_v38, %v11299_v26  ;;  %v6876_v47 = vadd.f32 %v6875_v59, %v6813_v15  ;;  %v6816_v38 = vmul.f32 %v11308_v21, %v11308_v21  ;;  %v11481_v26 = vpop.f32.mrf.mxu2 }
 0xc56   :  { %v6744_v28 = vadd.f32 %v6743_v27, %v11302_v14  ;;  %v6877_v7 = vadd.f32 %v6876_v47, %v6814_v51  ;;  %v6818_v27 = vmul.f32 %v11314_v9, %v11314_v9  ;;  %v11489_v47 = vpop.f32.mrf.mxu3 }
 0xc58   :  { %v6745_v31 = vadd.f32 %v6744_v28, %v11305_v20  ;;  %v6878_v12 = vadd.f32 %v6877_v7, %v6815_v17  ;;  %v6819_v28 = vmul.f32 %v11317_v36, %v11317_v36 }
 0xc59   :  { %v6691_v56 = vpop.f32.mrf.mxu1 }
 0xc5a   :  { %v11468_v48 = vadd.f32 %v6691_v56, %v11204_v30  ;;  %v6746_v63 = vadd.f32 %v6745_v31, %v11308_v21  ;;  %v6817_v30 = vmul.f32 %v11311_v5, %v11311_v5  ;;  %v6879_v15 = vadd.f32 %v6878_v12, %v6816_v38  ;;  %v11494_v17 = vpop.f32.mrf.mxu0 }
 0xc5b   :  { %v6820_v12 = vmul.f32 %v11320_v19, %v11320_v19 }
 0xc5c   :  { %v6747_v59 = vadd.f32 %v6746_v63, %v11311_v5  ;;  %v6880_v7 = vadd.f32 %v6879_v15, %v6817_v30 }
 0xc5e   :  { %v6748_v31 = vadd.f32 %v6747_v59, %v11314_v9  ;;  %v6881_v21 = vadd.f32 %v6880_v7, %v6818_v27  ;;  %v6822_v9 = vmul.f32 %v11326_v18, %v11326_v18  ;;  %v11507_v27 = vpop.f32.mrf.mxu2 }
 0xc60   :  { %v6749_v38 = vadd.f32 %v6748_v31, %v11317_v36  ;;  %v6882_v63 = vadd.f32 %v6881_v21, %v6819_v28  ;;  %v6823_v21 = vmul.f32 %v11329_v62, %v11329_v62  ;;  %v11512_v28 = vpop.f32.mrf.mxu3 }
 0xc61   :  { %v6694_v56 = vpop.f32.mrf.mxu1 }
 0xc62   :  { %v11487_v51 = vadd.f32 %v6694_v56, %v11209_v16  ;;  %v6750_v16 = vadd.f32 %v6749_v38, %v11320_v19  ;;  %v6821_v56 = vmul.f32 %v11323_v50, %v11323_v50  ;;  %v6883_v15 = vadd.f32 %v6882_v63, %v6820_v12  ;;  %v11517_v63 = vpop.f32.mrf.mxu0 }
 0xc63   :  { %v6824_v12 = vmul.f32 %v11332_v57, %v11332_v57 }
 0xc64   :  { %v6751_v59 = vadd.f32 %v6750_v16, %v11323_v50  ;;  %v6884_v7 = vadd.f32 %v6883_v15, %v6821_v56  ;;  %v6825_v56 = vmul.f32 %v11335_v6, %v11335_v6 }
 0xc66   :  { %v6752_v31 = vadd.f32 %v6751_v59, %v11326_v18  ;;  %v6885_v38 = vadd.f32 %v6884_v7, %v6822_v9  ;;  %v6826_v9 = vmul.f32 %v11338_v53, %v11338_v53 }
 0xc68   :  { %v6753_v19 = vadd.f32 %v6752_v31, %v11329_v62  ;;  %v6886_v16 = vadd.f32 %v6885_v38, %v6823_v21  ;;  %v6827_v62 = vmul.f32 %v11341_v4, %v11341_v4  ;;  %v11530_v21 = vpop.f32.mrf.mxu2 }
 0xc69   :  { %v11502_v30 = vpop.f32.mrf.mxu1 }
 0xc6a   :  { %v6754_v50 = vadd.f32 %v6753_v19, %v11332_v57  ;;  %v6887_v59 = vadd.f32 %v6886_v16, %v6824_v12  ;;  %v6828_v57 = vmul.f32 %v11344_v10, %v11344_v10  ;;  %v11535_v12 = vpop.f32.mrf.mxu3 }
 0xc6c   :  { %v6755_v18 = vadd.f32 %v6754_v50, %v11335_v6  ;;  %v6888_v7 = vadd.f32 %v6887_v59, %v6825_v56  ;;  %v6829_v56 = vmul.f32 %v11347_v32, %v11347_v32 }
 0xc6e   :  { %v6756_v31 = vadd.f32 %v6755_v18, %v11338_v53  ;;  %v6889_v19 = vadd.f32 %v6888_v7, %v6826_v9  ;;  %v11540_v18 = vpop.f32.mrf.mxu0  ;;  %v6830_v7 = vmul.f32 %v11350_v42, %v11350_v42 }
 0xc70   :  { %v6757_v38 = vadd.f32 %v6756_v31, %v11341_v4  ;;  %v6890_v50 = vadd.f32 %v6889_v19, %v6827_v62  ;;  %v6831_v62 = vmul.f32 %v11353_v41, %v11353_v41  ;;  %v11553_v6 = vpop.f32.mrf.mxu2 }
 0xc71   :  { %v11522_v15 = vpop.f32.mrf.mxu1 }
 0xc72   :  { %v6758_v16 = vadd.f32 %v6757_v38, %v11344_v10  ;;  %v6891_v53 = vadd.f32 %v6890_v50, %v6828_v57  ;;  %v6832_v10 = vmul.f32 %v11356_v11, %v11356_v11 }
 0xc74   :  { %v6759_v9 = vadd.f32 %v6758_v16, %v11347_v32  ;;  %v6892_v31 = vadd.f32 %v6891_v53, %v6829_v56  ;;  %v6833_v16 = vmul.f32 %v11359_v44, %v11359_v44  ;;  %v11558_v53 = vpop.f32.mrf.mxu3  ;;  %v6836_v32 = vmul.f32 %v11368_v23, %v11368_v23 }
 0xc76   :  { %v6760_v4 = vadd.f32 %v6759_v9, %v11350_v42  ;;  %v6893_v19 = vadd.f32 %v6892_v31, %v6830_v7  ;;  %v13313_v31 = vld [vmem:[#allocation39_spill] sm:$0xff] }
 0xc78   :  { %v6761_v38 = vadd.f32 %v6760_v4, %v11353_v41  ;;  %v6894_v57 = vadd.f32 %v6893_v19, %v6831_v62  ;;  %v6834_v4 = vmul.f32 %v13313_v31, %v13313_v31  ;;  %v11565_v41 = vpop.f32.mrf.mxu0  ;;  %v6835_v19 = vmul.f32 %v11365_v54, %v11365_v54 }
 0xc79   :  { %v11542_v59 = vpop.f32.mrf.mxu1 }
 0xc7a   :  { %v6762_v50 = vadd.f32 %v6761_v38, %v11356_v11  ;;  %v6895_v9 = vadd.f32 %v6894_v57, %v6832_v10 }
 0xc7c   :  { %v6763_v7 = vadd.f32 %v6762_v50, %v11359_v44  ;;  %v6896_v42 = vadd.f32 %v6895_v9, %v6833_v16  ;;  %v6837_v50 = vmul.f32 %v11371_v46, %v11371_v46  ;;  %v6204_v16 = vpop.f32.mrf.mxu2 }
 0xc7e   :  { %v6764_v62 = vadd.f32 %v6763_v7, %v13313_v31  ;;  %v6897_v38 = vadd.f32 %v6896_v42, %v6834_v4  ;;  %v6838_v42 = vmul.f32 %v11375_v43, %v11375_v43  ;;  %v6373_v4 = vpop.f32.mrf.mxu3  ;;  %v6840_v31 = vmul.f32 %v11398_v61, %v11398_v61 }
 0xc80   :  { %v6765_v11 = vadd.f32 %v6764_v62, %v11365_v54  ;;  %v6898_v10 = vadd.f32 %v6897_v38, %v6835_v19  ;;  %v6839_v19 = vmul.f32 %v11380_v58, %v11380_v58 }
 0xc81   :  { %v11560_v56 = vpop.f32.mrf.mxu1 }
 0xc82   :  { %v6766_v57 = vadd.f32 %v6765_v11, %v11368_v23  ;;  %v6899_v9 = vadd.f32 %v6898_v10, %v6836_v32  ;;  %v6542_v11 = vpop.f32.mrf.mxu0  ;;  %v13314_v32 = vld [vmem:[#allocation61_spill] sm:$0xff] }
 0xc83   :  { %v6190_v10 = vadd.f32 %v11433_v39, %v13314_v32 }
 0xc84   :  { %v6767_v7 = vadd.f32 %v6766_v57, %v11371_v46  ;;  %v6900_v62 = vadd.f32 %v6899_v9, %v6837_v50  ;;  %v6841_v50 = vmul.f32 %v11413_v25, %v11413_v25  ;;  %v13315_v9 = vld [vmem:[#allocation4_spill] sm:$0xff]  ;;  %v6207_v32 = vpop.f32.mrf.mxu2 }
 0xc86   :  { %v6768_v54 = vadd.f32 %v6767_v7, %v11375_v43  ;;  %v6901_v38 = vadd.f32 %v6900_v62, %v6838_v42  ;;  %v6193_v7 = vadd.f32 %v11457_v29, %v13315_v9  ;;  %v6359_v42 = vadd.f32 %v11438_v24, %v6190_v10  ;;  %v13317_v10 = vld [vmem:[#allocation34_spill] sm:$0xff] }
 0xc87   :  { %v6843_v24 = vmul.f32 %v11449_v1, %v11449_v1 }
 0xc88   :  { %v6769_v23 = vadd.f32 %v6768_v54, %v11380_v58  ;;  %v6902_v57 = vadd.f32 %v6901_v38, %v6839_v19  ;;  %v6842_v58 = vmul.f32 %v11428_v49, %v11428_v49  ;;  %v6362_v39 = vadd.f32 %v11462_v2, %v6193_v7  ;;  %v13316_v19 = vld [vmem:[#allocation20_spill] sm:$0xff]  ;;  %v6376_v2 = vpop.f32.mrf.mxu3 }
 0xc89   :  { %v11576_v44 = vpop.f32.mrf.mxu1  ;;  %v6528_v38 = vadd.f32 %v11443_v52, %v6359_v42  ;;  %v6844_v52 = vmul.f32 %v11468_v48, %v11468_v48 }
 0xc8a   :  { %v6770_v46 = vadd.f32 %v6769_v23, %v11398_v61  ;;  %v6903_v62 = vadd.f32 %v6902_v57, %v6840_v31  ;;  %v6195_v23 = vadd.f32 %v11481_v26, %v13316_v19  ;;  %v6198_v57 = vadd.f32 %v11507_v27, %v13317_v10 }
 0xc8c   :  { %v6771_v54 = vadd.f32 %v6770_v46, %v11413_v25  ;;  %v6904_v61 = vadd.f32 %v6903_v62, %v6841_v50  ;;  %v6364_v31 = vadd.f32 %v11489_v47, %v6195_v23  ;;  %v6531_v46 = vadd.f32 %v11470_v33, %v6362_v39  ;;  %v13318_v47 = vld [vmem:[#allocation6_spill] sm:$0xff]  ;;  %v6545_v62 = vpop.f32.mrf.mxu0 }
 0xc8d   :  { %v11613_v50 = vadd.f32 %v11502_v30, %v6528_v38  ;;  %v6367_v7 = vadd.f32 %v11512_v28, %v6198_v57  ;;  %v6200_v33 = vadd.f32 %v11530_v21, %v13318_v47  ;;  %v13319_v28 = vld [vmem:[#allocation11_spill] sm:$0xff] }
 0xc8e   :  { %v6772_v29 = vadd.f32 %v6771_v54, %v11428_v49  ;;  %v6905_v9 = vadd.f32 %v6904_v61, %v6842_v58  ;;  %v6533_v42 = vadd.f32 %v11494_v17, %v6364_v31  ;;  %v6845_v58 = vmul.f32 %v11487_v51, %v11487_v51 }
 0xc8f   :  { %v11623_v61 = vadd.f32 %v11522_v15, %v6531_v46  ;;  %v6369_v30 = vadd.f32 %v11535_v12, %v6200_v33  ;;  %v6536_v39 = vadd.f32 %v11517_v63, %v6367_v7  ;;  %v6203_v17 = vadd.f32 %v11553_v6, %v13319_v28  ;;  %v13320_v12 = vld [vmem:[#allocation10_spill] sm:$0xff] }
 0xc90   :  { %v6773_v26 = vadd.f32 %v6772_v29, %v11449_v1  ;;  %v6906_v54 = vadd.f32 %v6905_v9, %v6843_v24  ;;  %v6846_v38 = vmul.f32 %v11613_v50, %v11613_v50  ;;  %v11633_v29 = vadd.f32 %v11542_v59, %v6533_v42  ;;  %v13321_v59 = vld [vmem:[#allocation5_spill] sm:$0xff]  ;;  %v6378_v33 = vpop.f32.mrf.mxu3 }
 0xc91   :  { %v6709_v43 = vpop.f32.mrf.mxu1  ;;  %v6372_v15 = vadd.f32 %v11558_v53, %v6203_v17  ;;  %v6538_v24 = vadd.f32 %v11540_v18, %v6369_v30  ;;  %v6205_v31 = vadd.f32 %v6204_v16, %v13320_v12  ;;  %v6847_v6 = vmul.f32 %v11623_v61, %v11623_v61 }
 0xc92   :  { %v6774_v27 = vadd.f32 %v6773_v26, %v11468_v48  ;;  %v6907_v23 = vadd.f32 %v6906_v54, %v6844_v52  ;;  %v11642_v10 = vadd.f32 %v11560_v56, %v6536_v39  ;;  %v6208_v26 = vadd.f32 %v6207_v32, %v13321_v59  ;;  %v6209_v52 = vpop.f32.mrf.mxu2 }
 0xc93   :  { %v6374_v57 = vadd.f32 %v6373_v4, %v6205_v31  ;;  %v6541_v9 = vadd.f32 %v11565_v41, %v6372_v15  ;;  %v6848_v16 = vmul.f32 %v11633_v29, %v11633_v29  ;;  %v11650_v7 = vadd.f32 %v11576_v44, %v6538_v24 }
 0xc94   :  { %v6775_v21 = vadd.f32 %v6774_v27, %v11487_v51  ;;  %v6908_v63 = vadd.f32 %v6907_v23, %v6845_v58  ;;  %v6377_v42 = vadd.f32 %v6376_v2, %v6208_v26  ;;  %v6849_v41 = vmul.f32 %v11642_v10, %v11642_v10  ;;  %v6547_v27 = vpop.f32.mrf.mxu0 }
 0xc95   :  { %v6543_v47 = vadd.f32 %v6542_v11, %v6374_v57  ;;  %v11655_v32 = vadd.f32 %v6709_v43, %v6541_v9  ;;  %v6850_v44 = vmul.f32 %v11650_v7, %v11650_v7  ;;  %v13322_v11 = vld [vmem:[#allocation13_spill] sm:$0xff] }
 0xc96   :  { %v6776_v46 = vadd.f32 %v6775_v21, %v11613_v50  ;;  %v6909_v53 = vadd.f32 %v6908_v63, %v6846_v38  ;;  %v6546_v54 = vadd.f32 %v6545_v62, %v6377_v42  ;;  %v6210_v28 = vadd.f32 %v6209_v52, %v13322_v11 }
 0xc97   :  { %v6851_v43 = vmul.f32 %v11655_v32, %v11655_v32 }
 0xc98   :  { %v6777_v18 = vadd.f32 %v6776_v46, %v11623_v61  ;;  %v6910_v56 = vadd.f32 %v6909_v53, %v6847_v6  ;;  %v6379_v62 = vadd.f32 %v6378_v33, %v6210_v28  ;;  %v6381_v6 = vpop.f32.mrf.mxu3  ;;  %v13325_v53 = vld [vmem:[#allocation12_spill] sm:$0xff] }
 0xc99   :  { %v6711_v19 = vpop.f32.mrf.mxu1 }
 0xc9a   :  { %v6778_v4 = vadd.f32 %v6777_v18, %v11633_v29  ;;  %v6911_v30 = vadd.f32 %v6910_v56, %v6848_v16  ;;  %v11660_v2 = vadd.f32 %v6711_v19, %v6543_v47  ;;  %v6212_v12 = vpop.f32.mrf.mxu2  ;;  %v6548_v19 = vadd.f32 %v6547_v27, %v6379_v62 }
 0xc9b   :  { %v6213_v18 = vadd.f32 %v6212_v12, %v13325_v53 }
 0xc9c   :  { %v6779_v39 = vadd.f32 %v6778_v4, %v11642_v10  ;;  %v6912_v17 = vadd.f32 %v6911_v30, %v6849_v41  ;;  %v6852_v24 = vmul.f32 %v11660_v2, %v11660_v2  ;;  %v6550_v52 = vpop.f32.mrf.mxu0  ;;  %v13327_v30 = vld [vmem:[#allocation15_spill] sm:$0xff] }
 0xc9d   :  { %v6382_v33 = vadd.f32 %v6381_v6, %v6213_v18 }
 0xc9e   :  { %v6780_v23 = vadd.f32 %v6779_v39, %v11650_v7  ;;  %v6913_v38 = vadd.f32 %v6912_v17, %v6850_v44 }
 0xc9f   :  { %v6551_v4 = vadd.f32 %v6550_v52, %v6382_v33 }
 0xca0   :  { %v6781_v15 = vadd.f32 %v6780_v23, %v11655_v32  ;;  %v6914_v31 = vadd.f32 %v6913_v38, %v6851_v43 }
 0xca1   :  { %v6714_v58 = vpop.f32.mrf.mxu1 }
 0xca2   :  { %v11666_v21 = vadd.f32 %v6714_v58, %v6546_v54  ;;  %v6782_v63 = vadd.f32 %v6781_v15, %v11660_v2  ;;  %v6915_v9 = vadd.f32 %v6914_v31, %v6852_v24  ;;  %v6214_v27 = vpop.f32.mrf.mxu2  ;;  %v6383_v58 = vpop.f32.mrf.mxu3 }
 0xca3   :  { %v6215_v39 = vadd.f32 %v6214_v27, %v13327_v30  ;;  %v13329_v27 = vld [vmem:[#allocation14_spill] sm:$0xff]  ;;  %v13330_v30 = vld [vmem:[#allocation9_spill] sm:$0xff] }
 0xca4   :  { %13323 = vst [vmem:[#allocation46_spill] sm:$0xff] %v11666_v21  ;;  %v6853_v46 = vmul.f32 %v11666_v21, %v11666_v21  ;;  %v6783_v59 = vadd.f32 %v6782_v63, %v11666_v21  ;;  %v6552_v28 = vpop.f32.mrf.mxu0 }
 0xca5   :  { %v6384_v17 = vadd.f32 %v6383_v58, %v6215_v39  ;;  %v13354_v39 = vld [vmem:[#allocation39_spill] sm:$0xff] }
 0xca6   :  { %v6916_v16 = vadd.f32 %v6915_v9, %v6853_v46 }
 0xca7   :  { %v6553_v43 = vadd.f32 %v6552_v28, %v6384_v17  ;;  %v13331_v28 = vld [vmem:[#allocation62_spill] sm:$0xff]  ;;  %v13356_v17 = vld [vmem:[#allocation41_spill] sm:$0xff] }
 0xca9   :  { %v6716_v57 = vpop.f32.mrf.mxu1 }
 0xcaa   :  { %v11675_v26 = vadd.f32 %v6716_v57, %v6548_v19 }
 0xcac   :  { %13324 = vst [vmem:[#allocation47_spill] sm:$0xff] %v11675_v26  ;;  %v6784_v42 = vadd.f32 %v6783_v59, %v11675_v26  ;;  %v6854_v47 = vmul.f32 %v11675_v26, %v11675_v26 }
 0xcae   :  { %v6917_v56 = vadd.f32 %v6916_v16, %v6854_v47 }
 0xcb1   :  { %v6719_v41 = vpop.f32.mrf.mxu1 }
 0xcb2   :  { %v11681_v54 = vadd.f32 %v6719_v41, %v6551_v4 }
 0xcb4   :  { %13326 = vst [vmem:[#allocation48_spill] sm:$0xff] %v11681_v54  ;;  %v6785_v44 = vadd.f32 %v6784_v42, %v11681_v54  ;;  %v6855_v11 = vmul.f32 %v11681_v54, %v11681_v54  ;;  %v13358_v54 = vld [vmem:[#allocation43_spill] sm:$0xff] }
 0xcb6   :  { %v6918_v23 = vadd.f32 %v6917_v56, %v6855_v11 }
 0xcb9   :  { %v6721_v62 = vpop.f32.mrf.mxu1 }
 0xcba   :  { %v11687_v38 = vadd.f32 %v6721_v62, %v6553_v43  ;;  %v13342_v62 = vld [vmem:[#allocation26_spill] sm:$0xff] }
 0xcbc   :  { %13328 = vst [vmem:[#allocation49_spill] sm:$0xff] %v11687_v38  ;;  %v6786_v15 = vadd.f32 %v6785_v44, %v11687_v38  ;;  %v6856_v24 = vmul.f32 %v11687_v38, %v11687_v38  ;;  %v13355_v44 = vld [vmem:[#allocation40_spill] sm:$0xff] }
 0xcbe   :  { %v6787_v12 = vrot.slane %v6786_v15, 4  ;;  %v6919_v19 = vadd.f32 %v6918_v23, %v6856_v24  ;;  %v13344_v24 = vld [vmem:[#allocation28_spill] sm:$0xff] }
 0xcc0   :  { %v6788_v31 = vadd.f32 %v6787_v12, %v6786_v15  ;;  %v6920_v63 = vrot.slane %v6919_v19, 4  ;;  %v13341_v15 = vld [vmem:[#allocation25_spill] sm:$0xff] }
 0xcc2   :  { %v6789_v46 = vrot.slane %v6788_v31, 2  ;;  %v6921_v6 = vadd.f32 %v6920_v63, %v6919_v19  ;;  %v13357_v19 = vld [vmem:[#allocation42_spill] sm:$0xff] }
 0xcc4   :  { %v6790_v57 = vadd.f32 %v6789_v46, %v6788_v31  ;;  %v6922_v9 = vrot.slane %v6921_v6, 2  ;;  %v13332_v46 = vld [vmem:[#allocation17_spill] sm:$0xff] }
 0xcc6   :  { %v6791_v59 = vrot.slane %v6790_v57, 1  ;;  %v6923_v52 = vadd.f32 %v6922_v9, %v6921_v6  ;;  %v13337_v6 = vld [vmem:[#allocation21_spill] sm:$0xff]  ;;  %v13343_v9 = vld [vmem:[#allocation27_spill] sm:$0xff] }
 0xcc8   :  { %v6792_v53 = vadd.f32 %v6791_v59, %v6790_v57  ;;  %v6924_v18 = vrot.slane %v6923_v52, 1  ;;  %v13333_v59 = vld [vmem:[#allocation16_spill] sm:$0xff] }
 0xcca   :  { %v6925_v16 = vadd.f32 %v6924_v18, %v6923_v52  ;;  %v11692_v42 = vmul.f32 0.001953125, %v6792_v53  ;;  %v13334_v53 = vld [vmem:[#allocation63_spill] sm:$0xff]  ;;  %v13345_v18 = vld [vmem:[#allocation29_spill] sm:$0xff] }
 0xccb   :  { %v13339_v52 = vld [vmem:[#allocation23_spill] sm:$0xff] }
 0xccc   :  { %v6927_v47 = vmul.f32 0.001953125, %v6925_v16  ;;  %v6928_v33 = vmul.f32 %v11692_v42, %v11692_v42  ;;  %v13340_v16 = vld [vmem:[#allocation24_spill] sm:$0xff]  ;;  %v6986_v38 = vsub.f32 %v13356_v17, %v11692_v42  ;;  %v6988_v11 = vsub.f32 %v13358_v54, %v11692_v42 }
 0xccd   :  { %v6991_v23 = vsub.f32 %v11413_v25, %v11692_v42  ;;  %v6993_v17 = vsub.f32 %v11449_v1, %v11692_v42  ;;  %v6995_v54 = vsub.f32 %v11487_v51, %v11692_v42  ;;  %v6998_v25 = vsub.f32 %v11633_v29, %v11692_v42 }
 0xcce   :  { %v6929_v56 = vsub.f32 %v6927_v47, %v6928_v33  ;;  %v13335_v47 = vld [vmem:[#allocation19_spill] sm:$0xff]  ;;  %v13338_v33 = vld [vmem:[#allocation22_spill] sm:$0xff]  ;;  %v7000_v1 = vsub.f32 %v11650_v7, %v11692_v42  ;;  %v7002_v51 = vsub.f32 %v11660_v2, %v11692_v42  ;;  %v13362_v29 = vsub.f32 %v13330_v30, %v11692_v42 }
 0xccf   :  { %v13363_v7 = vsub.f32 %v11245_v60, %v11692_v42  ;;  %v13364_v2 = vsub.f32 %v11248_v35, %v11692_v42 }
 0xcd0   :  { %v6930_v4 = vmax.f32 %v6929_v56, 0.0  ;;  %v13336_v56 = vld [vmem:[#allocation18_spill] sm:$0xff] }
 0xcd2   :  { %v6931_v41 = vadd.f32 1e-05, %v6930_v4  ;;  %v13359_v4 = vld [vmem:[#allocation44_spill] sm:$0xff] }
 0xcd3   :  { %v6989_v21 = vsub.f32 %v13359_v4, %v11692_v42 }
 0xcd4   :  { %8078 = vrsqrt.f32 %v6931_v41  ;;  %vm6938_vm3 = vweird.f32 %v6931_v41 }
 0xcda   :  { %v8079_v12 = vpop.eup %8078 }
 0xcdb   :  { %v6933_v57 = vmul.f32 %v8079_v12, %v6931_v41  ;;  %vm6939_vm4 = vweird.f32 %v8079_v12  ;;  %v6987_v41 = vsub.f32 %v13357_v19, %v11692_v42  ;;  %v6997_v19 = vsub.f32 %v11623_v61, %v11692_v42 }
 0xcdc   :  { %vm6940_vm5 = vmor %vm6938_vm3, %vm6939_vm4 }
 0xcdd   :  { %v6934_v31 = vmul.f32 %v8079_v12, %v6933_v57  ;;  %v13360_v57 = vld [vmem:[#allocation45_spill] sm:$0xff] }
 0xcdf   :  { %v6935_v63 = vmul.f32 0.5, %v6934_v31 }
 0xce1   :  { %v6936_v31 = vsub.f32 1.5, %v6935_v63  ;;  %v3758_v63 = vld [vmem:[%s12688_s7] sm:$0x1] }
 0xce3   :  { %v6937_v43 = vmul.f32 %v8079_v12, %v6936_v31  ;;  %v6990_v31 = vsub.f32 %v13360_v57, %v11692_v42  ;;  %v13366_v57 = vsub.f32 %v11254_v55, %v11692_v42 }
 0xce5   :  { %v6941_v58 = vsel %vm6940_vm5, %v8079_v12, %v6937_v43  ;;  %v6992_v43 = vsub.f32 %v11428_v49, %v11692_v42  ;;  %v6994_v12 = vsub.f32 %v11468_v48, %v11692_v42  ;;  %v6999_v49 = vsub.f32 %v11642_v10, %v11692_v42 }
 0xce6   :  { %v6942_v26 = vmul.f32 %v6941_v58, %v3758_v63  ;;  %v6996_v58 = vsub.f32 %v11613_v50, %v11692_v42  ;;  %v7001_v48 = vsub.f32 %v11655_v32, %v11692_v42  ;;  %v13361_v50 = vsub.f32 %v13329_v27, %v11692_v42 }
 0xce7   :  { %v13365_v27 = vsub.f32 %v13331_v28, %v11692_v42  ;;  %v13367_v63 = vsub.f32 %v11257_v40, %v11692_v42 }
 0xce8   :  { %v11820_v4 = vperm.slane %v6942_v26, 0 }
 0xcea   :  { %v11834_v61 = vmul.f32 %v11820_v4, %v13361_v50  ;;  %v11840_v10 = vmul.f32 %v11820_v4, %v13362_v29  ;;  %v11846_v32 = vmul.f32 %v11820_v4, %v13363_v7  ;;  %v11852_v26 = vmul.f32 %v11820_v4, %v13364_v2 }
 0xceb   :  { %v11858_v30 = vmul.f32 %v11820_v4, %v13365_v27  ;;  %v11864_v60 = vmul.f32 %v11820_v4, %v13366_v57  ;;  %v11870_v35 = vmul.f32 %v11820_v4, %v13367_v63  ;;  %v13368_v50 = vsub.f32 %v11260_v13, %v11692_v42 }
 0xcec   :  { %v13369_v29 = vsub.f32 %v11263_v8, %v11692_v42  ;;  %v13370_v7 = vsub.f32 %v11266_v0, %v11692_v42  ;;  %v13371_v2 = vsub.f32 %v11269_v3, %v11692_v42  ;;  %v13372_v27 = vsub.f32 %v11272_v22, %v11692_v42 }
 0xced   :  { %v11876_v28 = vmul.f32 %v11820_v4, %v13368_v50  ;;  %v13373_v57 = vsub.f32 %v11275_v34, %v11692_v42  ;;  %v13374_v63 = vsub.f32 %v13332_v46, %v11692_v42  ;;  %v13375_v50 = vsub.f32 %v11281_v37, %v11692_v42 }
 0xcee   :  { %v11882_v55 = vmul.f32 %v11820_v4, %v13369_v29  ;;  %v11888_v40 = vmul.f32 %v11820_v4, %v13370_v7  ;;  %v11894_v13 = vmul.f32 %v11820_v4, %v13371_v2  ;;  %v11900_v8 = vmul.f32 %v11820_v4, %v13372_v27 }
 0xcef   :  { %v11906_v0 = vmul.f32 %v11820_v4, %v13373_v57  ;;  %v11912_v3 = vmul.f32 %v11820_v4, %v13374_v63  ;;  %v11918_v22 = vmul.f32 %v11820_v4, %v13375_v50  ;;  %v13376_v29 = vsub.f32 %v13333_v59, %v11692_v42 }
 0xcf0   :  { %v13377_v7 = vsub.f32 %v13334_v53, %v11692_v42  ;;  %v13378_v2 = vsub.f32 %v11290_v45, %v11692_v42  ;;  %v13379_v27 = vsub.f32 %v13335_v47, %v11692_v42  ;;  %v13380_v57 = vsub.f32 %v13336_v56, %v11692_v42 }
 0xcf1   :  { %v11924_v34 = vmul.f32 %v11820_v4, %v13376_v29  ;;  %v13381_v63 = vsub.f32 %v13337_v6, %v11692_v42  ;;  %v13382_v50 = vsub.f32 %v11302_v14, %v11692_v42  ;;  %v13383_v29 = vsub.f32 %v11305_v20, %v11692_v42 }
 0xcf2   :  { %v11930_v46 = vmul.f32 %v11820_v4, %v13377_v7  ;;  %v11936_v37 = vmul.f32 %v11820_v4, %v13378_v2  ;;  %v11942_v59 = vmul.f32 %v11820_v4, %v13379_v27  ;;  %v11948_v53 = vmul.f32 %v11820_v4, %v13380_v57 }
 0xcf3   :  { %v11954_v45 = vmul.f32 %v11820_v4, %v13381_v63  ;;  %v11960_v47 = vmul.f32 %v11820_v4, %v13382_v50  ;;  %v11966_v56 = vmul.f32 %v11820_v4, %v13383_v29  ;;  %v13384_v7 = vsub.f32 %v13338_v33, %v11692_v42 }
 0xcf4   :  { %v13385_v2 = vsub.f32 %v11311_v5, %v11692_v42  ;;  %v13386_v27 = vsub.f32 %v13339_v52, %v11692_v42  ;;  %v13387_v57 = vsub.f32 %v11317_v36, %v11692_v42  ;;  %v13388_v63 = vsub.f32 %v13340_v16, %v11692_v42 }
 0xcf5   :  { %v11972_v6 = vmul.f32 %v11820_v4, %v13384_v7  ;;  %v13389_v50 = vsub.f32 %v13341_v15, %v11692_v42  ;;  %v13390_v29 = vsub.f32 %v13342_v62, %v11692_v42  ;;  %v13391_v7 = vsub.f32 %v13343_v9, %v11692_v42 }
 0xcf6   :  { %v11978_v14 = vmul.f32 %v11820_v4, %v13385_v2  ;;  %v11984_v20 = vmul.f32 %v11820_v4, %v13386_v27  ;;  %v11990_v33 = vmul.f32 %v11820_v4, %v13387_v57  ;;  %v11996_v5 = vmul.f32 %v11820_v4, %v13388_v63  ;;  %v13395_v57 = vld [vmem:[#allocation30_spill] sm:$0xff] }
 0xcf7   :  { %v12002_v52 = vmul.f32 %v11820_v4, %v13389_v50  ;;  %v12008_v36 = vmul.f32 %v11820_v4, %v13390_v29  ;;  %v12014_v16 = vmul.f32 %v11820_v4, %v13391_v7  ;;  %v13392_v2 = vsub.f32 %v13344_v24, %v11692_v42  ;;  %v13398_v50 = vld [vmem:[#allocation31_spill] sm:$0xff]  ;;  %v13401_v7 = vld [vmem:[#allocation32_spill] sm:$0xff] }
 0xcf8   :  { %v13393_v27 = vsub.f32 %v13345_v18, %v11692_v42  ;;  %v13396_v63 = vsub.f32 %v13395_v57, %v11692_v42  ;;  %v13399_v29 = vsub.f32 %v13398_v50, %v11692_v42 }
 0xcf9   :  { %v12020_v15 = vmul.f32 %v11820_v4, %v13392_v2  ;;  %v13402_v2 = vsub.f32 %v13401_v7, %v11692_v42 }
 0xcfa   :  { %v12026_v62 = vmul.f32 %v11820_v4, %v13393_v27  ;;  %v12032_v9 = vmul.f32 %v11820_v4, %v13396_v63  ;;  %v12038_v24 = vmul.f32 %v11820_v4, %v13399_v29  ;;  %v13404_v27 = vld [vmem:[#allocation35_spill] sm:$0xff]  ;;  %v13407_v63 = vld [vmem:[#allocation36_spill] sm:$0xff]  ;;  %v13409_v29 = vld [vmem:[#allocation37_spill] sm:$0xff] }
 0xcfb   :  { %v12044_v18 = vmul.f32 %v11820_v4, %v13402_v2  ;;  %v13411_v2 = vld [vmem:[#allocation33_spill] sm:$0xff] }
 0xcfc   :  { %13394 = vst [vmem:[#allocation56_spill] sm:$0xff] %v12026_v62  ;;  %v13405_v62 = vsub.f32 %v13404_v27, %v11692_v42 }
 0xcfd   :  { %13397 = vst [vmem:[#allocation57_spill] sm:$0xff] %v12032_v9  ;;  %v13408_v9 = vsub.f32 %v13407_v63, %v11692_v42 }
 0xcfe   :  { %13400 = vst [vmem:[#allocation58_spill] sm:$0xff] %v12038_v24  ;;  %v12050_v57 = vmul.f32 %v11820_v4, %v13405_v62  ;;  %v13410_v24 = vsub.f32 %v13409_v29, %v11692_v42  ;;  %v13413_v62 = vld [vmem:[#allocation38_spill] sm:$0xff] }
 0xcff   :  { %13403 = vst [vmem:[#allocation60_spill] sm:$0xff] %v12044_v18  ;;  %v12056_v50 = vmul.f32 %v11820_v4, %v13408_v9  ;;  %v13412_v18 = vsub.f32 %v13411_v2, %v11692_v42  ;;  %v13415_v9 = vsub.f32 %v13354_v39, %v11692_v42  ;;  %v12098_v39 = vmul.f32 %v11820_v4, %v6989_v21 }
 0xd00   :  { %13406 = vst [vmem:[#allocation3_spill] sm:$0xff] %v12050_v57  ;;  %v12062_v7 = vmul.f32 %v11820_v4, %v13410_v24  ;;  %v13414_v57 = vsub.f32 %v13413_v62, %v11692_v42  ;;  %v13416_v24 = vsub.f32 %v13355_v44, %v11692_v42  ;;  %v12092_v62 = vmul.f32 %v11820_v4, %v6987_v41 }
 0xd01   :  { %v12068_v27 = vmul.f32 %v11820_v4, %v13412_v18  ;;  %v12080_v29 = vmul.f32 %v11820_v4, %v13415_v9  ;;  %v12089_v18 = vmul.f32 %v11820_v4, %v6986_v38  ;;  %v12101_v9 = vmul.f32 %v11820_v4, %v6990_v31 }
 0xd02   :  { %v12074_v63 = vmul.f32 %v11820_v4, %v13414_v57  ;;  %v12086_v2 = vmul.f32 %v11820_v4, %v13416_v24  ;;  %v12095_v57 = vmul.f32 %v11820_v4, %v6988_v11  ;;  %v12104_v44 = vmul.f32 %v11820_v4, %v6991_v23 }
 0xd03   :  { %v12107_v24 = vmul.f32 %v11820_v4, %v6992_v43  ;;  %v12110_v38 = vmul.f32 %v11820_v4, %v6993_v17  ;;  %v12113_v41 = vmul.f32 %v11820_v4, %v6994_v12  ;;  %v12116_v11 = vmul.f32 %v11820_v4, %v6995_v54 }
 0xd04   :  { %v12119_v21 = vmul.f32 %v11820_v4, %v6996_v58  ;;  %v12122_v31 = vmul.f32 %v11820_v4, %v6997_v19  ;;  %v12125_v23 = vmul.f32 %v11820_v4, %v6998_v25  ;;  %v12128_v43 = vmul.f32 %v11820_v4, %v6999_v49  ;;  %v13424_v58 = vld [vmem:[#allocation46_spill] sm:$0xff]  ;;  %v13427_v25 = vld [vmem:[#allocation47_spill] sm:$0xff] }
 0xd05   :  { %v12131_v17 = vmul.f32 %v11820_v4, %v7000_v1  ;;  %v12134_v12 = vmul.f32 %v11820_v4, %v7001_v48  ;;  %v12137_v54 = vmul.f32 %v11820_v4, %v7002_v51  ;;  %v13430_v1 = vld [vmem:[#allocation48_spill] sm:$0xff]  ;;  %v13433_v51 = vld [vmem:[#allocation49_spill] sm:$0xff] }
 0xd06   :  { %13417 = vst [vmem:[#allocation7_spill] sm:$0xff] %v12119_v21  ;;  %v13425_v21 = vsub.f32 %v13424_v58, %v11692_v42 }
 0xd07   :  { %13418 = vst [vmem:[#allocation8_spill] sm:$0xff] %v12122_v31 }
 0xd08   :  { %13419 = vst [vmem:[#allocation50_spill] sm:$0xff] %v12125_v23  ;;  %v12143_v19 = vmul.f32 %v11820_v4, %v13425_v21  ;;  %v13428_v23 = vsub.f32 %v13427_v25, %v11692_v42  ;;  %v12164_v21 = vld [vmem:[%s12687_s8] ss:$0 sm:$0xff] }
 0xd09   :  { %13420 = vst [vmem:[#allocation51_spill] sm:$0xff] %v12128_v43  ;;  %v7076_v25 = vadd.f32 %v12164_v21, %v11840_v10  ;;  %v7079_v10 = vadd.f32 %v12164_v21, %v11858_v30  ;;  %v7144_v30 = vld [vmem:[%s12681_s0 + $0x28] sm:$0xff]  ;;  %v7083_v43 = vadd.f32 %v12164_v21, %v11882_v55  ;;  %v7085_v55 = vadd.f32 %v12164_v21, %v11894_v13 }
 0xd0a   :  { %13421 = vst [vmem:[#allocation53_spill] sm:$0xff] %v12131_v17  ;;  %v12149_v49 = vmul.f32 %v11820_v4, %v13428_v23  ;;  %v13431_v17 = vsub.f32 %v13430_v1, %v11692_v42  ;;  %v7075_v23 = vadd.f32 %v12164_v21, %v11834_v61  ;;  %v7078_v1 = vadd.f32 %v12164_v21, %v11852_v26  ;;  %v7141_v61 = vld [vmem:[%s12681_s0 + $0x10] sm:$0xff] }
 0xd0b   :  { %13422 = vst [vmem:[#allocation52_spill] sm:$0xff] %v12134_v12  ;;  %v7080_v26 = vadd.f32 %v12164_v21, %v11864_v60  ;;  %v7082_v60 = vadd.f32 %v12164_v21, %v11876_v28  ;;  %v7084_v28 = vadd.f32 %v12164_v21, %v11888_v40  ;;  %v7086_v40 = vadd.f32 %v12164_v21, %v11900_v8 }
 0xd0c   :  { %13423 = vst [vmem:[#allocation54_spill] sm:$0xff] %v12137_v54  ;;  %v12155_v48 = vmul.f32 %v11820_v4, %v13431_v17  ;;  %v13434_v54 = vsub.f32 %v13433_v51, %v11692_v42  ;;  %v7077_v17 = vadd.f32 %v12164_v21, %v11846_v32  ;;  %v7139_v42 = vld [vmem:[%s12681_s0] sm:$0xff]  ;;  %v7142_v32 = vld [vmem:[%s12681_s0 + $0x18] sm:$0xff]  ;;  %v7087_v13 = vadd.f32 %v12164_v21, %v11906_v0 }
 0xd0d   :  { %13426 = vst [vmem:[#allocation55_spill] sm:$0xff] %v12143_v19  ;;  %v7143_v51 = vld [vmem:[%s12681_s0 + $0x20] sm:$0xff]  ;;  %v7088_v8 = vadd.f32 %v12164_v21, %v11912_v3  ;;  %v7089_v0 = vadd.f32 %v12164_v21, %v11918_v22  ;;  %v7090_v3 = vadd.f32 %v12164_v21, %v11924_v34  ;;  %v7091_v22 = vadd.f32 %v12164_v21, %v11930_v46 }
 0xd0e   :  { %13429 = vst [vmem:[#allocation59_spill] sm:$0xff] %v12149_v49  ;;  %v7071_v58 = vmul.f32 %v11820_v4, %v13434_v54  ;;  %v7140_v4 = vld [vmem:[%s12681_s0 + $0x8] sm:$0xff]  ;;  %v7203_v49 = vadd.f32 %v7139_v42, %v7075_v23  ;;  %v7205_v12 = vadd.f32 %v7141_v61, %v7077_v17  ;;  %v7207_v31 = vadd.f32 %v7143_v51, %v7079_v10  ;;  %v7147_v23 = vld [vmem:[%s12681_s0 + $0x40] sm:$0xff]  ;;  %v7153_v61 = vld [vmem:[%s12681_s0 + $0x70] sm:$0xff] }
 0xd0f   :  { %13432 = vst [vmem:[#allocation61_spill] sm:$0xff] %v12155_v48  ;;  %v7081_v48 = vadd.f32 %v12164_v21, %v11870_v35  ;;  %v7204_v19 = vadd.f32 %v7140_v4, %v7076_v25  ;;  %v7146_v35 = vld [vmem:[%s12681_s0 + $0x38] sm:$0xff]  ;;  %v7208_v25 = vadd.f32 %v7144_v30, %v7080_v26  ;;  %v7148_v17 = vld [vmem:[%s12681_s0 + $0x48] sm:$0xff]  ;;  %v7151_v42 = vld [vmem:[%s12681_s0 + $0x60] sm:$0xff]  ;;  %v7092_v34 = vadd.f32 %v12164_v21, %v11936_v37 }
 0xd10   :  { %v12191_v54 = vadd.f32 %v12164_v21, %v7071_v58  ;;  %v7145_v58 = vld [vmem:[%s12681_s0 + $0x30] sm:$0xff]  ;;  %7267 = vst [vmem:[%s12689_s9] sm:$0xff] %v7203_v49  ;;  %v7212_v4 = vadd.f32 %v7148_v17, %v7084_v28  ;;  %v7215_v26 = vadd.f32 %v7151_v42, %v7087_v13  ;;  %v7093_v46 = vadd.f32 %v12164_v21, %v11942_v59  ;;  %v7156_v30 = vld [vmem:[%s12681_s0 + $0x88] sm:$0xff]  ;;  %v7158_v28 = vld [vmem:[%s12681_s0 + $0x98] sm:$0xff] }
 0xd11   :  { %7268 = vst [vmem:[%s12689_s9 + $0x8] sm:$0xff] %v7204_v19  ;;  %v7209_v49 = vadd.f32 %v7145_v58, %v7081_v48  ;;  %v7210_v19 = vadd.f32 %v7146_v35, %v7082_v60  ;;  %v7150_v48 = vld [vmem:[%s12681_s0 + $0x58] sm:$0xff]  ;;  %v7217_v60 = vadd.f32 %v7153_v61, %v7089_v0  ;;  %v7094_v37 = vadd.f32 %v12164_v21, %v11948_v53  ;;  %v7157_v58 = vld [vmem:[%s12681_s0 + $0x90] sm:$0xff]  ;;  %v7160_v17 = vld [vmem:[%s12681_s0 + $0xa8] sm:$0xff] }
 0xd12   :  { %13435 = vst [vmem:[#allocation4_spill] sm:$0xff] %v12191_v54  ;;  %v7206_v54 = vadd.f32 %v7142_v32, %v7078_v1  ;;  %v7149_v1 = vld [vmem:[%s12681_s0 + $0x50] sm:$0xff]  ;;  %v7214_v10 = vadd.f32 %v7150_v48, %v7086_v40  ;;  %v7154_v32 = vld [vmem:[%s12681_s0 + $0x78] sm:$0xff]  ;;  %v7095_v59 = vadd.f32 %v12164_v21, %v11954_v45  ;;  %v7096_v53 = vadd.f32 %v12164_v21, %v11960_v47  ;;  %v7163_v48 = vld [vmem:[%s12681_s0 + $0xc0] sm:$0xff] }
 0xd13   :  { %7269 = vst [vmem:[%s12689_s9 + $0x10] sm:$0xff] %v7205_v12  ;;  %v7211_v12 = vadd.f32 %v7147_v23, %v7083_v43  ;;  %v7152_v43 = vld [vmem:[%s12681_s0 + $0x68] sm:$0xff]  ;;  %v7218_v35 = vadd.f32 %v7154_v32, %v7090_v3  ;;  %v7097_v45 = vadd.f32 %v12164_v21, %v11966_v56  ;;  %v7098_v47 = vadd.f32 %v12164_v21, %v11972_v6  ;;  %v7161_v40 = vld [vmem:[%s12681_s0 + $0xb0] sm:$0xff]  ;;  %v7167_v3 = vld [vmem:[%s12681_s0 + $0xe0] sm:$0xff] }
 0xd14   :  { %7270 = vst [vmem:[%s12689_s9 + $0x18] sm:$0xff] %v7206_v54  ;;  %v7155_v54 = vld [vmem:[%s12681_s0 + $0x80] sm:$0xff]  ;;  %v7216_v51 = vadd.f32 %v7152_v43, %v7088_v8  ;;  %v7099_v56 = vadd.f32 %v12164_v21, %v11978_v14  ;;  %v7100_v6 = vadd.f32 %v12164_v21, %v11984_v20  ;;  %v7101_v14 = vadd.f32 %v12164_v21, %v11990_v33  ;;  %v7164_v8 = vld [vmem:[%s12681_s0 + $0xc8] sm:$0xff]  ;;  %v7166_v43 = vld [vmem:[%s12681_s0 + $0xd8] sm:$0xff] }
 0xd15   :  { %7271 = vst [vmem:[%s12689_s9 + $0x20] sm:$0xff] %v7207_v31  ;;  %v7213_v31 = vadd.f32 %v7149_v1, %v7085_v55  ;;  %v7219_v23 = vadd.f32 %v7155_v54, %v7091_v22  ;;  %v7220_v55 = vadd.f32 %v7156_v30, %v7092_v34  ;;  %v7222_v1 = vadd.f32 %v7158_v28, %v7094_v37  ;;  %v7169_v32 = vld [vmem:[%s12681_s0 + $0xf0] sm:$0xff]  ;;  %v7170_v54 = vld [vmem:[%s12681_s0 + $0xf8] sm:$0xff]  ;;  %v7171_v30 = vld [vmem:[%s12681_s0 + $0x100] sm:$0xff] }
 0xd16   :  { %7272 = vst [vmem:[%s12689_s9 + $0x28] sm:$0xff] %v7208_v25  ;;  %v7159_v25 = vld [vmem:[%s12681_s0 + $0xa0] sm:$0xff]  ;;  %v7225_v42 = vadd.f32 %v7161_v40, %v7097_v45  ;;  %v7102_v20 = vadd.f32 %v12164_v21, %v11996_v5  ;;  %v7103_v33 = vadd.f32 %v12164_v21, %v12002_v52  ;;  %v7104_v5 = vadd.f32 %v12164_v21, %v12008_v36  ;;  %v13438_v37 = vld [vmem:[#allocation58_spill] sm:$0xff]  ;;  %v13439_v28 = vld [vmem:[#allocation60_spill] sm:$0xff] }
 0xd17   :  { %7273 = vst [vmem:[%s12689_s9 + $0x30] sm:$0xff] %v7209_v49  ;;  %v7221_v49 = vadd.f32 %v7157_v58, %v7093_v46  ;;  %v7223_v13 = vadd.f32 %v7159_v25, %v7095_v59  ;;  %v7228_v61 = vadd.f32 %v7164_v8, %v7100_v6  ;;  %v7105_v52 = vadd.f32 %v12164_v21, %v12014_v16  ;;  %v13436_v16 = vld [vmem:[#allocation56_spill] sm:$0xff]  ;;  %v7175_v40 = vld [vmem:[%s12681_s0 + $0x120] sm:$0xff]  ;;  %v7177_v6 = vld [vmem:[%s12681_s0 + $0x130] sm:$0xff] }
 0xd18   :  { %7274 = vst [vmem:[%s12689_s9 + $0x38] sm:$0xff] %v7210_v19  ;;  %v7162_v19 = vld [vmem:[%s12681_s0 + $0xb8] sm:$0xff]  ;;  %v7106_v36 = vadd.f32 %v12164_v21, %v12020_v15  ;;  %v7107_v34 = vadd.f32 %v12164_v21, %v13436_v16  ;;  %v13437_v15 = vld [vmem:[#allocation57_spill] sm:$0xff]  ;;  %v7109_v58 = vadd.f32 %v12164_v21, %v13438_v37  ;;  %v7179_v8 = vld [vmem:[%s12681_s0 + $0x140] sm:$0xff] }
 0xd19   :  { %7275 = vst [vmem:[%s12689_s9 + $0x40] sm:$0xff] %v7211_v12  ;;  %v7224_v12 = vadd.f32 %v7160_v17, %v7096_v53  ;;  %v7226_v0 = vadd.f32 %v7162_v19, %v7098_v47  ;;  %v7108_v46 = vadd.f32 %v12164_v21, %v13437_v15  ;;  %v7233_v59 = vadd.f32 %v7169_v32, %v7105_v52  ;;  %v7173_v53 = vld [vmem:[%s12681_s0 + $0x110] sm:$0xff]  ;;  %v7174_v17 = vld [vmem:[%s12681_s0 + $0x118] sm:$0xff]  ;;  %v7176_v19 = vld [vmem:[%s12681_s0 + $0x128] sm:$0xff] }
 0xd1a   :  { %7276 = vst [vmem:[%s12689_s9 + $0x48] sm:$0xff] %v7212_v4  ;;  %v7165_v4 = vld [vmem:[%s12681_s0 + $0xd0] sm:$0xff]  ;;  %v7234_v25 = vadd.f32 %v7170_v54, %v7106_v36  ;;  %v7112_v47 = vadd.f32 %v12164_v21, %v12056_v50  ;;  %v7114_v50 = vadd.f32 %v12164_v21, %v12068_v27  ;;  %v7116_v27 = vadd.f32 %v12164_v21, %v12080_v29  ;;  %v7186_v36 = vld [vmem:[%s12681_s0 + $0x178] sm:$0xff]  ;;  %v7191_v37 = vld [vmem:[%s12681_s0 + $0x1a0] sm:$0xff] }
 0xd1b   :  { %7277 = vst [vmem:[%s12689_s9 + $0x50] sm:$0xff] %v7213_v31  ;;  %v7227_v31 = vadd.f32 %v7163_v48, %v7099_v56  ;;  %v7229_v22 = vadd.f32 %v7165_v4, %v7101_v14  ;;  %v7113_v56 = vadd.f32 %v12164_v21, %v12062_v7  ;;  %v7115_v7 = vadd.f32 %v12164_v21, %v12074_v63 }
 0xd1c   :  { %7278 = vst [vmem:[%s12689_s9 + $0x58] sm:$0xff] %v7214_v10  ;;  %v7168_v10 = vld [vmem:[%s12681_s0 + $0xe8] sm:$0xff]  ;;  %v7117_v63 = vadd.f32 %v12164_v21, %v12086_v2  ;;  %v7118_v29 = vadd.f32 %v12164_v21, %v12089_v18  ;;  %v7119_v2 = vadd.f32 %v12164_v21, %v12092_v62  ;;  %v7120_v18 = vadd.f32 %v12164_v21, %v12095_v57 }
 0xd1d   :  { %7279 = vst [vmem:[%s12689_s9 + $0x60] sm:$0xff] %v7215_v26  ;;  %v7230_v26 = vadd.f32 %v7166_v43, %v7102_v20  ;;  %v7180_v20 = vld [vmem:[%s12681_s0 + $0x148] sm:$0xff]  ;;  %v7241_v4 = vadd.f32 %v7177_v6, %v7113_v56  ;;  %v7182_v43 = vld [vmem:[%s12681_s0 + $0x158] sm:$0xff]  ;;  %v7121_v62 = vadd.f32 %v12164_v21, %v12098_v39  ;;  %v7122_v57 = vadd.f32 %v12164_v21, %v12101_v9  ;;  %v7195_v56 = vld [vmem:[%s12681_s0 + $0x1c0] sm:$0xff] }
 0xd1e   :  { %7280 = vst [vmem:[%s12689_s9 + $0x68] sm:$0xff] %v7216_v51  ;;  %v7231_v51 = vadd.f32 %v7167_v3, %v7103_v33  ;;  %v7244_v3 = vadd.f32 %v7180_v20, %v7116_v27  ;;  %v7123_v39 = vadd.f32 %v12164_v21, %v12104_v44  ;;  %v7124_v9 = vadd.f32 %v12164_v21, %v12107_v24  ;;  %v7196_v6 = vld [vmem:[%s12681_s0 + $0x1c8] sm:$0xff] }
 0xd1f   :  { %7281 = vst [vmem:[%s12689_s9 + $0x70] sm:$0xff] %v7217_v60  ;;  %v7232_v60 = vadd.f32 %v7168_v10, %v7104_v5  ;;  %v7183_v5 = vld [vmem:[%s12681_s0 + $0x160] sm:$0xff]  ;;  %v7185_v10 = vld [vmem:[%s12681_s0 + $0x170] sm:$0xff]  ;;  %v7125_v44 = vadd.f32 %v12164_v21, %v12110_v38  ;;  %v7126_v24 = vadd.f32 %v12164_v21, %v12113_v41  ;;  %v7250_v15 = vadd.f32 %v7186_v36, %v7122_v57  ;;  %v13451_v57 = vld [vmem:[#allocation4_spill] sm:$0xff] }
 0xd20   :  { %7282 = vst [vmem:[%s12689_s9 + $0x78] sm:$0xff] %v7218_v35  ;;  %v7172_v35 = vld [vmem:[%s12681_s0 + $0x108] sm:$0xff]  ;;  %v7247_v32 = vadd.f32 %v7183_v5, %v7119_v2  ;;  %v7249_v54 = vadd.f32 %v7185_v10, %v7121_v62  ;;  %v7127_v38 = vadd.f32 %v12164_v21, %v12116_v11  ;;  %v13441_v41 = vld [vmem:[#allocation7_spill] sm:$0xff]  ;;  %v13450_v2 = vld [vmem:[#allocation61_spill] sm:$0xff] }
 0xd21   :  { %7283 = vst [vmem:[%s12689_s9 + $0x80] sm:$0xff] %v7219_v23  ;;  %v7110_v23 = vadd.f32 %v12164_v21, %v13439_v28  ;;  %v13442_v11 = vld [vmem:[#allocation8_spill] sm:$0xff]  ;;  %v7201_v5 = vld [vmem:[%s12681_s0 + $0x1f0] sm:$0xff] }
 0xd22   :  { %7284 = vst [vmem:[%s12689_s9 + $0x88] sm:$0xff] %v7220_v55  ;;  %v13440_v55 = vld [vmem:[#allocation3_spill] sm:$0xff] }
 0xd23   :  { %7285 = vst [vmem:[%s12689_s9 + $0x90] sm:$0xff] %v7221_v49  ;;  %v7111_v45 = vadd.f32 %v12164_v21, %v13440_v55  ;;  %v7235_v49 = vadd.f32 %v7171_v30, %v7107_v34  ;;  %v7238_v48 = vadd.f32 %v7174_v17, %v7110_v23  ;;  %v7188_v34 = vld [vmem:[%s12681_s0 + $0x188] sm:$0xff]  ;;  %v13443_v23 = vld [vmem:[#allocation50_spill] sm:$0xff] }
 0xd24   :  { %7286 = vst [vmem:[%s12689_s9 + $0x98] sm:$0xff] %v7222_v1  ;;  %v7236_v1 = vadd.f32 %v7172_v35, %v7108_v46  ;;  %v7190_v46 = vld [vmem:[%s12681_s0 + $0x198] sm:$0xff]  ;;  %v7129_v35 = vadd.f32 %v12164_v21, %v13442_v11 }
 0xd25   :  { %7287 = vst [vmem:[%s12689_s9 + $0xa0] sm:$0xff] %v7223_v13  ;;  %v7237_v13 = vadd.f32 %v7173_v53, %v7109_v58  ;;  %v7239_v14 = vadd.f32 %v7175_v40, %v7111_v45  ;;  %v7252_v58 = vadd.f32 %v7188_v34, %v7124_v9  ;;  %v7130_v53 = vadd.f32 %v12164_v21, %v13443_v23  ;;  %v13444_v45 = vld [vmem:[#allocation51_spill] sm:$0xff]  ;;  %v13445_v40 = vld [vmem:[#allocation53_spill] sm:$0xff] }
 0xd26   :  { %7288 = vst [vmem:[%s12689_s9 + $0xa8] sm:$0xff] %v7224_v12  ;;  %v7178_v12 = vld [vmem:[%s12681_s0 + $0x138] sm:$0xff]  ;;  %v7254_v55 = vadd.f32 %v7190_v46, %v7126_v24  ;;  %v7131_v17 = vadd.f32 %v12164_v21, %v13444_v45 }
 0xd27   :  { %7289 = vst [vmem:[%s12689_s9 + $0xb0] sm:$0xff] %v7225_v42  ;;  %v7240_v42 = vadd.f32 %v7176_v19, %v7112_v47  ;;  %v7242_v33 = vadd.f32 %v7178_v12, %v7114_v50  ;;  %v7255_v47 = vadd.f32 %v7191_v37, %v7127_v38 }
 0xd28   :  { %7290 = vst [vmem:[%s12689_s9 + $0xb8] sm:$0xff] %v7226_v0  ;;  %v7181_v0 = vld [vmem:[%s12681_s0 + $0x150] sm:$0xff]  ;;  %v7259_v20 = vadd.f32 %v7195_v56, %v7131_v17 }
 0xd29   :  { %7291 = vst [vmem:[%s12689_s9 + $0xc0] sm:$0xff] %v7227_v31  ;;  %v7243_v31 = vadd.f32 %v7179_v8, %v7115_v7  ;;  %v7245_v52 = vadd.f32 %v7181_v0, %v7117_v63  ;;  %v13447_v7 = vld [vmem:[#allocation54_spill] sm:$0xff]  ;;  %v13448_v8 = vld [vmem:[#allocation55_spill] sm:$0xff] }
 0xd2a   :  { %7292 = vst [vmem:[%s12689_s9 + $0xc8] sm:$0xff] %v7228_v61  ;;  %v7184_v61 = vld [vmem:[%s12681_s0 + $0x168] sm:$0xff]  ;;  %v7134_v12 = vadd.f32 %v12164_v21, %v13447_v7  ;;  %v7198_v63 = vld [vmem:[%s12681_s0 + $0x1d8] sm:$0xff]  ;;  %v7199_v0 = vld [vmem:[%s12681_s0 + $0x1e0] sm:$0xff] }
 0xd2b   :  { %7293 = vst [vmem:[%s12689_s9 + $0xd0] sm:$0xff] %v7229_v22  ;;  %v7246_v22 = vadd.f32 %v7182_v43, %v7118_v29  ;;  %v7248_v16 = vadd.f32 %v7184_v61, %v7120_v18  ;;  %v7137_v43 = vadd.f32 %v12164_v21, %v13450_v2 }
 0xd2c   :  { %7294 = vst [vmem:[%s12689_s9 + $0xd8] sm:$0xff] %v7230_v26  ;;  %v7187_v26 = vld [vmem:[%s12681_s0 + $0x180] sm:$0xff] }
 0xd2d   :  { %7295 = vst [vmem:[%s12689_s9 + $0xe0] sm:$0xff] %v7231_v51  ;;  %v7189_v51 = vld [vmem:[%s12681_s0 + $0x190] sm:$0xff]  ;;  %v7251_v30 = vadd.f32 %v7187_v26, %v7123_v39 }
 0xd2e   :  { %7296 = vst [vmem:[%s12689_s9 + $0xe8] sm:$0xff] %v7232_v60  ;;  %v7128_v60 = vadd.f32 %v12164_v21, %v13441_v41  ;;  %v7253_v28 = vadd.f32 %v7189_v51, %v7125_v44 }
 0xd2f   :  { %7297 = vst [vmem:[%s12689_s9 + $0xf0] sm:$0xff] %v7233_v59  ;;  %v7192_v59 = vld [vmem:[%s12681_s0 + $0x1a8] sm:$0xff] }
 0xd30   :  { %7298 = vst [vmem:[%s12689_s9 + $0xf8] sm:$0xff] %v7234_v25  ;;  %v7193_v25 = vld [vmem:[%s12681_s0 + $0x1b0] sm:$0xff]  ;;  %v7256_v19 = vadd.f32 %v7192_v59, %v7128_v60 }
 0xd31   :  { %7299 = vst [vmem:[%s12689_s9 + $0x100] sm:$0xff] %v7235_v49  ;;  %v7194_v49 = vld [vmem:[%s12681_s0 + $0x1b8] sm:$0xff] }
 0xd32   :  { %7300 = vst [vmem:[%s12689_s9 + $0x108] sm:$0xff] %v7236_v1  ;;  %v7132_v1 = vadd.f32 %v12164_v21, %v13445_v40  ;;  %v7258_v27 = vadd.f32 %v7194_v49, %v7130_v53 }
 0xd33   :  { %7301 = vst [vmem:[%s12689_s9 + $0x110] sm:$0xff] %v7237_v13  ;;  %v13446_v13 = vld [vmem:[#allocation52_spill] sm:$0xff] }
 0xd34   :  { %7302 = vst [vmem:[%s12689_s9 + $0x118] sm:$0xff] %v7238_v48  ;;  %v7133_v50 = vadd.f32 %v12164_v21, %v13446_v13  ;;  %v7257_v48 = vadd.f32 %v7193_v25, %v7129_v35 }
 0xd35   :  { %7303 = vst [vmem:[%s12689_s9 + $0x120] sm:$0xff] %v7239_v14  ;;  %v7197_v14 = vld [vmem:[%s12681_s0 + $0x1d0] sm:$0xff] }
 0xd36   :  { %7304 = vst [vmem:[%s12689_s9 + $0x128] sm:$0xff] %v7240_v42  ;;  %v7135_v42 = vadd.f32 %v12164_v21, %v13448_v8  ;;  %v7261_v18 = vadd.f32 %v7197_v14, %v7133_v50 }
 0xd37   :  { %7305 = vst [vmem:[%s12689_s9 + $0x130] sm:$0xff] %v7241_v4  ;;  %v13449_v4 = vld [vmem:[#allocation59_spill] sm:$0xff] }
 0xd38   :  { %7306 = vst [vmem:[%s12689_s9 + $0x138] sm:$0xff] %v7242_v33  ;;  %v7136_v29 = vadd.f32 %v12164_v21, %v13449_v4  ;;  %v7260_v33 = vadd.f32 %v7196_v6, %v7132_v1  ;;  %v7202_v21 = vld [vmem:[%s12681_s0 + $0x1f8] sm:$0xff]  ;;  %v7263_v62 = vadd.f32 %v7199_v0, %v7135_v42 }
 0xd39   :  { %7307 = vst [vmem:[%s12689_s9 + $0x140] sm:$0xff] %v7243_v31  ;;  %v7200_v31 = vld [vmem:[%s12681_s0 + $0x1e8] sm:$0xff]  ;;  %v7266_v10 = vadd.f32 %v7202_v21, %v13451_v57 }
 0xd3a   :  { %7308 = vst [vmem:[%s12689_s9 + $0x148] sm:$0xff] %v7244_v3  ;;  %v7262_v3 = vadd.f32 %v7198_v63, %v7134_v12  ;;  %v7264_v61 = vadd.f32 %v7200_v31, %v7136_v29 }
 0xd3b   :  { %7309 = vst [vmem:[%s12689_s9 + $0x150] sm:$0xff] %v7245_v52  ;;  %v7265_v52 = vadd.f32 %v7201_v5, %v7137_v43 }
 0xd3c   :  { %7310 = vst [vmem:[%s12689_s9 + $0x158] sm:$0xff] %v7246_v22 }
 0xd3d   :  { %7311 = vst [vmem:[%s12689_s9 + $0x160] sm:$0xff] %v7247_v32 }
 0xd3e   :  { %7312 = vst [vmem:[%s12689_s9 + $0x168] sm:$0xff] %v7248_v16 }
 0xd3f   :  { %7313 = vst [vmem:[%s12689_s9 + $0x170] sm:$0xff] %v7249_v54 }
 0xd40   :  { %7314 = vst [vmem:[%s12689_s9 + $0x178] sm:$0xff] %v7250_v15 }
 0xd41   :  { %7315 = vst [vmem:[%s12689_s9 + $0x180] sm:$0xff] %v7251_v30 }
 0xd42   :  { %7316 = vst [vmem:[%s12689_s9 + $0x188] sm:$0xff] %v7252_v58 }
 0xd43   :  { %7317 = vst [vmem:[%s12689_s9 + $0x190] sm:$0xff] %v7253_v28 }
 0xd44   :  { %7318 = vst [vmem:[%s12689_s9 + $0x198] sm:$0xff] %v7254_v55 }
 0xd45   :  { %7319 = vst [vmem:[%s12689_s9 + $0x1a0] sm:$0xff] %v7255_v47 }
 0xd46   :  { %7320 = vst [vmem:[%s12689_s9 + $0x1a8] sm:$0xff] %v7256_v19 }
 0xd47   :  { %7321 = vst [vmem:[%s12689_s9 + $0x1b0] sm:$0xff] %v7257_v48 }
 0xd48   :  { %7322 = vst [vmem:[%s12689_s9 + $0x1b8] sm:$0xff] %v7258_v27 }
 0xd49   :  { %7323 = vst [vmem:[%s12689_s9 + $0x1c0] sm:$0xff] %v7259_v20 }
 0xd4a   :  { %7324 = vst [vmem:[%s12689_s9 + $0x1c8] sm:$0xff] %v7260_v33 }
 0xd4b   :  { %7325 = vst [vmem:[%s12689_s9 + $0x1d0] sm:$0xff] %v7261_v18 }
 0xd4c   :  { %7326 = vst [vmem:[%s12689_s9 + $0x1d8] sm:$0xff] %v7262_v3 }
 0xd4d   :  { %7327 = vst [vmem:[%s12689_s9 + $0x1e0] sm:$0xff] %v7263_v62 }
 0xd4e   :  { %7328 = vst [vmem:[%s12689_s9 + $0x1e8] sm:$0xff] %v7264_v61 }
 0xd4f   :  { %7329 = vst [vmem:[%s12689_s9 + $0x1f0] sm:$0xff] %v7265_v52 }
 0xd50   :  { %7330 = vst [vmem:[%s12689_s9 + $0x1f8] sm:$0xff] %v7266_v10 }

</bundles_post_ra>
